<compile_context>
chip_gen: v7x
topology: tpu7x:2x2x1
jax: 0.10.0
libtpu: 0.0.40
codegen_flags: <defaults>
</compile_context>

<pallas_src>
import functools

import jax
import jax.numpy as jnp
from jax.experimental import pallas as pl
from jax.experimental.pallas import tpu as pltpu

OUT_FEATURES = 10   # logits the model actually produces
OUT_PAD = 128       # lane-dense padded fc5 width (multiple of 128)


def _round_up(x, m):
    return ((x + m - 1) // m) * m


@functools.lru_cache(maxsize=1)
def _vmem_limit_bytes():
    """Generation-aware scoped-VMEM cap: ~half of physical VMEM.

    v7x has 64 MiB physical VMEM -> 32 MiB cap; v5e/v6e have 128 MiB -> 64 MiB cap.
    Falls back to a v7x-safe 32 MiB if the hardware query is unavailable.
    """
    try:
        cap = int(pltpu.get_tpu_info().vmem_capacity_bytes)
    except Exception:
        return 32 << 20
    return int(min(max(cap // 2, 32 << 20), 64 << 20))


def cifar_fcn_kernel(
    x_ref,
    w1_ref, b1_ref,
    w2_ref, b2_ref,
    w3_ref, b3_ref,
    w4_ref, b4_ref,
    w5_ref, b5_ref,
    o_ref,
):
    # Fused 5-layer MLP on one batch tile, fully VMEM-resident.
    # x arrives as f32 (raw producer dtype); cast to bf16 here (free VPU work under fc1).
    # Weights are bf16 (in, out); every dot accumulates in f32 on the MXU.
    x = x_ref[...].astype(jnp.bfloat16)                                   # [tm, 3072] bf16

    h = jnp.dot(x, w1_ref[...], preferred_element_type=jnp.float32)      # [tm, 1024] f32
    h = jnp.maximum(h + b1_ref[...], 0.0)                                 # ReLU(fc1)
    # dropout (eval mode) -> identity

    h = jnp.dot(h.astype(jnp.bfloat16), w2_ref[...],
                preferred_element_type=jnp.float32)                       # [tm, 512]
    h = jnp.maximum(h + b2_ref[...], 0.0)                                 # ReLU(fc2)
    # dropout (eval mode) -> identity

    h = jnp.dot(h.astype(jnp.bfloat16), w3_ref[...],
                preferred_element_type=jnp.float32)                       # [tm, 256]
    h = jnp.maximum(h + b3_ref[...], 0.0)                                 # ReLU(fc3)

    h = jnp.dot(h.astype(jnp.bfloat16), w4_ref[...],
                preferred_element_type=jnp.float32)                       # [tm, 128]
    h = jnp.maximum(h + b4_ref[...], 0.0)                                 # ReLU(fc4)

    out = jnp.dot(h.astype(jnp.bfloat16), w5_ref[...],
                  preferred_element_type=jnp.float32)                     # [tm, 128] padded
    o_ref[...] = (out + b5_ref[...]).astype(o_ref.dtype)


def prepare_params(params):
    """One-time weight staging: (out,in)->(in,out), cast to bf16, pad fc5 lane-dense.

    Do this once and keep the result device-resident in a serving loop so the
    transpose/cast/pad is never re-staged per forward call.
    """
    prepared = []
    for name in ("fc1", "fc2", "fc3", "fc4", "fc5"):
        W, b = params[name]
        Wt = W.T.astype(jnp.bfloat16)                       # (in, out) bf16
        bias = b.reshape(1, -1).astype(jnp.float32)         # (1, out) f32 (tiny; keep precise)
        if name == "fc5":
            Wt = jnp.pad(Wt, ((0, 0), (0, OUT_PAD - Wt.shape[1])))
            bias = jnp.pad(bias, ((0, 0), (0, OUT_PAD - bias.shape[1])))
        prepared.append(Wt)
        prepared.append(bias)
    return tuple(prepared)


@functools.partial(jax.jit, static_argnames=("block_m",))
def cifar_fcn_forward(x_nchw, prepared, block_m=256):
    """x_nchw: [B, 3, 32, 32] float32. prepared: output of prepare_params()."""
    B = x_nchw.shape[0]
    # Flatten only (== x.view(x.size(0), -1)); NO dtype cast here — casting in the wrapper
    # costs an extra HBM round trip. The kernel casts to bf16 in-register.
    x_flat = x_nchw.reshape(B, -1)
    in_dim = x_flat.shape[1]                                # 3072

    # Batch tile: multiple of 8 sublanes, capped at block_m rows per grid step.
    # block_m=256 fills the 256-wide MXU M dimension on v6e/v7x.
    tm = min(block_m, _round_up(B, 8))
    B_pad = _round_up(B, tm)
    if B_pad != B:
        x_flat = jnp.pad(x_flat, ((0, B_pad - B), (0, 0)))

    grid = (B_pad // tm,)

    x_spec = pl.BlockSpec((tm, in_dim), lambda i: (i, 0))
    out_spec = pl.BlockSpec((tm, OUT_PAD), lambda i: (i, 0))

    # Weights/biases: full-array blocks with a constant index map -> loaded once and
    # VMEM-resident across all batch tiles.  Single-buffered (Buffered(1)): the block
    # never changes, so a second pipeline buffer would only double their VMEM cost.
    const_map = lambda i: (0, 0)
    param_specs = [
        pl.BlockSpec(p.shape, const_map, pipeline_mode=pl.Buffered(1)) for p in prepared
    ]

    # Small per-call batch: weight DMA dominates -> keep on one TC ("arbitrary").
    # Large batch: shard batch tiles across v7x's two TensorCores ("parallel");
    # no-op on single-TC v5e/v6e.
    dim_sem = ("parallel",) if B_pad >= 1024 else ("arbitrary",)

    out_padded = pl.pallas_call(
        cifar_fcn_kernel,
        out_shape=jax.ShapeDtypeStruct((B_pad, OUT_PAD), jnp.float32),
        grid=grid,
        in_specs=[x_spec] + param_specs,
        out_specs=out_spec,
        compiler_params=pltpu.CompilerParams(
            dimension_semantics=dim_sem,
            vmem_limit_bytes=_vmem_limit_bytes(),
        ),
    )(x_flat, *prepared)

    return out_padded[:B, :OUT_FEATURES]


def init_params(key):
    """Deterministic init matching nn.Linear shapes (weight: (out, in), bias: (out,))."""
    dims = [(32 * 32 * 3, 1024), (1024, 512), (512, 256), (256, 128), (128, 10)]
    names = ("fc1", "fc2", "fc3", "fc4", "fc5")
    params = {}
    for name, (fan_in, fan_out) in zip(names, dims):
        key, kw, kb = jax.random.split(key, 3)
        bound = 1.0 / jnp.sqrt(fan_in)
        W = jax.random.uniform(kw, (fan_out, fan_in), jnp.float32, -bound, bound)
        b = jax.random.uniform(kb, (fan_out,), jnp.float32, -bound, bound)
        params[name] = (W, b)
    return params


def reference_forward(x_nchw, params):
    """Pure-JAX reference of the PyTorch forward (eval mode).

    NOTE: mirrors the kernel's bf16-weight/bf16-activation, f32-accumulate recipe, so the
    check validates kernel wiring/tiling; bf16 weight quantization error vs. the true f32
    PyTorch model (~1e-2 on logits) is an accepted, deliberate trade-off.
    """
    h = x_nchw.reshape(x_nchw.shape[0], -1).astype(jnp.bfloat16)
    for name in ("fc1", "fc2", "fc3", "fc4"):
        W, b = params[name]
        h = jnp.dot(h, W.T.astype(jnp.bfloat16), preferred_element_type=jnp.float32)
        h = jnp.maximum(h + b, 0.0).astype(jnp.bfloat16)
    W, b = params["fc5"]
    return jnp.dot(h, W.T.astype(jnp.bfloat16), preferred_element_type=jnp.float32) + b


if __name__ == "__main__":
    key = jax.random.PRNGKey(0)
    kx, kp = jax.random.split(key)

    B = 8  # small batch
    x = jax.random.normal(kx, (B, 3, 32, 32), jnp.float32)  # NCHW, CIFAR-shaped
    params = init_params(kp)

    prepared = prepare_params(params)   # one-time staging; device-resident for serving

    out = cifar_fcn_forward(x, prepared)
    out = jax.block_until_ready(out)

    ref = reference_forward(x, params)
    assert out.shape == (B, OUT_FEATURES), out.shape
    max_err = float(jnp.max(jnp.abs(out - ref)))
    assert jnp.allclose(out, ref, atol=2e-2, rtol=2e-2), max_err

    print("KERNEL_OK")
</pallas_src>

<mosaic_0001>
module attributes {stable_mosaic.version = 11 : i64} {
  func.func @cifar_fcn_kernel(%arg0: i32, %arg1: memref<8x3072xf32, #tpu.memory_space<vmem>>, %arg2: memref<3072x1024xbf16, #tpu.memory_space<vmem>>, %arg3: memref<1x1024xf32, #tpu.memory_space<vmem>>, %arg4: memref<1024x512xbf16, #tpu.memory_space<vmem>>, %arg5: memref<1x512xf32, #tpu.memory_space<vmem>>, %arg6: memref<512x256xbf16, #tpu.memory_space<vmem>>, %arg7: memref<1x256xf32, #tpu.memory_space<vmem>>, %arg8: memref<256x128xbf16, #tpu.memory_space<vmem>>, %arg9: memref<1x128xf32, #tpu.memory_space<vmem>>, %arg10: memref<128x128xbf16, #tpu.memory_space<vmem>>, %arg11: memref<1x128xf32, #tpu.memory_space<vmem>>, %arg12: memref<8x128xf32, #tpu.memory_space<vmem>>) attributes {dimension_semantics = [#tpu.dimension_semantics<arbitrary>], iteration_bounds = array<i64: 1>, scalar_prefetch = 0 : i64, scratch_operands = 0 : i64, tpu.core_type = #tpu.core_type<tc>, window_params = [{transform_indices = @transform_0, window_bounds = array<i64: 8, 3072>}, {pipeline_mode = #tpu.pipeline_mode<synchronous>, transform_indices = @transform_1, window_bounds = array<i64: 3072, 1024>}, {pipeline_mode = #tpu.pipeline_mode<synchronous>, transform_indices = @transform_2, window_bounds = array<i64: 1, 1024>}, {pipeline_mode = #tpu.pipeline_mode<synchronous>, transform_indices = @transform_3, window_bounds = array<i64: 1024, 512>}, {pipeline_mode = #tpu.pipeline_mode<synchronous>, transform_indices = @transform_4, window_bounds = array<i64: 1, 512>}, {pipeline_mode = #tpu.pipeline_mode<synchronous>, transform_indices = @transform_5, window_bounds = array<i64: 512, 256>}, {pipeline_mode = #tpu.pipeline_mode<synchronous>, transform_indices = @transform_6, window_bounds = array<i64: 1, 256>}, {pipeline_mode = #tpu.pipeline_mode<synchronous>, transform_indices = @transform_7, window_bounds = array<i64: 256, 128>}, {pipeline_mode = #tpu.pipeline_mode<synchronous>, transform_indices = @transform_8, window_bounds = array<i64: 1, 128>}, {pipeline_mode = #tpu.pipeline_mode<synchronous>, transform_indices = @transform_9, window_bounds = array<i64: 128, 128>}, {pipeline_mode = #tpu.pipeline_mode<synchronous>, transform_indices = @transform_10, window_bounds = array<i64: 1, 128>}, {transform_indices = @transform_11, window_bounds = array<i64: 8, 128>}]} {
    %c0 = arith.constant 0 : index
    %c0_0 = arith.constant 0 : index
    %0 = vector.load %arg1[%c0, %c0_0] : memref<8x3072xf32, #tpu.memory_space<vmem>>, vector<8x3072xf32>
    %1 = arith.truncf %0 : vector<8x3072xf32> to vector<8x3072xbf16>
    %c0_1 = arith.constant 0 : index
    %c0_2 = arith.constant 0 : index
    %2 = vector.load %arg2[%c0_1, %c0_2] : memref<3072x1024xbf16, #tpu.memory_space<vmem>>, vector<3072x1024xbf16>
    %cst = arith.constant dense<0.000000e+00> : vector<8x1024xf32>
    %3 = tpu.matmul %1, %2, %cst {dimension_numbers = #tpu.dot_dimension_numbers<[1], [0], [0], [1], [0, 0, 1, 1], [], []>} : vector<8x3072xbf16>, vector<3072x1024xbf16>, vector<8x1024xf32> -> vector<8x1024xf32>
    %c0_3 = arith.constant 0 : index
    %c0_4 = arith.constant 0 : index
    %4 = vector.load %arg3[%c0_3, %c0_4] : memref<1x1024xf32, #tpu.memory_space<vmem>>, vector<1x1024xf32>
    %5 = vector.broadcast %4 : vector<1x1024xf32> to vector<8x1024xf32>
    %6 = arith.addf %3, %5 : vector<8x1024xf32>
    %cst_5 = arith.constant 0.000000e+00 : f32
    %7 = vector.broadcast %cst_5 : f32 to vector<8x1024xf32>
    %8 = arith.maximumf %6, %7 : vector<8x1024xf32>
    %9 = arith.truncf %8 : vector<8x1024xf32> to vector<8x1024xbf16>
    %c0_6 = arith.constant 0 : index
    %c0_7 = arith.constant 0 : index
    %10 = vector.load %arg4[%c0_6, %c0_7] : memref<1024x512xbf16, #tpu.memory_space<vmem>>, vector<1024x512xbf16>
    %cst_8 = arith.constant dense<0.000000e+00> : vector<8x512xf32>
    %11 = tpu.matmul %9, %10, %cst_8 {dimension_numbers = #tpu.dot_dimension_numbers<[1], [0], [0], [1], [0, 0, 1, 1], [], []>} : vector<8x1024xbf16>, vector<1024x512xbf16>, vector<8x512xf32> -> vector<8x512xf32>
    %c0_9 = arith.constant 0 : index
    %c0_10 = arith.constant 0 : index
    %12 = vector.load %arg5[%c0_9, %c0_10] : memref<1x512xf32, #tpu.memory_space<vmem>>, vector<1x512xf32>
    %13 = vector.broadcast %12 : vector<1x512xf32> to vector<8x512xf32>
    %14 = arith.addf %11, %13 : vector<8x512xf32>
    %cst_11 = arith.constant 0.000000e+00 : f32
    %15 = vector.broadcast %cst_11 : f32 to vector<8x512xf32>
    %16 = arith.maximumf %14, %15 : vector<8x512xf32>
    %17 = arith.truncf %16 : vector<8x512xf32> to vector<8x512xbf16>
    %c0_12 = arith.constant 0 : index
    %c0_13 = arith.constant 0 : index
    %18 = vector.load %arg6[%c0_12, %c0_13] : memref<512x256xbf16, #tpu.memory_space<vmem>>, vector<512x256xbf16>
    %cst_14 = arith.constant dense<0.000000e+00> : vector<8x256xf32>
    %19 = tpu.matmul %17, %18, %cst_14 {dimension_numbers = #tpu.dot_dimension_numbers<[1], [0], [0], [1], [0, 0, 1, 1], [], []>} : vector<8x512xbf16>, vector<512x256xbf16>, vector<8x256xf32> -> vector<8x256xf32>
    %c0_15 = arith.constant 0 : index
    %c0_16 = arith.constant 0 : index
    %20 = vector.load %arg7[%c0_15, %c0_16] : memref<1x256xf32, #tpu.memory_space<vmem>>, vector<1x256xf32>
    %21 = vector.broadcast %20 : vector<1x256xf32> to vector<8x256xf32>
    %22 = arith.addf %19, %21 : vector<8x256xf32>
    %cst_17 = arith.constant 0.000000e+00 : f32
    %23 = vector.broadcast %cst_17 : f32 to vector<8x256xf32>
    %24 = arith.maximumf %22, %23 : vector<8x256xf32>
    %25 = arith.truncf %24 : vector<8x256xf32> to vector<8x256xbf16>
    %c0_18 = arith.constant 0 : index
    %c0_19 = arith.constant 0 : index
    %26 = vector.load %arg8[%c0_18, %c0_19] : memref<256x128xbf16, #tpu.memory_space<vmem>>, vector<256x128xbf16>
    %cst_20 = arith.constant dense<0.000000e+00> : vector<8x128xf32>
    %27 = tpu.matmul %25, %26, %cst_20 {dimension_numbers = #tpu.dot_dimension_numbers<[1], [0], [0], [1], [0, 0, 1, 1], [], []>} : vector<8x256xbf16>, vector<256x128xbf16>, vector<8x128xf32> -> vector<8x128xf32>
    %c0_21 = arith.constant 0 : index
    %c0_22 = arith.constant 0 : index
    %28 = vector.load %arg9[%c0_21, %c0_22] : memref<1x128xf32, #tpu.memory_space<vmem>>, vector<1x128xf32>
    %29 = vector.broadcast %28 : vector<1x128xf32> to vector<8x128xf32>
    %30 = arith.addf %27, %29 : vector<8x128xf32>
    %cst_23 = arith.constant 0.000000e+00 : f32
    %31 = vector.broadcast %cst_23 : f32 to vector<8x128xf32>
    %32 = arith.maximumf %30, %31 : vector<8x128xf32>
    %33 = arith.truncf %32 : vector<8x128xf32> to vector<8x128xbf16>
    %c0_24 = arith.constant 0 : index
    %c0_25 = arith.constant 0 : index
    %34 = vector.load %arg10[%c0_24, %c0_25] : memref<128x128xbf16, #tpu.memory_space<vmem>>, vector<128x128xbf16>
    %cst_26 = arith.constant dense<0.000000e+00> : vector<8x128xf32>
    %35 = tpu.matmul %33, %34, %cst_26 {dimension_numbers = #tpu.dot_dimension_numbers<[1], [0], [0], [1], [0, 0, 1, 1], [], []>} : vector<8x128xbf16>, vector<128x128xbf16>, vector<8x128xf32> -> vector<8x128xf32>
    %c0_27 = arith.constant 0 : index
    %c0_28 = arith.constant 0 : index
    %36 = vector.load %arg11[%c0_27, %c0_28] : memref<1x128xf32, #tpu.memory_space<vmem>>, vector<1x128xf32>
    %37 = vector.broadcast %36 : vector<1x128xf32> to vector<8x128xf32>
    %38 = arith.addf %35, %37 : vector<8x128xf32>
    %c0_29 = arith.constant 0 : index
    %c0_30 = arith.constant 0 : index
    %39 = vector.load %arg12[%c0_29, %c0_30] : memref<8x128xf32, #tpu.memory_space<vmem>>, vector<8x128xf32>
    tpu.vector_store %arg12[%c0_29, %c0_30], %38 {strides = array<i32>} : memref<8x128xf32, #tpu.memory_space<vmem>>, vector<8x128xf32>,
    return
  }
  func.func @transform_0(%arg0: i32) -> (i32, i32) {
    %c0_i32 = arith.constant 0 : i32
    %c0_i32_0 = arith.constant 0 : i32
    return %arg0, %c0_i32 : i32, i32
  }
  func.func @transform_1(%arg0: i32) -> (i32, i32) {
    %c0_i32 = arith.constant 0 : i32
    %c0_i32_0 = arith.constant 0 : i32
    %c0_i32_1 = arith.constant 0 : i32
    return %c0_i32, %c0_i32_0 : i32, i32
  }
  func.func @transform_2(%arg0: i32) -> (i32, i32) {
    %c0_i32 = arith.constant 0 : i32
    %c0_i32_0 = arith.constant 0 : i32
    %c0_i32_1 = arith.constant 0 : i32
    return %c0_i32, %c0_i32_0 : i32, i32
  }
  func.func @transform_3(%arg0: i32) -> (i32, i32) {
    %c0_i32 = arith.constant 0 : i32
    %c0_i32_0 = arith.constant 0 : i32
    %c0_i32_1 = arith.constant 0 : i32
    return %c0_i32, %c0_i32_0 : i32, i32
  }
  func.func @transform_4(%arg0: i32) -> (i32, i32) {
    %c0_i32 = arith.constant 0 : i32
    %c0_i32_0 = arith.constant 0 : i32
    %c0_i32_1 = arith.constant 0 : i32
    return %c0_i32, %c0_i32_0 : i32, i32
  }
  func.func @transform_5(%arg0: i32) -> (i32, i32) {
    %c0_i32 = arith.constant 0 : i32
    %c0_i32_0 = arith.constant 0 : i32
    %c0_i32_1 = arith.constant 0 : i32
    return %c0_i32, %c0_i32_0 : i32, i32
  }
  func.func @transform_6(%arg0: i32) -> (i32, i32) {
    %c0_i32 = arith.constant 0 : i32
    %c0_i32_0 = arith.constant 0 : i32
    %c0_i32_1 = arith.constant 0 : i32
    return %c0_i32, %c0_i32_0 : i32, i32
  }
  func.func @transform_7(%arg0: i32) -> (i32, i32) {
    %c0_i32 = arith.constant 0 : i32
    %c0_i32_0 = arith.constant 0 : i32
    %c0_i32_1 = arith.constant 0 : i32
    return %c0_i32, %c0_i32_0 : i32, i32
  }
  func.func @transform_8(%arg0: i32) -> (i32, i32) {
    %c0_i32 = arith.constant 0 : i32
    %c0_i32_0 = arith.constant 0 : i32
    %c0_i32_1 = arith.constant 0 : i32
    return %c0_i32, %c0_i32_0 : i32, i32
  }
  func.func @transform_9(%arg0: i32) -> (i32, i32) {
    %c0_i32 = arith.constant 0 : i32
    %c0_i32_0 = arith.constant 0 : i32
    %c0_i32_1 = arith.constant 0 : i32
    return %c0_i32, %c0_i32_0 : i32, i32
  }
  func.func @transform_10(%arg0: i32) -> (i32, i32) {
    %c0_i32 = arith.constant 0 : i32
    %c0_i32_0 = arith.constant 0 : i32
    %c0_i32_1 = arith.constant 0 : i32
    return %c0_i32, %c0_i32_0 : i32, i32
  }
  func.func @transform_11(%arg0: i32) -> (i32, i32) {
    %c0_i32 = arith.constant 0 : i32
    %c0_i32_0 = arith.constant 0 : i32
    return %arg0, %c0_i32 : i32, i32
  }
}

</mosaic_0001>

<bundles_post_ra>
// kernel: cifar_fcn_forward.1
= control target key start
LH: loop header
LB: loop body
LE: loop exit
PB: predicated region body
PF: predicated region fallthrough
CT: control target
= control target key end

     0   :  { %16 = vsyncpa [#allocation3], 0  ;;  %s17564_s0 = inlined_call_operand.vmem [shape: f32[8,3072], index: 0, kind: input, shape index: {}]   ;;  %s17565_s1 = inlined_call_operand.hbm [shape: bf16[3072,1024], index: 1, kind: input, shape index: {}]   ;;  %s17566_s2 = inlined_call_operand.hbm [shape: f32[1,1024], index: 2, kind: input, shape index: {}]   ;;  %s17567_s3 = inlined_call_operand.hbm [shape: bf16[1024,512], index: 3, kind: input, shape index: {}]   ;;  %s17568_s4 = inlined_call_operand.hbm [shape: f32[1,512], index: 4, kind: input, shape index: {}]   ;;  %s17569_s5 = inlined_call_operand.hbm [shape: bf16[512,256], index: 5, kind: input, shape index: {}]   ;;  %s17570_s6 = inlined_call_operand.hbm [shape: f32[1,256], index: 6, kind: input, shape index: {}]   ;;  %s17571_s7 = inlined_call_operand.hbm [shape: bf16[256,128], index: 7, kind: input, shape index: {}]   ;;  %s17572_s8 = inlined_call_operand.hbm [shape: f32[1,128], index: 8, kind: input, shape index: {}]   ;;  %s17573_s9 = inlined_call_operand.hbm [shape: bf16[128,128], index: 9, kind: input, shape index: {}]   ;;  %s17574_s10 = inlined_call_operand.hbm [shape: f32[1,128], index: 10, kind: input, shape index: {}]   ;;  %s17575_s11 = inlined_call_operand.hbm [shape: f32[8,128], index: 11, kind: output, shape index: {}]  }
   0x1   :  { %17 = vsyncpa [#allocation6], 0 }
   0x2   :  { %18 = vsyncpa [#allocation9], 0 }
   0x3   :  { %19 = vsyncpa [#allocation12], 0 }
   0x4   :  { %20 = vsyncpa [#allocation15], 0 }
   0x5   :  { %21 = vsyncpa [#allocation18], 0 }
   0x6   :  { %22 = vsyncpa [#allocation4], 0  ;;  %s17074_s17 = smov [#allocation5]   ;;  %s17075_s19 = smov [#allocation8]  }
   0x7   :  { %s43_s18 = sshll.u32 %s17074_s17, 4  ;;  %s65_s20 = sshll.u32 %s17075_s19, 4  ;;  %s44_s18 = int_to_ptr.vmem [resolvable:$true] %s43_s18  ;;  %s66_s20 = int_to_ptr.vmem [resolvable:$true] %s65_s20 }
   0x8   :  { %s16818_s23 = scalar_lea.hbm %s17566_s2, 128 }
   0x9   :  { %p16819_p0 = scmp.ne.s32.totalorder %s17566_s2, %s16818_s23  ;;  %p16822_p1 = scmp.lt.u32.totalorder %s16818_s23, %s17566_s2 }
   0xb   :  { %p16824_p2 = pnand %p16822_p1, %p16819_p0 }
   0xd   :  { %16827 = shalt.err (!%p16824_p2)
}
   0xe   :  { %s16828_s28 = scalar_lea.vmem %s44_s18, 128  ;;  %p16833_p4 = scmp.lt.s32.totalorder %s44_s18, %s44_s18 }
   0xf   :  { %p16829_p3 = scmp.ne.s32.totalorder %s44_s18, %s16828_s28  ;;  %p16834_p5 = scmp.lt.s32.totalorder %s16828_s28, %s16828_s28 }
  0x11   :  { %p16835_p6 = por %p16834_p5, %p16833_p4 }
  0x13   :  { %p16836_p7 = pnand %p16835_p6, %p16829_p3 }
  0x15   :  { %16839 = shalt.err (!%p16836_p7)
}
  0x16   :  { %46 = dma.hbm_to_vmem [thread:$0]  %s17566_s2, 128, %s44_s18, [#allocation6]  }
  0x17   :  { %s16840_s14 = scalar_lea.hbm %s17568_s4, 64 }
  0x18   :  { %p16841_p8 = scmp.ne.s32.totalorder %s17568_s4, %s16840_s14  ;;  %p16844_p9 = scmp.lt.u32.totalorder %s16840_s14, %s17568_s4 }
  0x1a   :  { %p16846_p10 = pnand %p16844_p9, %p16841_p8 }
  0x1c   :  { %16849 = shalt.err (!%p16846_p10)
}
  0x1d   :  { %s16850_s21 = scalar_lea.vmem %s66_s20, 64  ;;  %p16855_p12 = scmp.lt.s32.totalorder %s66_s20, %s66_s20 }
  0x1e   :  { %p16851_p11 = scmp.ne.s32.totalorder %s66_s20, %s16850_s21  ;;  %p16856_p13 = scmp.lt.s32.totalorder %s16850_s21, %s16850_s21 }
  0x20   :  { %p16857_p0 = por %p16856_p13, %p16855_p12 }
  0x22   :  { %p16858_p1 = pnand %p16857_p0, %p16851_p11 }
  0x24   :  { %16861 = shalt.err (!%p16858_p1)
}
  0x25   :  { %68 = dma.hbm_to_vmem [thread:$0]  %s17568_s4, 64, %s66_s20, [#allocation9]  }
  0x26   :  { %s17076_s22 = smov [#allocation11]   ;;  %s17077_s24 = smov [#allocation14]  }
  0x27   :  { %s87_s23 = sshll.u32 %s17076_s22, 4  ;;  %s109_s25 = sshll.u32 %s17077_s24, 4  ;;  %s88_s23 = int_to_ptr.vmem [resolvable:$true] %s87_s23  ;;  %s110_s25 = int_to_ptr.vmem [resolvable:$true] %s109_s25 }
  0x28   :  { %s16862_s28 = scalar_lea.hbm %s17570_s6, 32 }
  0x29   :  { %p16863_p2 = scmp.ne.s32.totalorder %s17570_s6, %s16862_s28  ;;  %p16866_p3 = scmp.lt.u32.totalorder %s16862_s28, %s17570_s6 }
  0x2b   :  { %p16868_p4 = pnand %p16866_p3, %p16863_p2 }
  0x2d   :  { %16871 = shalt.err (!%p16868_p4)
}
  0x2e   :  { %s16872_s4 = scalar_lea.vmem %s88_s23, 32  ;;  %p16877_p6 = scmp.lt.s32.totalorder %s88_s23, %s88_s23 }
  0x2f   :  { %p16873_p5 = scmp.ne.s32.totalorder %s88_s23, %s16872_s4  ;;  %p16878_p7 = scmp.lt.s32.totalorder %s16872_s4, %s16872_s4 }
  0x31   :  { %p16879_p8 = por %p16878_p7, %p16877_p6 }
  0x33   :  { %p16880_p9 = pnand %p16879_p8, %p16873_p5 }
  0x35   :  { %16883 = shalt.err (!%p16880_p9)
}
  0x36   :  { %90 = dma.hbm_to_vmem [thread:$0]  %s17570_s6, 32, %s88_s23, [#allocation12]  }
  0x37   :  { %s16884_s17 = scalar_lea.hbm %s17572_s8, 16 }
  0x38   :  { %p16885_p10 = scmp.ne.s32.totalorder %s17572_s8, %s16884_s17  ;;  %p16888_p11 = scmp.lt.u32.totalorder %s16884_s17, %s17572_s8 }
  0x3a   :  { %p16890_p12 = pnand %p16888_p11, %p16885_p10 }
  0x3c   :  { %16893 = shalt.err (!%p16890_p12)
}
  0x3d   :  { %s16894_s22 = scalar_lea.vmem %s110_s25, 16  ;;  %s16898_s24 = scalar_lea.vmem %s110_s25, 32 }
  0x3e   :  { %p16895_p13 = scmp.ne.s32.totalorder %s110_s25, %s16894_s22  ;;  %p16899_p0 = scmp.lt.s32.totalorder %s110_s25, %s110_s25 }
  0x3f   :  { %p16900_p1 = scmp.lt.s32.totalorder %s16898_s24, %s16894_s22 }
  0x41   :  { %p16901_p2 = por %p16900_p1, %p16899_p0 }
  0x43   :  { %p16902_p3 = pnand %p16901_p2, %p16895_p13 }
  0x45   :  { %16905 = shalt.err (!%p16902_p3)
}
  0x46   :  { %112 = dma.hbm_to_vmem [thread:$0]  %s17572_s8, 16, %s110_s25, [#allocation15]  }
  0x47   :  { %s17078_s26 = smov [#allocation2]   ;;  %s16906_s30 = scalar_lea.hbm %s17565_s1, 196608 }
  0x48   :  { %s30_s27 = sshll.u32 %s17078_s26, 4  ;;  %p16907_p4 = scmp.ne.s32.totalorder %s17565_s1, %s16906_s30  ;;  %s31_s27 = int_to_ptr.vmem [resolvable:$true] %s30_s27 }
  0x49   :  { %p16910_p5 = scmp.lt.u32.totalorder %s16906_s30, %s17565_s1 }
  0x4b   :  { %p16912_p6 = pnand %p16910_p5, %p16907_p4 }
  0x4d   :  { %16915 = shalt.err (!%p16912_p6)
}
  0x4e   :  { %s16916_s14 = scalar_lea.vmem %s31_s27, 196608  ;;  %p16921_p8 = scmp.lt.s32.totalorder %s31_s27, %s31_s27 }
  0x4f   :  { %p16917_p7 = scmp.ne.s32.totalorder %s31_s27, %s16916_s14  ;;  %p16922_p9 = scmp.lt.s32.totalorder %s16916_s14, %s16916_s14 }
  0x51   :  { %p16923_p10 = por %p16922_p9, %p16921_p8 }
  0x53   :  { %p16924_p11 = pnand %p16923_p10, %p16917_p7 }
  0x55   :  { %16927 = shalt.err (!%p16924_p11)
}
  0x56   :  { %s17079_s8 = smov 512   ;;  %s17080_s25 = smov 32  }
  0x57   :  { %36 = dma.hbm_to_vmem [thread:$0]  %s17565_s1, 196608, %s31_s27, [#allocation3], %s17079_s8, %s17079_s8, %s17080_s25  }
  0x58   :  { %s17081_s17 = smov [#allocation7]   ;;  %s16928_s18 = scalar_lea.hbm %s17567_s3, 32768 }
  0x59   :  { %s52_s19 = sshll.u32 %s17081_s17, 4  ;;  %p16929_p12 = scmp.ne.s32.totalorder %s17567_s3, %s16928_s18  ;;  %s53_s19 = int_to_ptr.vmem [resolvable:$true] %s52_s19 }
  0x5a   :  { %p16932_p13 = scmp.lt.u32.totalorder %s16928_s18, %s17567_s3 }
  0x5c   :  { %p16934_p0 = pnand %p16932_p13, %p16929_p12 }
  0x5e   :  { %16937 = shalt.err (!%p16934_p0)
}
  0x5f   :  { %s16938_s26 = scalar_lea.vmem %s53_s19, 32768  ;;  %p16943_p2 = scmp.lt.s32.totalorder %s53_s19, %s53_s19 }
  0x60   :  { %p16939_p1 = scmp.ne.s32.totalorder %s53_s19, %s16938_s26  ;;  %p16944_p3 = scmp.lt.s32.totalorder %s16938_s26, %s16938_s26 }
  0x62   :  { %p16945_p4 = por %p16944_p3, %p16943_p2 }
  0x64   :  { %p16946_p5 = pnand %p16945_p4, %p16939_p1 }
  0x66   :  { %16949 = shalt.err (!%p16946_p5)
}
  0x67   :  { %s17082_s1 = smov 256   ;;  %s17083_s27 = smov 16  }
  0x68   :  { %58 = dma.hbm_to_vmem [thread:$0]  %s17567_s3, 32768, %s53_s19, [#allocation6], %s17082_s1, %s17082_s1, %s17083_s27  }
  0x69   :  { %s17084_s30 = smov [#allocation10]   ;;  %s16950_s20 = scalar_lea.hbm %s17569_s5, 8192 }
  0x6a   :  { %s74_s12 = sshll.u32 %s17084_s30, 4  ;;  %p16951_p6 = scmp.ne.s32.totalorder %s17569_s5, %s16950_s20  ;;  %s75_s12 = int_to_ptr.vmem [resolvable:$true] %s74_s12 }
  0x6b   :  { %p16954_p7 = scmp.lt.u32.totalorder %s16950_s20, %s17569_s5 }
  0x6d   :  { %p16956_p8 = pnand %p16954_p7, %p16951_p6 }
  0x6f   :  { %16959 = shalt.err (!%p16956_p8)
}
  0x70   :  { %s16960_s16 = scalar_lea.vmem %s75_s12, 8192  ;;  %p16965_p10 = scmp.lt.s32.totalorder %s75_s12, %s75_s12 }
  0x71   :  { %p16961_p9 = scmp.ne.s32.totalorder %s75_s12, %s16960_s16  ;;  %p16966_p11 = scmp.lt.s32.totalorder %s16960_s16, %s16960_s16 }
  0x73   :  { %p16967_p12 = por %p16966_p11, %p16965_p10 }
  0x75   :  { %p16968_p13 = pnand %p16967_p12, %p16961_p9 }
  0x77   :  { %16971 = shalt.err (!%p16968_p13)
}
  0x78   :  { %s17085_s3 = smov 128   ;;  %s17086_s17 = smov 8  }
  0x79   :  { %80 = dma.hbm_to_vmem [thread:$0]  %s17569_s5, 8192, %s75_s12, [#allocation9], %s17085_s3, %s17085_s3, %s17086_s17  }
  0x7a   :  { %s17087_s2 = smov [#allocation13]   ;;  %s16972_s6 = scalar_lea.hbm %s17571_s7, 2048 }
  0x7b   :  { %s96_s18 = sshll.u32 %s17087_s2, 4  ;;  %p16973_p0 = scmp.ne.s32.totalorder %s17571_s7, %s16972_s6  ;;  %s97_s18 = int_to_ptr.vmem [resolvable:$true] %s96_s18 }
  0x7c   :  { %p16976_p1 = scmp.lt.u32.totalorder %s16972_s6, %s17571_s7 }
  0x7e   :  { %p16978_p2 = pnand %p16976_p1, %p16973_p0 }
  0x80   :  { %16981 = shalt.err (!%p16978_p2)
}
  0x81   :  { %s16982_s28 = scalar_lea.vmem %s97_s18, 2048  ;;  %p16987_p4 = scmp.lt.s32.totalorder %s97_s18, %s97_s18 }
  0x82   :  { %p16983_p3 = scmp.ne.s32.totalorder %s97_s18, %s16982_s28  ;;  %p16988_p5 = scmp.lt.s32.totalorder %s16982_s28, %s16982_s28 }
  0x84   :  { %p16989_p6 = por %p16988_p5, %p16987_p4 }
  0x86   :  { %p16990_p7 = pnand %p16989_p6, %p16983_p3 }
  0x88   :  { %16993 = shalt.err (!%p16990_p7)
}
  0x89   :  { %s17088_s5 = smov 64   ;;  %s17089_s29 = smov 4  }
  0x8a   :  { %102 = dma.hbm_to_vmem [thread:$0]  %s17571_s7, 2048, %s97_s18, [#allocation12], %s17088_s5, %s17088_s5, %s17089_s29  }
  0x8b   :  { %s17090_s13 = smov [#allocation16]   ;;  %s17091_s20 = smov [#allocation17]  }
  0x8c   :  { %s118_s4 = sshll.u32 %s17090_s13, 4  ;;  %s131_s14 = sshll.u32 %s17091_s20, 4  ;;  %s119_s4 = int_to_ptr.vmem [resolvable:$true] %s118_s4  ;;  %s132_s14 = int_to_ptr.vmem [resolvable:$true] %s131_s14 }
  0x8d   :  { %s16994_s15 = scalar_lea.hbm %s17573_s9, 1024 }
  0x8e   :  { %p16995_p8 = scmp.ne.s32.totalorder %s17573_s9, %s16994_s15  ;;  %p16998_p9 = scmp.lt.u32.totalorder %s16994_s15, %s17573_s9 }
  0x90   :  { %p17000_p10 = pnand %p16998_p9, %p16995_p8 }
  0x92   :  { %17003 = shalt.err (!%p17000_p10)
}
  0x93   :  { %s17004_s7 = scalar_lea.vmem %s119_s4, 1024  ;;  %p17009_p12 = scmp.lt.s32.totalorder %s119_s4, %s119_s4 }
  0x94   :  { %p17005_p11 = scmp.ne.s32.totalorder %s119_s4, %s17004_s7  ;;  %p17010_p13 = scmp.lt.s32.totalorder %s17004_s7, %s17004_s7 }
  0x96   :  { %p17011_p0 = por %p17010_p13, %p17009_p12 }
  0x98   :  { %p17012_p1 = pnand %p17011_p0, %p17005_p11 }
  0x9a   :  { %17015 = shalt.err (!%p17012_p1)
}
  0x9b   :  { %124 = dma.hbm_to_vmem [thread:$0]  %s17573_s9, 1024, %s119_s4, [#allocation15], %s17088_s5, %s17088_s5, %s17089_s29  }
  0x9c   :  { %s17016_s24 = scalar_lea.hbm %s17574_s10, 16 }
  0x9d   :  { %p17017_p2 = scmp.ne.s32.totalorder %s17574_s10, %s17016_s24  ;;  %p17020_p3 = scmp.lt.u32.totalorder %s17016_s24, %s17574_s10 }
  0x9f   :  { %p17022_p4 = pnand %p17020_p3, %p17017_p2 }
  0xa1   :  { %17025 = shalt.err (!%p17022_p4)
}
  0xa2   :  { %s17026_s27 = scalar_lea.vmem %s132_s14, 16  ;;  %s17030_s28 = scalar_lea.vmem %s132_s14, 32 }
  0xa3   :  { %p17027_p5 = scmp.ne.s32.totalorder %s132_s14, %s17026_s27  ;;  %p17031_p6 = scmp.lt.s32.totalorder %s132_s14, %s132_s14 }
  0xa4   :  { %p17032_p7 = scmp.lt.s32.totalorder %s17030_s28, %s17026_s27 }
  0xa6   :  { %p17033_p8 = por %p17032_p7, %p17031_p6 }
  0xa8   :  { %p17034_p9 = pnand %p17033_p8, %p17027_p5 }
  0xaa   :  { %17037 = shalt.err (!%p17034_p9)
}
  0xab   :  { %134 = dma.hbm_to_vmem [thread:$0]  %s17574_s10, 16, %s132_s14, [#allocation18]  }
  0xac   :  { %17060 = dma.done.wait [#allocation3], 196608  }
  0xad   :  { %17061 = vsyncadd [#allocation3], 4294770688 }
  0xae   :  { %17062 = dma.done.wait [#allocation6], 32896  }
  0xaf   :  { %17063 = vsyncadd [#allocation6], 4294934400 }
  0xb0   :  { %17064 = dma.done.wait [#allocation9], 8256  }
  0xb1   :  { %17065 = vsyncadd [#allocation9], 4294959040 }
  0xb2   :  { %17066 = dma.done.wait [#allocation12], 2080  }
  0xb3   :  { %17067 = vsyncadd [#allocation12], 4294965216 }
  0xb4   :  { %17068 = dma.done.wait [#allocation15], 1040  }
  0xb5   :  { %17069 = vsyncadd [#allocation15], 4294966256 }
  0xb6   :  { %17070 = dma.done.wait [#allocation18], 16  }
  0xb7   :  { %17071 = vsyncadd [#allocation18], 4294967280  ;;  %v214_v0 = vld [vmem:[#allocation2] sm:$0xff]  ;;  %v215_v2 = vld [vmem:[#allocation2 + $0x8] sm:$0xff]  ;;  %vm17093_vm0 = vmmov 0  }
  0xb8   :  { %v218_v1 = vld [vmem:[#allocation2 + $0x20] sm:$0xff]  ;;  %v219_v4 = vld [vmem:[#allocation2 + $0x28] sm:$0xff] }
  0xb9   :  { %v14142_v3 = vcombine.high %v214_v0, %v218_v1  ;;  %v14141_v5 = vcombine.low %v214_v0, %v218_v1  ;;  %v222_v6 = vld [vmem:[#allocation2 + $0x40] sm:$0xff]  ;;  %v14144_v8 = vcombine.high %v215_v2, %v219_v4  ;;  %v14143_v9 = vcombine.low %v215_v2, %v219_v4  ;;  %v223_v11 = vld [vmem:[#allocation2 + $0x48] sm:$0xff] }
  0xba   :  { %v226_v7 = vld [vmem:[#allocation2 + $0x60] sm:$0xff]  ;;  %v227_v12 = vld [vmem:[#allocation2 + $0x68] sm:$0xff] }
  0xbb   :  { %v14150_v10 = vcombine.high %v222_v6, %v226_v7  ;;  %v230_v13 = vld [vmem:[#allocation2 + $0x80] sm:$0xff]  ;;  %9472 = vmatprep.subr.bf16.mxu0 %v14142_v3  ;;  %v14152_v14 = vcombine.high %v223_v11, %v227_v12  ;;  %v231_v16 = vld [vmem:[#allocation2 + $0x88] sm:$0xff]  ;;  %9964 = vmatprep.subr.bf16.mxu1 %v14144_v8  ;;  %v14149_v18 = vcombine.low %v222_v6, %v226_v7 }
  0xbc   :  { %v234_v15 = vld [vmem:[#allocation2 + $0xa0] sm:$0xff]  ;;  %v235_v17 = vld [vmem:[#allocation2 + $0xa8] sm:$0xff]  ;;  %9473 = vmatpush1.bf16.msra.mxu0 %v14141_v5  ;;  %9965 = vmatpush1.bf16.msra.mxu1 %v14143_v9  ;;  %v14151_v19 = vcombine.low %v223_v11, %v227_v12 }
  0xbd   :  { %9474 = vmatprep.subr.bf16.mxu0 %v14150_v10  ;;  %v14158_v20 = vcombine.high %v230_v13, %v234_v15  ;;  %9966 = vmatprep.subr.bf16.mxu1 %v14152_v14  ;;  %v14160_v21 = vcombine.high %v231_v16, %v235_v17  ;;  %v238_v22 = vld [vmem:[#allocation2 + $0xc0] sm:$0xff]  ;;  %v239_v24 = vld [vmem:[#allocation2 + $0xc8] sm:$0xff]  ;;  %v14157_v26 = vcombine.low %v230_v13, %v234_v15 }
  0xbe   :  { %v242_v23 = vld [vmem:[#allocation2 + $0xe0] sm:$0xff]  ;;  %v243_v25 = vld [vmem:[#allocation2 + $0xe8] sm:$0xff]  ;;  %v14159_v27 = vcombine.low %v231_v16, %v235_v17 }
  0xbf   :  { %v14166_v28 = vcombine.high %v238_v22, %v242_v23  ;;  %v14168_v29 = vcombine.high %v239_v24, %v243_v25  ;;  %v246_v30 = vld [vmem:[#allocation2 + $0x100] sm:$0xff]  ;;  %v247_v32 = vld [vmem:[#allocation2 + $0x108] sm:$0xff]  ;;  %v14165_v34 = vcombine.low %v238_v22, %v242_v23  ;;  %v14167_v35 = vcombine.low %v239_v24, %v243_v25 }
  0xc0   :  { %9475 = vmatpush1.bf16.msra.mxu0 %v14149_v18  ;;  %9967 = vmatpush1.bf16.msra.mxu1 %v14151_v19  ;;  %v250_v31 = vld [vmem:[#allocation2 + $0x120] sm:$0xff]  ;;  %v251_v33 = vld [vmem:[#allocation2 + $0x128] sm:$0xff] }
  0xc1   :  { %9476 = vmatprep.subr.bf16.mxu0 %v14158_v20  ;;  %9968 = vmatprep.subr.bf16.mxu1 %v14160_v21  ;;  %v14174_v36 = vcombine.high %v246_v30, %v250_v31  ;;  %v14176_v37 = vcombine.high %v247_v32, %v251_v33  ;;  %v254_v38 = vld [vmem:[#allocation2 + $0x140] sm:$0xff]  ;;  %v255_v40 = vld [vmem:[#allocation2 + $0x148] sm:$0xff]  ;;  %v14173_v42 = vcombine.low %v246_v30, %v250_v31 }
  0xc2   :  { %v258_v39 = vld [vmem:[#allocation2 + $0x160] sm:$0xff]  ;;  %v259_v41 = vld [vmem:[#allocation2 + $0x168] sm:$0xff]  ;;  %v14175_v43 = vcombine.low %v247_v32, %v251_v33 }
  0xc3   :  { %v14182_v44 = vcombine.high %v254_v38, %v258_v39  ;;  %v14184_v45 = vcombine.high %v255_v40, %v259_v41  ;;  %v262_v46 = vld [vmem:[#allocation2 + $0x180] sm:$0xff]  ;;  %v263_v48 = vld [vmem:[#allocation2 + $0x188] sm:$0xff]  ;;  %v14181_v50 = vcombine.low %v254_v38, %v258_v39  ;;  %v14183_v51 = vcombine.low %v255_v40, %v259_v41 }
  0xc4   :  { %9477 = vmatpush1.bf16.msra.mxu0 %v14157_v26  ;;  %9969 = vmatpush1.bf16.msra.mxu1 %v14159_v27  ;;  %v266_v47 = vld [vmem:[#allocation2 + $0x1a0] sm:$0xff]  ;;  %v267_v49 = vld [vmem:[#allocation2 + $0x1a8] sm:$0xff] }
  0xc5   :  { %9478 = vmatprep.subr.bf16.mxu0 %v14166_v28  ;;  %9970 = vmatprep.subr.bf16.mxu1 %v14168_v29  ;;  %v14190_v52 = vcombine.high %v262_v46, %v266_v47  ;;  %v167_v53 = vld [vmem:[%s17564_s0 + $0x8] sm:$0xff]  ;;  %v14192_v54 = vcombine.high %v263_v48, %v267_v49  ;;  %v270_v55 = vld [vmem:[#allocation2 + $0x1c0] sm:$0xff]  ;;  %v14189_v60 = vcombine.low %v262_v46, %v266_v47 }
  0xc6   :  { %v274_v56 = vld [vmem:[#allocation2 + $0x1e0] sm:$0xff]  ;;  %v17278_v57 = vpack.c.bf16 %v167_v53, %v167_v53  ;;  %v271_v58 = vld [vmem:[#allocation2 + $0x1c8] sm:$0xff]  ;;  %v14191_v61 = vcombine.low %v263_v48, %v267_v49 }
  0xc7   :  { %v275_v59 = vld [vmem:[#allocation2 + $0x1e8] sm:$0xff]  ;;  %v14198_v62 = vcombine.high %v270_v55, %v274_v56  ;;  %v278_v0 = vld [vmem:[#allocation2 + $0x200] sm:$0xff]  ;;  %v14197_v4 = vcombine.low %v270_v55, %v274_v56 }
  0xc8   :  { %9479 = vmatpush1.bf16.msra.mxu0 %v14165_v34  ;;  %9971 = vmatpush1.bf16.msra.mxu1 %v14167_v35  ;;  %v14200_v63 = vcombine.high %v271_v58, %v275_v59  ;;  %v282_v1 = vld [vmem:[#allocation2 + $0x220] sm:$0xff]  ;;  %v279_v2 = vld [vmem:[#allocation2 + $0x208] sm:$0xff]  ;;  %v14199_v5 = vcombine.low %v271_v58, %v275_v59 }
  0xc9   :  { %9480 = vmatprep.subr.bf16.mxu0 %v14174_v36  ;;  %9972 = vmatprep.subr.bf16.mxu1 %v14176_v37  ;;  %v283_v3 = vld [vmem:[#allocation2 + $0x228] sm:$0xff]  ;;  %v14206_v6 = vcombine.high %v278_v0, %v282_v1  ;;  %v286_v8 = vld [vmem:[#allocation2 + $0x240] sm:$0xff]  ;;  %v14205_v12 = vcombine.low %v278_v0, %v282_v1 }
  0xca   :  { %9504 = vmatprep.mubr.bf16.mxu0 %v17278_v57  ;;  %9996 = vmatprep.mubr.bf16.mxu1 %v17278_v57  ;;  %v14208_v7 = vcombine.high %v279_v2, %v283_v3  ;;  %v290_v9 = vld [vmem:[#allocation2 + $0x260] sm:$0xff]  ;;  %v287_v10 = vld [vmem:[#allocation2 + $0x248] sm:$0xff]  ;;  %v14207_v13 = vcombine.low %v279_v2, %v283_v3 }
  0xcb   :  { %v291_v11 = vld [vmem:[#allocation2 + $0x268] sm:$0xff]  ;;  %v14214_v14 = vcombine.high %v286_v8, %v290_v9  ;;  %v294_v16 = vld [vmem:[#allocation2 + $0x280] sm:$0xff]  ;;  %v14213_v20 = vcombine.low %v286_v8, %v290_v9 }
  0xcc   :  { %9481 = vmatpush1.bf16.msra.mxu0 %v14173_v42  ;;  %9973 = vmatpush1.bf16.msra.mxu1 %v14175_v43  ;;  %v14216_v15 = vcombine.high %v287_v10, %v291_v11  ;;  %v298_v17 = vld [vmem:[#allocation2 + $0x2a0] sm:$0xff]  ;;  %v295_v18 = vld [vmem:[#allocation2 + $0x288] sm:$0xff]  ;;  %v14215_v21 = vcombine.low %v287_v10, %v291_v11 }
  0xcd   :  { %9482 = vmatprep.subr.bf16.mxu0 %v14182_v44  ;;  %9974 = vmatprep.subr.bf16.mxu1 %v14184_v45  ;;  %v299_v19 = vld [vmem:[#allocation2 + $0x2a8] sm:$0xff]  ;;  %v14222_v22 = vcombine.high %v294_v16, %v298_v17  ;;  %v302_v24 = vld [vmem:[#allocation2 + $0x2c0] sm:$0xff]  ;;  %v14221_v28 = vcombine.low %v294_v16, %v298_v17 }
  0xce   :  { %v14224_v23 = vcombine.high %v295_v18, %v299_v19  ;;  %v306_v25 = vld [vmem:[#allocation2 + $0x2e0] sm:$0xff]  ;;  %v303_v26 = vld [vmem:[#allocation2 + $0x2c8] sm:$0xff]  ;;  %v14223_v29 = vcombine.low %v295_v18, %v299_v19 }
  0xcf   :  { %v307_v27 = vld [vmem:[#allocation2 + $0x2e8] sm:$0xff]  ;;  %v14230_v30 = vcombine.high %v302_v24, %v306_v25  ;;  %v310_v32 = vld [vmem:[#allocation2 + $0x300] sm:$0xff]  ;;  %v14229_v36 = vcombine.low %v302_v24, %v306_v25 }
  0xd0   :  { %9483 = vmatpush1.bf16.msra.mxu0 %v14181_v50  ;;  %9975 = vmatpush1.bf16.msra.mxu1 %v14183_v51  ;;  %v14232_v31 = vcombine.high %v303_v26, %v307_v27  ;;  %v314_v33 = vld [vmem:[#allocation2 + $0x320] sm:$0xff]  ;;  %v311_v34 = vld [vmem:[#allocation2 + $0x308] sm:$0xff]  ;;  %v14231_v37 = vcombine.low %v303_v26, %v307_v27 }
  0xd1   :  { %9484 = vmatprep.subr.bf16.mxu0 %v14190_v52  ;;  %9976 = vmatprep.subr.bf16.mxu1 %v14192_v54  ;;  %v315_v35 = vld [vmem:[#allocation2 + $0x328] sm:$0xff]  ;;  %v14238_v38 = vcombine.high %v310_v32, %v314_v33  ;;  %v318_v40 = vld [vmem:[#allocation2 + $0x340] sm:$0xff]  ;;  %v14237_v44 = vcombine.low %v310_v32, %v314_v33 }
  0xd2   :  { %v14240_v39 = vcombine.high %v311_v34, %v315_v35  ;;  %v322_v41 = vld [vmem:[#allocation2 + $0x360] sm:$0xff]  ;;  %v319_v42 = vld [vmem:[#allocation2 + $0x348] sm:$0xff]  ;;  %v14239_v45 = vcombine.low %v311_v34, %v315_v35 }
  0xd3   :  { %v323_v43 = vld [vmem:[#allocation2 + $0x368] sm:$0xff]  ;;  %v14246_v46 = vcombine.high %v318_v40, %v322_v41  ;;  %v326_v48 = vld [vmem:[#allocation2 + $0x380] sm:$0xff]  ;;  %v14245_v52 = vcombine.low %v318_v40, %v322_v41 }
  0xd4   :  { %9485 = vmatpush1.bf16.msra.mxu0 %v14189_v60  ;;  %9977 = vmatpush1.bf16.msra.mxu1 %v14191_v61  ;;  %v14248_v47 = vcombine.high %v319_v42, %v323_v43  ;;  %v330_v49 = vld [vmem:[#allocation2 + $0x3a0] sm:$0xff]  ;;  %v327_v50 = vld [vmem:[#allocation2 + $0x388] sm:$0xff]  ;;  %v14247_v53 = vcombine.low %v319_v42, %v323_v43 }
  0xd5   :  { %9486 = vmatprep.subr.bf16.mxu0 %v14198_v62  ;;  %9978 = vmatprep.subr.bf16.mxu1 %v14200_v63  ;;  %v331_v51 = vld [vmem:[#allocation2 + $0x3a8] sm:$0xff]  ;;  %v14254_v54 = vcombine.high %v326_v48, %v330_v49  ;;  %v334_v56 = vld [vmem:[#allocation2 + $0x3c0] sm:$0xff]  ;;  %v14253_v61 = vcombine.low %v326_v48, %v330_v49 }
  0xd6   :  { %v14256_v55 = vcombine.high %v327_v50, %v331_v51  ;;  %v338_v58 = vld [vmem:[#allocation2 + $0x3e0] sm:$0xff]  ;;  %v335_v59 = vld [vmem:[#allocation2 + $0x3c8] sm:$0xff]  ;;  %v14255_v62 = vcombine.low %v327_v50, %v331_v51 }
  0xd7   :  { %v339_v60 = vld [vmem:[#allocation2 + $0x3e8] sm:$0xff]  ;;  %v14262_v63 = vcombine.high %v334_v56, %v338_v58  ;;  %v342_v1 = vld [vmem:[#allocation2 + $0x400] sm:$0xff] }
  0xd8   :  { %9487 = vmatpush1.bf16.msra.mxu0 %v14197_v4  ;;  %9979 = vmatpush1.bf16.msra.mxu1 %v14199_v5  ;;  %v14264_v0 = vcombine.high %v335_v59, %v339_v60  ;;  %v346_v2 = vld [vmem:[#allocation2 + $0x420] sm:$0xff]  ;;  %v343_v3 = vld [vmem:[#allocation2 + $0x408] sm:$0xff]  ;;  %v14261_v5 = vcombine.low %v334_v56, %v338_v58 }
  0xd9   :  { %9488 = vmatprep.subr.bf16.mxu0 %v14206_v6  ;;  %9980 = vmatprep.subr.bf16.mxu1 %v14208_v7  ;;  %v347_v4 = vld [vmem:[#allocation2 + $0x428] sm:$0xff]  ;;  %v166_v6 = vld [vmem:[%s17564_s0] sm:$0xff]  ;;  %v14263_v7 = vcombine.low %v335_v59, %v339_v60  ;;  %v14270_v8 = vcombine.high %v342_v1, %v346_v2  ;;  %v14269_v16 = vcombine.low %v342_v1, %v346_v2 }
  0xda   :  { %v14272_v9 = vcombine.high %v343_v3, %v347_v4  ;;  %v350_v10 = vld [vmem:[#allocation2 + $0x440] sm:$0xff]  ;;  %v14271_v17 = vcombine.low %v343_v3, %v347_v4  ;;  %v363_v24 = vld [vmem:[#allocation2 + $0x4a8] sm:$0xff] }
  0xdb   :  { %v354_v11 = vld [vmem:[#allocation2 + $0x460] sm:$0xff]  ;;  %v371_v32 = vld [vmem:[#allocation2 + $0x4e8] sm:$0xff] }
  0xdc   :  { %9489 = vmatpush1.bf16.msra.mxu0 %v14205_v12  ;;  %9981 = vmatpush1.bf16.msra.mxu1 %v14207_v13  ;;  %v17285_v12 = vpack.c.bf16 %v166_v6, %v166_v6  ;;  %v351_v13 = vld [vmem:[#allocation2 + $0x448] sm:$0xff]  ;;  %v14278_v18 = vcombine.high %v350_v10, %v354_v11  ;;  %v14277_v25 = vcombine.low %v350_v10, %v354_v11  ;;  %v410_v6 = vld [vmem:[#allocation2 + $0x620] sm:$0xff] }
  0xdd   :  { %9490 = vmatprep.subr.bf16.mxu0 %v14214_v14  ;;  %9982 = vmatprep.subr.bf16.mxu1 %v14216_v15  ;;  %v355_v14 = vld [vmem:[#allocation2 + $0x468] sm:$0xff]  ;;  %v169_v15 = vld [vmem:[%s17564_s0 + $0x18] sm:$0xff] }
  0xde   :  { %v14280_v19 = vcombine.high %v351_v13, %v355_v14  ;;  %v14279_v26 = vcombine.low %v351_v13, %v355_v14  ;;  %v379_v40 = vld [vmem:[#allocation2 + $0x528] sm:$0xff]  ;;  %v414_v14 = vld [vmem:[#allocation2 + $0x640] sm:$0xff] }
  0xdf   :  { %v387_v48 = vld [vmem:[#allocation2 + $0x568] sm:$0xff] }
  0xe0   :  { %9491 = vmatpush1.bf16.msra.mxu0 %v14213_v20  ;;  %9983 = vmatpush1.bf16.msra.mxu1 %v14215_v21  ;;  %v358_v20 = vld [vmem:[#allocation2 + $0x480] sm:$0xff]  ;;  %v395_v56 = vld [vmem:[#allocation2 + $0x5a8] sm:$0xff] }
  0xe1   :  { %9492 = vmatprep.subr.bf16.mxu0 %v14222_v22  ;;  %9984 = vmatprep.subr.bf16.mxu1 %v14224_v23  ;;  %v362_v21 = vld [vmem:[#allocation2 + $0x4a0] sm:$0xff]  ;;  %v359_v22 = vld [vmem:[#allocation2 + $0x488] sm:$0xff]  ;;  %v17290_v23 = vpack.c.bf16 %v169_v15, %v169_v15 }
  0xe2   :  { %v14286_v27 = vcombine.high %v358_v20, %v362_v21  ;;  %v14285_v33 = vcombine.low %v358_v20, %v362_v21  ;;  %v14287_v34 = vcombine.low %v359_v22, %v363_v24  ;;  %v403_v1 = vld [vmem:[#allocation2 + $0x5e8] sm:$0xff]  ;;  %v418_v15 = vld [vmem:[#allocation2 + $0x660] sm:$0xff] }
  0xe3   :  { %v14342_v21 = vcombine.high %v414_v14, %v418_v15 }
  0xe4   :  { %9493 = vmatpush1.bf16.msra.mxu0 %v14221_v28  ;;  %9985 = vmatpush1.bf16.msra.mxu1 %v14223_v29  ;;  %v366_v28 = vld [vmem:[#allocation2 + $0x4c0] sm:$0xff] }
  0xe5   :  { %9494 = vmatprep.subr.bf16.mxu0 %v14230_v30  ;;  %9986 = vmatprep.subr.bf16.mxu1 %v14232_v31  ;;  %v370_v29 = vld [vmem:[#allocation2 + $0x4e0] sm:$0xff]  ;;  %v367_v30 = vld [vmem:[#allocation2 + $0x4c8] sm:$0xff]  ;;  %v14288_v31 = vcombine.high %v359_v22, %v363_v24 }
  0xe6   :  { %v14294_v35 = vcombine.high %v366_v28, %v370_v29  ;;  %v14293_v41 = vcombine.low %v366_v28, %v370_v29  ;;  %v14295_v42 = vcombine.low %v367_v30, %v371_v32  ;;  %v422_v22 = vld [vmem:[#allocation2 + $0x680] sm:$0xff]  ;;  %v14341_v28 = vcombine.low %v414_v14, %v418_v15  ;;  %v168_v14 = vld [vmem:[%s17564_s0 + $0x10] sm:$0xff] }
  0xe7   :  { %v426_v24 = vld [vmem:[#allocation2 + $0x6a0] sm:$0xff] }
  0xe8   :  { %9495 = vmatpush1.bf16.msra.mxu0 %v14229_v36  ;;  %9987 = vmatpush1.bf16.msra.mxu1 %v14231_v37  ;;  %v374_v36 = vld [vmem:[#allocation2 + $0x500] sm:$0xff] }
  0xe9   :  { %9496 = vmatprep.subr.bf16.mxu0 %v14238_v38  ;;  %9988 = vmatprep.subr.bf16.mxu1 %v14240_v39  ;;  %v378_v37 = vld [vmem:[#allocation2 + $0x520] sm:$0xff]  ;;  %v375_v38 = vld [vmem:[#allocation2 + $0x508] sm:$0xff]  ;;  %v14296_v39 = vcombine.high %v367_v30, %v371_v32  ;;  %v14350_v30 = vcombine.high %v422_v22, %v426_v24 }
  0xea   :  { %v14302_v43 = vcombine.high %v374_v36, %v378_v37  ;;  %v14301_v49 = vcombine.low %v374_v36, %v378_v37  ;;  %v14303_v50 = vcombine.low %v375_v38, %v379_v40  ;;  %v434_v32 = vld [vmem:[#allocation2 + $0x6e0] sm:$0xff]  ;;  %v14349_v36 = vcombine.low %v422_v22, %v426_v24  ;;  %v171_v24 = vld [vmem:[%s17564_s0 + $0x28] sm:$0xff] }
  0xec   :  { %9497 = vmatpush1.bf16.msra.mxu0 %v14237_v44  ;;  %9989 = vmatpush1.bf16.msra.mxu1 %v14239_v45  ;;  %v382_v44 = vld [vmem:[#allocation2 + $0x540] sm:$0xff] }
  0xed   :  { %9498 = vmatprep.subr.bf16.mxu0 %v14246_v46  ;;  %9990 = vmatprep.subr.bf16.mxu1 %v14248_v47  ;;  %v386_v45 = vld [vmem:[#allocation2 + $0x560] sm:$0xff]  ;;  %v383_v46 = vld [vmem:[#allocation2 + $0x548] sm:$0xff]  ;;  %v14304_v47 = vcombine.high %v375_v38, %v379_v40 }
  0xee   :  { %v14310_v51 = vcombine.high %v382_v44, %v386_v45  ;;  %v14309_v58 = vcombine.low %v382_v44, %v386_v45  ;;  %v14311_v59 = vcombine.low %v383_v46, %v387_v48  ;;  %v442_v40 = vld [vmem:[#allocation2 + $0x720] sm:$0xff] }
  0xf0   :  { %9499 = vmatpush1.bf16.msra.mxu0 %v14245_v52  ;;  %9991 = vmatpush1.bf16.msra.mxu1 %v14247_v53  ;;  %v390_v52 = vld [vmem:[#allocation2 + $0x580] sm:$0xff] }
  0xf1   :  { %9500 = vmatprep.subr.bf16.mxu0 %v14254_v54  ;;  %9992 = vmatprep.subr.bf16.mxu1 %v14256_v55  ;;  %v394_v53 = vld [vmem:[#allocation2 + $0x5a0] sm:$0xff]  ;;  %v391_v54 = vld [vmem:[#allocation2 + $0x588] sm:$0xff]  ;;  %v14312_v55 = vcombine.high %v383_v46, %v387_v48 }
  0xf2   :  { %v14318_v60 = vcombine.high %v390_v52, %v394_v53  ;;  %v14317_v2 = vcombine.low %v390_v52, %v394_v53  ;;  %v14319_v3 = vcombine.low %v391_v54, %v395_v56  ;;  %v450_v48 = vld [vmem:[#allocation2 + $0x760] sm:$0xff] }
  0xf4   :  { %9501 = vmatpush1.bf16.msra.mxu0 %v14253_v61  ;;  %9993 = vmatpush1.bf16.msra.mxu1 %v14255_v62  ;;  %v398_v61 = vld [vmem:[#allocation2 + $0x5c0] sm:$0xff] }
  0xf5   :  { %9502 = vmatprep.subr.bf16.mxu0 %v14262_v63  ;;  %9994 = vmatprep.subr.bf16.mxu1 %v14264_v0  ;;  %v402_v62 = vld [vmem:[#allocation2 + $0x5e0] sm:$0xff]  ;;  %v399_v63 = vld [vmem:[#allocation2 + $0x5c8] sm:$0xff]  ;;  %v14320_v0 = vcombine.high %v391_v54, %v395_v56 }
  0xf6   :  { %v14326_v4 = vcombine.high %v398_v61, %v402_v62  ;;  %v14325_v10 = vcombine.low %v398_v61, %v402_v62  ;;  %v14327_v11 = vcombine.low %v399_v63, %v403_v1  ;;  %v458_v56 = vld [vmem:[#allocation2 + $0x7a0] sm:$0xff] }
  0xf8   :  { %9503 = vmatpush1.bf16.msra.mxu0 %v14261_v5  ;;  %9995 = vmatpush1.bf16.msra.mxu1 %v14263_v7  ;;  %v406_v5 = vld [vmem:[#allocation2 + $0x600] sm:$0xff]  ;;  %v407_v7 = vld [vmem:[#allocation2 + $0x608] sm:$0xff] }
  0xf9   :  { %9513 = vmatprep.subr.bf16.mxu0 %v14270_v8  ;;  %10005 = vmatprep.subr.bf16.mxu1 %v14272_v9  ;;  %v14328_v8 = vcombine.high %v399_v63, %v403_v1  ;;  %v411_v9 = vld [vmem:[#allocation2 + $0x628] sm:$0xff]  ;;  %v14334_v13 = vcombine.high %v406_v5, %v410_v6  ;;  %v466_v1 = vld [vmem:[#allocation2 + $0x7e0] sm:$0xff] }
  0xfa   :  { %v14335_v20 = vcombine.low %v407_v7, %v411_v9 }
  0xfb   :  { %9505 = vmatmul.mubr.bf16.vlgmr.msra.gmra.mrb[0].mxu0 %v17285_v12  ;;  %9997 = vmatmul.mubr.bf16.vlgmr.msra.gmra.mrb[0].mxu1 %v17285_v12 }
  0xfc   :  { %9514 = vmatpush1.bf16.msra.mxu0 %v14269_v16  ;;  %10006 = vmatpush1.bf16.msra.mxu1 %v14271_v17  ;;  %v415_v16 = vld [vmem:[#allocation2 + $0x648] sm:$0xff]  ;;  %v14336_v17 = vcombine.high %v407_v7, %v411_v9  ;;  %v474_v9 = vld [vmem:[#allocation2 + $0x820] sm:$0xff] }
  0xfd   :  { %9515 = vmatprep.subr.bf16.mxu0 %v14278_v18  ;;  %10007 = vmatprep.subr.bf16.mxu1 %v14280_v19  ;;  %v419_v18 = vld [vmem:[#allocation2 + $0x668] sm:$0xff]  ;;  %v14333_v19 = vcombine.low %v406_v5, %v410_v6  ;;  %v470_v6 = vld [vmem:[#allocation2 + $0x800] sm:$0xff] }
  0xfe   :  { %9545 = vmatprep.mubr.bf16.mxu0 %v17290_v23  ;;  %10037 = vmatprep.mubr.bf16.mxu1 %v17290_v23  ;;  %v14343_v29 = vcombine.low %v415_v16, %v419_v18 }
 0x100   :  { %9516 = vmatpush1.bf16.msra.mxu0 %v14277_v25  ;;  %10008 = vmatpush1.bf16.msra.mxu1 %v14279_v26  ;;  %v423_v25 = vld [vmem:[#allocation2 + $0x688] sm:$0xff]  ;;  %v14344_v26 = vcombine.high %v415_v16, %v419_v18  ;;  %v478_v16 = vld [vmem:[#allocation2 + $0x840] sm:$0xff]  ;;  %v14398_v18 = vcombine.high %v470_v6, %v474_v9 }
 0x101   :  { %9517 = vmatprep.subr.bf16.mxu0 %v14286_v27  ;;  %10009 = vmatprep.subr.bf16.mxu1 %v14288_v31  ;;  %v427_v27 = vld [vmem:[#allocation2 + $0x6a8] sm:$0xff]  ;;  %v430_v31 = vld [vmem:[#allocation2 + $0x6c0] sm:$0xff] }
 0x102   :  { %v14351_v37 = vcombine.low %v423_v25, %v427_v27  ;;  %v14358_v38 = vcombine.high %v430_v31, %v434_v32  ;;  %v14357_v44 = vcombine.low %v430_v31, %v434_v32  ;;  %v490_v31 = vld [vmem:[#allocation2 + $0x8a0] sm:$0xff]  ;;  %v487_v32 = vld [vmem:[#allocation2 + $0x888] sm:$0xff] }
 0x104   :  { %9518 = vmatpush1.bf16.msra.mxu0 %v14285_v33  ;;  %10010 = vmatpush1.bf16.msra.mxu1 %v14287_v34  ;;  %v431_v33 = vld [vmem:[#allocation2 + $0x6c8] sm:$0xff]  ;;  %v14352_v34 = vcombine.high %v423_v25, %v427_v27  ;;  %v17302_v25 = vpack.c.bf16 %v168_v14, %v168_v14 }
 0x105   :  { %9519 = vmatprep.subr.bf16.mxu0 %v14294_v35  ;;  %10011 = vmatprep.subr.bf16.mxu1 %v14296_v39  ;;  %v435_v35 = vld [vmem:[#allocation2 + $0x6e8] sm:$0xff]  ;;  %v438_v39 = vld [vmem:[#allocation2 + $0x700] sm:$0xff] }
 0x106   :  { %v14359_v45 = vcombine.low %v431_v33, %v435_v35  ;;  %v14366_v46 = vcombine.high %v438_v39, %v442_v40  ;;  %v14365_v52 = vcombine.low %v438_v39, %v442_v40  ;;  %v498_v39 = vld [vmem:[#allocation2 + $0x8e0] sm:$0xff]  ;;  %v495_v40 = vld [vmem:[#allocation2 + $0x8c8] sm:$0xff] }
 0x108   :  { %9520 = vmatpush1.bf16.msra.mxu0 %v14293_v41  ;;  %10012 = vmatpush1.bf16.msra.mxu1 %v14295_v42  ;;  %v439_v41 = vld [vmem:[#allocation2 + $0x708] sm:$0xff]  ;;  %v14360_v42 = vcombine.high %v431_v33, %v435_v35 }
 0x109   :  { %9521 = vmatprep.subr.bf16.mxu0 %v14302_v43  ;;  %10013 = vmatprep.subr.bf16.mxu1 %v14304_v47  ;;  %v443_v43 = vld [vmem:[#allocation2 + $0x728] sm:$0xff]  ;;  %v446_v47 = vld [vmem:[#allocation2 + $0x740] sm:$0xff] }
 0x10a   :  { %v14367_v53 = vcombine.low %v439_v41, %v443_v43  ;;  %v14374_v54 = vcombine.high %v446_v47, %v450_v48  ;;  %v14373_v61 = vcombine.low %v446_v47, %v450_v48  ;;  %v491_v33 = vld [vmem:[#allocation2 + $0x8a8] sm:$0xff]  ;;  %v506_v47 = vld [vmem:[#allocation2 + $0x920] sm:$0xff] }
 0x10b   :  { %v503_v48 = vld [vmem:[#allocation2 + $0x908] sm:$0xff] }
 0x10c   :  { %9522 = vmatpush1.bf16.msra.mxu0 %v14301_v49  ;;  %10014 = vmatpush1.bf16.msra.mxu1 %v14303_v50  ;;  %v447_v49 = vld [vmem:[#allocation2 + $0x748] sm:$0xff]  ;;  %v14368_v50 = vcombine.high %v439_v41, %v443_v43  ;;  %v14416_v41 = vcombine.high %v487_v32, %v491_v33 }
 0x10d   :  { %9523 = vmatprep.subr.bf16.mxu0 %v14310_v51  ;;  %10015 = vmatprep.subr.bf16.mxu1 %v14312_v55  ;;  %v451_v51 = vld [vmem:[#allocation2 + $0x768] sm:$0xff]  ;;  %v454_v55 = vld [vmem:[#allocation2 + $0x780] sm:$0xff] }
 0x10e   :  { %v14375_v62 = vcombine.low %v447_v49, %v451_v51  ;;  %v14382_v63 = vcombine.high %v454_v55, %v458_v56  ;;  %v14381_v5 = vcombine.low %v454_v55, %v458_v56  ;;  %v514_v55 = vld [vmem:[#allocation2 + $0x960] sm:$0xff]  ;;  %v511_v56 = vld [vmem:[#allocation2 + $0x948] sm:$0xff] }
 0x110   :  { %9524 = vmatpush1.bf16.msra.mxu0 %v14309_v58  ;;  %10016 = vmatpush1.bf16.msra.mxu1 %v14311_v59  ;;  %v455_v58 = vld [vmem:[#allocation2 + $0x788] sm:$0xff]  ;;  %v14376_v59 = vcombine.high %v447_v49, %v451_v51 }
 0x111   :  { %9525 = vmatprep.subr.bf16.mxu0 %v14318_v60  ;;  %10017 = vmatprep.subr.bf16.mxu1 %v14320_v0  ;;  %v459_v60 = vld [vmem:[#allocation2 + $0x7a8] sm:$0xff]  ;;  %v462_v0 = vld [vmem:[#allocation2 + $0x7c0] sm:$0xff] }
 0x112   :  { %v14383_v7 = vcombine.low %v455_v58, %v459_v60  ;;  %v14389_v15 = vcombine.low %v462_v0, %v466_v1 }
 0x114   :  { %9526 = vmatpush1.bf16.msra.mxu0 %v14317_v2  ;;  %10018 = vmatpush1.bf16.msra.mxu1 %v14319_v3  ;;  %v463_v2 = vld [vmem:[#allocation2 + $0x7c8] sm:$0xff]  ;;  %v14384_v3 = vcombine.high %v455_v58, %v459_v60 }
 0x115   :  { %9527 = vmatprep.subr.bf16.mxu0 %v14326_v4  ;;  %10019 = vmatprep.subr.bf16.mxu1 %v14328_v8  ;;  %v467_v4 = vld [vmem:[#allocation2 + $0x7e8] sm:$0xff]  ;;  %v14390_v8 = vcombine.high %v462_v0, %v466_v1  ;;  %v522_v0 = vld [vmem:[#allocation2 + $0x9a0] sm:$0xff] }
 0x116   :  { %v519_v1 = vld [vmem:[#allocation2 + $0x988] sm:$0xff] }
 0x118   :  { %9528 = vmatpush1.bf16.msra.mxu0 %v14325_v10  ;;  %10020 = vmatpush1.bf16.msra.mxu1 %v14327_v11  ;;  %v471_v10 = vld [vmem:[#allocation2 + $0x808] sm:$0xff] }
 0x119   :  { %9529 = vmatprep.subr.bf16.mxu0 %v14334_v13  ;;  %10021 = vmatprep.subr.bf16.mxu1 %v14336_v17  ;;  %v475_v11 = vld [vmem:[#allocation2 + $0x828] sm:$0xff]  ;;  %v14392_v13 = vcombine.high %v463_v2, %v467_v4  ;;  %v14391_v17 = vcombine.low %v463_v2, %v467_v4 }
 0x11a   :  { %v14400_v22 = vcombine.high %v471_v10, %v475_v11  ;;  %v14399_v27 = vcombine.low %v471_v10, %v475_v11  ;;  %v531_v11 = vld [vmem:[#allocation2 + $0x9e8] sm:$0xff] }
 0x11c   :  { %9530 = vmatpush1.bf16.msra.mxu0 %v14333_v19  ;;  %10022 = vmatpush1.bf16.msra.mxu1 %v14335_v20  ;;  %v482_v19 = vld [vmem:[#allocation2 + $0x860] sm:$0xff]  ;;  %v479_v20 = vld [vmem:[#allocation2 + $0x848] sm:$0xff] }
 0x11d   :  { %9531 = vmatprep.subr.bf16.mxu0 %v14342_v21  ;;  %10023 = vmatprep.subr.bf16.mxu1 %v14344_v26  ;;  %v483_v21 = vld [vmem:[#allocation2 + $0x868] sm:$0xff]  ;;  %v14397_v26 = vcombine.low %v470_v6, %v474_v9  ;;  %v14405_v35 = vcombine.low %v478_v16, %v482_v19 }
 0x11e   :  { %v527_v9 = vld [vmem:[#allocation2 + $0x9c8] sm:$0xff] }
 0x120   :  { %9532 = vmatpush1.bf16.msra.mxu0 %v14341_v28  ;;  %10024 = vmatpush1.bf16.msra.mxu1 %v14343_v29  ;;  %v14406_v28 = vcombine.high %v478_v16, %v482_v19  ;;  %v486_v29 = vld [vmem:[#allocation2 + $0x880] sm:$0xff]  ;;  %v14456_v19 = vcombine.high %v527_v9, %v531_v11 }
 0x121   :  { %9533 = vmatprep.subr.bf16.mxu0 %v14350_v30  ;;  %10025 = vmatprep.subr.bf16.mxu1 %v14352_v34  ;;  %v14408_v30 = vcombine.high %v479_v20, %v483_v21  ;;  %v17304_v34 = vpack.c.bf16 %v171_v24, %v171_v24  ;;  %v14413_v43 = vcombine.low %v486_v29, %v490_v31  ;;  %v534_v16 = vld [vmem:[#allocation2 + $0xa00] sm:$0xff] }
 0x124   :  { %9534 = vmatpush1.bf16.msra.mxu0 %v14349_v36  ;;  %10026 = vmatpush1.bf16.msra.mxu1 %v14351_v37  ;;  %v14407_v36 = vcombine.low %v479_v20, %v483_v21  ;;  %v14414_v37 = vcombine.high %v486_v29, %v490_v31  ;;  %v539_v20 = vld [vmem:[#allocation2 + $0xa28] sm:$0xff] }
 0x125   :  { %9535 = vmatprep.subr.bf16.mxu0 %v14358_v38  ;;  %10027 = vmatprep.subr.bf16.mxu1 %v14360_v42  ;;  %v494_v38 = vld [vmem:[#allocation2 + $0x8c0] sm:$0xff]  ;;  %v499_v42 = vld [vmem:[#allocation2 + $0x8e8] sm:$0xff] }
 0x126   :  { %v14424_v49 = vcombine.high %v495_v40, %v499_v42  ;;  %v14421_v51 = vcombine.low %v494_v38, %v498_v39 }
 0x128   :  { %9536 = vmatpush1.bf16.msra.mxu0 %v14357_v44  ;;  %10028 = vmatpush1.bf16.msra.mxu1 %v14359_v45  ;;  %v14415_v44 = vcombine.low %v487_v32, %v491_v33  ;;  %v14422_v45 = vcombine.high %v494_v38, %v498_v39  ;;  %v555_v39 = vld [vmem:[#allocation2 + $0xaa8] sm:$0xff] }
 0x129   :  { %9537 = vmatprep.subr.bf16.mxu0 %v14366_v46  ;;  %10029 = vmatprep.subr.bf16.mxu1 %v14368_v50  ;;  %v502_v46 = vld [vmem:[#allocation2 + $0x900] sm:$0xff]  ;;  %v507_v50 = vld [vmem:[#allocation2 + $0x928] sm:$0xff] }
 0x12a   :  { %v14432_v58 = vcombine.high %v503_v48, %v507_v50  ;;  %v14429_v60 = vcombine.low %v502_v46, %v506_v47 }
 0x12c   :  { %9538 = vmatpush1.bf16.msra.mxu0 %v14365_v52  ;;  %10030 = vmatpush1.bf16.msra.mxu1 %v14367_v53  ;;  %v14423_v52 = vcombine.low %v495_v40, %v499_v42  ;;  %v14430_v53 = vcombine.high %v502_v46, %v506_v47  ;;  %v563_v47 = vld [vmem:[#allocation2 + $0xae8] sm:$0xff] }
 0x12d   :  { %9539 = vmatprep.subr.bf16.mxu0 %v14374_v54  ;;  %10031 = vmatprep.subr.bf16.mxu1 %v14376_v59  ;;  %v510_v54 = vld [vmem:[#allocation2 + $0x940] sm:$0xff]  ;;  %v515_v59 = vld [vmem:[#allocation2 + $0x968] sm:$0xff] }
 0x12e   :  { %v14440_v2 = vcombine.high %v511_v56, %v515_v59  ;;  %v14437_v4 = vcombine.low %v510_v54, %v514_v55 }
 0x130   :  { %9540 = vmatpush1.bf16.msra.mxu0 %v14373_v61  ;;  %10032 = vmatpush1.bf16.msra.mxu1 %v14375_v62  ;;  %v14431_v61 = vcombine.low %v503_v48, %v507_v50  ;;  %v14438_v62 = vcombine.high %v510_v54, %v514_v55  ;;  %v571_v55 = vld [vmem:[#allocation2 + $0xb28] sm:$0xff] }
 0x131   :  { %9541 = vmatprep.subr.bf16.mxu0 %v14382_v63  ;;  %10033 = vmatprep.subr.bf16.mxu1 %v14384_v3  ;;  %v518_v63 = vld [vmem:[#allocation2 + $0x980] sm:$0xff]  ;;  %v523_v3 = vld [vmem:[#allocation2 + $0x9a8] sm:$0xff] }
 0x132   :  { %v14446_v6 = vcombine.high %v518_v63, %v522_v0  ;;  %v14448_v10 = vcombine.high %v519_v1, %v523_v3  ;;  %v14447_v14 = vcombine.low %v519_v1, %v523_v3 }
 0x134   :  { %9542 = vmatpush1.bf16.msra.mxu0 %v14381_v5  ;;  %10034 = vmatpush1.bf16.msra.mxu1 %v14383_v7  ;;  %v14439_v5 = vcombine.low %v511_v56, %v515_v59  ;;  %v526_v7 = vld [vmem:[#allocation2 + $0x9c0] sm:$0xff] }
 0x135   :  { %9543 = vmatprep.subr.bf16.mxu0 %v14390_v8  ;;  %10035 = vmatprep.subr.bf16.mxu1 %v14392_v13  ;;  %v530_v8 = vld [vmem:[#allocation2 + $0x9e0] sm:$0xff]  ;;  %v14445_v13 = vcombine.low %v518_v63, %v522_v0  ;;  %v579_v0 = vld [vmem:[#allocation2 + $0xb68] sm:$0xff] }
 0x136   :  { %v14453_v21 = vcombine.low %v526_v7, %v530_v8 }
 0x138   :  { %9544 = vmatpush1.bf16.msra.mxu0 %v14389_v15  ;;  %10036 = vmatpush1.bf16.msra.mxu1 %v14391_v17  ;;  %v14454_v15 = vcombine.high %v526_v7, %v530_v8  ;;  %v538_v17 = vld [vmem:[#allocation2 + $0xa20] sm:$0xff]  ;;  %v587_v8 = vld [vmem:[#allocation2 + $0xba8] sm:$0xff] }
 0x139   :  { %9554 = vmatprep.subr.bf16.mxu0 %v14398_v18  ;;  %10046 = vmatprep.subr.bf16.mxu1 %v14400_v22  ;;  %v535_v18 = vld [vmem:[#allocation2 + $0xa08] sm:$0xff]  ;;  %v14455_v22 = vcombine.low %v527_v9, %v531_v11  ;;  %v14462_v24 = vcombine.high %v534_v16, %v538_v17  ;;  %v14461_v31 = vcombine.low %v534_v16, %v538_v17 }
 0x13a   :  { %v14464_v29 = vcombine.high %v535_v18, %v539_v20  ;;  %v14463_v32 = vcombine.low %v535_v18, %v539_v20  ;;  %v595_v17 = vld [vmem:[#allocation2 + $0xbe8] sm:$0xff] }
 0x13b   :  { %9546 = vmatmul.mubr.bf16.vlgmr.msra.gmra.mrb[0].mxu0 %v17302_v25  ;;  %10038 = vmatmul.mubr.bf16.vlgmr.msra.gmra.mrb[0].mxu1 %v17302_v25 }
 0x13c   :  { %9555 = vmatpush1.bf16.msra.mxu0 %v14397_v26  ;;  %10047 = vmatpush1.bf16.msra.mxu1 %v14399_v27  ;;  %v542_v26 = vld [vmem:[#allocation2 + $0xa40] sm:$0xff] }
 0x13d   :  { %9556 = vmatprep.subr.bf16.mxu0 %v14406_v28  ;;  %10048 = vmatprep.subr.bf16.mxu1 %v14408_v30  ;;  %v546_v27 = vld [vmem:[#allocation2 + $0xa60] sm:$0xff]  ;;  %v543_v28 = vld [vmem:[#allocation2 + $0xa48] sm:$0xff] }
 0x13e   :  { %9586 = vmatprep.mubr.bf16.mxu0 %v17304_v34  ;;  %10078 = vmatprep.mubr.bf16.mxu1 %v17304_v34  ;;  %v547_v30 = vld [vmem:[#allocation2 + $0xa68] sm:$0xff]  ;;  %v14470_v33 = vcombine.high %v542_v26, %v546_v27  ;;  %v14469_v40 = vcombine.low %v542_v26, %v546_v27 }
 0x13f   :  { %v14472_v38 = vcombine.high %v543_v28, %v547_v30  ;;  %v603_v26 = vld [vmem:[#allocation2 + $0xc28] sm:$0xff] }
 0x140   :  { %9557 = vmatpush1.bf16.msra.mxu0 %v14405_v35  ;;  %10049 = vmatpush1.bf16.msra.mxu1 %v14407_v36  ;;  %v550_v35 = vld [vmem:[#allocation2 + $0xa80] sm:$0xff] }
 0x141   :  { %9558 = vmatprep.subr.bf16.mxu0 %v14414_v37  ;;  %10050 = vmatprep.subr.bf16.mxu1 %v14416_v41  ;;  %v554_v36 = vld [vmem:[#allocation2 + $0xaa0] sm:$0xff]  ;;  %v551_v37 = vld [vmem:[#allocation2 + $0xa88] sm:$0xff]  ;;  %v14471_v41 = vcombine.low %v543_v28, %v547_v30 }
 0x142   :  { %v14478_v42 = vcombine.high %v550_v35, %v554_v36  ;;  %v14480_v46 = vcombine.high %v551_v37, %v555_v39  ;;  %v14477_v48 = vcombine.low %v550_v35, %v554_v36  ;;  %v170_v28 = vld [vmem:[%s17564_s0 + $0x20] sm:$0xff]  ;;  %v607_v35 = vld [vmem:[#allocation2 + $0xc48] sm:$0xff] }
 0x143   :  { %v606_v30 = vld [vmem:[#allocation2 + $0xc40] sm:$0xff]  ;;  %v611_v36 = vld [vmem:[#allocation2 + $0xc68] sm:$0xff] }
 0x144   :  { %9559 = vmatpush1.bf16.msra.mxu0 %v14413_v43  ;;  %10051 = vmatpush1.bf16.msra.mxu1 %v14415_v44  ;;  %v558_v43 = vld [vmem:[#allocation2 + $0xac0] sm:$0xff] }
 0x145   :  { %9560 = vmatprep.subr.bf16.mxu0 %v14422_v45  ;;  %10052 = vmatprep.subr.bf16.mxu1 %v14424_v49  ;;  %v562_v44 = vld [vmem:[#allocation2 + $0xae0] sm:$0xff]  ;;  %v559_v45 = vld [vmem:[#allocation2 + $0xac8] sm:$0xff]  ;;  %v14479_v49 = vcombine.low %v551_v37, %v555_v39  ;;  %v17316_v39 = vpack.c.bf16 %v170_v28, %v170_v28 }
 0x146   :  { %v14486_v50 = vcombine.high %v558_v43, %v562_v44  ;;  %v14488_v54 = vcombine.high %v559_v45, %v563_v47  ;;  %v14485_v56 = vcombine.low %v558_v43, %v562_v44  ;;  %v614_v43 = vld [vmem:[#allocation2 + $0xc80] sm:$0xff]  ;;  %v14536_v44 = vcombine.high %v607_v35, %v611_v36  ;;  %v659_v28 = vld [vmem:[#allocation2 + $0xde8] sm:$0xff] }
 0x148   :  { %9561 = vmatpush1.bf16.msra.mxu0 %v14421_v51  ;;  %10053 = vmatpush1.bf16.msra.mxu1 %v14423_v52  ;;  %v566_v51 = vld [vmem:[#allocation2 + $0xb00] sm:$0xff] }
 0x149   :  { %9562 = vmatprep.subr.bf16.mxu0 %v14430_v53  ;;  %10054 = vmatprep.subr.bf16.mxu1 %v14432_v58  ;;  %v570_v52 = vld [vmem:[#allocation2 + $0xb20] sm:$0xff]  ;;  %v567_v53 = vld [vmem:[#allocation2 + $0xb08] sm:$0xff]  ;;  %v14487_v58 = vcombine.low %v559_v45, %v563_v47 }
 0x14a   :  { %v14494_v59 = vcombine.high %v566_v51, %v570_v52  ;;  %v14496_v63 = vcombine.high %v567_v53, %v571_v55  ;;  %v14493_v1 = vcombine.low %v566_v51, %v570_v52  ;;  %v618_v45 = vld [vmem:[#allocation2 + $0xca0] sm:$0xff]  ;;  %v619_v47 = vld [vmem:[#allocation2 + $0xca8] sm:$0xff] }
 0x14b   :  { %v14542_v51 = vcombine.high %v614_v43, %v618_v45  ;;  %v622_v52 = vld [vmem:[#allocation2 + $0xcc0] sm:$0xff] }
 0x14c   :  { %9563 = vmatpush1.bf16.msra.mxu0 %v14429_v60  ;;  %10055 = vmatpush1.bf16.msra.mxu1 %v14431_v61  ;;  %v574_v60 = vld [vmem:[#allocation2 + $0xb40] sm:$0xff] }
 0x14d   :  { %9564 = vmatprep.subr.bf16.mxu0 %v14438_v62  ;;  %10056 = vmatprep.subr.bf16.mxu1 %v14440_v2  ;;  %v578_v61 = vld [vmem:[#allocation2 + $0xb60] sm:$0xff]  ;;  %v575_v62 = vld [vmem:[#allocation2 + $0xb48] sm:$0xff]  ;;  %v14495_v2 = vcombine.low %v567_v53, %v571_v55 }
 0x14e   :  { %v14502_v3 = vcombine.high %v574_v60, %v578_v61  ;;  %v14504_v7 = vcombine.high %v575_v62, %v579_v0  ;;  %v14501_v9 = vcombine.low %v574_v60, %v578_v61  ;;  %v626_v53 = vld [vmem:[#allocation2 + $0xce0] sm:$0xff] }
 0x14f   :  { %v14550_v60 = vcombine.high %v622_v52, %v626_v53  ;;  %v630_v61 = vld [vmem:[#allocation2 + $0xd00] sm:$0xff] }
 0x150   :  { %9565 = vmatpush1.bf16.msra.mxu0 %v14437_v4  ;;  %10057 = vmatpush1.bf16.msra.mxu1 %v14439_v5  ;;  %v582_v4 = vld [vmem:[#allocation2 + $0xb80] sm:$0xff] }
 0x151   :  { %9566 = vmatprep.subr.bf16.mxu0 %v14446_v6  ;;  %10058 = vmatprep.subr.bf16.mxu1 %v14448_v10  ;;  %v586_v5 = vld [vmem:[#allocation2 + $0xba0] sm:$0xff]  ;;  %v583_v6 = vld [vmem:[#allocation2 + $0xb88] sm:$0xff]  ;;  %v14503_v10 = vcombine.low %v575_v62, %v579_v0 }
 0x152   :  { %v14510_v11 = vcombine.high %v582_v4, %v586_v5  ;;  %v14512_v16 = vcombine.high %v583_v6, %v587_v8  ;;  %v14509_v18 = vcombine.low %v582_v4, %v586_v5  ;;  %v14511_v20 = vcombine.low %v583_v6, %v587_v8  ;;  %v634_v62 = vld [vmem:[#allocation2 + $0xd20] sm:$0xff] }
 0x153   :  { %v14558_v4 = vcombine.high %v630_v61, %v634_v62  ;;  %v638_v5 = vld [vmem:[#allocation2 + $0xd40] sm:$0xff] }
 0x154   :  { %9567 = vmatpush1.bf16.msra.mxu0 %v14445_v13  ;;  %10059 = vmatpush1.bf16.msra.mxu1 %v14447_v14  ;;  %v590_v13 = vld [vmem:[#allocation2 + $0xbc0] sm:$0xff] }
 0x155   :  { %9568 = vmatprep.subr.bf16.mxu0 %v14454_v15  ;;  %10060 = vmatprep.subr.bf16.mxu1 %v14456_v19  ;;  %v594_v14 = vld [vmem:[#allocation2 + $0xbe0] sm:$0xff]  ;;  %v591_v15 = vld [vmem:[#allocation2 + $0xbc8] sm:$0xff] }
 0x156   :  { %v598_v19 = vld [vmem:[#allocation2 + $0xc00] sm:$0xff]  ;;  %v14520_v27 = vcombine.high %v591_v15, %v595_v17 }
 0x157   :  { %v642_v6 = vld [vmem:[#allocation2 + $0xd60] sm:$0xff] }
 0x158   :  { %9569 = vmatpush1.bf16.msra.mxu0 %v14453_v21  ;;  %10061 = vmatpush1.bf16.msra.mxu1 %v14455_v22  ;;  %v14518_v21 = vcombine.high %v590_v13, %v594_v14  ;;  %v602_v22 = vld [vmem:[#allocation2 + $0xc20] sm:$0xff] }
 0x159   :  { %9570 = vmatprep.subr.bf16.mxu0 %v14462_v24  ;;  %10062 = vmatprep.subr.bf16.mxu1 %v14464_v29  ;;  %v599_v24 = vld [vmem:[#allocation2 + $0xc08] sm:$0xff]  ;;  %v14517_v29 = vcombine.low %v590_v13, %v594_v14  ;;  %v14566_v13 = vcombine.high %v638_v5, %v642_v6  ;;  %v646_v14 = vld [vmem:[#allocation2 + $0xd80] sm:$0xff] }
 0x15a   :  { %v14528_v37 = vcombine.high %v599_v24, %v603_v26 }
 0x15c   :  { %9571 = vmatpush1.bf16.msra.mxu0 %v14461_v31  ;;  %10063 = vmatpush1.bf16.msra.mxu1 %v14463_v32  ;;  %v14519_v31 = vcombine.low %v591_v15, %v595_v17  ;;  %v14526_v32 = vcombine.high %v598_v19, %v602_v22  ;;  %v650_v15 = vld [vmem:[#allocation2 + $0xda0] sm:$0xff] }
 0x15d   :  { %9572 = vmatprep.subr.bf16.mxu0 %v14470_v33  ;;  %10064 = vmatprep.subr.bf16.mxu1 %v14472_v38  ;;  %v610_v33 = vld [vmem:[#allocation2 + $0xc60] sm:$0xff]  ;;  %v173_v38 = vld [vmem:[%s17564_s0 + $0x38] sm:$0xff] }
 0x160   :  { %9573 = vmatpush1.bf16.msra.mxu0 %v14469_v40  ;;  %10065 = vmatpush1.bf16.msra.mxu1 %v14471_v41  ;;  %v14525_v40 = vcombine.low %v598_v19, %v602_v22  ;;  %v14527_v41 = vcombine.low %v599_v24, %v603_v26  ;;  %v14565_v19 = vcombine.low %v638_v5, %v642_v6  ;;  %v654_v22 = vld [vmem:[#allocation2 + $0xdc0] sm:$0xff]  ;;  %v655_v26 = vld [vmem:[#allocation2 + $0xdc8] sm:$0xff] }
 0x161   :  { %9574 = vmatprep.subr.bf16.mxu0 %v14478_v42  ;;  %10066 = vmatprep.subr.bf16.mxu1 %v14480_v46  ;;  %v14534_v42 = vcombine.high %v606_v30, %v610_v33  ;;  %v615_v46 = vld [vmem:[#allocation2 + $0xc88] sm:$0xff]  ;;  %v658_v24 = vld [vmem:[#allocation2 + $0xde0] sm:$0xff] }
 0x162   :  { %v14544_v55 = vcombine.high %v615_v46, %v619_v47  ;;  %v698_v5 = vld [vmem:[#allocation2 + $0xf20] sm:$0xff]  ;;  %v695_v6 = vld [vmem:[#allocation2 + $0xf08] sm:$0xff] }
 0x164   :  { %9575 = vmatpush1.bf16.msra.mxu0 %v14477_v48  ;;  %10067 = vmatpush1.bf16.msra.mxu1 %v14479_v49  ;;  %v17318_v48 = vpack.c.bf16 %v173_v38, %v173_v38  ;;  %v14533_v49 = vcombine.low %v606_v30, %v610_v33  ;;  %v666_v33 = vld [vmem:[#allocation2 + $0xe20] sm:$0xff]  ;;  %v14581_v38 = vcombine.low %v654_v22, %v658_v24 }
 0x165   :  { %9576 = vmatprep.subr.bf16.mxu0 %v14486_v50  ;;  %10068 = vmatprep.subr.bf16.mxu1 %v14488_v54  ;;  %v14535_v50 = vcombine.low %v607_v35, %v611_v36  ;;  %v623_v54 = vld [vmem:[#allocation2 + $0xcc8] sm:$0xff]  ;;  %v14584_v36 = vcombine.high %v655_v26, %v659_v28 }
 0x166   :  { %v663_v35 = vld [vmem:[#allocation2 + $0xe08] sm:$0xff] }
 0x168   :  { %9577 = vmatpush1.bf16.msra.mxu0 %v14485_v56  ;;  %10069 = vmatpush1.bf16.msra.mxu1 %v14487_v58  ;;  %v627_v56 = vld [vmem:[#allocation2 + $0xce8] sm:$0xff]  ;;  %v14541_v58 = vcombine.low %v614_v43, %v618_v45  ;;  %v674_v43 = vld [vmem:[#allocation2 + $0xe60] sm:$0xff] }
 0x169   :  { %9578 = vmatprep.subr.bf16.mxu0 %v14494_v59  ;;  %10070 = vmatprep.subr.bf16.mxu1 %v14496_v63  ;;  %v14543_v59 = vcombine.low %v615_v46, %v619_v47  ;;  %v631_v63 = vld [vmem:[#allocation2 + $0xd08] sm:$0xff]  ;;  %v14552_v0 = vcombine.high %v623_v54, %v627_v56 }
 0x16a   :  { %v675_v46 = vld [vmem:[#allocation2 + $0xe68] sm:$0xff] }
 0x16c   :  { %9579 = vmatpush1.bf16.msra.mxu0 %v14493_v1  ;;  %10071 = vmatpush1.bf16.msra.mxu1 %v14495_v2  ;;  %v635_v1 = vld [vmem:[#allocation2 + $0xd28] sm:$0xff]  ;;  %v14549_v2 = vcombine.low %v622_v52, %v626_v53  ;;  %v682_v52 = vld [vmem:[#allocation2 + $0xea0] sm:$0xff] }
 0x16d   :  { %9580 = vmatprep.subr.bf16.mxu0 %v14502_v3  ;;  %10072 = vmatprep.subr.bf16.mxu1 %v14504_v7  ;;  %v14551_v3 = vcombine.low %v623_v54, %v627_v56  ;;  %v639_v7 = vld [vmem:[#allocation2 + $0xd48] sm:$0xff]  ;;  %v14560_v8 = vcombine.high %v631_v63, %v635_v1 }
 0x16e   :  { %v679_v53 = vld [vmem:[#allocation2 + $0xe88] sm:$0xff] }
 0x170   :  { %9581 = vmatpush1.bf16.msra.mxu0 %v14501_v9  ;;  %10073 = vmatpush1.bf16.msra.mxu1 %v14503_v10  ;;  %v643_v9 = vld [vmem:[#allocation2 + $0xd68] sm:$0xff]  ;;  %v14557_v10 = vcombine.low %v630_v61, %v634_v62  ;;  %v690_v61 = vld [vmem:[#allocation2 + $0xee0] sm:$0xff] }
 0x171   :  { %9582 = vmatprep.subr.bf16.mxu0 %v14510_v11  ;;  %10074 = vmatprep.subr.bf16.mxu1 %v14512_v16  ;;  %v14559_v11 = vcombine.low %v631_v63, %v635_v1  ;;  %v647_v16 = vld [vmem:[#allocation2 + $0xd88] sm:$0xff]  ;;  %v14568_v17 = vcombine.high %v639_v7, %v643_v9 }
 0x172   :  { %v687_v62 = vld [vmem:[#allocation2 + $0xec8] sm:$0xff] }
 0x174   :  { %9583 = vmatpush1.bf16.msra.mxu0 %v14509_v18  ;;  %10075 = vmatpush1.bf16.msra.mxu1 %v14511_v20  ;;  %v651_v18 = vld [vmem:[#allocation2 + $0xda8] sm:$0xff]  ;;  %v14567_v20 = vcombine.low %v639_v7, %v643_v9 }
 0x175   :  { %9584 = vmatprep.subr.bf16.mxu0 %v14518_v21  ;;  %10076 = vmatprep.subr.bf16.mxu1 %v14520_v27  ;;  %v14574_v21 = vcombine.high %v646_v14, %v650_v15  ;;  %v14576_v27 = vcombine.high %v647_v16, %v651_v18  ;;  %v14575_v30 = vcombine.low %v647_v16, %v651_v18 }
 0x178   :  { %9585 = vmatpush1.bf16.msra.mxu0 %v14517_v29  ;;  %10077 = vmatpush1.bf16.msra.mxu1 %v14519_v31  ;;  %v14573_v29 = vcombine.low %v646_v14, %v650_v15  ;;  %v14582_v31 = vcombine.high %v654_v22, %v658_v24  ;;  %v706_v14 = vld [vmem:[#allocation2 + $0xf60] sm:$0xff]  ;;  %v703_v15 = vld [vmem:[#allocation2 + $0xf48] sm:$0xff] }
 0x179   :  { %9595 = vmatprep.subr.bf16.mxu0 %v14526_v32  ;;  %10087 = vmatprep.subr.bf16.mxu1 %v14528_v37  ;;  %v662_v32 = vld [vmem:[#allocation2 + $0xe00] sm:$0xff]  ;;  %v667_v37 = vld [vmem:[#allocation2 + $0xe28] sm:$0xff] }
 0x17a   :  { %v14592_v45 = vcombine.high %v663_v35, %v667_v37  ;;  %v14589_v47 = vcombine.low %v662_v32, %v666_v33  ;;  %v714_v22 = vld [vmem:[#allocation2 + $0xfa0] sm:$0xff]  ;;  %v711_v24 = vld [vmem:[#allocation2 + $0xf88] sm:$0xff] }
 0x17b   :  { %9587 = vmatmul.mubr.bf16.vlgmr.msra.gmra.mrb[0].mxu0 %v17316_v39  ;;  %10079 = vmatmul.mubr.bf16.vlgmr.msra.gmra.mrb[0].mxu1 %v17316_v39 }
 0x17c   :  { %9596 = vmatpush1.bf16.msra.mxu0 %v14525_v40  ;;  %10088 = vmatpush1.bf16.msra.mxu1 %v14527_v41  ;;  %v14583_v40 = vcombine.low %v655_v26, %v659_v28  ;;  %v14590_v41 = vcombine.high %v662_v32, %v666_v33  ;;  %v722_v32 = vld [vmem:[#allocation2 + $0xfe0] sm:$0xff]  ;;  %v719_v33 = vld [vmem:[#allocation2 + $0xfc8] sm:$0xff] }
 0x17d   :  { %9597 = vmatprep.subr.bf16.mxu0 %v14534_v42  ;;  %10089 = vmatprep.subr.bf16.mxu1 %v14536_v44  ;;  %v670_v42 = vld [vmem:[#allocation2 + $0xe40] sm:$0xff]  ;;  %v671_v44 = vld [vmem:[#allocation2 + $0xe48] sm:$0xff] }
 0x17e   :  { %9627 = vmatprep.mubr.bf16.mxu0 %v17318_v48  ;;  %10119 = vmatprep.mubr.bf16.mxu1 %v17318_v48  ;;  %v14600_v54 = vcombine.high %v671_v44, %v675_v46  ;;  %v14597_v56 = vcombine.low %v670_v42, %v674_v43 }
 0x180   :  { %9598 = vmatpush1.bf16.msra.mxu0 %v14533_v49  ;;  %10090 = vmatpush1.bf16.msra.mxu1 %v14535_v50  ;;  %v14591_v49 = vcombine.low %v663_v35, %v667_v37  ;;  %v14598_v50 = vcombine.high %v670_v42, %v674_v43  ;;  %v730_v42 = vld [vmem:[#allocation2 + $0x1020] sm:$0xff]  ;;  %v727_v43 = vld [vmem:[#allocation2 + $0x1008] sm:$0xff] }
 0x181   :  { %9599 = vmatprep.subr.bf16.mxu0 %v14542_v51  ;;  %10091 = vmatprep.subr.bf16.mxu1 %v14544_v55  ;;  %v678_v51 = vld [vmem:[#allocation2 + $0xe80] sm:$0xff]  ;;  %v683_v55 = vld [vmem:[#allocation2 + $0xea8] sm:$0xff] }
 0x182   :  { %v14608_v63 = vcombine.high %v679_v53, %v683_v55  ;;  %v14605_v1 = vcombine.low %v678_v51, %v682_v52 }
 0x184   :  { %9600 = vmatpush1.bf16.msra.mxu0 %v14541_v58  ;;  %10092 = vmatpush1.bf16.msra.mxu1 %v14543_v59  ;;  %v14599_v58 = vcombine.low %v671_v44, %v675_v46  ;;  %v14606_v59 = vcombine.high %v678_v51, %v682_v52  ;;  %v734_v52 = vld [vmem:[#allocation2 + $0x1040] sm:$0xff] }
 0x185   :  { %9601 = vmatprep.subr.bf16.mxu0 %v14550_v60  ;;  %10093 = vmatprep.subr.bf16.mxu1 %v14552_v0  ;;  %v686_v60 = vld [vmem:[#allocation2 + $0xec0] sm:$0xff]  ;;  %v691_v0 = vld [vmem:[#allocation2 + $0xee8] sm:$0xff] }
 0x186   :  { %v14616_v7 = vcombine.high %v687_v62, %v691_v0  ;;  %v14613_v9 = vcombine.low %v686_v60, %v690_v61 }
 0x188   :  { %9602 = vmatpush1.bf16.msra.mxu0 %v14549_v2  ;;  %10094 = vmatpush1.bf16.msra.mxu1 %v14551_v3  ;;  %v14607_v2 = vcombine.low %v679_v53, %v683_v55  ;;  %v14614_v3 = vcombine.high %v686_v60, %v690_v61  ;;  %v738_v53 = vld [vmem:[#allocation2 + $0x1060] sm:$0xff]  ;;  %v735_v55 = vld [vmem:[#allocation2 + $0x1048] sm:$0xff] }
 0x189   :  { %9603 = vmatprep.subr.bf16.mxu0 %v14558_v4  ;;  %10095 = vmatprep.subr.bf16.mxu1 %v14560_v8  ;;  %v694_v4 = vld [vmem:[#allocation2 + $0xf00] sm:$0xff]  ;;  %v699_v8 = vld [vmem:[#allocation2 + $0xf28] sm:$0xff]  ;;  %v14662_v61 = vcombine.high %v734_v52, %v738_v53 }
 0x18a   :  { %v14624_v16 = vcombine.high %v695_v6, %v699_v8  ;;  %v14621_v18 = vcombine.low %v694_v4, %v698_v5 }
 0x18c   :  { %9604 = vmatpush1.bf16.msra.mxu0 %v14557_v10  ;;  %10096 = vmatpush1.bf16.msra.mxu1 %v14559_v11  ;;  %v14615_v10 = vcombine.low %v687_v62, %v691_v0  ;;  %v14622_v11 = vcombine.high %v694_v4, %v698_v5  ;;  %v746_v0 = vld [vmem:[#allocation2 + $0x10a0] sm:$0xff]  ;;  %v14661_v4 = vcombine.low %v734_v52, %v738_v53 }
 0x18d   :  { %9605 = vmatprep.subr.bf16.mxu0 %v14566_v13  ;;  %10097 = vmatprep.subr.bf16.mxu1 %v14568_v17  ;;  %v702_v13 = vld [vmem:[#allocation2 + $0xf40] sm:$0xff]  ;;  %v707_v17 = vld [vmem:[#allocation2 + $0xf68] sm:$0xff] }
 0x18e   :  { %v14632_v26 = vcombine.high %v703_v15, %v707_v17  ;;  %v14629_v28 = vcombine.low %v702_v13, %v706_v14 }
 0x190   :  { %9606 = vmatpush1.bf16.msra.mxu0 %v14565_v19  ;;  %10098 = vmatpush1.bf16.msra.mxu1 %v14567_v20  ;;  %v14623_v19 = vcombine.low %v695_v6, %v699_v8  ;;  %v14630_v20 = vcombine.high %v702_v13, %v706_v14  ;;  %v750_v8 = vld [vmem:[#allocation2 + $0x10c0] sm:$0xff] }
 0x191   :  { %9607 = vmatprep.subr.bf16.mxu0 %v14574_v21  ;;  %10099 = vmatprep.subr.bf16.mxu1 %v14576_v27  ;;  %v710_v21 = vld [vmem:[#allocation2 + $0xf80] sm:$0xff]  ;;  %v715_v27 = vld [vmem:[#allocation2 + $0xfa8] sm:$0xff] }
 0x192   :  { %v14640_v35 = vcombine.high %v711_v24, %v715_v27  ;;  %v14637_v37 = vcombine.low %v710_v21, %v714_v22 }
 0x194   :  { %9608 = vmatpush1.bf16.msra.mxu0 %v14573_v29  ;;  %10100 = vmatpush1.bf16.msra.mxu1 %v14575_v30  ;;  %v14631_v29 = vcombine.low %v703_v15, %v707_v17  ;;  %v14638_v30 = vcombine.high %v710_v21, %v714_v22  ;;  %v758_v17 = vld [vmem:[#allocation2 + $0x1100] sm:$0xff] }
 0x195   :  { %9609 = vmatprep.subr.bf16.mxu0 %v14582_v31  ;;  %10101 = vmatprep.subr.bf16.mxu1 %v14584_v36  ;;  %v718_v31 = vld [vmem:[#allocation2 + $0xfc0] sm:$0xff]  ;;  %v723_v36 = vld [vmem:[#allocation2 + $0xfe8] sm:$0xff] }
 0x196   :  { %v14648_v44 = vcombine.high %v719_v33, %v723_v36  ;;  %v14645_v46 = vcombine.low %v718_v31, %v722_v32 }
 0x198   :  { %9610 = vmatpush1.bf16.msra.mxu0 %v14581_v38  ;;  %10102 = vmatpush1.bf16.msra.mxu1 %v14583_v40  ;;  %v14639_v38 = vcombine.low %v711_v24, %v715_v27  ;;  %v14646_v40 = vcombine.high %v718_v31, %v722_v32  ;;  %v766_v27 = vld [vmem:[#allocation2 + $0x1140] sm:$0xff] }
 0x199   :  { %9611 = vmatprep.subr.bf16.mxu0 %v14590_v41  ;;  %10103 = vmatprep.subr.bf16.mxu1 %v14592_v45  ;;  %v726_v41 = vld [vmem:[#allocation2 + $0x1000] sm:$0xff]  ;;  %v731_v45 = vld [vmem:[#allocation2 + $0x1028] sm:$0xff] }
 0x19a   :  { %v14656_v51 = vcombine.high %v727_v43, %v731_v45  ;;  %v14655_v60 = vcombine.low %v727_v43, %v731_v45  ;;  %v782_v45 = vld [vmem:[#allocation2 + $0x11c0] sm:$0xff] }
 0x19c   :  { %9612 = vmatpush1.bf16.msra.mxu0 %v14589_v47  ;;  %10104 = vmatpush1.bf16.msra.mxu1 %v14591_v49  ;;  %v172_v47 = vld [vmem:[%s17564_s0 + $0x30] sm:$0xff]  ;;  %v14647_v49 = vcombine.low %v719_v33, %v723_v36  ;;  %v774_v36 = vld [vmem:[#allocation2 + $0x1180] sm:$0xff] }
 0x19d   :  { %9613 = vmatprep.subr.bf16.mxu0 %v14598_v50  ;;  %10105 = vmatprep.subr.bf16.mxu1 %v14600_v54  ;;  %v14654_v50 = vcombine.high %v726_v41, %v730_v42  ;;  %v17327_v54 = vpack.c.bf16 %v172_v47, %v172_v47  ;;  %v783_v47 = vld [vmem:[#allocation2 + $0x11c8] sm:$0xff] }
 0x1a0   :  { %9614 = vmatpush1.bf16.msra.mxu0 %v14597_v56  ;;  %10106 = vmatpush1.bf16.msra.mxu1 %v14599_v58  ;;  %v739_v56 = vld [vmem:[#allocation2 + $0x1068] sm:$0xff] }
 0x1a1   :  { %9615 = vmatprep.subr.bf16.mxu0 %v14606_v59  ;;  %10107 = vmatprep.subr.bf16.mxu1 %v14608_v63  ;;  %v175_v58 = vld [vmem:[%s17564_s0 + $0x48] sm:$0xff]  ;;  %v14653_v59 = vcombine.low %v726_v41, %v730_v42  ;;  %v14664_v62 = vcombine.high %v735_v55, %v739_v56  ;;  %v742_v63 = vld [vmem:[#allocation2 + $0x1080] sm:$0xff]  ;;  %v14663_v5 = vcombine.low %v735_v55, %v739_v56 }
 0x1a2   :  { %v14670_v6 = vcombine.high %v742_v63, %v746_v0  ;;  %v14669_v13 = vcombine.low %v742_v63, %v746_v0  ;;  %v790_v55 = vld [vmem:[#allocation2 + $0x1200] sm:$0xff] }
 0x1a3   :  { %v794_v56 = vld [vmem:[#allocation2 + $0x1220] sm:$0xff] }
 0x1a4   :  { %9616 = vmatpush1.bf16.msra.mxu0 %v14605_v1  ;;  %10108 = vmatpush1.bf16.msra.mxu1 %v14607_v2  ;;  %v17332_v1 = vpack.c.bf16 %v175_v58, %v175_v58  ;;  %v743_v2 = vld [vmem:[#allocation2 + $0x1088] sm:$0xff]  ;;  %v798_v0 = vld [vmem:[#allocation2 + $0x1240] sm:$0xff] }
 0x1a5   :  { %9617 = vmatprep.subr.bf16.mxu0 %v14614_v3  ;;  %10109 = vmatprep.subr.bf16.mxu1 %v14616_v7  ;;  %v747_v3 = vld [vmem:[#allocation2 + $0x10a8] sm:$0xff] }
 0x1a6   :  { %v14672_v7 = vcombine.high %v743_v2, %v747_v3  ;;  %v14671_v14 = vcombine.low %v743_v2, %v747_v3  ;;  %v791_v58 = vld [vmem:[#allocation2 + $0x1208] sm:$0xff]  ;;  %v802_v2 = vld [vmem:[#allocation2 + $0x1260] sm:$0xff] }
 0x1a7   :  { %v799_v3 = vld [vmem:[#allocation2 + $0x1248] sm:$0xff] }
 0x1a8   :  { %9618 = vmatpush1.bf16.msra.mxu0 %v14613_v9  ;;  %10110 = vmatpush1.bf16.msra.mxu1 %v14615_v10  ;;  %v754_v9 = vld [vmem:[#allocation2 + $0x10e0] sm:$0xff]  ;;  %v751_v10 = vld [vmem:[#allocation2 + $0x10c8] sm:$0xff] }
 0x1a9   :  { %9619 = vmatprep.subr.bf16.mxu0 %v14622_v11  ;;  %10111 = vmatprep.subr.bf16.mxu1 %v14624_v16  ;;  %v755_v11 = vld [vmem:[#allocation2 + $0x10e8] sm:$0xff]  ;;  %v14678_v15 = vcombine.high %v750_v8, %v754_v9  ;;  %v14677_v21 = vcombine.low %v750_v8, %v754_v9  ;;  %v806_v9 = vld [vmem:[#allocation2 + $0x1280] sm:$0xff] }
 0x1aa   :  { %v14680_v16 = vcombine.high %v751_v10, %v755_v11  ;;  %v14679_v22 = vcombine.low %v751_v10, %v755_v11  ;;  %v810_v10 = vld [vmem:[#allocation2 + $0x12a0] sm:$0xff]  ;;  %v807_v11 = vld [vmem:[#allocation2 + $0x1288] sm:$0xff] }
 0x1ac   :  { %9620 = vmatpush1.bf16.msra.mxu0 %v14621_v18  ;;  %10112 = vmatpush1.bf16.msra.mxu1 %v14623_v19  ;;  %v762_v18 = vld [vmem:[#allocation2 + $0x1120] sm:$0xff]  ;;  %v759_v19 = vld [vmem:[#allocation2 + $0x1108] sm:$0xff] }
 0x1ad   :  { %9621 = vmatprep.subr.bf16.mxu0 %v14630_v20  ;;  %10113 = vmatprep.subr.bf16.mxu1 %v14632_v26  ;;  %v763_v20 = vld [vmem:[#allocation2 + $0x1128] sm:$0xff]  ;;  %v14686_v24 = vcombine.high %v758_v17, %v762_v18  ;;  %v14685_v31 = vcombine.low %v758_v17, %v762_v18  ;;  %v814_v18 = vld [vmem:[#allocation2 + $0x12c0] sm:$0xff] }
 0x1ae   :  { %v14688_v26 = vcombine.high %v759_v19, %v763_v20  ;;  %v14687_v32 = vcombine.low %v759_v19, %v763_v20  ;;  %v818_v19 = vld [vmem:[#allocation2 + $0x12e0] sm:$0xff]  ;;  %v815_v20 = vld [vmem:[#allocation2 + $0x12c8] sm:$0xff] }
 0x1b0   :  { %9622 = vmatpush1.bf16.msra.mxu0 %v14629_v28  ;;  %10114 = vmatpush1.bf16.msra.mxu1 %v14631_v29  ;;  %v770_v28 = vld [vmem:[#allocation2 + $0x1160] sm:$0xff]  ;;  %v767_v29 = vld [vmem:[#allocation2 + $0x1148] sm:$0xff] }
 0x1b1   :  { %9623 = vmatprep.subr.bf16.mxu0 %v14638_v30  ;;  %10115 = vmatprep.subr.bf16.mxu1 %v14640_v35  ;;  %v771_v30 = vld [vmem:[#allocation2 + $0x1168] sm:$0xff]  ;;  %v14694_v33 = vcombine.high %v766_v27, %v770_v28  ;;  %v14693_v41 = vcombine.low %v766_v27, %v770_v28  ;;  %v822_v28 = vld [vmem:[#allocation2 + $0x1300] sm:$0xff] }
 0x1b2   :  { %v14696_v35 = vcombine.high %v767_v29, %v771_v30  ;;  %v14695_v42 = vcombine.low %v767_v29, %v771_v30  ;;  %v826_v29 = vld [vmem:[#allocation2 + $0x1320] sm:$0xff]  ;;  %v823_v30 = vld [vmem:[#allocation2 + $0x1308] sm:$0xff] }
 0x1b4   :  { %9624 = vmatpush1.bf16.msra.mxu0 %v14637_v37  ;;  %10116 = vmatpush1.bf16.msra.mxu1 %v14639_v38  ;;  %v778_v37 = vld [vmem:[#allocation2 + $0x11a0] sm:$0xff]  ;;  %v775_v38 = vld [vmem:[#allocation2 + $0x1188] sm:$0xff] }
 0x1b5   :  { %9625 = vmatprep.subr.bf16.mxu0 %v14646_v40  ;;  %10117 = vmatprep.subr.bf16.mxu1 %v14648_v44  ;;  %v779_v40 = vld [vmem:[#allocation2 + $0x11a8] sm:$0xff]  ;;  %v14702_v43 = vcombine.high %v774_v36, %v778_v37 }
 0x1b6   :  { %v14704_v44 = vcombine.high %v775_v38, %v779_v40 }
 0x1b8   :  { %9626 = vmatpush1.bf16.msra.mxu0 %v14645_v46  ;;  %10118 = vmatpush1.bf16.msra.mxu1 %v14647_v49  ;;  %v786_v46 = vld [vmem:[#allocation2 + $0x11e0] sm:$0xff]  ;;  %v787_v49 = vld [vmem:[#allocation2 + $0x11e8] sm:$0xff] }
 0x1b9   :  { %9636 = vmatprep.subr.bf16.mxu0 %v14654_v50  ;;  %10128 = vmatprep.subr.bf16.mxu1 %v14656_v51  ;;  %v14701_v50 = vcombine.low %v774_v36, %v778_v37  ;;  %v14703_v51 = vcombine.low %v775_v38, %v779_v40  ;;  %v14710_v52 = vcombine.high %v782_v45, %v786_v46  ;;  %v830_v37 = vld [vmem:[#allocation2 + $0x1340] sm:$0xff]  ;;  %v831_v40 = vld [vmem:[#allocation2 + $0x1348] sm:$0xff] }
 0x1ba   :  { %v14712_v53 = vcombine.high %v783_v47, %v787_v49  ;;  %v834_v38 = vld [vmem:[#allocation2 + $0x1360] sm:$0xff] }
 0x1bb   :  { %9628 = vmatmul.mubr.bf16.vlgmr.msra.gmra.mrb[0].mxu0 %v17327_v54  ;;  %10120 = vmatmul.mubr.bf16.vlgmr.msra.gmra.mrb[0].mxu1 %v17327_v54 }
 0x1bc   :  { %9637 = vmatpush1.bf16.msra.mxu0 %v14653_v59  ;;  %10129 = vmatpush1.bf16.msra.mxu1 %v14655_v60  ;;  %v795_v59 = vld [vmem:[#allocation2 + $0x1228] sm:$0xff]  ;;  %v14709_v60 = vcombine.low %v782_v45, %v786_v46  ;;  %v838_v46 = vld [vmem:[#allocation2 + $0x1380] sm:$0xff] }
 0x1bd   :  { %9638 = vmatprep.subr.bf16.mxu0 %v14662_v61  ;;  %10130 = vmatprep.subr.bf16.mxu1 %v14664_v62  ;;  %v14711_v61 = vcombine.low %v783_v47, %v787_v49  ;;  %v14718_v62 = vcombine.high %v790_v55, %v794_v56  ;;  %v14720_v63 = vcombine.high %v791_v58, %v795_v59  ;;  %v842_v47 = vld [vmem:[#allocation2 + $0x13a0] sm:$0xff]  ;;  %v839_v49 = vld [vmem:[#allocation2 + $0x1388] sm:$0xff] }
 0x1be   :  { %9668 = vmatprep.mubr.bf16.mxu0 %v17332_v1  ;;  %10160 = vmatprep.mubr.bf16.mxu1 %v17332_v1 }
 0x1c0   :  { %9639 = vmatpush1.bf16.msra.mxu0 %v14661_v4  ;;  %10131 = vmatpush1.bf16.msra.mxu1 %v14663_v5  ;;  %v803_v4 = vld [vmem:[#allocation2 + $0x1268] sm:$0xff]  ;;  %v14717_v5 = vcombine.low %v790_v55, %v794_v56  ;;  %v846_v56 = vld [vmem:[#allocation2 + $0x13c0] sm:$0xff] }
 0x1c1   :  { %9640 = vmatprep.subr.bf16.mxu0 %v14670_v6  ;;  %10132 = vmatprep.subr.bf16.mxu1 %v14672_v7  ;;  %v14719_v6 = vcombine.low %v791_v58, %v795_v59  ;;  %v14726_v7 = vcombine.high %v798_v0, %v802_v2  ;;  %v14728_v8 = vcombine.high %v799_v3, %v803_v4  ;;  %v850_v58 = vld [vmem:[#allocation2 + $0x13e0] sm:$0xff]  ;;  %v847_v59 = vld [vmem:[#allocation2 + $0x13c8] sm:$0xff] }
 0x1c4   :  { %9641 = vmatpush1.bf16.msra.mxu0 %v14669_v13  ;;  %10133 = vmatpush1.bf16.msra.mxu1 %v14671_v14  ;;  %v811_v13 = vld [vmem:[#allocation2 + $0x12a8] sm:$0xff]  ;;  %v14725_v14 = vcombine.low %v798_v0, %v802_v2  ;;  %v854_v2 = vld [vmem:[#allocation2 + $0x1400] sm:$0xff] }
 0x1c5   :  { %9642 = vmatprep.subr.bf16.mxu0 %v14678_v15  ;;  %10134 = vmatprep.subr.bf16.mxu1 %v14680_v16  ;;  %v14727_v15 = vcombine.low %v799_v3, %v803_v4  ;;  %v14734_v16 = vcombine.high %v806_v9, %v810_v10  ;;  %v14736_v17 = vcombine.high %v807_v11, %v811_v13  ;;  %v858_v3 = vld [vmem:[#allocation2 + $0x1420] sm:$0xff]  ;;  %v855_v4 = vld [vmem:[#allocation2 + $0x1408] sm:$0xff] }
 0x1c8   :  { %9643 = vmatpush1.bf16.msra.mxu0 %v14677_v21  ;;  %10135 = vmatpush1.bf16.msra.mxu1 %v14679_v22  ;;  %v819_v21 = vld [vmem:[#allocation2 + $0x12e8] sm:$0xff]  ;;  %v14733_v22 = vcombine.low %v806_v9, %v810_v10  ;;  %v14782_v9 = vcombine.high %v854_v2, %v858_v3 }
 0x1c9   :  { %9644 = vmatprep.subr.bf16.mxu0 %v14686_v24  ;;  %10136 = vmatprep.subr.bf16.mxu1 %v14688_v26  ;;  %v14735_v24 = vcombine.low %v807_v11, %v811_v13  ;;  %v14742_v26 = vcombine.high %v814_v18, %v818_v19  ;;  %v14744_v27 = vcombine.high %v815_v20, %v819_v21  ;;  %v862_v11 = vld [vmem:[#allocation2 + $0x1440] sm:$0xff] }
 0x1ca   :  { %v866_v13 = vld [vmem:[#allocation2 + $0x1460] sm:$0xff] }
 0x1cc   :  { %9645 = vmatpush1.bf16.msra.mxu0 %v14685_v31  ;;  %10137 = vmatpush1.bf16.msra.mxu1 %v14687_v32  ;;  %v827_v31 = vld [vmem:[#allocation2 + $0x1328] sm:$0xff]  ;;  %v14741_v32 = vcombine.low %v814_v18, %v818_v19  ;;  %v14781_v18 = vcombine.low %v854_v2, %v858_v3 }
 0x1cd   :  { %9646 = vmatprep.subr.bf16.mxu0 %v14694_v33  ;;  %10138 = vmatprep.subr.bf16.mxu1 %v14696_v35  ;;  %v14743_v33 = vcombine.low %v815_v20, %v819_v21  ;;  %v14750_v35 = vcombine.high %v822_v28, %v826_v29  ;;  %v14752_v36 = vcombine.high %v823_v30, %v827_v31  ;;  %v907_v2 = vld [vmem:[#allocation2 + $0x15a8] sm:$0xff] }
 0x1ce   :  { %v14790_v20 = vcombine.high %v862_v11, %v866_v13 }
 0x1d0   :  { %9647 = vmatpush1.bf16.msra.mxu0 %v14693_v41  ;;  %10139 = vmatpush1.bf16.msra.mxu1 %v14695_v42  ;;  %v835_v41 = vld [vmem:[#allocation2 + $0x1368] sm:$0xff]  ;;  %v14749_v42 = vcombine.low %v822_v28, %v826_v29  ;;  %v14789_v29 = vcombine.low %v862_v11, %v866_v13 }
 0x1d1   :  { %9648 = vmatprep.subr.bf16.mxu0 %v14702_v43  ;;  %10140 = vmatprep.subr.bf16.mxu1 %v14704_v44  ;;  %v14751_v43 = vcombine.low %v823_v30, %v827_v31  ;;  %v14758_v44 = vcombine.high %v830_v37, %v834_v38  ;;  %v14760_v45 = vcombine.high %v831_v40, %v835_v41  ;;  %v875_v28 = vld [vmem:[#allocation2 + $0x14a8] sm:$0xff] }
 0x1d4   :  { %9649 = vmatpush1.bf16.msra.mxu0 %v14701_v50  ;;  %10141 = vmatpush1.bf16.msra.mxu1 %v14703_v51  ;;  %v843_v50 = vld [vmem:[#allocation2 + $0x13a8] sm:$0xff]  ;;  %v14757_v51 = vcombine.low %v830_v37, %v834_v38 }
 0x1d5   :  { %9650 = vmatprep.subr.bf16.mxu0 %v14710_v52  ;;  %10142 = vmatprep.subr.bf16.mxu1 %v14712_v53  ;;  %v14759_v52 = vcombine.low %v831_v40, %v835_v41  ;;  %v14766_v53 = vcombine.high %v838_v46, %v842_v47  ;;  %v14768_v55 = vcombine.high %v839_v49, %v843_v50  ;;  %v883_v37 = vld [vmem:[#allocation2 + $0x14e8] sm:$0xff] }
 0x1d8   :  { %9651 = vmatpush1.bf16.msra.mxu0 %v14709_v60  ;;  %10143 = vmatpush1.bf16.msra.mxu1 %v14711_v61  ;;  %v851_v60 = vld [vmem:[#allocation2 + $0x13e8] sm:$0xff]  ;;  %v14765_v61 = vcombine.low %v838_v46, %v842_v47 }
 0x1d9   :  { %9652 = vmatprep.subr.bf16.mxu0 %v14718_v62  ;;  %10144 = vmatprep.subr.bf16.mxu1 %v14720_v63  ;;  %v14767_v62 = vcombine.low %v839_v49, %v843_v50  ;;  %v14774_v63 = vcombine.high %v846_v56, %v850_v58  ;;  %v14776_v0 = vcombine.high %v847_v59, %v851_v60  ;;  %v891_v46 = vld [vmem:[#allocation2 + $0x1528] sm:$0xff] }
 0x1dc   :  { %9653 = vmatpush1.bf16.msra.mxu0 %v14717_v5  ;;  %10145 = vmatpush1.bf16.msra.mxu1 %v14719_v6  ;;  %v859_v5 = vld [vmem:[#allocation2 + $0x1428] sm:$0xff]  ;;  %v14773_v6 = vcombine.low %v846_v56, %v850_v58 }
 0x1dd   :  { %9654 = vmatprep.subr.bf16.mxu0 %v14726_v7  ;;  %10146 = vmatprep.subr.bf16.mxu1 %v14728_v8  ;;  %v174_v7 = vld [vmem:[%s17564_s0 + $0x40] sm:$0xff]  ;;  %v14775_v8 = vcombine.low %v847_v59, %v851_v60  ;;  %v14784_v10 = vcombine.high %v855_v4, %v859_v5  ;;  %v14783_v19 = vcombine.low %v855_v4, %v859_v5  ;;  %v899_v56 = vld [vmem:[#allocation2 + $0x1568] sm:$0xff] }
 0x1e0   :  { %9655 = vmatpush1.bf16.msra.mxu0 %v14725_v14  ;;  %10147 = vmatpush1.bf16.msra.mxu1 %v14727_v15  ;;  %v17341_v14 = vpack.c.bf16 %v174_v7, %v174_v7  ;;  %v863_v15 = vld [vmem:[#allocation2 + $0x1448] sm:$0xff]  ;;  %v910_v7 = vld [vmem:[#allocation2 + $0x15c0] sm:$0xff] }
 0x1e1   :  { %9656 = vmatprep.subr.bf16.mxu0 %v14734_v16  ;;  %10148 = vmatprep.subr.bf16.mxu1 %v14736_v17  ;;  %v867_v16 = vld [vmem:[#allocation2 + $0x1468] sm:$0xff]  ;;  %v177_v17 = vld [vmem:[%s17564_s0 + $0x58] sm:$0xff] }
 0x1e2   :  { %v14792_v21 = vcombine.high %v863_v15, %v867_v16  ;;  %v14791_v30 = vcombine.low %v863_v15, %v867_v16 }
 0x1e4   :  { %9657 = vmatpush1.bf16.msra.mxu0 %v14733_v22  ;;  %10149 = vmatpush1.bf16.msra.mxu1 %v14735_v24  ;;  %v870_v22 = vld [vmem:[#allocation2 + $0x1480] sm:$0xff] }
 0x1e5   :  { %9658 = vmatprep.subr.bf16.mxu0 %v14742_v26  ;;  %10150 = vmatprep.subr.bf16.mxu1 %v14744_v27  ;;  %v874_v24 = vld [vmem:[#allocation2 + $0x14a0] sm:$0xff]  ;;  %v17346_v26 = vpack.c.bf16 %v177_v17, %v177_v17  ;;  %v871_v27 = vld [vmem:[#allocation2 + $0x1488] sm:$0xff] }
 0x1e6   :  { %v14798_v31 = vcombine.high %v870_v22, %v874_v24  ;;  %v14797_v38 = vcombine.low %v870_v22, %v874_v24  ;;  %v14799_v40 = vcombine.low %v871_v27, %v875_v28  ;;  %v918_v17 = vld [vmem:[#allocation2 + $0x1600] sm:$0xff] }
 0x1e8   :  { %9659 = vmatpush1.bf16.msra.mxu0 %v14741_v32  ;;  %10151 = vmatpush1.bf16.msra.mxu1 %v14743_v33  ;;  %v14800_v32 = vcombine.high %v871_v27, %v875_v28  ;;  %v878_v33 = vld [vmem:[#allocation2 + $0x14c0] sm:$0xff] }
 0x1e9   :  { %9660 = vmatprep.subr.bf16.mxu0 %v14750_v35  ;;  %10152 = vmatprep.subr.bf16.mxu1 %v14752_v36  ;;  %v882_v35 = vld [vmem:[#allocation2 + $0x14e0] sm:$0xff]  ;;  %v879_v36 = vld [vmem:[#allocation2 + $0x14c8] sm:$0xff] }
 0x1ea   :  { %v14806_v41 = vcombine.high %v878_v33, %v882_v35  ;;  %v14805_v47 = vcombine.low %v878_v33, %v882_v35  ;;  %v14807_v49 = vcombine.low %v879_v36, %v883_v37  ;;  %v926_v28 = vld [vmem:[#allocation2 + $0x1640] sm:$0xff] }
 0x1ec   :  { %9661 = vmatpush1.bf16.msra.mxu0 %v14749_v42  ;;  %10153 = vmatpush1.bf16.msra.mxu1 %v14751_v43  ;;  %v14808_v42 = vcombine.high %v879_v36, %v883_v37  ;;  %v886_v43 = vld [vmem:[#allocation2 + $0x1500] sm:$0xff] }
 0x1ed   :  { %9662 = vmatprep.subr.bf16.mxu0 %v14758_v44  ;;  %10154 = vmatprep.subr.bf16.mxu1 %v14760_v45  ;;  %v890_v44 = vld [vmem:[#allocation2 + $0x1520] sm:$0xff]  ;;  %v887_v45 = vld [vmem:[#allocation2 + $0x1508] sm:$0xff] }
 0x1ee   :  { %v14814_v50 = vcombine.high %v886_v43, %v890_v44  ;;  %v14813_v58 = vcombine.low %v886_v43, %v890_v44  ;;  %v14815_v59 = vcombine.low %v887_v45, %v891_v46  ;;  %v934_v37 = vld [vmem:[#allocation2 + $0x1680] sm:$0xff] }
 0x1f0   :  { %9663 = vmatpush1.bf16.msra.mxu0 %v14757_v51  ;;  %10155 = vmatpush1.bf16.msra.mxu1 %v14759_v52  ;;  %v14816_v51 = vcombine.high %v887_v45, %v891_v46  ;;  %v894_v52 = vld [vmem:[#allocation2 + $0x1540] sm:$0xff] }
 0x1f1   :  { %9664 = vmatprep.subr.bf16.mxu0 %v14766_v53  ;;  %10156 = vmatprep.subr.bf16.mxu1 %v14768_v55  ;;  %v898_v53 = vld [vmem:[#allocation2 + $0x1560] sm:$0xff]  ;;  %v895_v55 = vld [vmem:[#allocation2 + $0x1548] sm:$0xff] }
 0x1f2   :  { %v14822_v60 = vcombine.high %v894_v52, %v898_v53  ;;  %v14821_v3 = vcombine.low %v894_v52, %v898_v53  ;;  %v14823_v4 = vcombine.low %v895_v55, %v899_v56  ;;  %v942_v46 = vld [vmem:[#allocation2 + $0x16c0] sm:$0xff] }
 0x1f4   :  { %9665 = vmatpush1.bf16.msra.mxu0 %v14765_v61  ;;  %10157 = vmatpush1.bf16.msra.mxu1 %v14767_v62  ;;  %v14824_v61 = vcombine.high %v895_v55, %v899_v56  ;;  %v902_v62 = vld [vmem:[#allocation2 + $0x1580] sm:$0xff] }
 0x1f5   :  { %9666 = vmatprep.subr.bf16.mxu0 %v14774_v63  ;;  %10158 = vmatprep.subr.bf16.mxu1 %v14776_v0  ;;  %v906_v63 = vld [vmem:[#allocation2 + $0x15a0] sm:$0xff]  ;;  %v903_v0 = vld [vmem:[#allocation2 + $0x1588] sm:$0xff] }
 0x1f6   :  { %v14830_v5 = vcombine.high %v902_v62, %v906_v63  ;;  %v14829_v11 = vcombine.low %v902_v62, %v906_v63  ;;  %v14831_v13 = vcombine.low %v903_v0, %v907_v2  ;;  %v950_v56 = vld [vmem:[#allocation2 + $0x1700] sm:$0xff] }
 0x1f8   :  { %9667 = vmatpush1.bf16.msra.mxu0 %v14773_v6  ;;  %10159 = vmatpush1.bf16.msra.mxu1 %v14775_v8  ;;  %v14832_v6 = vcombine.high %v903_v0, %v907_v2  ;;  %v914_v8 = vld [vmem:[#allocation2 + $0x15e0] sm:$0xff] }
 0x1f9   :  { %9677 = vmatprep.subr.bf16.mxu0 %v14782_v9  ;;  %10169 = vmatprep.subr.bf16.mxu1 %v14784_v10  ;;  %v911_v9 = vld [vmem:[#allocation2 + $0x15c8] sm:$0xff]  ;;  %v14838_v15 = vcombine.high %v910_v7, %v914_v8  ;;  %v958_v2 = vld [vmem:[#allocation2 + $0x1740] sm:$0xff] }
 0x1fa   :  { %v915_v10 = vld [vmem:[#allocation2 + $0x15e8] sm:$0xff] }
 0x1fb   :  { %9669 = vmatmul.mubr.bf16.vlgmr.msra.gmra.mrb[0].mxu0 %v17341_v14  ;;  %10161 = vmatmul.mubr.bf16.vlgmr.msra.gmra.mrb[0].mxu1 %v17341_v14  ;;  %v14840_v16 = vcombine.high %v911_v9, %v915_v10  ;;  %v14839_v22 = vcombine.low %v911_v9, %v915_v10  ;;  %v966_v10 = vld [vmem:[#allocation2 + $0x1780] sm:$0xff] }
 0x1fc   :  { %9678 = vmatpush1.bf16.msra.mxu0 %v14781_v18  ;;  %10170 = vmatpush1.bf16.msra.mxu1 %v14783_v19  ;;  %v922_v18 = vld [vmem:[#allocation2 + $0x1620] sm:$0xff]  ;;  %v919_v19 = vld [vmem:[#allocation2 + $0x1608] sm:$0xff] }
 0x1fd   :  { %9679 = vmatprep.subr.bf16.mxu0 %v14790_v20  ;;  %10171 = vmatprep.subr.bf16.mxu1 %v14792_v21  ;;  %v923_v20 = vld [vmem:[#allocation2 + $0x1628] sm:$0xff]  ;;  %v14837_v21 = vcombine.low %v910_v7, %v914_v8  ;;  %v14846_v24 = vcombine.high %v918_v17, %v922_v18 }
 0x1fe   :  { %9709 = vmatprep.mubr.bf16.mxu0 %v17346_v26  ;;  %10201 = vmatprep.mubr.bf16.mxu1 %v17346_v26  ;;  %v14848_v27 = vcombine.high %v919_v19, %v923_v20  ;;  %v14847_v33 = vcombine.low %v919_v19, %v923_v20  ;;  %v974_v20 = vld [vmem:[#allocation2 + $0x17c0] sm:$0xff] }
 0x200   :  { %9680 = vmatpush1.bf16.msra.mxu0 %v14789_v29  ;;  %10172 = vmatpush1.bf16.msra.mxu1 %v14791_v30  ;;  %v930_v29 = vld [vmem:[#allocation2 + $0x1660] sm:$0xff]  ;;  %v927_v30 = vld [vmem:[#allocation2 + $0x1648] sm:$0xff] }
 0x201   :  { %9681 = vmatprep.subr.bf16.mxu0 %v14798_v31  ;;  %10173 = vmatprep.subr.bf16.mxu1 %v14800_v32  ;;  %v931_v31 = vld [vmem:[#allocation2 + $0x1668] sm:$0xff]  ;;  %v14845_v32 = vcombine.low %v918_v17, %v922_v18  ;;  %v14854_v35 = vcombine.high %v926_v28, %v930_v29 }
 0x202   :  { %v14856_v36 = vcombine.high %v927_v30, %v931_v31  ;;  %v14855_v43 = vcombine.low %v927_v30, %v931_v31  ;;  %v982_v31 = vld [vmem:[#allocation2 + $0x1800] sm:$0xff] }
 0x204   :  { %9682 = vmatpush1.bf16.msra.mxu0 %v14797_v38  ;;  %10174 = vmatpush1.bf16.msra.mxu1 %v14799_v40  ;;  %v938_v38 = vld [vmem:[#allocation2 + $0x16a0] sm:$0xff]  ;;  %v935_v40 = vld [vmem:[#allocation2 + $0x1688] sm:$0xff] }
 0x205   :  { %9683 = vmatprep.subr.bf16.mxu0 %v14806_v41  ;;  %10175 = vmatprep.subr.bf16.mxu1 %v14808_v42  ;;  %v939_v41 = vld [vmem:[#allocation2 + $0x16a8] sm:$0xff]  ;;  %v14853_v42 = vcombine.low %v926_v28, %v930_v29  ;;  %v14862_v44 = vcombine.high %v934_v37, %v938_v38 }
 0x206   :  { %v14864_v45 = vcombine.high %v935_v40, %v939_v41  ;;  %v14863_v52 = vcombine.low %v935_v40, %v939_v41 }
 0x208   :  { %9684 = vmatpush1.bf16.msra.mxu0 %v14805_v47  ;;  %10176 = vmatpush1.bf16.msra.mxu1 %v14807_v49  ;;  %v946_v47 = vld [vmem:[#allocation2 + $0x16e0] sm:$0xff]  ;;  %v943_v49 = vld [vmem:[#allocation2 + $0x16c8] sm:$0xff] }
 0x209   :  { %9685 = vmatprep.subr.bf16.mxu0 %v14814_v50  ;;  %10177 = vmatprep.subr.bf16.mxu1 %v14816_v51  ;;  %v947_v50 = vld [vmem:[#allocation2 + $0x16e8] sm:$0xff]  ;;  %v14861_v51 = vcombine.low %v934_v37, %v938_v38  ;;  %v14870_v53 = vcombine.high %v942_v46, %v946_v47  ;;  %v176_v37 = vld [vmem:[%s17564_s0 + $0x50] sm:$0xff] }
 0x20a   :  { %v14872_v55 = vcombine.high %v943_v49, %v947_v50  ;;  %v14871_v62 = vcombine.low %v943_v49, %v947_v50 }
 0x20c   :  { %9686 = vmatpush1.bf16.msra.mxu0 %v14813_v58  ;;  %10178 = vmatpush1.bf16.msra.mxu1 %v14815_v59  ;;  %v954_v58 = vld [vmem:[#allocation2 + $0x1720] sm:$0xff]  ;;  %v951_v59 = vld [vmem:[#allocation2 + $0x1708] sm:$0xff] }
 0x20d   :  { %9687 = vmatprep.subr.bf16.mxu0 %v14822_v60  ;;  %10179 = vmatprep.subr.bf16.mxu1 %v14824_v61  ;;  %v955_v60 = vld [vmem:[#allocation2 + $0x1728] sm:$0xff]  ;;  %v14869_v61 = vcombine.low %v942_v46, %v946_v47  ;;  %v14878_v63 = vcombine.high %v950_v56, %v954_v58 }
 0x20e   :  { %v14880_v0 = vcombine.high %v951_v59, %v955_v60  ;;  %v14879_v7 = vcombine.low %v951_v59, %v955_v60  ;;  %v995_v46 = vld [vmem:[#allocation2 + $0x1868] sm:$0xff] }
 0x20f   :  { %v179_v47 = vld [vmem:[%s17564_s0 + $0x68] sm:$0xff] }
 0x210   :  { %9688 = vmatpush1.bf16.msra.mxu0 %v14821_v3  ;;  %10180 = vmatpush1.bf16.msra.mxu1 %v14823_v4  ;;  %v962_v3 = vld [vmem:[#allocation2 + $0x1760] sm:$0xff]  ;;  %v959_v4 = vld [vmem:[#allocation2 + $0x1748] sm:$0xff] }
 0x211   :  { %9689 = vmatprep.subr.bf16.mxu0 %v14830_v5  ;;  %10181 = vmatprep.subr.bf16.mxu1 %v14832_v6  ;;  %v963_v5 = vld [vmem:[#allocation2 + $0x1768] sm:$0xff]  ;;  %v14877_v6 = vcombine.low %v950_v56, %v954_v58  ;;  %v14886_v8 = vcombine.high %v958_v2, %v962_v3  ;;  %v17360_v56 = vpack.c.bf16 %v179_v47, %v179_v47 }
 0x212   :  { %v14888_v9 = vcombine.high %v959_v4, %v963_v5  ;;  %v14887_v17 = vcombine.low %v959_v4, %v963_v5  ;;  %v999_v58 = vld [vmem:[#allocation2 + $0x1888] sm:$0xff] }
 0x213   :  { %v1003_v59 = vld [vmem:[#allocation2 + $0x18a8] sm:$0xff] }
 0x214   :  { %9690 = vmatpush1.bf16.msra.mxu0 %v14829_v11  ;;  %10182 = vmatpush1.bf16.msra.mxu1 %v14831_v13  ;;  %v970_v11 = vld [vmem:[#allocation2 + $0x17a0] sm:$0xff]  ;;  %v967_v13 = vld [vmem:[#allocation2 + $0x1788] sm:$0xff] }
 0x215   :  { %9691 = vmatprep.subr.bf16.mxu0 %v14838_v15  ;;  %10183 = vmatprep.subr.bf16.mxu1 %v14840_v16  ;;  %v971_v15 = vld [vmem:[#allocation2 + $0x17a8] sm:$0xff]  ;;  %v14885_v16 = vcombine.low %v958_v2, %v962_v3  ;;  %v14894_v18 = vcombine.high %v966_v10, %v970_v11  ;;  %v1010_v2 = vld [vmem:[#allocation2 + $0x18e0] sm:$0xff] }
 0x216   :  { %v14896_v19 = vcombine.high %v967_v13, %v971_v15  ;;  %v14895_v28 = vcombine.low %v967_v13, %v971_v15  ;;  %v1007_v3 = vld [vmem:[#allocation2 + $0x18c8] sm:$0xff] }
 0x217   :  { %v1011_v4 = vld [vmem:[#allocation2 + $0x18e8] sm:$0xff] }
 0x218   :  { %9692 = vmatpush1.bf16.msra.mxu0 %v14837_v21  ;;  %10184 = vmatpush1.bf16.msra.mxu1 %v14839_v22  ;;  %v978_v21 = vld [vmem:[#allocation2 + $0x17e0] sm:$0xff]  ;;  %v975_v22 = vld [vmem:[#allocation2 + $0x17c8] sm:$0xff] }
 0x219   :  { %9693 = vmatprep.subr.bf16.mxu0 %v14846_v24  ;;  %10185 = vmatprep.subr.bf16.mxu1 %v14848_v27  ;;  %v979_v24 = vld [vmem:[#allocation2 + $0x17e8] sm:$0xff]  ;;  %v14893_v27 = vcombine.low %v966_v10, %v970_v11  ;;  %v14902_v29 = vcombine.high %v974_v20, %v978_v21  ;;  %v1018_v10 = vld [vmem:[#allocation2 + $0x1920] sm:$0xff] }
 0x21a   :  { %v14904_v30 = vcombine.high %v975_v22, %v979_v24  ;;  %v14903_v38 = vcombine.low %v975_v22, %v979_v24  ;;  %v1015_v11 = vld [vmem:[#allocation2 + $0x1908] sm:$0xff] }
 0x21b   :  { %v1019_v13 = vld [vmem:[#allocation2 + $0x1928] sm:$0xff] }
 0x21c   :  { %9694 = vmatpush1.bf16.msra.mxu0 %v14845_v32  ;;  %10186 = vmatpush1.bf16.msra.mxu1 %v14847_v33  ;;  %v986_v32 = vld [vmem:[#allocation2 + $0x1820] sm:$0xff]  ;;  %v983_v33 = vld [vmem:[#allocation2 + $0x1808] sm:$0xff] }
 0x21d   :  { %9695 = vmatprep.subr.bf16.mxu0 %v14854_v35  ;;  %10187 = vmatprep.subr.bf16.mxu1 %v14856_v36  ;;  %v987_v35 = vld [vmem:[#allocation2 + $0x1828] sm:$0xff]  ;;  %v14901_v36 = vcombine.low %v974_v20, %v978_v21  ;;  %v14910_v40 = vcombine.high %v982_v31, %v986_v32  ;;  %v14909_v49 = vcombine.low %v982_v31, %v986_v32  ;;  %v1026_v20 = vld [vmem:[#allocation2 + $0x1960] sm:$0xff] }
 0x21e   :  { %v14912_v41 = vcombine.high %v983_v33, %v987_v35  ;;  %v14911_v50 = vcombine.low %v983_v33, %v987_v35  ;;  %v1023_v21 = vld [vmem:[#allocation2 + $0x1948] sm:$0xff]  ;;  %v1034_v31 = vld [vmem:[#allocation2 + $0x19a0] sm:$0xff] }
 0x21f   :  { %v1027_v22 = vld [vmem:[#allocation2 + $0x1968] sm:$0xff] }
 0x220   :  { %9696 = vmatpush1.bf16.msra.mxu0 %v14853_v42  ;;  %10188 = vmatpush1.bf16.msra.mxu1 %v14855_v43  ;;  %v990_v42 = vld [vmem:[#allocation2 + $0x1840] sm:$0xff]  ;;  %v1031_v32 = vld [vmem:[#allocation2 + $0x1988] sm:$0xff] }
 0x221   :  { %9697 = vmatprep.subr.bf16.mxu0 %v14862_v44  ;;  %10189 = vmatprep.subr.bf16.mxu1 %v14864_v45  ;;  %v994_v43 = vld [vmem:[#allocation2 + $0x1860] sm:$0xff]  ;;  %v17355_v44 = vpack.c.bf16 %v176_v37, %v176_v37  ;;  %v991_v45 = vld [vmem:[#allocation2 + $0x1848] sm:$0xff] }
 0x222   :  { %v14917_v60 = vcombine.low %v990_v42, %v994_v43  ;;  %v1035_v33 = vld [vmem:[#allocation2 + $0x19a8] sm:$0xff] }
 0x224   :  { %9698 = vmatpush1.bf16.msra.mxu0 %v14861_v51  ;;  %10190 = vmatpush1.bf16.msra.mxu1 %v14863_v52  ;;  %v14918_v51 = vcombine.high %v990_v42, %v994_v43  ;;  %v14920_v52 = vcombine.high %v991_v45, %v995_v46  ;;  %v1039_v42 = vld [vmem:[#allocation2 + $0x19c8] sm:$0xff] }
 0x225   :  { %9699 = vmatprep.subr.bf16.mxu0 %v14870_v53  ;;  %10191 = vmatprep.subr.bf16.mxu1 %v14872_v55  ;;  %v998_v53 = vld [vmem:[#allocation2 + $0x1880] sm:$0xff]  ;;  %v1043_v43 = vld [vmem:[#allocation2 + $0x19e8] sm:$0xff] }
 0x226   :  { %v1002_v55 = vld [vmem:[#allocation2 + $0x18a0] sm:$0xff] }
 0x227   :  { %v14925_v5 = vcombine.low %v998_v53, %v1002_v55 }
 0x228   :  { %9700 = vmatpush1.bf16.msra.mxu0 %v14869_v61  ;;  %10192 = vmatpush1.bf16.msra.mxu1 %v14871_v62  ;;  %v14919_v61 = vcombine.low %v991_v45, %v995_v46  ;;  %v14926_v62 = vcombine.high %v998_v53, %v1002_v55  ;;  %v14959_v46 = vcombine.low %v1031_v32, %v1035_v33  ;;  %v1051_v53 = vld [vmem:[#allocation2 + $0x1a28] sm:$0xff] }
 0x229   :  { %9701 = vmatprep.subr.bf16.mxu0 %v14878_v63  ;;  %10193 = vmatprep.subr.bf16.mxu1 %v14880_v0  ;;  %v14928_v63 = vcombine.high %v999_v58, %v1003_v59  ;;  %v1006_v0 = vld [vmem:[#allocation2 + $0x18c0] sm:$0xff] }
 0x22a   :  { %v14933_v15 = vcombine.low %v1006_v0, %v1010_v2 }
 0x22c   :  { %9702 = vmatpush1.bf16.msra.mxu0 %v14877_v6  ;;  %10194 = vmatpush1.bf16.msra.mxu1 %v14879_v7  ;;  %v14927_v6 = vcombine.low %v999_v58, %v1003_v59  ;;  %v14934_v7 = vcombine.high %v1006_v0, %v1010_v2  ;;  %v14967_v58 = vcombine.low %v1039_v42, %v1043_v43  ;;  %v1059_v0 = vld [vmem:[#allocation2 + $0x1a68] sm:$0xff] }
 0x22d   :  { %9703 = vmatprep.subr.bf16.mxu0 %v14886_v8  ;;  %10195 = vmatprep.subr.bf16.mxu1 %v14888_v9  ;;  %v14936_v8 = vcombine.high %v1007_v3, %v1011_v4  ;;  %v1014_v9 = vld [vmem:[#allocation2 + $0x1900] sm:$0xff] }
 0x22e   :  { %v14941_v24 = vcombine.low %v1014_v9, %v1018_v10 }
 0x230   :  { %9704 = vmatpush1.bf16.msra.mxu0 %v14885_v16  ;;  %10196 = vmatpush1.bf16.msra.mxu1 %v14887_v17  ;;  %v14935_v16 = vcombine.low %v1007_v3, %v1011_v4  ;;  %v14942_v17 = vcombine.high %v1014_v9, %v1018_v10  ;;  %v1067_v9 = vld [vmem:[#allocation2 + $0x1aa8] sm:$0xff] }
 0x231   :  { %9705 = vmatprep.subr.bf16.mxu0 %v14894_v18  ;;  %10197 = vmatprep.subr.bf16.mxu1 %v14896_v19  ;;  %v14944_v18 = vcombine.high %v1015_v11, %v1019_v13  ;;  %v1022_v19 = vld [vmem:[#allocation2 + $0x1940] sm:$0xff] }
 0x232   :  { %v14949_v35 = vcombine.low %v1022_v19, %v1026_v20 }
 0x234   :  { %9706 = vmatpush1.bf16.msra.mxu0 %v14893_v27  ;;  %10198 = vmatpush1.bf16.msra.mxu1 %v14895_v28  ;;  %v14943_v27 = vcombine.low %v1015_v11, %v1019_v13  ;;  %v14950_v28 = vcombine.high %v1022_v19, %v1026_v20  ;;  %v1075_v19 = vld [vmem:[#allocation2 + $0x1ae8] sm:$0xff] }
 0x235   :  { %9707 = vmatprep.subr.bf16.mxu0 %v14902_v29  ;;  %10199 = vmatprep.subr.bf16.mxu1 %v14904_v30  ;;  %v14952_v29 = vcombine.high %v1023_v21, %v1027_v22  ;;  %v1030_v30 = vld [vmem:[#allocation2 + $0x1980] sm:$0xff] }
 0x236   :  { %v14958_v37 = vcombine.high %v1030_v30, %v1034_v31  ;;  %v14957_v45 = vcombine.low %v1030_v30, %v1034_v31  ;;  %v1083_v30 = vld [vmem:[#allocation2 + $0x1b28] sm:$0xff] }
 0x238   :  { %9708 = vmatpush1.bf16.msra.mxu0 %v14901_v36  ;;  %10200 = vmatpush1.bf16.msra.mxu1 %v14903_v38  ;;  %v14951_v36 = vcombine.low %v1023_v21, %v1027_v22  ;;  %v14960_v38 = vcombine.high %v1031_v32, %v1035_v33 }
 0x239   :  { %9718 = vmatprep.subr.bf16.mxu0 %v14910_v40  ;;  %10210 = vmatprep.subr.bf16.mxu1 %v14912_v41  ;;  %v1038_v40 = vld [vmem:[#allocation2 + $0x19c0] sm:$0xff] }
 0x23a   :  { %v1042_v41 = vld [vmem:[#allocation2 + $0x19e0] sm:$0xff] }
 0x23b   :  { %9710 = vmatmul.mubr.bf16.vlgmr.msra.gmra.mrb[0].mxu0 %v17355_v44  ;;  %10202 = vmatmul.mubr.bf16.vlgmr.msra.gmra.mrb[0].mxu1 %v17355_v44  ;;  %v14966_v47 = vcombine.high %v1038_v40, %v1042_v41  ;;  %v14965_v55 = vcombine.low %v1038_v40, %v1042_v41  ;;  %v1091_v40 = vld [vmem:[#allocation2 + $0x1b68] sm:$0xff] }
 0x23c   :  { %9719 = vmatpush1.bf16.msra.mxu0 %v14909_v49  ;;  %10211 = vmatpush1.bf16.msra.mxu1 %v14911_v50  ;;  %v14968_v49 = vcombine.high %v1039_v42, %v1043_v43  ;;  %v1046_v50 = vld [vmem:[#allocation2 + $0x1a00] sm:$0xff] }
 0x23d   :  { %9720 = vmatprep.subr.bf16.mxu0 %v14918_v51  ;;  %10212 = vmatprep.subr.bf16.mxu1 %v14920_v52  ;;  %v1050_v51 = vld [vmem:[#allocation2 + $0x1a20] sm:$0xff]  ;;  %v1047_v52 = vld [vmem:[#allocation2 + $0x1a08] sm:$0xff] }
 0x23e   :  { %9750 = vmatprep.mubr.bf16.mxu0 %v17360_v56  ;;  %10242 = vmatprep.mubr.bf16.mxu1 %v17360_v56  ;;  %v14974_v59 = vcombine.high %v1046_v50, %v1050_v51  ;;  %v14973_v2 = vcombine.low %v1046_v50, %v1050_v51  ;;  %v14975_v3 = vcombine.low %v1047_v52, %v1051_v53  ;;  %v1099_v50 = vld [vmem:[#allocation2 + $0x1ba8] sm:$0xff] }
 0x240   :  { %9721 = vmatpush1.bf16.msra.mxu0 %v14917_v60  ;;  %10213 = vmatpush1.bf16.msra.mxu1 %v14919_v61  ;;  %v14976_v60 = vcombine.high %v1047_v52, %v1051_v53  ;;  %v1054_v61 = vld [vmem:[#allocation2 + $0x1a40] sm:$0xff] }
 0x241   :  { %9722 = vmatprep.subr.bf16.mxu0 %v14926_v62  ;;  %10214 = vmatprep.subr.bf16.mxu1 %v14928_v63  ;;  %v1058_v62 = vld [vmem:[#allocation2 + $0x1a60] sm:$0xff]  ;;  %v1055_v63 = vld [vmem:[#allocation2 + $0x1a48] sm:$0xff] }
 0x242   :  { %v14982_v4 = vcombine.high %v1054_v61, %v1058_v62  ;;  %v14981_v10 = vcombine.low %v1054_v61, %v1058_v62  ;;  %v14983_v11 = vcombine.low %v1055_v63, %v1059_v0  ;;  %v1107_v61 = vld [vmem:[#allocation2 + $0x1be8] sm:$0xff] }
 0x244   :  { %9723 = vmatpush1.bf16.msra.mxu0 %v14925_v5  ;;  %10215 = vmatpush1.bf16.msra.mxu1 %v14927_v6  ;;  %v14984_v5 = vcombine.high %v1055_v63, %v1059_v0  ;;  %v1062_v6 = vld [vmem:[#allocation2 + $0x1a80] sm:$0xff] }
 0x245   :  { %9724 = vmatprep.subr.bf16.mxu0 %v14934_v7  ;;  %10216 = vmatprep.subr.bf16.mxu1 %v14936_v8  ;;  %v1066_v7 = vld [vmem:[#allocation2 + $0x1aa0] sm:$0xff]  ;;  %v1063_v8 = vld [vmem:[#allocation2 + $0x1a88] sm:$0xff] }
 0x246   :  { %v14990_v13 = vcombine.high %v1062_v6, %v1066_v7  ;;  %v14989_v20 = vcombine.low %v1062_v6, %v1066_v7  ;;  %v14991_v21 = vcombine.low %v1063_v8, %v1067_v9  ;;  %v1115_v6 = vld [vmem:[#allocation2 + $0x1c28] sm:$0xff] }
 0x248   :  { %9725 = vmatpush1.bf16.msra.mxu0 %v14933_v15  ;;  %10217 = vmatpush1.bf16.msra.mxu1 %v14935_v16  ;;  %v14992_v15 = vcombine.high %v1063_v8, %v1067_v9  ;;  %v1070_v16 = vld [vmem:[#allocation2 + $0x1ac0] sm:$0xff] }
 0x249   :  { %9726 = vmatprep.subr.bf16.mxu0 %v14942_v17  ;;  %10218 = vmatprep.subr.bf16.mxu1 %v14944_v18  ;;  %v1074_v17 = vld [vmem:[#allocation2 + $0x1ae0] sm:$0xff]  ;;  %v1071_v18 = vld [vmem:[#allocation2 + $0x1ac8] sm:$0xff] }
 0x24a   :  { %v14998_v22 = vcombine.high %v1070_v16, %v1074_v17  ;;  %v14997_v31 = vcombine.low %v1070_v16, %v1074_v17  ;;  %v14999_v32 = vcombine.low %v1071_v18, %v1075_v19  ;;  %v178_v8 = vld [vmem:[%s17564_s0 + $0x60] sm:$0xff]  ;;  %v1119_v17 = vld [vmem:[#allocation2 + $0x1c48] sm:$0xff] }
 0x24b   :  { %v17369_v16 = vpack.c.bf16 %v178_v8, %v178_v8 }
 0x24c   :  { %9727 = vmatpush1.bf16.msra.mxu0 %v14941_v24  ;;  %10219 = vmatpush1.bf16.msra.mxu1 %v14943_v27  ;;  %v15000_v24 = vcombine.high %v1071_v18, %v1075_v19  ;;  %v1078_v27 = vld [vmem:[#allocation2 + $0x1b00] sm:$0xff]  ;;  %v1123_v18 = vld [vmem:[#allocation2 + $0x1c68] sm:$0xff]  ;;  %v181_v19 = vld [vmem:[%s17564_s0 + $0x78] sm:$0xff] }
 0x24d   :  { %9728 = vmatprep.subr.bf16.mxu0 %v14950_v28  ;;  %10220 = vmatprep.subr.bf16.mxu1 %v14952_v29  ;;  %v1082_v28 = vld [vmem:[#allocation2 + $0x1b20] sm:$0xff]  ;;  %v1079_v29 = vld [vmem:[#allocation2 + $0x1b08] sm:$0xff] }
 0x24e   :  { %v15006_v33 = vcombine.high %v1078_v27, %v1082_v28  ;;  %v15005_v41 = vcombine.low %v1078_v27, %v1082_v28  ;;  %v15007_v42 = vcombine.low %v1079_v29, %v1083_v30  ;;  %v1126_v27 = vld [vmem:[#allocation2 + $0x1c80] sm:$0xff] }
 0x24f   :  { %v1130_v28 = vld [vmem:[#allocation2 + $0x1ca0] sm:$0xff] }
 0x250   :  { %9729 = vmatpush1.bf16.msra.mxu0 %v14949_v35  ;;  %10221 = vmatpush1.bf16.msra.mxu1 %v14951_v36  ;;  %v15008_v35 = vcombine.high %v1079_v29, %v1083_v30  ;;  %v1086_v36 = vld [vmem:[#allocation2 + $0x1b40] sm:$0xff]  ;;  %v17374_v29 = vpack.c.bf16 %v181_v19, %v181_v19  ;;  %v1127_v30 = vld [vmem:[#allocation2 + $0x1c88] sm:$0xff] }
 0x251   :  { %9730 = vmatprep.subr.bf16.mxu0 %v14958_v37  ;;  %10222 = vmatprep.subr.bf16.mxu1 %v14960_v38  ;;  %v1090_v37 = vld [vmem:[#allocation2 + $0x1b60] sm:$0xff]  ;;  %v1087_v38 = vld [vmem:[#allocation2 + $0x1b48] sm:$0xff] }
 0x252   :  { %v15014_v43 = vcombine.high %v1086_v36, %v1090_v37  ;;  %v15013_v51 = vcombine.low %v1086_v36, %v1090_v37  ;;  %v15015_v52 = vcombine.low %v1087_v38, %v1091_v40  ;;  %v1134_v37 = vld [vmem:[#allocation2 + $0x1cc0] sm:$0xff] }
 0x254   :  { %9731 = vmatpush1.bf16.msra.mxu0 %v14957_v45  ;;  %10223 = vmatpush1.bf16.msra.mxu1 %v14959_v46  ;;  %v15016_v45 = vcombine.high %v1087_v38, %v1091_v40  ;;  %v1094_v46 = vld [vmem:[#allocation2 + $0x1b80] sm:$0xff]  ;;  %v1135_v40 = vld [vmem:[#allocation2 + $0x1cc8] sm:$0xff] }
 0x255   :  { %9732 = vmatprep.subr.bf16.mxu0 %v14966_v47  ;;  %10224 = vmatprep.subr.bf16.mxu1 %v14968_v49  ;;  %v1098_v47 = vld [vmem:[#allocation2 + $0x1ba0] sm:$0xff]  ;;  %v1095_v49 = vld [vmem:[#allocation2 + $0x1b88] sm:$0xff] }
 0x256   :  { %v15022_v53 = vcombine.high %v1094_v46, %v1098_v47  ;;  %v15021_v62 = vcombine.low %v1094_v46, %v1098_v47  ;;  %v15023_v63 = vcombine.low %v1095_v49, %v1099_v50  ;;  %v1138_v38 = vld [vmem:[#allocation2 + $0x1ce0] sm:$0xff] }
 0x257   :  { %v1142_v47 = vld [vmem:[#allocation2 + $0x1d00] sm:$0xff] }
 0x258   :  { %9733 = vmatpush1.bf16.msra.mxu0 %v14965_v55  ;;  %10225 = vmatpush1.bf16.msra.mxu1 %v14967_v58  ;;  %v15024_v55 = vcombine.high %v1095_v49, %v1099_v50  ;;  %v1102_v58 = vld [vmem:[#allocation2 + $0x1bc0] sm:$0xff]  ;;  %v1143_v50 = vld [vmem:[#allocation2 + $0x1d08] sm:$0xff] }
 0x259   :  { %9734 = vmatprep.subr.bf16.mxu0 %v14974_v59  ;;  %10226 = vmatprep.subr.bf16.mxu1 %v14976_v60  ;;  %v1106_v59 = vld [vmem:[#allocation2 + $0x1be0] sm:$0xff]  ;;  %v1103_v60 = vld [vmem:[#allocation2 + $0x1bc8] sm:$0xff] }
 0x25a   :  { %v15030_v0 = vcombine.high %v1102_v58, %v1106_v59  ;;  %v15029_v7 = vcombine.low %v1102_v58, %v1106_v59  ;;  %v15031_v9 = vcombine.low %v1103_v60, %v1107_v61  ;;  %v1146_v49 = vld [vmem:[#allocation2 + $0x1d20] sm:$0xff] }
 0x25b   :  { %v1150_v59 = vld [vmem:[#allocation2 + $0x1d40] sm:$0xff] }
 0x25c   :  { %9735 = vmatpush1.bf16.msra.mxu0 %v14973_v2  ;;  %10227 = vmatpush1.bf16.msra.mxu1 %v14975_v3  ;;  %v15032_v2 = vcombine.high %v1103_v60, %v1107_v61  ;;  %v1110_v3 = vld [vmem:[#allocation2 + $0x1c00] sm:$0xff]  ;;  %v1151_v61 = vld [vmem:[#allocation2 + $0x1d48] sm:$0xff] }
 0x25d   :  { %9736 = vmatprep.subr.bf16.mxu0 %v14982_v4  ;;  %10228 = vmatprep.subr.bf16.mxu1 %v14984_v5  ;;  %v1114_v4 = vld [vmem:[#allocation2 + $0x1c20] sm:$0xff]  ;;  %v1111_v5 = vld [vmem:[#allocation2 + $0x1c08] sm:$0xff] }
 0x25e   :  { %v1154_v60 = vld [vmem:[#allocation2 + $0x1d60] sm:$0xff] }
 0x25f   :  { %v15077_v8 = vcombine.low %v1150_v59, %v1154_v60 }
 0x260   :  { %9737 = vmatpush1.bf16.msra.mxu0 %v14981_v10  ;;  %10229 = vmatpush1.bf16.msra.mxu1 %v14983_v11  ;;  %v15038_v10 = vcombine.high %v1110_v3, %v1114_v4  ;;  %v15040_v11 = vcombine.high %v1111_v5, %v1115_v6 }
 0x261   :  { %9738 = vmatprep.subr.bf16.mxu0 %v14990_v13  ;;  %10230 = vmatprep.subr.bf16.mxu1 %v14992_v15  ;;  %v1118_v13 = vld [vmem:[#allocation2 + $0x1c40] sm:$0xff] }
 0x262   :  { %v1122_v15 = vld [vmem:[#allocation2 + $0x1c60] sm:$0xff] }
 0x264   :  { %9739 = vmatpush1.bf16.msra.mxu0 %v14989_v20  ;;  %10231 = vmatpush1.bf16.msra.mxu1 %v14991_v21  ;;  %v15037_v20 = vcombine.low %v1110_v3, %v1114_v4  ;;  %v15039_v21 = vcombine.low %v1111_v5, %v1115_v6  ;;  %v1158_v4 = vld [vmem:[#allocation2 + $0x1d80] sm:$0xff]  ;;  %v1159_v6 = vld [vmem:[#allocation2 + $0x1d88] sm:$0xff] }
 0x265   :  { %9740 = vmatprep.subr.bf16.mxu0 %v14998_v22  ;;  %10232 = vmatprep.subr.bf16.mxu1 %v15000_v24  ;;  %v15046_v22 = vcombine.high %v1118_v13, %v1122_v15  ;;  %v15048_v24 = vcombine.high %v1119_v17, %v1123_v18  ;;  %v1162_v5 = vld [vmem:[#allocation2 + $0x1da0] sm:$0xff] }
 0x266   :  { %v15085_v19 = vcombine.low %v1158_v4, %v1162_v5 }
 0x268   :  { %9741 = vmatpush1.bf16.msra.mxu0 %v14997_v31  ;;  %10233 = vmatpush1.bf16.msra.mxu1 %v14999_v32  ;;  %v1131_v31 = vld [vmem:[#allocation2 + $0x1ca8] sm:$0xff]  ;;  %v15045_v32 = vcombine.low %v1118_v13, %v1122_v15  ;;  %v1166_v13 = vld [vmem:[#allocation2 + $0x1dc0] sm:$0xff] }
 0x269   :  { %9742 = vmatprep.subr.bf16.mxu0 %v15006_v33  ;;  %10234 = vmatprep.subr.bf16.mxu1 %v15008_v35  ;;  %v15047_v33 = vcombine.low %v1119_v17, %v1123_v18  ;;  %v15054_v35 = vcombine.high %v1126_v27, %v1130_v28  ;;  %v15056_v36 = vcombine.high %v1127_v30, %v1131_v31  ;;  %v1170_v15 = vld [vmem:[#allocation2 + $0x1de0] sm:$0xff]  ;;  %v1167_v17 = vld [vmem:[#allocation2 + $0x1dc8] sm:$0xff] }
 0x26a   :  { %v1171_v18 = vld [vmem:[#allocation2 + $0x1de8] sm:$0xff] }
 0x26c   :  { %9743 = vmatpush1.bf16.msra.mxu0 %v15005_v41  ;;  %10235 = vmatpush1.bf16.msra.mxu1 %v15007_v42  ;;  %v1139_v41 = vld [vmem:[#allocation2 + $0x1ce8] sm:$0xff]  ;;  %v15053_v42 = vcombine.low %v1126_v27, %v1130_v28  ;;  %v1178_v27 = vld [vmem:[#allocation2 + $0x1e20] sm:$0xff] }
 0x26d   :  { %9744 = vmatprep.subr.bf16.mxu0 %v15014_v43  ;;  %10236 = vmatprep.subr.bf16.mxu1 %v15016_v45  ;;  %v15055_v43 = vcombine.low %v1127_v30, %v1131_v31  ;;  %v15062_v45 = vcombine.high %v1134_v37, %v1138_v38  ;;  %v15064_v46 = vcombine.high %v1135_v40, %v1139_v41  ;;  %v1175_v28 = vld [vmem:[#allocation2 + $0x1e08] sm:$0xff] }
 0x26e   :  { %v1179_v30 = vld [vmem:[#allocation2 + $0x1e28] sm:$0xff]  ;;  %v15093_v31 = vcombine.low %v1166_v13, %v1170_v15 }
 0x270   :  { %9745 = vmatpush1.bf16.msra.mxu0 %v15013_v51  ;;  %10237 = vmatpush1.bf16.msra.mxu1 %v15015_v52  ;;  %v1147_v51 = vld [vmem:[#allocation2 + $0x1d28] sm:$0xff]  ;;  %v15061_v52 = vcombine.low %v1134_v37, %v1138_v38  ;;  %v1186_v37 = vld [vmem:[#allocation2 + $0x1e60] sm:$0xff] }
 0x271   :  { %9746 = vmatprep.subr.bf16.mxu0 %v15022_v53  ;;  %10238 = vmatprep.subr.bf16.mxu1 %v15024_v55  ;;  %v15063_v53 = vcombine.low %v1135_v40, %v1139_v41  ;;  %v15070_v55 = vcombine.high %v1142_v47, %v1146_v49  ;;  %v15072_v58 = vcombine.high %v1143_v50, %v1147_v51  ;;  %v1183_v38 = vld [vmem:[#allocation2 + $0x1e48] sm:$0xff] }
 0x272   :  { %v1187_v40 = vld [vmem:[#allocation2 + $0x1e68] sm:$0xff] }
 0x274   :  { %9747 = vmatpush1.bf16.msra.mxu0 %v15021_v62  ;;  %10239 = vmatpush1.bf16.msra.mxu1 %v15023_v63  ;;  %v1155_v62 = vld [vmem:[#allocation2 + $0x1d68] sm:$0xff]  ;;  %v15069_v63 = vcombine.low %v1142_v47, %v1146_v49  ;;  %v1194_v47 = vld [vmem:[#allocation2 + $0x1ea0] sm:$0xff] }
 0x275   :  { %9748 = vmatprep.subr.bf16.mxu0 %v15030_v0  ;;  %10240 = vmatprep.subr.bf16.mxu1 %v15032_v2  ;;  %v15071_v0 = vcombine.low %v1143_v50, %v1147_v51  ;;  %v15078_v2 = vcombine.high %v1150_v59, %v1154_v60  ;;  %v15080_v3 = vcombine.high %v1151_v61, %v1155_v62  ;;  %v1191_v49 = vld [vmem:[#allocation2 + $0x1e88] sm:$0xff]  ;;  %v1202_v59 = vld [vmem:[#allocation2 + $0x1ee0] sm:$0xff] }
 0x276   :  { %v1195_v50 = vld [vmem:[#allocation2 + $0x1ea8] sm:$0xff] }
 0x277   :  { %v1199_v60 = vld [vmem:[#allocation2 + $0x1ec8] sm:$0xff] }
 0x278   :  { %9749 = vmatpush1.bf16.msra.mxu0 %v15029_v7  ;;  %10241 = vmatpush1.bf16.msra.mxu1 %v15031_v9  ;;  %v1163_v7 = vld [vmem:[#allocation2 + $0x1da8] sm:$0xff]  ;;  %v15079_v9 = vcombine.low %v1151_v61, %v1155_v62 }
 0x279   :  { %9759 = vmatprep.subr.bf16.mxu0 %v15038_v10  ;;  %10251 = vmatprep.subr.bf16.mxu1 %v15040_v11  ;;  %v15086_v10 = vcombine.high %v1158_v4, %v1162_v5  ;;  %v15088_v11 = vcombine.high %v1159_v6, %v1163_v7  ;;  %v1203_v61 = vld [vmem:[#allocation2 + $0x1ee8] sm:$0xff]  ;;  %v1210_v4 = vld [vmem:[#allocation2 + $0x1f20] sm:$0xff] }
 0x27a   :  { %v1207_v5 = vld [vmem:[#allocation2 + $0x1f08] sm:$0xff] }
 0x27b   :  { %9751 = vmatmul.mubr.bf16.vlgmr.msra.gmra.mrb[0].mxu0 %v17369_v16  ;;  %10243 = vmatmul.mubr.bf16.vlgmr.msra.gmra.mrb[0].mxu1 %v17369_v16 }
 0x27c   :  { %9760 = vmatpush1.bf16.msra.mxu0 %v15037_v20  ;;  %10252 = vmatpush1.bf16.msra.mxu1 %v15039_v21  ;;  %v15087_v20 = vcombine.low %v1159_v6, %v1163_v7  ;;  %v15094_v21 = vcombine.high %v1166_v13, %v1170_v15  ;;  %v1211_v6 = vld [vmem:[#allocation2 + $0x1f28] sm:$0xff]  ;;  %v1218_v13 = vld [vmem:[#allocation2 + $0x1f60] sm:$0xff] }
 0x27d   :  { %9761 = vmatprep.subr.bf16.mxu0 %v15046_v22  ;;  %10253 = vmatprep.subr.bf16.mxu1 %v15048_v24  ;;  %v15096_v22 = vcombine.high %v1167_v17, %v1171_v18  ;;  %v1174_v24 = vld [vmem:[#allocation2 + $0x1e00] sm:$0xff]  ;;  %v1215_v15 = vld [vmem:[#allocation2 + $0x1f48] sm:$0xff] }
 0x27e   :  { %9791 = vmatprep.mubr.bf16.mxu0 %v17374_v29  ;;  %10283 = vmatprep.mubr.bf16.mxu1 %v17374_v29  ;;  %v15101_v41 = vcombine.low %v1174_v24, %v1178_v27 }
 0x280   :  { %9762 = vmatpush1.bf16.msra.mxu0 %v15045_v32  ;;  %10254 = vmatpush1.bf16.msra.mxu1 %v15047_v33  ;;  %v15095_v32 = vcombine.low %v1167_v17, %v1171_v18  ;;  %v15102_v33 = vcombine.high %v1174_v24, %v1178_v27  ;;  %v1219_v17 = vld [vmem:[#allocation2 + $0x1f68] sm:$0xff]  ;;  %v1226_v24 = vld [vmem:[#allocation2 + $0x1fa0] sm:$0xff] }
 0x281   :  { %9763 = vmatprep.subr.bf16.mxu0 %v15054_v35  ;;  %10255 = vmatprep.subr.bf16.mxu1 %v15056_v36  ;;  %v15104_v35 = vcombine.high %v1175_v28, %v1179_v30  ;;  %v1182_v36 = vld [vmem:[#allocation2 + $0x1e40] sm:$0xff]  ;;  %v1223_v27 = vld [vmem:[#allocation2 + $0x1f88] sm:$0xff] }
 0x282   :  { %v15109_v51 = vcombine.low %v1182_v36, %v1186_v37 }
 0x284   :  { %9764 = vmatpush1.bf16.msra.mxu0 %v15053_v42  ;;  %10256 = vmatpush1.bf16.msra.mxu1 %v15055_v43  ;;  %v15103_v42 = vcombine.low %v1175_v28, %v1179_v30  ;;  %v15110_v43 = vcombine.high %v1182_v36, %v1186_v37  ;;  %v1227_v28 = vld [vmem:[#allocation2 + $0x1fa8] sm:$0xff]  ;;  %v1234_v36 = vld [vmem:[#allocation2 + $0x1fe0] sm:$0xff] }
 0x285   :  { %9765 = vmatprep.subr.bf16.mxu0 %v15062_v45  ;;  %10257 = vmatprep.subr.bf16.mxu1 %v15064_v46  ;;  %v15112_v45 = vcombine.high %v1183_v38, %v1187_v40  ;;  %v1190_v46 = vld [vmem:[#allocation2 + $0x1e80] sm:$0xff]  ;;  %v1231_v37 = vld [vmem:[#allocation2 + $0x1fc8] sm:$0xff] }
 0x286   :  { %v15117_v62 = vcombine.low %v1190_v46, %v1194_v47 }
 0x288   :  { %9766 = vmatpush1.bf16.msra.mxu0 %v15061_v52  ;;  %10258 = vmatpush1.bf16.msra.mxu1 %v15063_v53  ;;  %v15111_v52 = vcombine.low %v1183_v38, %v1187_v40  ;;  %v15118_v53 = vcombine.high %v1190_v46, %v1194_v47  ;;  %v1235_v38 = vld [vmem:[#allocation2 + $0x1fe8] sm:$0xff]  ;;  %v1242_v46 = vld [vmem:[#allocation2 + $0x2020] sm:$0xff] }
 0x289   :  { %9767 = vmatprep.subr.bf16.mxu0 %v15070_v55  ;;  %10259 = vmatprep.subr.bf16.mxu1 %v15072_v58  ;;  %v15120_v55 = vcombine.high %v1191_v49, %v1195_v50  ;;  %v1198_v58 = vld [vmem:[#allocation2 + $0x1ec0] sm:$0xff]  ;;  %v1239_v47 = vld [vmem:[#allocation2 + $0x2008] sm:$0xff] }
 0x28a   :  { %v15125_v7 = vcombine.low %v1198_v58, %v1202_v59 }
 0x28c   :  { %9768 = vmatpush1.bf16.msra.mxu0 %v15069_v63  ;;  %10260 = vmatpush1.bf16.msra.mxu1 %v15071_v0  ;;  %v15119_v63 = vcombine.low %v1191_v49, %v1195_v50  ;;  %v15126_v0 = vcombine.high %v1198_v58, %v1202_v59  ;;  %v1243_v49 = vld [vmem:[#allocation2 + $0x2028] sm:$0xff]  ;;  %v1246_v58 = vld [vmem:[#allocation2 + $0x2040] sm:$0xff] }
 0x28d   :  { %9769 = vmatprep.subr.bf16.mxu0 %v15078_v2  ;;  %10261 = vmatprep.subr.bf16.mxu1 %v15080_v3  ;;  %v15128_v2 = vcombine.high %v1199_v60, %v1203_v61  ;;  %v1206_v3 = vld [vmem:[#allocation2 + $0x1f00] sm:$0xff] }
 0x28e   :  { %v15133_v18 = vcombine.low %v1206_v3, %v1210_v4  ;;  %v1250_v59 = vld [vmem:[#allocation2 + $0x2060] sm:$0xff] }
 0x290   :  { %9770 = vmatpush1.bf16.msra.mxu0 %v15077_v8  ;;  %10262 = vmatpush1.bf16.msra.mxu1 %v15079_v9  ;;  %v15127_v8 = vcombine.low %v1199_v60, %v1203_v61  ;;  %v15134_v9 = vcombine.high %v1206_v3, %v1210_v4  ;;  %v1247_v61 = vld [vmem:[#allocation2 + $0x2048] sm:$0xff]  ;;  %v15174_v3 = vcombine.high %v1246_v58, %v1250_v59 }
 0x291   :  { %9771 = vmatprep.subr.bf16.mxu0 %v15086_v10  ;;  %10263 = vmatprep.subr.bf16.mxu1 %v15088_v11  ;;  %v15136_v10 = vcombine.high %v1207_v5, %v1211_v6  ;;  %v1214_v11 = vld [vmem:[#allocation2 + $0x1f40] sm:$0xff] }
 0x292   :  { %v15141_v30 = vcombine.low %v1214_v11, %v1218_v13 }
 0x294   :  { %9772 = vmatpush1.bf16.msra.mxu0 %v15085_v19  ;;  %10264 = vmatpush1.bf16.msra.mxu1 %v15087_v20  ;;  %v15135_v19 = vcombine.low %v1207_v5, %v1211_v6  ;;  %v15142_v20 = vcombine.high %v1214_v11, %v1218_v13  ;;  %v1254_v5 = vld [vmem:[#allocation2 + $0x2080] sm:$0xff] }
 0x295   :  { %9773 = vmatprep.subr.bf16.mxu0 %v15094_v21  ;;  %10265 = vmatprep.subr.bf16.mxu1 %v15096_v22  ;;  %v15144_v21 = vcombine.high %v1215_v15, %v1219_v17  ;;  %v1222_v22 = vld [vmem:[#allocation2 + $0x1f80] sm:$0xff] }
 0x296   :  { %v15149_v40 = vcombine.low %v1222_v22, %v1226_v24  ;;  %v1258_v6 = vld [vmem:[#allocation2 + $0x20a0] sm:$0xff] }
 0x297   :  { %v15182_v13 = vcombine.high %v1254_v5, %v1258_v6 }
 0x298   :  { %9774 = vmatpush1.bf16.msra.mxu0 %v15093_v31  ;;  %10266 = vmatpush1.bf16.msra.mxu1 %v15095_v32  ;;  %v15143_v31 = vcombine.low %v1215_v15, %v1219_v17  ;;  %v15150_v32 = vcombine.high %v1222_v22, %v1226_v24  ;;  %v1262_v17 = vld [vmem:[#allocation2 + $0x20c0] sm:$0xff] }
 0x299   :  { %9775 = vmatprep.subr.bf16.mxu0 %v15102_v33  ;;  %10267 = vmatprep.subr.bf16.mxu1 %v15104_v35  ;;  %v15152_v33 = vcombine.high %v1223_v27, %v1227_v28  ;;  %v1230_v35 = vld [vmem:[#allocation2 + $0x1fc0] sm:$0xff] }
 0x29a   :  { %v15157_v50 = vcombine.low %v1230_v35, %v1234_v36 }
 0x29c   :  { %9776 = vmatpush1.bf16.msra.mxu0 %v15101_v41  ;;  %10268 = vmatpush1.bf16.msra.mxu1 %v15103_v42  ;;  %v15151_v41 = vcombine.low %v1223_v27, %v1227_v28  ;;  %v15158_v42 = vcombine.high %v1230_v35, %v1234_v36  ;;  %v1270_v28 = vld [vmem:[#allocation2 + $0x2100] sm:$0xff] }
 0x29d   :  { %9777 = vmatprep.subr.bf16.mxu0 %v15110_v43  ;;  %10269 = vmatprep.subr.bf16.mxu1 %v15112_v45  ;;  %v15160_v43 = vcombine.high %v1231_v37, %v1235_v38  ;;  %v1238_v45 = vld [vmem:[#allocation2 + $0x2000] sm:$0xff] }
 0x2a0   :  { %9778 = vmatpush1.bf16.msra.mxu0 %v15109_v51  ;;  %10270 = vmatpush1.bf16.msra.mxu1 %v15111_v52  ;;  %v180_v51 = vld [vmem:[%s17564_s0 + $0x70] sm:$0xff]  ;;  %v15159_v52 = vcombine.low %v1231_v37, %v1235_v38  ;;  %v1278_v38 = vld [vmem:[#allocation2 + $0x2140] sm:$0xff] }
 0x2a1   :  { %9779 = vmatprep.subr.bf16.mxu0 %v15118_v53  ;;  %10271 = vmatprep.subr.bf16.mxu1 %v15120_v55  ;;  %v15166_v53 = vcombine.high %v1238_v45, %v1242_v46  ;;  %v15168_v55 = vcombine.high %v1239_v47, %v1243_v49  ;;  %v17383_v60 = vpack.c.bf16 %v180_v51, %v180_v51  ;;  %v1287_v51 = vld [vmem:[#allocation2 + $0x2188] sm:$0xff] }
 0x2a4   :  { %9780 = vmatpush1.bf16.msra.mxu0 %v15117_v62  ;;  %10272 = vmatpush1.bf16.msra.mxu1 %v15119_v63  ;;  %v1251_v62 = vld [vmem:[#allocation2 + $0x2068] sm:$0xff] }
 0x2a5   :  { %9781 = vmatprep.subr.bf16.mxu0 %v15126_v0  ;;  %10273 = vmatprep.subr.bf16.mxu1 %v15128_v2  ;;  %v183_v63 = vld [vmem:[%s17564_s0 + $0x88] sm:$0xff]  ;;  %v15165_v0 = vcombine.low %v1238_v45, %v1242_v46  ;;  %v15167_v2 = vcombine.low %v1239_v47, %v1243_v49  ;;  %v15176_v4 = vcombine.high %v1247_v61, %v1251_v62  ;;  %v1286_v49 = vld [vmem:[#allocation2 + $0x2180] sm:$0xff] }
 0x2a6   :  { %v15175_v11 = vcombine.low %v1247_v61, %v1251_v62  ;;  %v1294_v61 = vld [vmem:[#allocation2 + $0x21c0] sm:$0xff] }
 0x2a7   :  { %v1298_v62 = vld [vmem:[#allocation2 + $0x21e0] sm:$0xff] }
 0x2a8   :  { %9782 = vmatpush1.bf16.msra.mxu0 %v15125_v7  ;;  %10274 = vmatpush1.bf16.msra.mxu1 %v15127_v8  ;;  %v17388_v7 = vpack.c.bf16 %v183_v63, %v183_v63  ;;  %v1255_v8 = vld [vmem:[#allocation2 + $0x2088] sm:$0xff] }
 0x2a9   :  { %9783 = vmatprep.subr.bf16.mxu0 %v15134_v9  ;;  %10275 = vmatprep.subr.bf16.mxu1 %v15136_v10  ;;  %v1259_v9 = vld [vmem:[#allocation2 + $0x20a8] sm:$0xff]  ;;  %v15173_v10 = vcombine.low %v1246_v58, %v1250_v59 }
 0x2aa   :  { %v15184_v15 = vcombine.high %v1255_v8, %v1259_v9  ;;  %v15183_v22 = vcombine.low %v1255_v8, %v1259_v9  ;;  %v1295_v63 = vld [vmem:[#allocation2 + $0x21c8] sm:$0xff]  ;;  %v1306_v8 = vld [vmem:[#allocation2 + $0x2220] sm:$0xff] }
 0x2ab   :  { %v1303_v9 = vld [vmem:[#allocation2 + $0x2208] sm:$0xff] }
 0x2ac   :  { %9784 = vmatpush1.bf16.msra.mxu0 %v15133_v18  ;;  %10276 = vmatpush1.bf16.msra.mxu1 %v15135_v19  ;;  %v1266_v18 = vld [vmem:[#allocation2 + $0x20e0] sm:$0xff]  ;;  %v1263_v19 = vld [vmem:[#allocation2 + $0x20c8] sm:$0xff] }
 0x2ad   :  { %9785 = vmatprep.subr.bf16.mxu0 %v15142_v20  ;;  %10277 = vmatprep.subr.bf16.mxu1 %v15144_v21  ;;  %v1267_v20 = vld [vmem:[#allocation2 + $0x20e8] sm:$0xff]  ;;  %v15181_v21 = vcombine.low %v1254_v5, %v1258_v6  ;;  %v15190_v24 = vcombine.high %v1262_v17, %v1266_v18  ;;  %v1302_v6 = vld [vmem:[#allocation2 + $0x2200] sm:$0xff] }
 0x2ae   :  { %v15192_v27 = vcombine.high %v1263_v19, %v1267_v20  ;;  %v15191_v35 = vcombine.low %v1263_v19, %v1267_v20  ;;  %v1314_v19 = vld [vmem:[#allocation2 + $0x2260] sm:$0xff]  ;;  %v1311_v20 = vld [vmem:[#allocation2 + $0x2248] sm:$0xff] }
 0x2b0   :  { %9786 = vmatpush1.bf16.msra.mxu0 %v15141_v30  ;;  %10278 = vmatpush1.bf16.msra.mxu1 %v15143_v31  ;;  %v1274_v30 = vld [vmem:[#allocation2 + $0x2120] sm:$0xff]  ;;  %v1271_v31 = vld [vmem:[#allocation2 + $0x2108] sm:$0xff] }
 0x2b1   :  { %9787 = vmatprep.subr.bf16.mxu0 %v15150_v32  ;;  %10279 = vmatprep.subr.bf16.mxu1 %v15152_v33  ;;  %v1275_v32 = vld [vmem:[#allocation2 + $0x2128] sm:$0xff]  ;;  %v15189_v33 = vcombine.low %v1262_v17, %v1266_v18  ;;  %v15198_v36 = vcombine.high %v1270_v28, %v1274_v30  ;;  %v1310_v18 = vld [vmem:[#allocation2 + $0x2240] sm:$0xff] }
 0x2b2   :  { %v15200_v37 = vcombine.high %v1271_v31, %v1275_v32  ;;  %v15199_v45 = vcombine.low %v1271_v31, %v1275_v32  ;;  %v1322_v31 = vld [vmem:[#allocation2 + $0x22a0] sm:$0xff]  ;;  %v1319_v32 = vld [vmem:[#allocation2 + $0x2288] sm:$0xff] }
 0x2b4   :  { %9788 = vmatpush1.bf16.msra.mxu0 %v15149_v40  ;;  %10280 = vmatpush1.bf16.msra.mxu1 %v15151_v41  ;;  %v1282_v40 = vld [vmem:[#allocation2 + $0x2160] sm:$0xff]  ;;  %v1279_v41 = vld [vmem:[#allocation2 + $0x2148] sm:$0xff] }
 0x2b5   :  { %9789 = vmatprep.subr.bf16.mxu0 %v15158_v42  ;;  %10281 = vmatprep.subr.bf16.mxu1 %v15160_v43  ;;  %v1283_v42 = vld [vmem:[#allocation2 + $0x2168] sm:$0xff]  ;;  %v15197_v43 = vcombine.low %v1270_v28, %v1274_v30  ;;  %v15206_v46 = vcombine.high %v1278_v38, %v1282_v40  ;;  %v1318_v30 = vld [vmem:[#allocation2 + $0x2280] sm:$0xff] }
 0x2b6   :  { %v15208_v47 = vcombine.high %v1279_v41, %v1283_v42 }
 0x2b8   :  { %9790 = vmatpush1.bf16.msra.mxu0 %v15157_v50  ;;  %10282 = vmatpush1.bf16.msra.mxu1 %v15159_v52  ;;  %v1290_v50 = vld [vmem:[#allocation2 + $0x21a0] sm:$0xff]  ;;  %v1291_v52 = vld [vmem:[#allocation2 + $0x21a8] sm:$0xff] }
 0x2b9   :  { %9800 = vmatprep.subr.bf16.mxu0 %v15166_v53  ;;  %10292 = vmatprep.subr.bf16.mxu1 %v15168_v55  ;;  %v15205_v53 = vcombine.low %v1278_v38, %v1282_v40  ;;  %v15207_v55 = vcombine.low %v1279_v41, %v1283_v42  ;;  %v15214_v58 = vcombine.high %v1286_v49, %v1290_v50  ;;  %v1326_v40 = vld [vmem:[#allocation2 + $0x22c0] sm:$0xff]  ;;  %v1327_v42 = vld [vmem:[#allocation2 + $0x22c8] sm:$0xff] }
 0x2ba   :  { %v15216_v59 = vcombine.high %v1287_v51, %v1291_v52  ;;  %v1330_v41 = vld [vmem:[#allocation2 + $0x22e0] sm:$0xff] }
 0x2bb   :  { %9792 = vmatmul.mubr.bf16.vlgmr.msra.gmra.mrb[0].mxu0 %v17383_v60  ;;  %10284 = vmatmul.mubr.bf16.vlgmr.msra.gmra.mrb[0].mxu1 %v17383_v60 }
 0x2bc   :  { %9801 = vmatpush1.bf16.msra.mxu0 %v15165_v0  ;;  %10293 = vmatpush1.bf16.msra.mxu1 %v15167_v2  ;;  %v1299_v0 = vld [vmem:[#allocation2 + $0x21e8] sm:$0xff]  ;;  %v15213_v2 = vcombine.low %v1286_v49, %v1290_v50  ;;  %v1334_v50 = vld [vmem:[#allocation2 + $0x2300] sm:$0xff] }
 0x2bd   :  { %9802 = vmatprep.subr.bf16.mxu0 %v15174_v3  ;;  %10294 = vmatprep.subr.bf16.mxu1 %v15176_v4  ;;  %v15215_v3 = vcombine.low %v1287_v51, %v1291_v52  ;;  %v15222_v4 = vcombine.high %v1294_v61, %v1298_v62  ;;  %v15224_v5 = vcombine.high %v1295_v63, %v1299_v0  ;;  %v1338_v51 = vld [vmem:[#allocation2 + $0x2320] sm:$0xff]  ;;  %v1335_v52 = vld [vmem:[#allocation2 + $0x2308] sm:$0xff] }
 0x2be   :  { %9832 = vmatprep.mubr.bf16.mxu0 %v17388_v7  ;;  %10324 = vmatprep.mubr.bf16.mxu1 %v17388_v7 }
 0x2c0   :  { %9803 = vmatpush1.bf16.msra.mxu0 %v15173_v10  ;;  %10295 = vmatpush1.bf16.msra.mxu1 %v15175_v11  ;;  %v1307_v10 = vld [vmem:[#allocation2 + $0x2228] sm:$0xff]  ;;  %v15221_v11 = vcombine.low %v1294_v61, %v1298_v62  ;;  %v1342_v62 = vld [vmem:[#allocation2 + $0x2340] sm:$0xff] }
 0x2c1   :  { %9804 = vmatprep.subr.bf16.mxu0 %v15182_v13  ;;  %10296 = vmatprep.subr.bf16.mxu1 %v15184_v15  ;;  %v15223_v13 = vcombine.low %v1295_v63, %v1299_v0  ;;  %v15230_v15 = vcombine.high %v1302_v6, %v1306_v8  ;;  %v15232_v17 = vcombine.high %v1303_v9, %v1307_v10  ;;  %v1346_v63 = vld [vmem:[#allocation2 + $0x2360] sm:$0xff]  ;;  %v1343_v0 = vld [vmem:[#allocation2 + $0x2348] sm:$0xff] }
 0x2c4   :  { %9805 = vmatpush1.bf16.msra.mxu0 %v15181_v21  ;;  %10297 = vmatpush1.bf16.msra.mxu1 %v15183_v22  ;;  %v1315_v21 = vld [vmem:[#allocation2 + $0x2268] sm:$0xff]  ;;  %v15229_v22 = vcombine.low %v1302_v6, %v1306_v8  ;;  %v1350_v8 = vld [vmem:[#allocation2 + $0x2380] sm:$0xff] }
 0x2c5   :  { %9806 = vmatprep.subr.bf16.mxu0 %v15190_v24  ;;  %10298 = vmatprep.subr.bf16.mxu1 %v15192_v27  ;;  %v15231_v24 = vcombine.low %v1303_v9, %v1307_v10  ;;  %v15238_v27 = vcombine.high %v1310_v18, %v1314_v19  ;;  %v15240_v28 = vcombine.high %v1311_v20, %v1315_v21  ;;  %v1354_v9 = vld [vmem:[#allocation2 + $0x23a0] sm:$0xff]  ;;  %v1351_v10 = vld [vmem:[#allocation2 + $0x2388] sm:$0xff] }
 0x2c8   :  { %9807 = vmatpush1.bf16.msra.mxu0 %v15189_v33  ;;  %10299 = vmatpush1.bf16.msra.mxu1 %v15191_v35  ;;  %v1323_v33 = vld [vmem:[#allocation2 + $0x22a8] sm:$0xff]  ;;  %v15237_v35 = vcombine.low %v1310_v18, %v1314_v19  ;;  %v1358_v19 = vld [vmem:[#allocation2 + $0x23c0] sm:$0xff] }
 0x2c9   :  { %9808 = vmatprep.subr.bf16.mxu0 %v15198_v36  ;;  %10300 = vmatprep.subr.bf16.mxu1 %v15200_v37  ;;  %v15239_v36 = vcombine.low %v1311_v20, %v1315_v21  ;;  %v15246_v37 = vcombine.high %v1318_v30, %v1322_v31  ;;  %v15248_v38 = vcombine.high %v1319_v32, %v1323_v33  ;;  %v1362_v20 = vld [vmem:[#allocation2 + $0x23e0] sm:$0xff]  ;;  %v1359_v21 = vld [vmem:[#allocation2 + $0x23c8] sm:$0xff] }
 0x2cc   :  { %9809 = vmatpush1.bf16.msra.mxu0 %v15197_v43  ;;  %10301 = vmatpush1.bf16.msra.mxu1 %v15199_v45  ;;  %v1331_v43 = vld [vmem:[#allocation2 + $0x22e8] sm:$0xff]  ;;  %v15245_v45 = vcombine.low %v1318_v30, %v1322_v31  ;;  %v1366_v31 = vld [vmem:[#allocation2 + $0x2400] sm:$0xff] }
 0x2cd   :  { %9810 = vmatprep.subr.bf16.mxu0 %v15206_v46  ;;  %10302 = vmatprep.subr.bf16.mxu1 %v15208_v47  ;;  %v15247_v46 = vcombine.low %v1319_v32, %v1323_v33  ;;  %v15254_v47 = vcombine.high %v1326_v40, %v1330_v41  ;;  %v15256_v49 = vcombine.high %v1327_v42, %v1331_v43  ;;  %v1370_v32 = vld [vmem:[#allocation2 + $0x2420] sm:$0xff]  ;;  %v1367_v33 = vld [vmem:[#allocation2 + $0x2408] sm:$0xff] }
 0x2d0   :  { %9811 = vmatpush1.bf16.msra.mxu0 %v15205_v53  ;;  %10303 = vmatpush1.bf16.msra.mxu1 %v15207_v55  ;;  %v1339_v53 = vld [vmem:[#allocation2 + $0x2328] sm:$0xff]  ;;  %v15253_v55 = vcombine.low %v1326_v40, %v1330_v41  ;;  %v15294_v40 = vcombine.high %v1366_v31, %v1370_v32 }
 0x2d1   :  { %9812 = vmatprep.subr.bf16.mxu0 %v15214_v58  ;;  %10304 = vmatprep.subr.bf16.mxu1 %v15216_v59  ;;  %v15255_v58 = vcombine.low %v1327_v42, %v1331_v43  ;;  %v15262_v59 = vcombine.high %v1334_v50, %v1338_v51  ;;  %v15264_v61 = vcombine.high %v1335_v52, %v1339_v53  ;;  %v1374_v42 = vld [vmem:[#allocation2 + $0x2440] sm:$0xff] }
 0x2d2   :  { %v1378_v43 = vld [vmem:[#allocation2 + $0x2460] sm:$0xff] }
 0x2d4   :  { %9813 = vmatpush1.bf16.msra.mxu0 %v15213_v2  ;;  %10305 = vmatpush1.bf16.msra.mxu1 %v15215_v3  ;;  %v1347_v2 = vld [vmem:[#allocation2 + $0x2368] sm:$0xff]  ;;  %v15261_v3 = vcombine.low %v1334_v50, %v1338_v51  ;;  %v15293_v50 = vcombine.low %v1366_v31, %v1370_v32 }
 0x2d5   :  { %9814 = vmatprep.subr.bf16.mxu0 %v15222_v4  ;;  %10306 = vmatprep.subr.bf16.mxu1 %v15224_v5  ;;  %v15263_v4 = vcombine.low %v1335_v52, %v1339_v53  ;;  %v15270_v5 = vcombine.high %v1342_v62, %v1346_v63  ;;  %v15272_v6 = vcombine.high %v1343_v0, %v1347_v2  ;;  %v1411_v31 = vld [vmem:[#allocation2 + $0x2568] sm:$0xff] }
 0x2d6   :  { %v15302_v52 = vcombine.high %v1374_v42, %v1378_v43 }
 0x2d8   :  { %9815 = vmatpush1.bf16.msra.mxu0 %v15221_v11  ;;  %10307 = vmatpush1.bf16.msra.mxu1 %v15223_v13  ;;  %v1355_v11 = vld [vmem:[#allocation2 + $0x23a8] sm:$0xff]  ;;  %v15269_v13 = vcombine.low %v1342_v62, %v1346_v63  ;;  %v15301_v63 = vcombine.low %v1374_v42, %v1378_v43 }
 0x2d9   :  { %9816 = vmatprep.subr.bf16.mxu0 %v15230_v15  ;;  %10308 = vmatprep.subr.bf16.mxu1 %v15232_v17  ;;  %v15271_v15 = vcombine.low %v1343_v0, %v1347_v2  ;;  %v15278_v17 = vcombine.high %v1350_v8, %v1354_v9  ;;  %v15280_v18 = vcombine.high %v1351_v10, %v1355_v11  ;;  %v1387_v62 = vld [vmem:[#allocation2 + $0x24a8] sm:$0xff] }
 0x2dc   :  { %9817 = vmatpush1.bf16.msra.mxu0 %v15229_v22  ;;  %10309 = vmatpush1.bf16.msra.mxu1 %v15231_v24  ;;  %v1363_v22 = vld [vmem:[#allocation2 + $0x23e8] sm:$0xff]  ;;  %v15277_v24 = vcombine.low %v1350_v8, %v1354_v9 }
 0x2dd   :  { %9818 = vmatprep.subr.bf16.mxu0 %v15238_v27  ;;  %10310 = vmatprep.subr.bf16.mxu1 %v15240_v28  ;;  %v15279_v27 = vcombine.low %v1351_v10, %v1355_v11  ;;  %v15286_v28 = vcombine.high %v1358_v19, %v1362_v20  ;;  %v15288_v30 = vcombine.high %v1359_v21, %v1363_v22  ;;  %v1395_v8 = vld [vmem:[#allocation2 + $0x24e8] sm:$0xff] }
 0x2e0   :  { %9819 = vmatpush1.bf16.msra.mxu0 %v15237_v35  ;;  %10311 = vmatpush1.bf16.msra.mxu1 %v15239_v36  ;;  %v1371_v35 = vld [vmem:[#allocation2 + $0x2428] sm:$0xff]  ;;  %v15285_v36 = vcombine.low %v1358_v19, %v1362_v20 }
 0x2e1   :  { %9820 = vmatprep.subr.bf16.mxu0 %v15246_v37  ;;  %10312 = vmatprep.subr.bf16.mxu1 %v15248_v38  ;;  %v182_v37 = vld [vmem:[%s17564_s0 + $0x80] sm:$0xff]  ;;  %v15287_v38 = vcombine.low %v1359_v21, %v1363_v22  ;;  %v15296_v41 = vcombine.high %v1367_v33, %v1371_v35  ;;  %v15295_v51 = vcombine.low %v1367_v33, %v1371_v35  ;;  %v1403_v19 = vld [vmem:[#allocation2 + $0x2528] sm:$0xff] }
 0x2e4   :  { %9821 = vmatpush1.bf16.msra.mxu0 %v15245_v45  ;;  %10313 = vmatpush1.bf16.msra.mxu1 %v15247_v46  ;;  %v17397_v45 = vpack.c.bf16 %v182_v37, %v182_v37  ;;  %v1375_v46 = vld [vmem:[#allocation2 + $0x2448] sm:$0xff]  ;;  %v1414_v37 = vld [vmem:[#allocation2 + $0x2580] sm:$0xff] }
 0x2e5   :  { %9822 = vmatprep.subr.bf16.mxu0 %v15254_v47  ;;  %10314 = vmatprep.subr.bf16.mxu1 %v15256_v49  ;;  %v1379_v47 = vld [vmem:[#allocation2 + $0x2468] sm:$0xff]  ;;  %v185_v49 = vld [vmem:[%s17564_s0 + $0x98] sm:$0xff] }
 0x2e6   :  { %v15304_v53 = vcombine.high %v1375_v46, %v1379_v47  ;;  %v15303_v0 = vcombine.low %v1375_v46, %v1379_v47 }
 0x2e8   :  { %9823 = vmatpush1.bf16.msra.mxu0 %v15253_v55  ;;  %10315 = vmatpush1.bf16.msra.mxu1 %v15255_v58  ;;  %v1382_v55 = vld [vmem:[#allocation2 + $0x2480] sm:$0xff] }
 0x2e9   :  { %9824 = vmatprep.subr.bf16.mxu0 %v15262_v59  ;;  %10316 = vmatprep.subr.bf16.mxu1 %v15264_v61  ;;  %v1386_v58 = vld [vmem:[#allocation2 + $0x24a0] sm:$0xff]  ;;  %v17402_v59 = vpack.c.bf16 %v185_v49, %v185_v49  ;;  %v1383_v61 = vld [vmem:[#allocation2 + $0x2488] sm:$0xff] }
 0x2ea   :  { %v15310_v2 = vcombine.high %v1382_v55, %v1386_v58  ;;  %v15309_v9 = vcombine.low %v1382_v55, %v1386_v58  ;;  %v15311_v10 = vcombine.low %v1383_v61, %v1387_v62  ;;  %v1422_v49 = vld [vmem:[#allocation2 + $0x25c0] sm:$0xff] }
 0x2ec   :  { %9825 = vmatpush1.bf16.msra.mxu0 %v15261_v3  ;;  %10317 = vmatpush1.bf16.msra.mxu1 %v15263_v4  ;;  %v15312_v3 = vcombine.high %v1383_v61, %v1387_v62  ;;  %v1390_v4 = vld [vmem:[#allocation2 + $0x24c0] sm:$0xff] }
 0x2ed   :  { %9826 = vmatprep.subr.bf16.mxu0 %v15270_v5  ;;  %10318 = vmatprep.subr.bf16.mxu1 %v15272_v6  ;;  %v1394_v5 = vld [vmem:[#allocation2 + $0x24e0] sm:$0xff]  ;;  %v1391_v6 = vld [vmem:[#allocation2 + $0x24c8] sm:$0xff] }
 0x2ee   :  { %v15318_v11 = vcombine.high %v1390_v4, %v1394_v5  ;;  %v15317_v20 = vcombine.low %v1390_v4, %v1394_v5  ;;  %v15319_v21 = vcombine.low %v1391_v6, %v1395_v8  ;;  %v1430_v62 = vld [vmem:[#allocation2 + $0x2600] sm:$0xff] }
 0x2f0   :  { %9827 = vmatpush1.bf16.msra.mxu0 %v15269_v13  ;;  %10319 = vmatpush1.bf16.msra.mxu1 %v15271_v15  ;;  %v15320_v13 = vcombine.high %v1391_v6, %v1395_v8  ;;  %v1398_v15 = vld [vmem:[#allocation2 + $0x2500] sm:$0xff] }
 0x2f1   :  { %9828 = vmatprep.subr.bf16.mxu0 %v15278_v17  ;;  %10320 = vmatprep.subr.bf16.mxu1 %v15280_v18  ;;  %v1402_v17 = vld [vmem:[#allocation2 + $0x2520] sm:$0xff]  ;;  %v1399_v18 = vld [vmem:[#allocation2 + $0x2508] sm:$0xff] }
 0x2f2   :  { %v15326_v22 = vcombine.high %v1398_v15, %v1402_v17  ;;  %v15325_v32 = vcombine.low %v1398_v15, %v1402_v17  ;;  %v15327_v33 = vcombine.low %v1399_v18, %v1403_v19  ;;  %v1438_v8 = vld [vmem:[#allocation2 + $0x2640] sm:$0xff] }
 0x2f4   :  { %9829 = vmatpush1.bf16.msra.mxu0 %v15277_v24  ;;  %10321 = vmatpush1.bf16.msra.mxu1 %v15279_v27  ;;  %v15328_v24 = vcombine.high %v1399_v18, %v1403_v19  ;;  %v1406_v27 = vld [vmem:[#allocation2 + $0x2540] sm:$0xff] }
 0x2f5   :  { %9830 = vmatprep.subr.bf16.mxu0 %v15286_v28  ;;  %10322 = vmatprep.subr.bf16.mxu1 %v15288_v30  ;;  %v1410_v28 = vld [vmem:[#allocation2 + $0x2560] sm:$0xff]  ;;  %v1407_v30 = vld [vmem:[#allocation2 + $0x2548] sm:$0xff] }
 0x2f6   :  { %v15334_v35 = vcombine.high %v1406_v27, %v1410_v28  ;;  %v15333_v42 = vcombine.low %v1406_v27, %v1410_v28  ;;  %v15335_v43 = vcombine.low %v1407_v30, %v1411_v31  ;;  %v1446_v19 = vld [vmem:[#allocation2 + $0x2680] sm:$0xff] }
 0x2f8   :  { %9831 = vmatpush1.bf16.msra.mxu0 %v15285_v36  ;;  %10323 = vmatpush1.bf16.msra.mxu1 %v15287_v38  ;;  %v15336_v36 = vcombine.high %v1407_v30, %v1411_v31  ;;  %v1418_v38 = vld [vmem:[#allocation2 + $0x25a0] sm:$0xff] }
 0x2f9   :  { %9841 = vmatprep.subr.bf16.mxu0 %v15294_v40  ;;  %10333 = vmatprep.subr.bf16.mxu1 %v15296_v41  ;;  %v1415_v40 = vld [vmem:[#allocation2 + $0x2588] sm:$0xff]  ;;  %v15342_v46 = vcombine.high %v1414_v37, %v1418_v38  ;;  %v1454_v31 = vld [vmem:[#allocation2 + $0x26c0] sm:$0xff] }
 0x2fa   :  { %v1419_v41 = vld [vmem:[#allocation2 + $0x25a8] sm:$0xff] }
 0x2fb   :  { %9833 = vmatmul.mubr.bf16.vlgmr.msra.gmra.mrb[0].mxu0 %v17397_v45  ;;  %10325 = vmatmul.mubr.bf16.vlgmr.msra.gmra.mrb[0].mxu1 %v17397_v45  ;;  %v15344_v47 = vcombine.high %v1415_v40, %v1419_v41  ;;  %v15343_v55 = vcombine.low %v1415_v40, %v1419_v41  ;;  %v1462_v41 = vld [vmem:[#allocation2 + $0x2700] sm:$0xff] }
 0x2fc   :  { %9842 = vmatpush1.bf16.msra.mxu0 %v15293_v50  ;;  %10334 = vmatpush1.bf16.msra.mxu1 %v15295_v51  ;;  %v1426_v50 = vld [vmem:[#allocation2 + $0x25e0] sm:$0xff]  ;;  %v1423_v51 = vld [vmem:[#allocation2 + $0x25c8] sm:$0xff] }
 0x2fd   :  { %9843 = vmatprep.subr.bf16.mxu0 %v15302_v52  ;;  %10335 = vmatprep.subr.bf16.mxu1 %v15304_v53  ;;  %v1427_v52 = vld [vmem:[#allocation2 + $0x25e8] sm:$0xff]  ;;  %v15341_v53 = vcombine.low %v1414_v37, %v1418_v38  ;;  %v15350_v58 = vcombine.high %v1422_v49, %v1426_v50 }
 0x2fe   :  { %9873 = vmatprep.mubr.bf16.mxu0 %v17402_v59  ;;  %10365 = vmatprep.mubr.bf16.mxu1 %v17402_v59  ;;  %v15352_v61 = vcombine.high %v1423_v51, %v1427_v52  ;;  %v15351_v4 = vcombine.low %v1423_v51, %v1427_v52  ;;  %v1470_v52 = vld [vmem:[#allocation2 + $0x2740] sm:$0xff] }
 0x300   :  { %9844 = vmatpush1.bf16.msra.mxu0 %v15301_v63  ;;  %10336 = vmatpush1.bf16.msra.mxu1 %v15303_v0  ;;  %v1434_v63 = vld [vmem:[#allocation2 + $0x2620] sm:$0xff]  ;;  %v1431_v0 = vld [vmem:[#allocation2 + $0x2608] sm:$0xff] }
 0x301   :  { %9845 = vmatprep.subr.bf16.mxu0 %v15310_v2  ;;  %10337 = vmatprep.subr.bf16.mxu1 %v15312_v3  ;;  %v1435_v2 = vld [vmem:[#allocation2 + $0x2628] sm:$0xff]  ;;  %v15349_v3 = vcombine.low %v1422_v49, %v1426_v50  ;;  %v15358_v5 = vcombine.high %v1430_v62, %v1434_v63 }
 0x302   :  { %v15360_v6 = vcombine.high %v1431_v0, %v1435_v2  ;;  %v15359_v15 = vcombine.low %v1431_v0, %v1435_v2  ;;  %v1478_v2 = vld [vmem:[#allocation2 + $0x2780] sm:$0xff] }
 0x304   :  { %9846 = vmatpush1.bf16.msra.mxu0 %v15309_v9  ;;  %10338 = vmatpush1.bf16.msra.mxu1 %v15311_v10  ;;  %v1442_v9 = vld [vmem:[#allocation2 + $0x2660] sm:$0xff]  ;;  %v1439_v10 = vld [vmem:[#allocation2 + $0x2648] sm:$0xff] }
 0x305   :  { %9847 = vmatprep.subr.bf16.mxu0 %v15318_v11  ;;  %10339 = vmatprep.subr.bf16.mxu1 %v15320_v13  ;;  %v1443_v11 = vld [vmem:[#allocation2 + $0x2668] sm:$0xff]  ;;  %v15357_v13 = vcombine.low %v1430_v62, %v1434_v63  ;;  %v15366_v17 = vcombine.high %v1438_v8, %v1442_v9 }
 0x306   :  { %v15368_v18 = vcombine.high %v1439_v10, %v1443_v11  ;;  %v15367_v27 = vcombine.low %v1439_v10, %v1443_v11  ;;  %v1486_v11 = vld [vmem:[#allocation2 + $0x27c0] sm:$0xff] }
 0x308   :  { %9848 = vmatpush1.bf16.msra.mxu0 %v15317_v20  ;;  %10340 = vmatpush1.bf16.msra.mxu1 %v15319_v21  ;;  %v1450_v20 = vld [vmem:[#allocation2 + $0x26a0] sm:$0xff]  ;;  %v1447_v21 = vld [vmem:[#allocation2 + $0x2688] sm:$0xff] }
 0x309   :  { %9849 = vmatprep.subr.bf16.mxu0 %v15326_v22  ;;  %10341 = vmatprep.subr.bf16.mxu1 %v15328_v24  ;;  %v1451_v22 = vld [vmem:[#allocation2 + $0x26a8] sm:$0xff]  ;;  %v15365_v24 = vcombine.low %v1438_v8, %v1442_v9  ;;  %v15374_v28 = vcombine.high %v1446_v19, %v1450_v20 }
 0x30a   :  { %v15376_v30 = vcombine.high %v1447_v21, %v1451_v22  ;;  %v15375_v37 = vcombine.low %v1447_v21, %v1451_v22  ;;  %v1494_v22 = vld [vmem:[#allocation2 + $0x2800] sm:$0xff] }
 0x30c   :  { %9850 = vmatpush1.bf16.msra.mxu0 %v15325_v32  ;;  %10342 = vmatpush1.bf16.msra.mxu1 %v15327_v33  ;;  %v1458_v32 = vld [vmem:[#allocation2 + $0x26e0] sm:$0xff]  ;;  %v1455_v33 = vld [vmem:[#allocation2 + $0x26c8] sm:$0xff] }
 0x30d   :  { %9851 = vmatprep.subr.bf16.mxu0 %v15334_v35  ;;  %10343 = vmatprep.subr.bf16.mxu1 %v15336_v36  ;;  %v1459_v35 = vld [vmem:[#allocation2 + $0x26e8] sm:$0xff]  ;;  %v15373_v36 = vcombine.low %v1446_v19, %v1450_v20  ;;  %v15382_v38 = vcombine.high %v1454_v31, %v1458_v32 }
 0x30e   :  { %v15384_v40 = vcombine.high %v1455_v33, %v1459_v35  ;;  %v15383_v49 = vcombine.low %v1455_v33, %v1459_v35 }
 0x310   :  { %9852 = vmatpush1.bf16.msra.mxu0 %v15333_v42  ;;  %10344 = vmatpush1.bf16.msra.mxu1 %v15335_v43  ;;  %v1466_v42 = vld [vmem:[#allocation2 + $0x2720] sm:$0xff]  ;;  %v1463_v43 = vld [vmem:[#allocation2 + $0x2708] sm:$0xff] }
 0x311   :  { %9853 = vmatprep.subr.bf16.mxu0 %v15342_v46  ;;  %10345 = vmatprep.subr.bf16.mxu1 %v15344_v47  ;;  %v1467_v46 = vld [vmem:[#allocation2 + $0x2728] sm:$0xff]  ;;  %v15381_v47 = vcombine.low %v1454_v31, %v1458_v32  ;;  %v15390_v50 = vcombine.high %v1462_v41, %v1466_v42  ;;  %v184_v31 = vld [vmem:[%s17564_s0 + $0x90] sm:$0xff] }
 0x312   :  { %v15392_v51 = vcombine.high %v1463_v43, %v1467_v46  ;;  %v15391_v62 = vcombine.low %v1463_v43, %v1467_v46 }
 0x314   :  { %9854 = vmatpush1.bf16.msra.mxu0 %v15341_v53  ;;  %10346 = vmatpush1.bf16.msra.mxu1 %v15343_v55  ;;  %v1474_v53 = vld [vmem:[#allocation2 + $0x2760] sm:$0xff]  ;;  %v1471_v55 = vld [vmem:[#allocation2 + $0x2748] sm:$0xff] }
 0x315   :  { %9855 = vmatprep.subr.bf16.mxu0 %v15350_v58  ;;  %10347 = vmatprep.subr.bf16.mxu1 %v15352_v61  ;;  %v1475_v58 = vld [vmem:[#allocation2 + $0x2768] sm:$0xff]  ;;  %v15389_v61 = vcombine.low %v1462_v41, %v1466_v42  ;;  %v15398_v63 = vcombine.high %v1470_v52, %v1474_v53 }
 0x316   :  { %v15400_v0 = vcombine.high %v1471_v55, %v1475_v58  ;;  %v15399_v8 = vcombine.low %v1471_v55, %v1475_v58  ;;  %v1507_v41 = vld [vmem:[#allocation2 + $0x2868] sm:$0xff] }
 0x317   :  { %v187_v42 = vld [vmem:[%s17564_s0 + $0xa8] sm:$0xff] }
 0x318   :  { %9856 = vmatpush1.bf16.msra.mxu0 %v15349_v3  ;;  %10348 = vmatpush1.bf16.msra.mxu1 %v15351_v4  ;;  %v1482_v3 = vld [vmem:[#allocation2 + $0x27a0] sm:$0xff]  ;;  %v1479_v4 = vld [vmem:[#allocation2 + $0x2788] sm:$0xff] }
 0x319   :  { %9857 = vmatprep.subr.bf16.mxu0 %v15358_v5  ;;  %10349 = vmatprep.subr.bf16.mxu1 %v15360_v6  ;;  %v1483_v5 = vld [vmem:[#allocation2 + $0x27a8] sm:$0xff]  ;;  %v15397_v6 = vcombine.low %v1470_v52, %v1474_v53  ;;  %v15406_v9 = vcombine.high %v1478_v2, %v1482_v3  ;;  %v17416_v52 = vpack.c.bf16 %v187_v42, %v187_v42 }
 0x31a   :  { %v15408_v10 = vcombine.high %v1479_v4, %v1483_v5  ;;  %v15407_v19 = vcombine.low %v1479_v4, %v1483_v5  ;;  %v1511_v53 = vld [vmem:[#allocation2 + $0x2888] sm:$0xff] }
 0x31b   :  { %v1515_v55 = vld [vmem:[#allocation2 + $0x28a8] sm:$0xff] }
 0x31c   :  { %9858 = vmatpush1.bf16.msra.mxu0 %v15357_v13  ;;  %10350 = vmatpush1.bf16.msra.mxu1 %v15359_v15  ;;  %v1490_v13 = vld [vmem:[#allocation2 + $0x27e0] sm:$0xff]  ;;  %v1487_v15 = vld [vmem:[#allocation2 + $0x27c8] sm:$0xff] }
 0x31d   :  { %9859 = vmatprep.subr.bf16.mxu0 %v15366_v17  ;;  %10351 = vmatprep.subr.bf16.mxu1 %v15368_v18  ;;  %v1491_v17 = vld [vmem:[#allocation2 + $0x27e8] sm:$0xff]  ;;  %v15405_v18 = vcombine.low %v1478_v2, %v1482_v3  ;;  %v15414_v20 = vcombine.high %v1486_v11, %v1490_v13  ;;  %v1522_v2 = vld [vmem:[#allocation2 + $0x28e0] sm:$0xff] }
 0x31e   :  { %v15416_v21 = vcombine.high %v1487_v15, %v1491_v17  ;;  %v15415_v32 = vcombine.low %v1487_v15, %v1491_v17  ;;  %v1519_v3 = vld [vmem:[#allocation2 + $0x28c8] sm:$0xff] }
 0x31f   :  { %v1523_v4 = vld [vmem:[#allocation2 + $0x28e8] sm:$0xff] }
 0x320   :  { %9860 = vmatpush1.bf16.msra.mxu0 %v15365_v24  ;;  %10352 = vmatpush1.bf16.msra.mxu1 %v15367_v27  ;;  %v1498_v24 = vld [vmem:[#allocation2 + $0x2820] sm:$0xff]  ;;  %v1495_v27 = vld [vmem:[#allocation2 + $0x2808] sm:$0xff] }
 0x321   :  { %9861 = vmatprep.subr.bf16.mxu0 %v15374_v28  ;;  %10353 = vmatprep.subr.bf16.mxu1 %v15376_v30  ;;  %v1499_v28 = vld [vmem:[#allocation2 + $0x2828] sm:$0xff]  ;;  %v15413_v30 = vcombine.low %v1486_v11, %v1490_v13  ;;  %v15422_v33 = vcombine.high %v1494_v22, %v1498_v24  ;;  %v15421_v43 = vcombine.low %v1494_v22, %v1498_v24  ;;  %v1530_v11 = vld [vmem:[#allocation2 + $0x2920] sm:$0xff] }
 0x322   :  { %v15424_v35 = vcombine.high %v1495_v27, %v1499_v28  ;;  %v15423_v46 = vcombine.low %v1495_v27, %v1499_v28  ;;  %v1527_v13 = vld [vmem:[#allocation2 + $0x2908] sm:$0xff]  ;;  %v1538_v22 = vld [vmem:[#allocation2 + $0x2960] sm:$0xff] }
 0x323   :  { %v1531_v15 = vld [vmem:[#allocation2 + $0x2928] sm:$0xff] }
 0x324   :  { %9862 = vmatpush1.bf16.msra.mxu0 %v15373_v36  ;;  %10354 = vmatpush1.bf16.msra.mxu1 %v15375_v37  ;;  %v1502_v36 = vld [vmem:[#allocation2 + $0x2840] sm:$0xff]  ;;  %v1535_v24 = vld [vmem:[#allocation2 + $0x2948] sm:$0xff] }
 0x325   :  { %9863 = vmatprep.subr.bf16.mxu0 %v15382_v38  ;;  %10355 = vmatprep.subr.bf16.mxu1 %v15384_v40  ;;  %v1506_v37 = vld [vmem:[#allocation2 + $0x2860] sm:$0xff]  ;;  %v17411_v38 = vpack.c.bf16 %v184_v31, %v184_v31  ;;  %v1503_v40 = vld [vmem:[#allocation2 + $0x2848] sm:$0xff] }
 0x326   :  { %v15429_v58 = vcombine.low %v1502_v36, %v1506_v37  ;;  %v1539_v27 = vld [vmem:[#allocation2 + $0x2968] sm:$0xff] }
 0x328   :  { %9864 = vmatpush1.bf16.msra.mxu0 %v15381_v47  ;;  %10356 = vmatpush1.bf16.msra.mxu1 %v15383_v49  ;;  %v15430_v47 = vcombine.high %v1502_v36, %v1506_v37  ;;  %v15432_v49 = vcombine.high %v1503_v40, %v1507_v41  ;;  %v1543_v36 = vld [vmem:[#allocation2 + $0x2988] sm:$0xff] }
 0x329   :  { %9865 = vmatprep.subr.bf16.mxu0 %v15390_v50  ;;  %10357 = vmatprep.subr.bf16.mxu1 %v15392_v51  ;;  %v1510_v50 = vld [vmem:[#allocation2 + $0x2880] sm:$0xff]  ;;  %v1547_v37 = vld [vmem:[#allocation2 + $0x29a8] sm:$0xff] }
 0x32a   :  { %v1514_v51 = vld [vmem:[#allocation2 + $0x28a0] sm:$0xff] }
 0x32b   :  { %v15437_v5 = vcombine.low %v1510_v50, %v1514_v51 }
 0x32c   :  { %9866 = vmatpush1.bf16.msra.mxu0 %v15389_v61  ;;  %10358 = vmatpush1.bf16.msra.mxu1 %v15391_v62  ;;  %v15431_v61 = vcombine.low %v1503_v40, %v1507_v41  ;;  %v15438_v62 = vcombine.high %v1510_v50, %v1514_v51  ;;  %v15463_v41 = vcombine.low %v1535_v24, %v1539_v27  ;;  %v1555_v50 = vld [vmem:[#allocation2 + $0x29e8] sm:$0xff] }
 0x32d   :  { %9867 = vmatprep.subr.bf16.mxu0 %v15398_v63  ;;  %10359 = vmatprep.subr.bf16.mxu1 %v15400_v0  ;;  %v15440_v63 = vcombine.high %v1511_v53, %v1515_v55  ;;  %v1518_v0 = vld [vmem:[#allocation2 + $0x28c0] sm:$0xff] }
 0x32e   :  { %v15445_v17 = vcombine.low %v1518_v0, %v1522_v2 }
 0x330   :  { %9868 = vmatpush1.bf16.msra.mxu0 %v15397_v6  ;;  %10360 = vmatpush1.bf16.msra.mxu1 %v15399_v8  ;;  %v15439_v6 = vcombine.low %v1511_v53, %v1515_v55  ;;  %v15446_v8 = vcombine.high %v1518_v0, %v1522_v2  ;;  %v15471_v53 = vcombine.low %v1543_v36, %v1547_v37  ;;  %v1563_v0 = vld [vmem:[#allocation2 + $0x2a28] sm:$0xff] }
 0x331   :  { %9869 = vmatprep.subr.bf16.mxu0 %v15406_v9  ;;  %10361 = vmatprep.subr.bf16.mxu1 %v15408_v10  ;;  %v15448_v9 = vcombine.high %v1519_v3, %v1523_v4  ;;  %v1526_v10 = vld [vmem:[#allocation2 + $0x2900] sm:$0xff] }
 0x332   :  { %v15453_v28 = vcombine.low %v1526_v10, %v1530_v11 }
 0x334   :  { %9870 = vmatpush1.bf16.msra.mxu0 %v15405_v18  ;;  %10362 = vmatpush1.bf16.msra.mxu1 %v15407_v19  ;;  %v15447_v18 = vcombine.low %v1519_v3, %v1523_v4  ;;  %v15454_v19 = vcombine.high %v1526_v10, %v1530_v11  ;;  %v1571_v10 = vld [vmem:[#allocation2 + $0x2a68] sm:$0xff] }
 0x335   :  { %9871 = vmatprep.subr.bf16.mxu0 %v15414_v20  ;;  %10363 = vmatprep.subr.bf16.mxu1 %v15416_v21  ;;  %v15456_v20 = vcombine.high %v1527_v13, %v1531_v15  ;;  %v1534_v21 = vld [vmem:[#allocation2 + $0x2940] sm:$0xff] }
 0x336   :  { %v15462_v31 = vcombine.high %v1534_v21, %v1538_v22  ;;  %v15461_v40 = vcombine.low %v1534_v21, %v1538_v22  ;;  %v1579_v21 = vld [vmem:[#allocation2 + $0x2aa8] sm:$0xff] }
 0x338   :  { %9872 = vmatpush1.bf16.msra.mxu0 %v15413_v30  ;;  %10364 = vmatpush1.bf16.msra.mxu1 %v15415_v32  ;;  %v15455_v30 = vcombine.low %v1527_v13, %v1531_v15  ;;  %v15464_v32 = vcombine.high %v1535_v24, %v1539_v27 }
 0x339   :  { %9882 = vmatprep.subr.bf16.mxu0 %v15422_v33  ;;  %10374 = vmatprep.subr.bf16.mxu1 %v15424_v35  ;;  %v1542_v33 = vld [vmem:[#allocation2 + $0x2980] sm:$0xff] }
 0x33a   :  { %v1546_v35 = vld [vmem:[#allocation2 + $0x29a0] sm:$0xff] }
 0x33b   :  { %9874 = vmatmul.mubr.bf16.vlgmr.msra.gmra.mrb[0].mxu0 %v17411_v38  ;;  %10366 = vmatmul.mubr.bf16.vlgmr.msra.gmra.mrb[0].mxu1 %v17411_v38  ;;  %v15470_v42 = vcombine.high %v1542_v33, %v1546_v35  ;;  %v15469_v51 = vcombine.low %v1542_v33, %v1546_v35  ;;  %v1587_v33 = vld [vmem:[#allocation2 + $0x2ae8] sm:$0xff] }
 0x33c   :  { %9883 = vmatpush1.bf16.msra.mxu0 %v15421_v43  ;;  %10375 = vmatpush1.bf16.msra.mxu1 %v15423_v46  ;;  %v15472_v43 = vcombine.high %v1543_v36, %v1547_v37  ;;  %v1550_v46 = vld [vmem:[#allocation2 + $0x29c0] sm:$0xff] }
 0x33d   :  { %9884 = vmatprep.subr.bf16.mxu0 %v15430_v47  ;;  %10376 = vmatprep.subr.bf16.mxu1 %v15432_v49  ;;  %v1554_v47 = vld [vmem:[#allocation2 + $0x29e0] sm:$0xff]  ;;  %v1551_v49 = vld [vmem:[#allocation2 + $0x29c8] sm:$0xff] }
 0x33e   :  { %9914 = vmatprep.mubr.bf16.mxu0 %v17416_v52  ;;  %10406 = vmatprep.mubr.bf16.mxu1 %v17416_v52  ;;  %v15478_v55 = vcombine.high %v1550_v46, %v1554_v47  ;;  %v15477_v2 = vcombine.low %v1550_v46, %v1554_v47  ;;  %v15479_v3 = vcombine.low %v1551_v49, %v1555_v50  ;;  %v1595_v46 = vld [vmem:[#allocation2 + $0x2b28] sm:$0xff] }
 0x340   :  { %9885 = vmatpush1.bf16.msra.mxu0 %v15429_v58  ;;  %10377 = vmatpush1.bf16.msra.mxu1 %v15431_v61  ;;  %v15480_v58 = vcombine.high %v1551_v49, %v1555_v50  ;;  %v1558_v61 = vld [vmem:[#allocation2 + $0x2a00] sm:$0xff] }
 0x341   :  { %9886 = vmatprep.subr.bf16.mxu0 %v15438_v62  ;;  %10378 = vmatprep.subr.bf16.mxu1 %v15440_v63  ;;  %v1562_v62 = vld [vmem:[#allocation2 + $0x2a20] sm:$0xff]  ;;  %v1559_v63 = vld [vmem:[#allocation2 + $0x2a08] sm:$0xff] }
 0x342   :  { %v15486_v4 = vcombine.high %v1558_v61, %v1562_v62  ;;  %v15485_v11 = vcombine.low %v1558_v61, %v1562_v62  ;;  %v15487_v13 = vcombine.low %v1559_v63, %v1563_v0  ;;  %v1603_v61 = vld [vmem:[#allocation2 + $0x2b68] sm:$0xff] }
 0x344   :  { %9887 = vmatpush1.bf16.msra.mxu0 %v15437_v5  ;;  %10379 = vmatpush1.bf16.msra.mxu1 %v15439_v6  ;;  %v15488_v5 = vcombine.high %v1559_v63, %v1563_v0  ;;  %v1566_v6 = vld [vmem:[#allocation2 + $0x2a40] sm:$0xff] }
 0x345   :  { %9888 = vmatprep.subr.bf16.mxu0 %v15446_v8  ;;  %10380 = vmatprep.subr.bf16.mxu1 %v15448_v9  ;;  %v1570_v8 = vld [vmem:[#allocation2 + $0x2a60] sm:$0xff]  ;;  %v1567_v9 = vld [vmem:[#allocation2 + $0x2a48] sm:$0xff] }
 0x346   :  { %v15494_v15 = vcombine.high %v1566_v6, %v1570_v8  ;;  %v15493_v22 = vcombine.low %v1566_v6, %v1570_v8  ;;  %v15495_v24 = vcombine.low %v1567_v9, %v1571_v10  ;;  %v1611_v6 = vld [vmem:[#allocation2 + $0x2ba8] sm:$0xff] }
 0x348   :  { %9889 = vmatpush1.bf16.msra.mxu0 %v15445_v17  ;;  %10381 = vmatpush1.bf16.msra.mxu1 %v15447_v18  ;;  %v15496_v17 = vcombine.high %v1567_v9, %v1571_v10  ;;  %v1574_v18 = vld [vmem:[#allocation2 + $0x2a80] sm:$0xff] }
 0x349   :  { %9890 = vmatprep.subr.bf16.mxu0 %v15454_v19  ;;  %10382 = vmatprep.subr.bf16.mxu1 %v15456_v20  ;;  %v1578_v19 = vld [vmem:[#allocation2 + $0x2aa0] sm:$0xff]  ;;  %v1575_v20 = vld [vmem:[#allocation2 + $0x2a88] sm:$0xff] }
 0x34a   :  { %v15502_v27 = vcombine.high %v1574_v18, %v1578_v19  ;;  %v15501_v35 = vcombine.low %v1574_v18, %v1578_v19  ;;  %v15503_v36 = vcombine.low %v1575_v20, %v1579_v21  ;;  %v1619_v18 = vld [vmem:[#allocation2 + $0x2be8] sm:$0xff] }
 0x34c   :  { %9891 = vmatpush1.bf16.msra.mxu0 %v15453_v28  ;;  %10383 = vmatpush1.bf16.msra.mxu1 %v15455_v30  ;;  %v15504_v28 = vcombine.high %v1575_v20, %v1579_v21  ;;  %v1582_v30 = vld [vmem:[#allocation2 + $0x2ac0] sm:$0xff] }
 0x34d   :  { %9892 = vmatprep.subr.bf16.mxu0 %v15462_v31  ;;  %10384 = vmatprep.subr.bf16.mxu1 %v15464_v32  ;;  %v1586_v31 = vld [vmem:[#allocation2 + $0x2ae0] sm:$0xff]  ;;  %v1583_v32 = vld [vmem:[#allocation2 + $0x2ac8] sm:$0xff] }
 0x34e   :  { %v15510_v37 = vcombine.high %v1582_v30, %v1586_v31  ;;  %v15509_v47 = vcombine.low %v1582_v30, %v1586_v31  ;;  %v15511_v49 = vcombine.low %v1583_v32, %v1587_v33  ;;  %v1627_v30 = vld [vmem:[#allocation2 + $0x2c28] sm:$0xff] }
 0x350   :  { %9893 = vmatpush1.bf16.msra.mxu0 %v15461_v40  ;;  %10385 = vmatpush1.bf16.msra.mxu1 %v15463_v41  ;;  %v15512_v40 = vcombine.high %v1583_v32, %v1587_v33  ;;  %v1590_v41 = vld [vmem:[#allocation2 + $0x2b00] sm:$0xff] }
 0x351   :  { %9894 = vmatprep.subr.bf16.mxu0 %v15470_v42  ;;  %10386 = vmatprep.subr.bf16.mxu1 %v15472_v43  ;;  %v1594_v42 = vld [vmem:[#allocation2 + $0x2b20] sm:$0xff]  ;;  %v1591_v43 = vld [vmem:[#allocation2 + $0x2b08] sm:$0xff] }
 0x352   :  { %v15518_v50 = vcombine.high %v1590_v41, %v1594_v42  ;;  %v15517_v62 = vcombine.low %v1590_v41, %v1594_v42  ;;  %v15519_v63 = vcombine.low %v1591_v43, %v1595_v46  ;;  %v186_v32 = vld [vmem:[%s17564_s0 + $0xa0] sm:$0xff]  ;;  %v1631_v42 = vld [vmem:[#allocation2 + $0x2c48] sm:$0xff] }
 0x353   :  { %v17425_v41 = vpack.c.bf16 %v186_v32, %v186_v32 }
 0x354   :  { %9895 = vmatpush1.bf16.msra.mxu0 %v15469_v51  ;;  %10387 = vmatpush1.bf16.msra.mxu1 %v15471_v53  ;;  %v15520_v51 = vcombine.high %v1591_v43, %v1595_v46  ;;  %v1598_v53 = vld [vmem:[#allocation2 + $0x2b40] sm:$0xff]  ;;  %v1635_v43 = vld [vmem:[#allocation2 + $0x2c68] sm:$0xff]  ;;  %v189_v46 = vld [vmem:[%s17564_s0 + $0xb8] sm:$0xff] }
 0x355   :  { %9896 = vmatprep.subr.bf16.mxu0 %v15478_v55  ;;  %10388 = vmatprep.subr.bf16.mxu1 %v15480_v58  ;;  %v1602_v55 = vld [vmem:[#allocation2 + $0x2b60] sm:$0xff]  ;;  %v1599_v58 = vld [vmem:[#allocation2 + $0x2b48] sm:$0xff] }
 0x356   :  { %v15526_v0 = vcombine.high %v1598_v53, %v1602_v55  ;;  %v15525_v8 = vcombine.low %v1598_v53, %v1602_v55  ;;  %v15527_v9 = vcombine.low %v1599_v58, %v1603_v61  ;;  %v1638_v53 = vld [vmem:[#allocation2 + $0x2c80] sm:$0xff] }
 0x357   :  { %v1642_v55 = vld [vmem:[#allocation2 + $0x2ca0] sm:$0xff] }
 0x358   :  { %9897 = vmatpush1.bf16.msra.mxu0 %v15477_v2  ;;  %10389 = vmatpush1.bf16.msra.mxu1 %v15479_v3  ;;  %v15528_v2 = vcombine.high %v1599_v58, %v1603_v61  ;;  %v1606_v3 = vld [vmem:[#allocation2 + $0x2b80] sm:$0xff]  ;;  %v17430_v58 = vpack.c.bf16 %v189_v46, %v189_v46  ;;  %v1639_v61 = vld [vmem:[#allocation2 + $0x2c88] sm:$0xff] }
 0x359   :  { %9898 = vmatprep.subr.bf16.mxu0 %v15486_v4  ;;  %10390 = vmatprep.subr.bf16.mxu1 %v15488_v5  ;;  %v1610_v4 = vld [vmem:[#allocation2 + $0x2ba0] sm:$0xff]  ;;  %v1607_v5 = vld [vmem:[#allocation2 + $0x2b88] sm:$0xff] }
 0x35a   :  { %v15534_v10 = vcombine.high %v1606_v3, %v1610_v4  ;;  %v15533_v19 = vcombine.low %v1606_v3, %v1610_v4  ;;  %v15535_v20 = vcombine.low %v1607_v5, %v1611_v6  ;;  %v1646_v4 = vld [vmem:[#allocation2 + $0x2cc0] sm:$0xff] }
 0x35c   :  { %9899 = vmatpush1.bf16.msra.mxu0 %v15485_v11  ;;  %10391 = vmatpush1.bf16.msra.mxu1 %v15487_v13  ;;  %v15536_v11 = vcombine.high %v1607_v5, %v1611_v6  ;;  %v1614_v13 = vld [vmem:[#allocation2 + $0x2bc0] sm:$0xff]  ;;  %v1647_v6 = vld [vmem:[#allocation2 + $0x2cc8] sm:$0xff] }
 0x35d   :  { %9900 = vmatprep.subr.bf16.mxu0 %v15494_v15  ;;  %10392 = vmatprep.subr.bf16.mxu1 %v15496_v17  ;;  %v1618_v15 = vld [vmem:[#allocation2 + $0x2be0] sm:$0xff]  ;;  %v1615_v17 = vld [vmem:[#allocation2 + $0x2bc8] sm:$0xff] }
 0x35e   :  { %v15542_v21 = vcombine.high %v1614_v13, %v1618_v15  ;;  %v15541_v31 = vcombine.low %v1614_v13, %v1618_v15  ;;  %v15543_v33 = vcombine.low %v1615_v17, %v1619_v18  ;;  %v1650_v5 = vld [vmem:[#allocation2 + $0x2ce0] sm:$0xff] }
 0x35f   :  { %v1654_v15 = vld [vmem:[#allocation2 + $0x2d00] sm:$0xff] }
 0x360   :  { %9901 = vmatpush1.bf16.msra.mxu0 %v15493_v22  ;;  %10393 = vmatpush1.bf16.msra.mxu1 %v15495_v24  ;;  %v15544_v22 = vcombine.high %v1615_v17, %v1619_v18  ;;  %v1622_v24 = vld [vmem:[#allocation2 + $0x2c00] sm:$0xff]  ;;  %v1655_v18 = vld [vmem:[#allocation2 + $0x2d08] sm:$0xff] }
 0x361   :  { %9902 = vmatprep.subr.bf16.mxu0 %v15502_v27  ;;  %10394 = vmatprep.subr.bf16.mxu1 %v15504_v28  ;;  %v1626_v27 = vld [vmem:[#allocation2 + $0x2c20] sm:$0xff]  ;;  %v1623_v28 = vld [vmem:[#allocation2 + $0x2c08] sm:$0xff] }
 0x362   :  { %v1658_v17 = vld [vmem:[#allocation2 + $0x2d20] sm:$0xff] }
 0x363   :  { %v15581_v32 = vcombine.low %v1654_v15, %v1658_v17 }
 0x364   :  { %9903 = vmatpush1.bf16.msra.mxu0 %v15501_v35  ;;  %10395 = vmatpush1.bf16.msra.mxu1 %v15503_v36  ;;  %v15550_v35 = vcombine.high %v1622_v24, %v1626_v27  ;;  %v15552_v36 = vcombine.high %v1623_v28, %v1627_v30 }
 0x365   :  { %9904 = vmatprep.subr.bf16.mxu0 %v15510_v37  ;;  %10396 = vmatprep.subr.bf16.mxu1 %v15512_v40  ;;  %v1630_v37 = vld [vmem:[#allocation2 + $0x2c40] sm:$0xff] }
 0x366   :  { %v1634_v40 = vld [vmem:[#allocation2 + $0x2c60] sm:$0xff] }
 0x368   :  { %9905 = vmatpush1.bf16.msra.mxu0 %v15509_v47  ;;  %10397 = vmatpush1.bf16.msra.mxu1 %v15511_v49  ;;  %v15549_v47 = vcombine.low %v1622_v24, %v1626_v27  ;;  %v15551_v49 = vcombine.low %v1623_v28, %v1627_v30  ;;  %v1662_v27 = vld [vmem:[#allocation2 + $0x2d40] sm:$0xff]  ;;  %v1663_v30 = vld [vmem:[#allocation2 + $0x2d48] sm:$0xff] }
 0x369   :  { %9906 = vmatprep.subr.bf16.mxu0 %v15518_v50  ;;  %10398 = vmatprep.subr.bf16.mxu1 %v15520_v51  ;;  %v15558_v50 = vcombine.high %v1630_v37, %v1634_v40  ;;  %v15560_v51 = vcombine.high %v1631_v42, %v1635_v43  ;;  %v1666_v28 = vld [vmem:[#allocation2 + $0x2d60] sm:$0xff] }
 0x36a   :  { %v15589_v46 = vcombine.low %v1662_v27, %v1666_v28 }
 0x36c   :  { %9907 = vmatpush1.bf16.msra.mxu0 %v15517_v62  ;;  %10399 = vmatpush1.bf16.msra.mxu1 %v15519_v63  ;;  %v1643_v62 = vld [vmem:[#allocation2 + $0x2ca8] sm:$0xff]  ;;  %v15557_v63 = vcombine.low %v1630_v37, %v1634_v40  ;;  %v1670_v37 = vld [vmem:[#allocation2 + $0x2d80] sm:$0xff] }
 0x36d   :  { %9908 = vmatprep.subr.bf16.mxu0 %v15526_v0  ;;  %10400 = vmatprep.subr.bf16.mxu1 %v15528_v2  ;;  %v15559_v0 = vcombine.low %v1631_v42, %v1635_v43  ;;  %v15566_v2 = vcombine.high %v1638_v53, %v1642_v55  ;;  %v15568_v3 = vcombine.high %v1639_v61, %v1643_v62  ;;  %v1674_v40 = vld [vmem:[#allocation2 + $0x2da0] sm:$0xff]  ;;  %v1671_v42 = vld [vmem:[#allocation2 + $0x2d88] sm:$0xff] }
 0x36e   :  { %v1675_v43 = vld [vmem:[#allocation2 + $0x2da8] sm:$0xff] }
 0x370   :  { %9909 = vmatpush1.bf16.msra.mxu0 %v15525_v8  ;;  %10401 = vmatpush1.bf16.msra.mxu1 %v15527_v9  ;;  %v1651_v8 = vld [vmem:[#allocation2 + $0x2ce8] sm:$0xff]  ;;  %v15565_v9 = vcombine.low %v1638_v53, %v1642_v55  ;;  %v1682_v53 = vld [vmem:[#allocation2 + $0x2de0] sm:$0xff] }
 0x371   :  { %9910 = vmatprep.subr.bf16.mxu0 %v15534_v10  ;;  %10402 = vmatprep.subr.bf16.mxu1 %v15536_v11  ;;  %v15567_v10 = vcombine.low %v1639_v61, %v1643_v62  ;;  %v15574_v11 = vcombine.high %v1646_v4, %v1650_v5  ;;  %v15576_v13 = vcombine.high %v1647_v6, %v1651_v8  ;;  %v1679_v55 = vld [vmem:[#allocation2 + $0x2dc8] sm:$0xff] }
 0x372   :  { %v1683_v61 = vld [vmem:[#allocation2 + $0x2de8] sm:$0xff]  ;;  %v15597_v62 = vcombine.low %v1670_v37, %v1674_v40 }
 0x374   :  { %9911 = vmatpush1.bf16.msra.mxu0 %v15533_v19  ;;  %10403 = vmatpush1.bf16.msra.mxu1 %v15535_v20  ;;  %v1659_v19 = vld [vmem:[#allocation2 + $0x2d28] sm:$0xff]  ;;  %v15573_v20 = vcombine.low %v1646_v4, %v1650_v5  ;;  %v1690_v4 = vld [vmem:[#allocation2 + $0x2e20] sm:$0xff] }
 0x375   :  { %9912 = vmatprep.subr.bf16.mxu0 %v15542_v21  ;;  %10404 = vmatprep.subr.bf16.mxu1 %v15544_v22  ;;  %v15575_v21 = vcombine.low %v1647_v6, %v1651_v8  ;;  %v15582_v22 = vcombine.high %v1654_v15, %v1658_v17  ;;  %v15584_v24 = vcombine.high %v1655_v18, %v1659_v19  ;;  %v1687_v5 = vld [vmem:[#allocation2 + $0x2e08] sm:$0xff]  ;;  %v1698_v15 = vld [vmem:[#allocation2 + $0x2e60] sm:$0xff] }
 0x376   :  { %v1691_v6 = vld [vmem:[#allocation2 + $0x2e28] sm:$0xff] }
 0x377   :  { %v1695_v17 = vld [vmem:[#allocation2 + $0x2e48] sm:$0xff] }
 0x378   :  { %9913 = vmatpush1.bf16.msra.mxu0 %v15541_v31  ;;  %10405 = vmatpush1.bf16.msra.mxu1 %v15543_v33  ;;  %v1667_v31 = vld [vmem:[#allocation2 + $0x2d68] sm:$0xff]  ;;  %v15583_v33 = vcombine.low %v1655_v18, %v1659_v19 }
 0x379   :  { %9923 = vmatprep.subr.bf16.mxu0 %v15550_v35  ;;  %10415 = vmatprep.subr.bf16.mxu1 %v15552_v36  ;;  %v15590_v35 = vcombine.high %v1662_v27, %v1666_v28  ;;  %v15592_v36 = vcombine.high %v1663_v30, %v1667_v31  ;;  %v1699_v18 = vld [vmem:[#allocation2 + $0x2e68] sm:$0xff]  ;;  %v1706_v27 = vld [vmem:[#allocation2 + $0x2ea0] sm:$0xff] }
 0x37a   :  { %v1703_v28 = vld [vmem:[#allocation2 + $0x2e88] sm:$0xff] }
 0x37b   :  { %9915 = vmatmul.mubr.bf16.vlgmr.msra.gmra.mrb[0].mxu0 %v17425_v41  ;;  %10407 = vmatmul.mubr.bf16.vlgmr.msra.gmra.mrb[0].mxu1 %v17425_v41 }
 0x37c   :  { %9924 = vmatpush1.bf16.msra.mxu0 %v15549_v47  ;;  %10416 = vmatpush1.bf16.msra.mxu1 %v15551_v49  ;;  %v15591_v47 = vcombine.low %v1663_v30, %v1667_v31  ;;  %v15598_v49 = vcombine.high %v1670_v37, %v1674_v40  ;;  %v1707_v30 = vld [vmem:[#allocation2 + $0x2ea8] sm:$0xff]  ;;  %v1714_v37 = vld [vmem:[#allocation2 + $0x2ee0] sm:$0xff] }
 0x37d   :  { %9925 = vmatprep.subr.bf16.mxu0 %v15558_v50  ;;  %10417 = vmatprep.subr.bf16.mxu1 %v15560_v51  ;;  %v15600_v50 = vcombine.high %v1671_v42, %v1675_v43  ;;  %v1678_v51 = vld [vmem:[#allocation2 + $0x2dc0] sm:$0xff]  ;;  %v1711_v40 = vld [vmem:[#allocation2 + $0x2ec8] sm:$0xff] }
 0x37e   :  { %9955 = vmatprep.mubr.bf16.mxu0 %v17430_v58  ;;  %10447 = vmatprep.mubr.bf16.mxu1 %v17430_v58  ;;  %v15605_v8 = vcombine.low %v1678_v51, %v1682_v53 }
 0x380   :  { %9926 = vmatpush1.bf16.msra.mxu0 %v15557_v63  ;;  %10418 = vmatpush1.bf16.msra.mxu1 %v15559_v0  ;;  %v15599_v63 = vcombine.low %v1671_v42, %v1675_v43  ;;  %v15606_v0 = vcombine.high %v1678_v51, %v1682_v53  ;;  %v1715_v42 = vld [vmem:[#allocation2 + $0x2ee8] sm:$0xff]  ;;  %v1722_v51 = vld [vmem:[#allocation2 + $0x2f20] sm:$0xff] }
 0x381   :  { %9927 = vmatprep.subr.bf16.mxu0 %v15566_v2  ;;  %10419 = vmatprep.subr.bf16.mxu1 %v15568_v3  ;;  %v15608_v2 = vcombine.high %v1679_v55, %v1683_v61  ;;  %v1686_v3 = vld [vmem:[#allocation2 + $0x2e00] sm:$0xff]  ;;  %v1719_v53 = vld [vmem:[#allocation2 + $0x2f08] sm:$0xff] }
 0x382   :  { %v15613_v19 = vcombine.low %v1686_v3, %v1690_v4 }
 0x384   :  { %9928 = vmatpush1.bf16.msra.mxu0 %v15565_v9  ;;  %10420 = vmatpush1.bf16.msra.mxu1 %v15567_v10  ;;  %v15607_v9 = vcombine.low %v1679_v55, %v1683_v61  ;;  %v15614_v10 = vcombine.high %v1686_v3, %v1690_v4  ;;  %v1723_v55 = vld [vmem:[#allocation2 + $0x2f28] sm:$0xff]  ;;  %v1730_v3 = vld [vmem:[#allocation2 + $0x2f60] sm:$0xff] }
 0x385   :  { %9929 = vmatprep.subr.bf16.mxu0 %v15574_v11  ;;  %10421 = vmatprep.subr.bf16.mxu1 %v15576_v13  ;;  %v15616_v11 = vcombine.high %v1687_v5, %v1691_v6  ;;  %v1694_v13 = vld [vmem:[#allocation2 + $0x2e40] sm:$0xff]  ;;  %v1727_v4 = vld [vmem:[#allocation2 + $0x2f48] sm:$0xff] }
 0x386   :  { %v15621_v31 = vcombine.low %v1694_v13, %v1698_v15 }
 0x388   :  { %9930 = vmatpush1.bf16.msra.mxu0 %v15573_v20  ;;  %10422 = vmatpush1.bf16.msra.mxu1 %v15575_v21  ;;  %v15615_v20 = vcombine.low %v1687_v5, %v1691_v6  ;;  %v15622_v21 = vcombine.high %v1694_v13, %v1698_v15  ;;  %v1731_v5 = vld [vmem:[#allocation2 + $0x2f68] sm:$0xff]  ;;  %v1738_v13 = vld [vmem:[#allocation2 + $0x2fa0] sm:$0xff] }
 0x389   :  { %9931 = vmatprep.subr.bf16.mxu0 %v15582_v22  ;;  %10423 = vmatprep.subr.bf16.mxu1 %v15584_v24  ;;  %v15624_v22 = vcombine.high %v1695_v17, %v1699_v18  ;;  %v1702_v24 = vld [vmem:[#allocation2 + $0x2e80] sm:$0xff]  ;;  %v1735_v15 = vld [vmem:[#allocation2 + $0x2f88] sm:$0xff] }
 0x38a   :  { %v15629_v43 = vcombine.low %v1702_v24, %v1706_v27 }
 0x38c   :  { %9932 = vmatpush1.bf16.msra.mxu0 %v15581_v32  ;;  %10424 = vmatpush1.bf16.msra.mxu1 %v15583_v33  ;;  %v15623_v32 = vcombine.low %v1695_v17, %v1699_v18  ;;  %v15630_v33 = vcombine.high %v1702_v24, %v1706_v27  ;;  %v1739_v17 = vld [vmem:[#allocation2 + $0x2fa8] sm:$0xff]  ;;  %v1746_v24 = vld [vmem:[#allocation2 + $0x2fe0] sm:$0xff] }
 0x38d   :  { %9933 = vmatprep.subr.bf16.mxu0 %v15590_v35  ;;  %10425 = vmatprep.subr.bf16.mxu1 %v15592_v36  ;;  %v15632_v35 = vcombine.high %v1703_v28, %v1707_v30  ;;  %v1710_v36 = vld [vmem:[#allocation2 + $0x2ec0] sm:$0xff]  ;;  %v1743_v27 = vld [vmem:[#allocation2 + $0x2fc8] sm:$0xff] }
 0x38e   :  { %v15637_v61 = vcombine.low %v1710_v36, %v1714_v37 }
 0x390   :  { %9934 = vmatpush1.bf16.msra.mxu0 %v15589_v46  ;;  %10426 = vmatpush1.bf16.msra.mxu1 %v15591_v47  ;;  %v15631_v46 = vcombine.low %v1703_v28, %v1707_v30  ;;  %v15638_v47 = vcombine.high %v1710_v36, %v1714_v37  ;;  %v1747_v28 = vld [vmem:[#allocation2 + $0x2fe8] sm:$0xff]  ;;  %v220_v36 = vld [vmem:[#allocation2 + $0x30] sm:$0xff]  ;;  %v217_v37 = vld [vmem:[#allocation2 + $0x18] sm:$0xff] }
 0x391   :  { %9935 = vmatprep.subr.bf16.mxu0 %v15598_v49  ;;  %10427 = vmatprep.subr.bf16.mxu1 %v15600_v50  ;;  %v15640_v49 = vcombine.high %v1711_v40, %v1715_v42  ;;  %v1718_v50 = vld [vmem:[#allocation2 + $0x2f00] sm:$0xff] }
 0x392   :  { %v15645_v6 = vcombine.low %v1718_v50, %v1722_v51 }
 0x394   :  { %9936 = vmatpush1.bf16.msra.mxu0 %v15597_v62  ;;  %10428 = vmatpush1.bf16.msra.mxu1 %v15599_v63  ;;  %v15639_v62 = vcombine.low %v1711_v40, %v1715_v42  ;;  %v15646_v63 = vcombine.high %v1718_v50, %v1722_v51  ;;  %v221_v40 = vld [vmem:[#allocation2 + $0x38] sm:$0xff]  ;;  %v224_v50 = vld [vmem:[#allocation2 + $0x50] sm:$0xff] }
 0x395   :  { %9937 = vmatprep.subr.bf16.mxu0 %v15606_v0  ;;  %10429 = vmatprep.subr.bf16.mxu1 %v15608_v2  ;;  %v15648_v0 = vcombine.high %v1719_v53, %v1723_v55  ;;  %v1726_v2 = vld [vmem:[#allocation2 + $0x2f40] sm:$0xff]  ;;  %v228_v51 = vld [vmem:[#allocation2 + $0x70] sm:$0xff] }
 0x396   :  { %v15653_v18 = vcombine.low %v1726_v2, %v1730_v3 }
 0x398   :  { %9938 = vmatpush1.bf16.msra.mxu0 %v15605_v8  ;;  %10430 = vmatpush1.bf16.msra.mxu1 %v15607_v9  ;;  %v15647_v8 = vcombine.low %v1719_v53, %v1723_v55  ;;  %v15654_v9 = vcombine.high %v1726_v2, %v1730_v3  ;;  %v225_v55 = vld [vmem:[#allocation2 + $0x58] sm:$0xff]  ;;  %v232_v3 = vld [vmem:[#allocation2 + $0x90] sm:$0xff] }
 0x399   :  { %9939 = vmatprep.subr.bf16.mxu0 %v15614_v10  ;;  %10431 = vmatprep.subr.bf16.mxu1 %v15616_v11  ;;  %v15656_v10 = vcombine.high %v1727_v4, %v1731_v5  ;;  %v1734_v11 = vld [vmem:[#allocation2 + $0x2f80] sm:$0xff] }
 0x39a   :  { %v15661_v30 = vcombine.low %v1734_v11, %v1738_v13 }
 0x39c   :  { %9940 = vmatpush1.bf16.msra.mxu0 %v15613_v19  ;;  %10432 = vmatpush1.bf16.msra.mxu1 %v15615_v20  ;;  %v15655_v19 = vcombine.low %v1727_v4, %v1731_v5  ;;  %v15662_v20 = vcombine.high %v1734_v11, %v1738_v13  ;;  %v236_v4 = vld [vmem:[#allocation2 + $0xb0] sm:$0xff]  ;;  %v233_v5 = vld [vmem:[#allocation2 + $0x98] sm:$0xff] }
 0x39d   :  { %9941 = vmatprep.subr.bf16.mxu0 %v15622_v21  ;;  %10433 = vmatprep.subr.bf16.mxu1 %v15624_v22  ;;  %v15664_v21 = vcombine.high %v1735_v15, %v1739_v17  ;;  %v1742_v22 = vld [vmem:[#allocation2 + $0x2fc0] sm:$0xff]  ;;  %v240_v13 = vld [vmem:[#allocation2 + $0xd0] sm:$0xff] }
 0x39e   :  { %v15669_v42 = vcombine.low %v1742_v22, %v1746_v24 }
 0x3a0   :  { %9942 = vmatpush1.bf16.msra.mxu0 %v15621_v31  ;;  %10434 = vmatpush1.bf16.msra.mxu1 %v15623_v32  ;;  %v15663_v31 = vcombine.low %v1735_v15, %v1739_v17  ;;  %v15670_v32 = vcombine.high %v1742_v22, %v1746_v24  ;;  %v244_v15 = vld [vmem:[#allocation2 + $0xf0] sm:$0xff]  ;;  %v241_v17 = vld [vmem:[#allocation2 + $0xd8] sm:$0xff] }
 0x3a1   :  { %9943 = vmatprep.subr.bf16.mxu0 %v15630_v33  ;;  %10435 = vmatprep.subr.bf16.mxu1 %v15632_v35  ;;  %v15672_v33 = vcombine.high %v1743_v27, %v1747_v28  ;;  %v216_v35 = vld [vmem:[#allocation2 + $0x10] sm:$0xff] }
 0x3a2   :  { %v248_v24 = vld [vmem:[#allocation2 + $0x110] sm:$0xff] }
 0x3a4   :  { %9944 = vmatpush1.bf16.msra.mxu0 %v15629_v43  ;;  %10436 = vmatpush1.bf16.msra.mxu1 %v15631_v46  ;;  %v188_v43 = vld [vmem:[%s17564_s0 + $0xb0] sm:$0xff]  ;;  %v15671_v46 = vcombine.low %v1743_v27, %v1747_v28  ;;  %v249_v28 = vld [vmem:[#allocation2 + $0x118] sm:$0xff]  ;;  %s17094_s0 = smov [#allocation19]  }
 0x3a5   :  { %9945 = vmatprep.subr.bf16.mxu0 %v15638_v47  ;;  %10437 = vmatprep.subr.bf16.mxu1 %v15640_v49  ;;  %v14146_v47 = vcombine.high %v216_v35, %v220_v36  ;;  %v14148_v49 = vcombine.high %v217_v37, %v221_v40  ;;  %v17439_v53 = vpack.c.bf16 %v188_v43, %v188_v43  ;;  %v252_v27 = vld [vmem:[#allocation2 + $0x130] sm:$0xff]  ;;  %s14127_s22 = sshll.u32 %s17094_s0, 4  ;;  %s14128_s22 = int_to_ptr.vmem [resolvable:$true] %s14127_s22 }
 0x3a6   :  { %s17038_s24 = scalar_lea.vmem %s14128_s22, 128  ;;  %p17043_p11 = scmp.lt.s32.totalorder %s14128_s22, %s14128_s22 }
 0x3a7   :  { %p17039_p10 = scmp.ne.s32.totalorder %s14128_s22, %s17038_s24  ;;  %p17044_p12 = scmp.lt.s32.totalorder %s17038_s24, %s17038_s24 }
 0x3a8   :  { %9946 = vmatpush1.bf16.msra.mxu0 %v15637_v61  ;;  %10438 = vmatpush1.bf16.msra.mxu1 %v15639_v62  ;;  %v229_v61 = vld [vmem:[#allocation2 + $0x78] sm:$0xff]  ;;  %v14145_v62 = vcombine.low %v216_v35, %v220_v36  ;;  %v256_v35 = vld [vmem:[#allocation2 + $0x150] sm:$0xff] }
 0x3a9   :  { %9947 = vmatprep.subr.bf16.mxu0 %v15646_v63  ;;  %10439 = vmatprep.subr.bf16.mxu1 %v15648_v0  ;;  %v14147_v63 = vcombine.low %v217_v37, %v221_v40  ;;  %v14154_v0 = vcombine.high %v224_v50, %v228_v51  ;;  %v14156_v2 = vcombine.high %v225_v55, %v229_v61  ;;  %v260_v36 = vld [vmem:[#allocation2 + $0x170] sm:$0xff]  ;;  %v257_v37 = vld [vmem:[#allocation2 + $0x158] sm:$0xff]  ;;  %p17045_p13 = por %p17044_p12, %p17043_p11 }
 0x3aa   :  { %v261_v40 = vld [vmem:[#allocation2 + $0x178] sm:$0xff] }
 0x3ab   :  { %p17046_p0 = pnand %p17045_p13, %p17039_p10 }
 0x3ac   :  { %9948 = vmatpush1.bf16.msra.mxu0 %v15645_v6  ;;  %10440 = vmatpush1.bf16.msra.mxu1 %v15647_v8  ;;  %v237_v6 = vld [vmem:[#allocation2 + $0xb8] sm:$0xff]  ;;  %v14153_v8 = vcombine.low %v224_v50, %v228_v51  ;;  %v268_v50 = vld [vmem:[#allocation2 + $0x1b0] sm:$0xff] }
 0x3ad   :  { %9949 = vmatprep.subr.bf16.mxu0 %v15654_v9  ;;  %10441 = vmatprep.subr.bf16.mxu1 %v15656_v10  ;;  %v14155_v9 = vcombine.low %v225_v55, %v229_v61  ;;  %v14162_v10 = vcombine.high %v232_v3, %v236_v4  ;;  %v14164_v11 = vcombine.high %v233_v5, %v237_v6  ;;  %v265_v51 = vld [vmem:[#allocation2 + $0x198] sm:$0xff] }
 0x3ae   :  { %v269_v55 = vld [vmem:[#allocation2 + $0x1b8] sm:$0xff]  ;;  %v14185_v61 = vcombine.low %v256_v35, %v260_v36 }
 0x3b0   :  { %9950 = vmatpush1.bf16.msra.mxu0 %v15653_v18  ;;  %10442 = vmatpush1.bf16.msra.mxu1 %v15655_v19  ;;  %v245_v18 = vld [vmem:[#allocation2 + $0xf8] sm:$0xff]  ;;  %v14161_v19 = vcombine.low %v232_v3, %v236_v4  ;;  %v276_v3 = vld [vmem:[#allocation2 + $0x1f0] sm:$0xff] }
 0x3b1   :  { %9951 = vmatprep.subr.bf16.mxu0 %v15662_v20  ;;  %10443 = vmatprep.subr.bf16.mxu1 %v15664_v21  ;;  %v14163_v20 = vcombine.low %v233_v5, %v237_v6  ;;  %v14170_v21 = vcombine.high %v240_v13, %v244_v15  ;;  %v14172_v22 = vcombine.high %v241_v17, %v245_v18  ;;  %v273_v4 = vld [vmem:[#allocation2 + $0x1d8] sm:$0xff] }
 0x3b2   :  { %v277_v5 = vld [vmem:[#allocation2 + $0x1f8] sm:$0xff] }
 0x3b4   :  { %9952 = vmatpush1.bf16.msra.mxu0 %v15661_v30  ;;  %10444 = vmatpush1.bf16.msra.mxu1 %v15663_v31  ;;  %v253_v30 = vld [vmem:[#allocation2 + $0x138] sm:$0xff]  ;;  %v14169_v31 = vcombine.low %v240_v13, %v244_v15  ;;  %v284_v13 = vld [vmem:[#allocation2 + $0x230] sm:$0xff] }
 0x3b5   :  { %9953 = vmatprep.subr.bf16.mxu0 %v15670_v32  ;;  %10445 = vmatprep.subr.bf16.mxu1 %v15672_v33  ;;  %v14171_v32 = vcombine.low %v241_v17, %v245_v18  ;;  %v14178_v33 = vcombine.high %v248_v24, %v252_v27  ;;  %v14179_v43 = vcombine.low %v249_v28, %v253_v30  ;;  %v281_v15 = vld [vmem:[#allocation2 + $0x218] sm:$0xff] }
 0x3b6   :  { %v285_v17 = vld [vmem:[#allocation2 + $0x238] sm:$0xff] }
 0x3b8   :  { %9954 = vmatpush1.bf16.msra.mxu0 %v15669_v42  ;;  %10446 = vmatpush1.bf16.msra.mxu1 %v15671_v46  ;;  %v14177_v42 = vcombine.low %v248_v24, %v252_v27  ;;  %v14186_v46 = vcombine.high %v256_v35, %v260_v36  ;;  %v292_v24 = vld [vmem:[#allocation2 + $0x270] sm:$0xff]  ;;  %v289_v27 = vld [vmem:[#allocation2 + $0x258] sm:$0xff] }
 0x3b9   :  { %10456 = vmatprep.subr.bf16.mxu0 %v14146_v47  ;;  %10948 = vmatprep.subr.bf16.mxu1 %v14148_v49  ;;  %v14188_v47 = vcombine.high %v257_v37, %v261_v40  ;;  %v264_v49 = vld [vmem:[#allocation2 + $0x190] sm:$0xff]  ;;  %v297_v36 = vld [vmem:[#allocation2 + $0x298] sm:$0xff] }
 0x3ba   :  { %v14193_v6 = vcombine.low %v264_v49, %v268_v50  ;;  %v300_v35 = vld [vmem:[#allocation2 + $0x2b0] sm:$0xff] }
 0x3bb   :  { %9956 = vmatmul.mubr.bf16.vlgmr.msra.gmra.mrb[0].mxu0 %v17439_v53  ;;  %10448 = vmatmul.mubr.bf16.vlgmr.msra.gmra.mrb[0].mxu1 %v17439_v53 }
 0x3bc   :  { %10457 = vmatpush1.bf16.msra.mxu0 %v14145_v62  ;;  %10949 = vmatpush1.bf16.msra.mxu1 %v14147_v63  ;;  %v14187_v62 = vcombine.low %v257_v37, %v261_v40  ;;  %v14194_v63 = vcombine.high %v264_v49, %v268_v50  ;;  %v301_v37 = vld [vmem:[#allocation2 + $0x2b8] sm:$0xff]  ;;  %v308_v49 = vld [vmem:[#allocation2 + $0x2f0] sm:$0xff] }
 0x3bd   :  { %10458 = vmatprep.subr.bf16.mxu0 %v14154_v0  ;;  %10950 = vmatprep.subr.bf16.mxu1 %v14156_v2  ;;  %v14196_v0 = vcombine.high %v265_v51, %v269_v55  ;;  %v272_v2 = vld [vmem:[#allocation2 + $0x1d0] sm:$0xff]  ;;  %v305_v50 = vld [vmem:[#allocation2 + $0x2d8] sm:$0xff] }
 0x3be   :  { %10488 = vmatprep.mubr.bf16.mxu0 %v17278_v57  ;;  %10980 = vmatprep.mubr.bf16.mxu1 %v17278_v57  ;;  %v14180_v57 = vcombine.high %v249_v28, %v253_v30  ;;  %v14201_v18 = vcombine.low %v272_v2, %v276_v3  ;;  %v293_v28 = vld [vmem:[#allocation2 + $0x278] sm:$0xff] }
 0x3c0   :  { %10459 = vmatpush1.bf16.msra.mxu0 %v14153_v8  ;;  %10951 = vmatpush1.bf16.msra.mxu1 %v14155_v9  ;;  %v14195_v8 = vcombine.low %v265_v51, %v269_v55  ;;  %v14202_v9 = vcombine.high %v272_v2, %v276_v3  ;;  %v309_v51 = vld [vmem:[#allocation2 + $0x2f8] sm:$0xff]  ;;  %v316_v2 = vld [vmem:[#allocation2 + $0x330] sm:$0xff] }
 0x3c1   :  { %10460 = vmatprep.subr.bf16.mxu0 %v14162_v10  ;;  %10952 = vmatprep.subr.bf16.mxu1 %v14164_v11  ;;  %v14204_v10 = vcombine.high %v273_v4, %v277_v5  ;;  %v280_v11 = vld [vmem:[#allocation2 + $0x210] sm:$0xff]  ;;  %v313_v3 = vld [vmem:[#allocation2 + $0x318] sm:$0xff] }
 0x3c2   :  { %v14209_v30 = vcombine.low %v280_v11, %v284_v13 }
 0x3c4   :  { %10461 = vmatpush1.bf16.msra.mxu0 %v14161_v19  ;;  %10953 = vmatpush1.bf16.msra.mxu1 %v14163_v20  ;;  %v14203_v19 = vcombine.low %v273_v4, %v277_v5  ;;  %v14210_v20 = vcombine.high %v280_v11, %v284_v13  ;;  %v317_v4 = vld [vmem:[#allocation2 + $0x338] sm:$0xff]  ;;  %v324_v11 = vld [vmem:[#allocation2 + $0x370] sm:$0xff] }
 0x3c5   :  { %10462 = vmatprep.subr.bf16.mxu0 %v14170_v21  ;;  %10954 = vmatprep.subr.bf16.mxu1 %v14172_v22  ;;  %v14212_v21 = vcombine.high %v281_v15, %v285_v17  ;;  %v288_v22 = vld [vmem:[#allocation2 + $0x250] sm:$0xff]  ;;  %v321_v13 = vld [vmem:[#allocation2 + $0x358] sm:$0xff] }
 0x3c6   :  { %v14217_v40 = vcombine.low %v288_v22, %v292_v24 }
 0x3c8   :  { %10463 = vmatpush1.bf16.msra.mxu0 %v14169_v31  ;;  %10955 = vmatpush1.bf16.msra.mxu1 %v14171_v32  ;;  %v14211_v31 = vcombine.low %v281_v15, %v285_v17  ;;  %v14218_v32 = vcombine.high %v288_v22, %v292_v24  ;;  %v325_v15 = vld [vmem:[#allocation2 + $0x378] sm:$0xff]  ;;  %v332_v22 = vld [vmem:[#allocation2 + $0x3b0] sm:$0xff] }
 0x3c9   :  { %10464 = vmatprep.subr.bf16.mxu0 %v14178_v33  ;;  %10956 = vmatprep.subr.bf16.mxu1 %v14180_v57  ;;  %v14220_v33 = vcombine.high %v289_v27, %v293_v28  ;;  %v296_v57 = vld [vmem:[#allocation2 + $0x290] sm:$0xff]  ;;  %v329_v24 = vld [vmem:[#allocation2 + $0x398] sm:$0xff] }
 0x3ca   :  { %v14225_v55 = vcombine.low %v296_v57, %v300_v35 }
 0x3cc   :  { %10465 = vmatpush1.bf16.msra.mxu0 %v14177_v42  ;;  %10957 = vmatpush1.bf16.msra.mxu1 %v14179_v43  ;;  %v14219_v42 = vcombine.low %v289_v27, %v293_v28  ;;  %v14226_v43 = vcombine.high %v296_v57, %v300_v35  ;;  %v333_v27 = vld [vmem:[#allocation2 + $0x3b8] sm:$0xff]  ;;  %v340_v57 = vld [vmem:[#allocation2 + $0x3f0] sm:$0xff] }
 0x3cd   :  { %10466 = vmatprep.subr.bf16.mxu0 %v14186_v46  ;;  %10958 = vmatprep.subr.bf16.mxu1 %v14188_v47  ;;  %v14228_v46 = vcombine.high %v297_v36, %v301_v37  ;;  %v304_v47 = vld [vmem:[#allocation2 + $0x2d0] sm:$0xff]  ;;  %v337_v35 = vld [vmem:[#allocation2 + $0x3d8] sm:$0xff] }
 0x3ce   :  { %v14233_v5 = vcombine.low %v304_v47, %v308_v49 }
 0x3d0   :  { %10467 = vmatpush1.bf16.msra.mxu0 %v14185_v61  ;;  %10959 = vmatpush1.bf16.msra.mxu1 %v14187_v62  ;;  %v14227_v61 = vcombine.low %v297_v36, %v301_v37  ;;  %v14234_v62 = vcombine.high %v304_v47, %v308_v49  ;;  %v341_v36 = vld [vmem:[#allocation2 + $0x3f8] sm:$0xff]  ;;  %v348_v47 = vld [vmem:[#allocation2 + $0x430] sm:$0xff] }
 0x3d1   :  { %10468 = vmatprep.subr.bf16.mxu0 %v14194_v63  ;;  %10960 = vmatprep.subr.bf16.mxu1 %v14196_v0  ;;  %v14236_v63 = vcombine.high %v305_v50, %v309_v51  ;;  %v312_v0 = vld [vmem:[#allocation2 + $0x310] sm:$0xff]  ;;  %v345_v49 = vld [vmem:[#allocation2 + $0x418] sm:$0xff] }
 0x3d2   :  { %v14241_v17 = vcombine.low %v312_v0, %v316_v2 }
 0x3d4   :  { %10469 = vmatpush1.bf16.msra.mxu0 %v14193_v6  ;;  %10961 = vmatpush1.bf16.msra.mxu1 %v14195_v8  ;;  %v14235_v6 = vcombine.low %v305_v50, %v309_v51  ;;  %v14242_v8 = vcombine.high %v312_v0, %v316_v2  ;;  %v349_v50 = vld [vmem:[#allocation2 + $0x438] sm:$0xff]  ;;  %v356_v0 = vld [vmem:[#allocation2 + $0x470] sm:$0xff] }
 0x3d5   :  { %10470 = vmatprep.subr.bf16.mxu0 %v14202_v9  ;;  %10962 = vmatprep.subr.bf16.mxu1 %v14204_v10  ;;  %v14244_v9 = vcombine.high %v313_v3, %v317_v4  ;;  %v320_v10 = vld [vmem:[#allocation2 + $0x350] sm:$0xff]  ;;  %v353_v2 = vld [vmem:[#allocation2 + $0x458] sm:$0xff] }
 0x3d6   :  { %v14249_v28 = vcombine.low %v320_v10, %v324_v11 }
 0x3d8   :  { %10471 = vmatpush1.bf16.msra.mxu0 %v14201_v18  ;;  %10963 = vmatpush1.bf16.msra.mxu1 %v14203_v19  ;;  %v14243_v18 = vcombine.low %v313_v3, %v317_v4  ;;  %v14250_v19 = vcombine.high %v320_v10, %v324_v11  ;;  %v357_v3 = vld [vmem:[#allocation2 + $0x478] sm:$0xff]  ;;  %v364_v10 = vld [vmem:[#allocation2 + $0x4b0] sm:$0xff] }
 0x3d9   :  { %10472 = vmatprep.subr.bf16.mxu0 %v14210_v20  ;;  %10964 = vmatprep.subr.bf16.mxu1 %v14212_v21  ;;  %v14252_v20 = vcombine.high %v321_v13, %v325_v15  ;;  %v328_v21 = vld [vmem:[#allocation2 + $0x390] sm:$0xff]  ;;  %v361_v11 = vld [vmem:[#allocation2 + $0x498] sm:$0xff] }
 0x3da   :  { %v14257_v37 = vcombine.low %v328_v21, %v332_v22 }
 0x3dc   :  { %10473 = vmatpush1.bf16.msra.mxu0 %v14209_v30  ;;  %10965 = vmatpush1.bf16.msra.mxu1 %v14211_v31  ;;  %v14251_v30 = vcombine.low %v321_v13, %v325_v15  ;;  %v14258_v31 = vcombine.high %v328_v21, %v332_v22  ;;  %v365_v13 = vld [vmem:[#allocation2 + $0x4b8] sm:$0xff]  ;;  %v372_v21 = vld [vmem:[#allocation2 + $0x4f0] sm:$0xff] }
 0x3dd   :  { %10474 = vmatprep.subr.bf16.mxu0 %v14218_v32  ;;  %10966 = vmatprep.subr.bf16.mxu1 %v14220_v33  ;;  %v14260_v32 = vcombine.high %v329_v24, %v333_v27  ;;  %v336_v33 = vld [vmem:[#allocation2 + $0x3d0] sm:$0xff]  ;;  %v369_v22 = vld [vmem:[#allocation2 + $0x4d8] sm:$0xff] }
 0x3de   :  { %v14265_v51 = vcombine.low %v336_v33, %v340_v57 }
 0x3e0   :  { %10475 = vmatpush1.bf16.msra.mxu0 %v14217_v40  ;;  %10967 = vmatpush1.bf16.msra.mxu1 %v14219_v42  ;;  %v14259_v40 = vcombine.low %v329_v24, %v333_v27  ;;  %v14266_v42 = vcombine.high %v336_v33, %v340_v57  ;;  %v373_v24 = vld [vmem:[#allocation2 + $0x4f8] sm:$0xff] }
 0x3e1   :  { %10476 = vmatprep.subr.bf16.mxu0 %v14226_v43  ;;  %10968 = vmatprep.subr.bf16.mxu1 %v14228_v46  ;;  %v14268_v43 = vcombine.high %v337_v35, %v341_v36  ;;  %v344_v46 = vld [vmem:[#allocation2 + $0x410] sm:$0xff]  ;;  %v377_v33 = vld [vmem:[#allocation2 + $0x518] sm:$0xff] }
 0x3e2   :  { %v14273_v4 = vcombine.low %v344_v46, %v348_v47  ;;  %v381_v57 = vld [vmem:[#allocation2 + $0x538] sm:$0xff] }
 0x3e4   :  { %10477 = vmatpush1.bf16.msra.mxu0 %v14225_v55  ;;  %10969 = vmatpush1.bf16.msra.mxu1 %v14227_v61  ;;  %v14267_v55 = vcombine.low %v337_v35, %v341_v36  ;;  %v14274_v61 = vcombine.high %v344_v46, %v348_v47  ;;  %v14299_v36 = vcombine.low %v369_v22, %v373_v24  ;;  %v389_v46 = vld [vmem:[#allocation2 + $0x578] sm:$0xff] }
 0x3e5   :  { %10478 = vmatprep.subr.bf16.mxu0 %v14234_v62  ;;  %10970 = vmatprep.subr.bf16.mxu1 %v14236_v63  ;;  %v14276_v62 = vcombine.high %v345_v49, %v349_v50  ;;  %v352_v63 = vld [vmem:[#allocation2 + $0x450] sm:$0xff] }
 0x3e6   :  { %v14281_v15 = vcombine.low %v352_v63, %v356_v0 }
 0x3e8   :  { %10479 = vmatpush1.bf16.msra.mxu0 %v14233_v5  ;;  %10971 = vmatpush1.bf16.msra.mxu1 %v14235_v6  ;;  %v14275_v5 = vcombine.low %v345_v49, %v349_v50  ;;  %v14282_v6 = vcombine.high %v352_v63, %v356_v0  ;;  %v14307_v49 = vcombine.low %v377_v33, %v381_v57  ;;  %v397_v63 = vld [vmem:[#allocation2 + $0x5b8] sm:$0xff] }
 0x3e9   :  { %10480 = vmatprep.subr.bf16.mxu0 %v14242_v8  ;;  %10972 = vmatprep.subr.bf16.mxu1 %v14244_v9  ;;  %v14284_v8 = vcombine.high %v353_v2, %v357_v3  ;;  %v360_v9 = vld [vmem:[#allocation2 + $0x490] sm:$0xff] }
 0x3ea   :  { %v14289_v27 = vcombine.low %v360_v9, %v364_v10 }
 0x3ec   :  { %10481 = vmatpush1.bf16.msra.mxu0 %v14241_v17  ;;  %10973 = vmatpush1.bf16.msra.mxu1 %v14243_v18  ;;  %v14283_v17 = vcombine.low %v353_v2, %v357_v3  ;;  %v14290_v18 = vcombine.high %v360_v9, %v364_v10  ;;  %v405_v9 = vld [vmem:[#allocation2 + $0x5f8] sm:$0xff] }
 0x3ed   :  { %10482 = vmatprep.subr.bf16.mxu0 %v14250_v19  ;;  %10974 = vmatprep.subr.bf16.mxu1 %v14252_v20  ;;  %v14292_v19 = vcombine.high %v361_v11, %v365_v13  ;;  %v368_v20 = vld [vmem:[#allocation2 + $0x4d0] sm:$0xff] }
 0x3ee   :  { %v14297_v35 = vcombine.low %v368_v20, %v372_v21 }
 0x3f0   :  { %10483 = vmatpush1.bf16.msra.mxu0 %v14249_v28  ;;  %10975 = vmatpush1.bf16.msra.mxu1 %v14251_v30  ;;  %v14298_v28 = vcombine.high %v368_v20, %v372_v21  ;;  %v14300_v30 = vcombine.high %v369_v22, %v373_v24  ;;  %v413_v20 = vld [vmem:[#allocation2 + $0x638] sm:$0xff] }
 0x3f1   :  { %10484 = vmatprep.subr.bf16.mxu0 %v14258_v31  ;;  %10976 = vmatprep.subr.bf16.mxu1 %v14260_v32  ;;  %v376_v31 = vld [vmem:[#allocation2 + $0x510] sm:$0xff] }
 0x3f2   :  { %v380_v32 = vld [vmem:[#allocation2 + $0x530] sm:$0xff] }
 0x3f3   :  { %v14305_v47 = vcombine.low %v376_v31, %v380_v32 }
 0x3f4   :  { %10485 = vmatpush1.bf16.msra.mxu0 %v14257_v37  ;;  %10977 = vmatpush1.bf16.msra.mxu1 %v14259_v40  ;;  %v14306_v37 = vcombine.high %v376_v31, %v380_v32  ;;  %v384_v40 = vld [vmem:[#allocation2 + $0x550] sm:$0xff]  ;;  %v421_v31 = vld [vmem:[#allocation2 + $0x678] sm:$0xff] }
 0x3f5   :  { %10486 = vmatprep.subr.bf16.mxu0 %v14266_v42  ;;  %10978 = vmatprep.subr.bf16.mxu1 %v14268_v43  ;;  %v388_v42 = vld [vmem:[#allocation2 + $0x570] sm:$0xff]  ;;  %v385_v43 = vld [vmem:[#allocation2 + $0x558] sm:$0xff] }
 0x3f6   :  { %v14314_v50 = vcombine.high %v384_v40, %v388_v42  ;;  %v14313_v0 = vcombine.low %v384_v40, %v388_v42  ;;  %v14315_v2 = vcombine.low %v385_v43, %v389_v46  ;;  %v429_v40 = vld [vmem:[#allocation2 + $0x6b8] sm:$0xff] }
 0x3f8   :  { %10487 = vmatpush1.bf16.msra.mxu0 %v14265_v51  ;;  %10979 = vmatpush1.bf16.msra.mxu1 %v14267_v55  ;;  %v14316_v51 = vcombine.high %v385_v43, %v389_v46  ;;  %v392_v55 = vld [vmem:[#allocation2 + $0x590] sm:$0xff] }
 0x3f9   :  { %10497 = vmatprep.subr.bf16.mxu0 %v14274_v61  ;;  %10989 = vmatprep.subr.bf16.mxu1 %v14276_v62  ;;  %v396_v61 = vld [vmem:[#allocation2 + $0x5b0] sm:$0xff]  ;;  %v393_v62 = vld [vmem:[#allocation2 + $0x598] sm:$0xff] }
 0x3fa   :  { %v14322_v3 = vcombine.high %v392_v55, %v396_v61  ;;  %v14321_v10 = vcombine.low %v392_v55, %v396_v61  ;;  %v437_v55 = vld [vmem:[#allocation2 + $0x6f8] sm:$0xff] }
 0x3fb   :  { %10489 = vmatmul.mubr.bf16.vlgmr.msra.gmra.mrb[4].mxu0 %v17285_v12  ;;  %10981 = vmatmul.mubr.bf16.vlgmr.msra.gmra.mrb[4].mxu1 %v17285_v12  ;;  %v14291_v12 = vcombine.low %v361_v11, %v365_v13  ;;  %v14323_v11 = vcombine.low %v393_v62, %v397_v63 }
 0x3fc   :  { %10498 = vmatpush1.bf16.msra.mxu0 %v14273_v4  ;;  %10990 = vmatpush1.bf16.msra.mxu1 %v14275_v5  ;;  %v14324_v4 = vcombine.high %v393_v62, %v397_v63  ;;  %v400_v5 = vld [vmem:[#allocation2 + $0x5d0] sm:$0xff] }
 0x3fd   :  { %10499 = vmatprep.subr.bf16.mxu0 %v14282_v6  ;;  %10991 = vmatprep.subr.bf16.mxu1 %v14284_v8  ;;  %v404_v6 = vld [vmem:[#allocation2 + $0x5f0] sm:$0xff]  ;;  %v401_v8 = vld [vmem:[#allocation2 + $0x5d8] sm:$0xff] }
 0x3fe   :  { %10529 = vmatprep.mubr.bf16.mxu0 %v17290_v23  ;;  %11021 = vmatprep.mubr.bf16.mxu1 %v17290_v23  ;;  %v14308_v23 = vcombine.high %v377_v33, %v381_v57  ;;  %v14330_v13 = vcombine.high %v400_v5, %v404_v6  ;;  %v14329_v21 = vcombine.low %v400_v5, %v404_v6  ;;  %v445_v5 = vld [vmem:[#allocation2 + $0x738] sm:$0xff] }
 0x3ff   :  { %v14331_v22 = vcombine.low %v401_v8, %v405_v9 }
 0x400   :  { %10500 = vmatpush1.bf16.msra.mxu0 %v14281_v15  ;;  %10992 = vmatpush1.bf16.msra.mxu1 %v14283_v17  ;;  %v14332_v15 = vcombine.high %v401_v8, %v405_v9  ;;  %v408_v17 = vld [vmem:[#allocation2 + $0x610] sm:$0xff] }
 0x401   :  { %10501 = vmatprep.subr.bf16.mxu0 %v14290_v18  ;;  %10993 = vmatprep.subr.bf16.mxu1 %v14292_v19  ;;  %v412_v18 = vld [vmem:[#allocation2 + $0x630] sm:$0xff]  ;;  %v409_v19 = vld [vmem:[#allocation2 + $0x618] sm:$0xff] }
 0x402   :  { %v14338_v24 = vcombine.high %v408_v17, %v412_v18  ;;  %v14337_v32 = vcombine.low %v408_v17, %v412_v18  ;;  %v14339_v33 = vcombine.low %v409_v19, %v413_v20  ;;  %v453_v17 = vld [vmem:[#allocation2 + $0x778] sm:$0xff] }
 0x404   :  { %10502 = vmatpush1.bf16.msra.mxu0 %v14289_v27  ;;  %10994 = vmatpush1.bf16.msra.mxu1 %v14291_v12  ;;  %v14340_v27 = vcombine.high %v409_v19, %v413_v20  ;;  %v416_v12 = vld [vmem:[#allocation2 + $0x650] sm:$0xff] }
 0x405   :  { %10503 = vmatprep.subr.bf16.mxu0 %v14298_v28  ;;  %10995 = vmatprep.subr.bf16.mxu1 %v14300_v30  ;;  %v420_v28 = vld [vmem:[#allocation2 + $0x670] sm:$0xff]  ;;  %v417_v30 = vld [vmem:[#allocation2 + $0x658] sm:$0xff] }
 0x406   :  { %v14346_v57 = vcombine.high %v416_v12, %v420_v28  ;;  %v14345_v42 = vcombine.low %v416_v12, %v420_v28  ;;  %v14347_v43 = vcombine.low %v417_v30, %v421_v31  ;;  %v461_v12 = vld [vmem:[#allocation2 + $0x7b8] sm:$0xff] }
 0x408   :  { %10504 = vmatpush1.bf16.msra.mxu0 %v14297_v35  ;;  %10996 = vmatpush1.bf16.msra.mxu1 %v14299_v36  ;;  %v14348_v35 = vcombine.high %v417_v30, %v421_v31  ;;  %v424_v36 = vld [vmem:[#allocation2 + $0x690] sm:$0xff] }
 0x409   :  { %10505 = vmatprep.subr.bf16.mxu0 %v14306_v37  ;;  %10997 = vmatprep.subr.bf16.mxu1 %v14308_v23  ;;  %v428_v37 = vld [vmem:[#allocation2 + $0x6b0] sm:$0xff]  ;;  %v425_v23 = vld [vmem:[#allocation2 + $0x698] sm:$0xff] }
 0x40a   :  { %v14354_v46 = vcombine.high %v424_v36, %v428_v37  ;;  %v14353_v61 = vcombine.low %v424_v36, %v428_v37  ;;  %v14355_v62 = vcombine.low %v425_v23, %v429_v40  ;;  %v469_v36 = vld [vmem:[#allocation2 + $0x7f8] sm:$0xff] }
 0x40c   :  { %10506 = vmatpush1.bf16.msra.mxu0 %v14305_v47  ;;  %10998 = vmatpush1.bf16.msra.mxu1 %v14307_v49  ;;  %v14356_v47 = vcombine.high %v425_v23, %v429_v40  ;;  %v432_v49 = vld [vmem:[#allocation2 + $0x6d0] sm:$0xff] }
 0x40d   :  { %10507 = vmatprep.subr.bf16.mxu0 %v14314_v50  ;;  %10999 = vmatprep.subr.bf16.mxu1 %v14316_v51  ;;  %v436_v50 = vld [vmem:[#allocation2 + $0x6f0] sm:$0xff]  ;;  %v433_v51 = vld [vmem:[#allocation2 + $0x6d8] sm:$0xff] }
 0x40e   :  { %v14362_v63 = vcombine.high %v432_v49, %v436_v50  ;;  %v14361_v6 = vcombine.low %v432_v49, %v436_v50  ;;  %v14363_v8 = vcombine.low %v433_v51, %v437_v55  ;;  %v477_v49 = vld [vmem:[#allocation2 + $0x838] sm:$0xff] }
 0x410   :  { %10508 = vmatpush1.bf16.msra.mxu0 %v14313_v0  ;;  %11000 = vmatpush1.bf16.msra.mxu1 %v14315_v2  ;;  %v14364_v0 = vcombine.high %v433_v51, %v437_v55  ;;  %v440_v2 = vld [vmem:[#allocation2 + $0x710] sm:$0xff] }
 0x411   :  { %10509 = vmatprep.subr.bf16.mxu0 %v14322_v3  ;;  %11001 = vmatprep.subr.bf16.mxu1 %v14324_v4  ;;  %v444_v3 = vld [vmem:[#allocation2 + $0x730] sm:$0xff]  ;;  %v441_v4 = vld [vmem:[#allocation2 + $0x718] sm:$0xff] }
 0x412   :  { %v14370_v9 = vcombine.high %v440_v2, %v444_v3  ;;  %v14369_v18 = vcombine.low %v440_v2, %v444_v3  ;;  %v14371_v19 = vcombine.low %v441_v4, %v445_v5  ;;  %v485_v2 = vld [vmem:[#allocation2 + $0x878] sm:$0xff] }
 0x414   :  { %10510 = vmatpush1.bf16.msra.mxu0 %v14321_v10  ;;  %11002 = vmatpush1.bf16.msra.mxu1 %v14323_v11  ;;  %v14372_v10 = vcombine.high %v441_v4, %v445_v5  ;;  %v448_v11 = vld [vmem:[#allocation2 + $0x750] sm:$0xff] }
 0x415   :  { %10511 = vmatprep.subr.bf16.mxu0 %v14330_v13  ;;  %11003 = vmatprep.subr.bf16.mxu1 %v14332_v15  ;;  %v452_v13 = vld [vmem:[#allocation2 + $0x770] sm:$0xff]  ;;  %v449_v15 = vld [vmem:[#allocation2 + $0x758] sm:$0xff] }
 0x416   :  { %v14378_v20 = vcombine.high %v448_v11, %v452_v13  ;;  %v14377_v28 = vcombine.low %v448_v11, %v452_v13  ;;  %v14379_v30 = vcombine.low %v449_v15, %v453_v17  ;;  %v493_v11 = vld [vmem:[#allocation2 + $0x8b8] sm:$0xff] }
 0x418   :  { %10512 = vmatpush1.bf16.msra.mxu0 %v14329_v21  ;;  %11004 = vmatpush1.bf16.msra.mxu1 %v14331_v22  ;;  %v14380_v21 = vcombine.high %v449_v15, %v453_v17  ;;  %v456_v22 = vld [vmem:[#allocation2 + $0x790] sm:$0xff] }
 0x419   :  { %10513 = vmatprep.subr.bf16.mxu0 %v14338_v24  ;;  %11005 = vmatprep.subr.bf16.mxu1 %v14340_v27  ;;  %v460_v24 = vld [vmem:[#allocation2 + $0x7b0] sm:$0xff]  ;;  %v457_v27 = vld [vmem:[#allocation2 + $0x798] sm:$0xff] }
 0x41a   :  { %v14386_v31 = vcombine.high %v456_v22, %v460_v24  ;;  %v14385_v37 = vcombine.low %v456_v22, %v460_v24  ;;  %v14387_v23 = vcombine.low %v457_v27, %v461_v12  ;;  %v501_v22 = vld [vmem:[#allocation2 + $0x8f8] sm:$0xff] }
 0x41c   :  { %10514 = vmatpush1.bf16.msra.mxu0 %v14337_v32  ;;  %11006 = vmatpush1.bf16.msra.mxu1 %v14339_v33  ;;  %v14388_v32 = vcombine.high %v457_v27, %v461_v12  ;;  %v464_v33 = vld [vmem:[#allocation2 + $0x7d0] sm:$0xff] }
 0x41d   :  { %10515 = vmatprep.subr.bf16.mxu0 %v14346_v57  ;;  %11007 = vmatprep.subr.bf16.mxu1 %v14348_v35  ;;  %v468_v57 = vld [vmem:[#allocation2 + $0x7f0] sm:$0xff]  ;;  %v465_v35 = vld [vmem:[#allocation2 + $0x7d8] sm:$0xff] }
 0x41e   :  { %v14394_v40 = vcombine.high %v464_v33, %v468_v57  ;;  %v14393_v50 = vcombine.low %v464_v33, %v468_v57  ;;  %v14395_v51 = vcombine.low %v465_v35, %v469_v36 }
 0x420   :  { %10516 = vmatpush1.bf16.msra.mxu0 %v14345_v42  ;;  %11008 = vmatpush1.bf16.msra.mxu1 %v14347_v43  ;;  %v14396_v42 = vcombine.high %v465_v35, %v469_v36  ;;  %v472_v43 = vld [vmem:[#allocation2 + $0x810] sm:$0xff] }
 0x421   :  { %10517 = vmatprep.subr.bf16.mxu0 %v14354_v46  ;;  %11009 = vmatprep.subr.bf16.mxu1 %v14356_v47  ;;  %v476_v46 = vld [vmem:[#allocation2 + $0x830] sm:$0xff]  ;;  %v473_v47 = vld [vmem:[#allocation2 + $0x818] sm:$0xff] }
 0x422   :  { %v14402_v55 = vcombine.high %v472_v43, %v476_v46  ;;  %v14401_v3 = vcombine.low %v472_v43, %v476_v46  ;;  %v14403_v4 = vcombine.low %v473_v47, %v477_v49  ;;  %v512_v36 = vld [vmem:[#allocation2 + $0x950] sm:$0xff] }
 0x424   :  { %10518 = vmatpush1.bf16.msra.mxu0 %v14353_v61  ;;  %11010 = vmatpush1.bf16.msra.mxu1 %v14355_v62  ;;  %v14404_v61 = vcombine.high %v473_v47, %v477_v49  ;;  %v480_v62 = vld [vmem:[#allocation2 + $0x850] sm:$0xff] }
 0x425   :  { %10519 = vmatprep.subr.bf16.mxu0 %v14362_v63  ;;  %11011 = vmatprep.subr.bf16.mxu1 %v14364_v0  ;;  %v484_v63 = vld [vmem:[#allocation2 + $0x870] sm:$0xff]  ;;  %v481_v0 = vld [vmem:[#allocation2 + $0x858] sm:$0xff] }
 0x426   :  { %v14410_v5 = vcombine.high %v480_v62, %v484_v63  ;;  %v14409_v13 = vcombine.low %v480_v62, %v484_v63  ;;  %v14411_v15 = vcombine.low %v481_v0, %v485_v2  ;;  %v520_v49 = vld [vmem:[#allocation2 + $0x990] sm:$0xff] }
 0x428   :  { %10520 = vmatpush1.bf16.msra.mxu0 %v14361_v6  ;;  %11012 = vmatpush1.bf16.msra.mxu1 %v14363_v8  ;;  %v14412_v6 = vcombine.high %v481_v0, %v485_v2  ;;  %v488_v8 = vld [vmem:[#allocation2 + $0x890] sm:$0xff] }
 0x429   :  { %10521 = vmatprep.subr.bf16.mxu0 %v14370_v9  ;;  %11013 = vmatprep.subr.bf16.mxu1 %v14372_v10  ;;  %v492_v9 = vld [vmem:[#allocation2 + $0x8b0] sm:$0xff]  ;;  %v489_v10 = vld [vmem:[#allocation2 + $0x898] sm:$0xff] }
 0x42a   :  { %v14418_v17 = vcombine.high %v488_v8, %v492_v9  ;;  %v14417_v24 = vcombine.low %v488_v8, %v492_v9  ;;  %v528_v2 = vld [vmem:[#allocation2 + $0x9d0] sm:$0xff] }
 0x42c   :  { %10522 = vmatpush1.bf16.msra.mxu0 %v14369_v18  ;;  %11014 = vmatpush1.bf16.msra.mxu1 %v14371_v19  ;;  %v14420_v18 = vcombine.high %v489_v10, %v493_v11  ;;  %v496_v19 = vld [vmem:[#allocation2 + $0x8d0] sm:$0xff] }
 0x42d   :  { %10523 = vmatprep.subr.bf16.mxu0 %v14378_v20  ;;  %11015 = vmatprep.subr.bf16.mxu1 %v14380_v21  ;;  %v500_v20 = vld [vmem:[#allocation2 + $0x8f0] sm:$0xff]  ;;  %v497_v21 = vld [vmem:[#allocation2 + $0x8d8] sm:$0xff] }
 0x42e   :  { %v14426_v27 = vcombine.high %v496_v19, %v500_v20  ;;  %v14428_v12 = vcombine.high %v497_v21, %v501_v22  ;;  %v14425_v33 = vcombine.low %v496_v19, %v500_v20  ;;  %v14427_v57 = vcombine.low %v497_v21, %v501_v22  ;;  %v544_v22 = vld [vmem:[#allocation2 + $0xa50] sm:$0xff] }
 0x430   :  { %10524 = vmatpush1.bf16.msra.mxu0 %v14377_v28  ;;  %11016 = vmatpush1.bf16.msra.mxu1 %v14379_v30  ;;  %v504_v28 = vld [vmem:[#allocation2 + $0x910] sm:$0xff] }
 0x431   :  { %10525 = vmatprep.subr.bf16.mxu0 %v14386_v31  ;;  %11017 = vmatprep.subr.bf16.mxu1 %v14388_v32  ;;  %v508_v30 = vld [vmem:[#allocation2 + $0x930] sm:$0xff]  ;;  %v505_v31 = vld [vmem:[#allocation2 + $0x918] sm:$0xff] }
 0x432   :  { %v509_v32 = vld [vmem:[#allocation2 + $0x938] sm:$0xff]  ;;  %v14434_v35 = vcombine.high %v504_v28, %v508_v30 }
 0x433   :  { %v14435_v43 = vcombine.low %v505_v31, %v509_v32 }
 0x434   :  { %10526 = vmatpush1.bf16.msra.mxu0 %v14385_v37  ;;  %11018 = vmatpush1.bf16.msra.mxu1 %v14387_v23  ;;  %v516_v37 = vld [vmem:[#allocation2 + $0x970] sm:$0xff]  ;;  %v513_v23 = vld [vmem:[#allocation2 + $0x958] sm:$0xff] }
 0x435   :  { %10527 = vmatprep.subr.bf16.mxu0 %v14394_v40  ;;  %11019 = vmatprep.subr.bf16.mxu1 %v14396_v42  ;;  %v517_v40 = vld [vmem:[#allocation2 + $0x978] sm:$0xff]  ;;  %v14433_v42 = vcombine.low %v504_v28, %v508_v30  ;;  %v14442_v46 = vcombine.high %v512_v36, %v516_v37 }
 0x436   :  { %v14444_v47 = vcombine.high %v513_v23, %v517_v40  ;;  %v14443_v62 = vcombine.low %v513_v23, %v517_v40  ;;  %v560_v40 = vld [vmem:[#allocation2 + $0xad0] sm:$0xff] }
 0x438   :  { %10528 = vmatpush1.bf16.msra.mxu0 %v14393_v50  ;;  %11020 = vmatpush1.bf16.msra.mxu1 %v14395_v51  ;;  %v524_v50 = vld [vmem:[#allocation2 + $0x9b0] sm:$0xff]  ;;  %v521_v51 = vld [vmem:[#allocation2 + $0x998] sm:$0xff] }
 0x439   :  { %10538 = vmatprep.subr.bf16.mxu0 %v14402_v55  ;;  %11030 = vmatprep.subr.bf16.mxu1 %v14404_v61  ;;  %v525_v55 = vld [vmem:[#allocation2 + $0x9b8] sm:$0xff]  ;;  %v14441_v61 = vcombine.low %v512_v36, %v516_v37  ;;  %v14450_v63 = vcombine.high %v520_v49, %v524_v50 }
 0x43a   :  { %v14452_v0 = vcombine.high %v521_v51, %v525_v55  ;;  %v14451_v8 = vcombine.low %v521_v51, %v525_v55  ;;  %v568_v55 = vld [vmem:[#allocation2 + $0xb10] sm:$0xff] }
 0x43b   :  { %10530 = vmatmul.mubr.bf16.vlgmr.msra.gmra.mrb[4].mxu0 %v17302_v25  ;;  %11022 = vmatmul.mubr.bf16.vlgmr.msra.gmra.mrb[4].mxu1 %v17302_v25  ;;  %v14419_v25 = vcombine.low %v489_v10, %v493_v11  ;;  %v536_v11 = vld [vmem:[#allocation2 + $0xa10] sm:$0xff] }
 0x43c   :  { %10539 = vmatpush1.bf16.msra.mxu0 %v14401_v3  ;;  %11031 = vmatpush1.bf16.msra.mxu1 %v14403_v4  ;;  %v532_v3 = vld [vmem:[#allocation2 + $0x9f0] sm:$0xff]  ;;  %v529_v4 = vld [vmem:[#allocation2 + $0x9d8] sm:$0xff] }
 0x43d   :  { %10540 = vmatprep.subr.bf16.mxu0 %v14410_v5  ;;  %11032 = vmatprep.subr.bf16.mxu1 %v14412_v6  ;;  %v533_v5 = vld [vmem:[#allocation2 + $0x9f8] sm:$0xff]  ;;  %v14449_v6 = vcombine.low %v520_v49, %v524_v50  ;;  %v14458_v9 = vcombine.high %v528_v2, %v532_v3 }
 0x43e   :  { %10570 = vmatprep.mubr.bf16.mxu0 %v17304_v34  ;;  %11062 = vmatprep.mubr.bf16.mxu1 %v17304_v34  ;;  %v14436_v34 = vcombine.high %v505_v31, %v509_v32  ;;  %v14460_v10 = vcombine.high %v529_v4, %v533_v5  ;;  %v14459_v19 = vcombine.low %v529_v4, %v533_v5  ;;  %v552_v32 = vld [vmem:[#allocation2 + $0xa90] sm:$0xff] }
 0x43f   :  { %v576_v5 = vld [vmem:[#allocation2 + $0xb50] sm:$0xff] }
 0x440   :  { %10541 = vmatpush1.bf16.msra.mxu0 %v14409_v13  ;;  %11033 = vmatpush1.bf16.msra.mxu1 %v14411_v15  ;;  %v540_v13 = vld [vmem:[#allocation2 + $0xa30] sm:$0xff]  ;;  %v537_v15 = vld [vmem:[#allocation2 + $0xa18] sm:$0xff] }
 0x441   :  { %10542 = vmatprep.subr.bf16.mxu0 %v14418_v17  ;;  %11034 = vmatprep.subr.bf16.mxu1 %v14420_v18  ;;  %v541_v17 = vld [vmem:[#allocation2 + $0xa38] sm:$0xff]  ;;  %v14457_v18 = vcombine.low %v528_v2, %v532_v3  ;;  %v14466_v20 = vcombine.high %v536_v11, %v540_v13 }
 0x442   :  { %v14468_v21 = vcombine.high %v537_v15, %v541_v17  ;;  %v14467_v28 = vcombine.low %v537_v15, %v541_v17  ;;  %v584_v17 = vld [vmem:[#allocation2 + $0xb90] sm:$0xff] }
 0x444   :  { %10543 = vmatpush1.bf16.msra.mxu0 %v14417_v24  ;;  %11035 = vmatpush1.bf16.msra.mxu1 %v14419_v25  ;;  %v548_v24 = vld [vmem:[#allocation2 + $0xa70] sm:$0xff]  ;;  %v545_v25 = vld [vmem:[#allocation2 + $0xa58] sm:$0xff] }
 0x445   :  { %10544 = vmatprep.subr.bf16.mxu0 %v14426_v27  ;;  %11036 = vmatprep.subr.bf16.mxu1 %v14428_v12  ;;  %v549_v27 = vld [vmem:[#allocation2 + $0xa78] sm:$0xff]  ;;  %v14465_v12 = vcombine.low %v536_v11, %v540_v13  ;;  %v14474_v30 = vcombine.high %v544_v22, %v548_v24 }
 0x446   :  { %v14476_v31 = vcombine.high %v545_v25, %v549_v27  ;;  %v14475_v36 = vcombine.low %v545_v25, %v549_v27  ;;  %v592_v27 = vld [vmem:[#allocation2 + $0xbd0] sm:$0xff] }
 0x448   :  { %10545 = vmatpush1.bf16.msra.mxu0 %v14425_v33  ;;  %11037 = vmatpush1.bf16.msra.mxu1 %v14427_v57  ;;  %v556_v33 = vld [vmem:[#allocation2 + $0xab0] sm:$0xff]  ;;  %v553_v57 = vld [vmem:[#allocation2 + $0xa98] sm:$0xff] }
 0x449   :  { %10546 = vmatprep.subr.bf16.mxu0 %v14434_v35  ;;  %11038 = vmatprep.subr.bf16.mxu1 %v14436_v34  ;;  %v557_v35 = vld [vmem:[#allocation2 + $0xab8] sm:$0xff]  ;;  %v14473_v34 = vcombine.low %v544_v22, %v548_v24  ;;  %v14482_v37 = vcombine.high %v552_v32, %v556_v33 }
 0x44a   :  { %v14484_v23 = vcombine.high %v553_v57, %v557_v35  ;;  %v14483_v49 = vcombine.low %v553_v57, %v557_v35  ;;  %v600_v35 = vld [vmem:[#allocation2 + $0xc10] sm:$0xff] }
 0x44c   :  { %10547 = vmatpush1.bf16.msra.mxu0 %v14433_v42  ;;  %11039 = vmatpush1.bf16.msra.mxu1 %v14435_v43  ;;  %v564_v42 = vld [vmem:[#allocation2 + $0xaf0] sm:$0xff]  ;;  %v561_v43 = vld [vmem:[#allocation2 + $0xad8] sm:$0xff] }
 0x44d   :  { %10548 = vmatprep.subr.bf16.mxu0 %v14442_v46  ;;  %11040 = vmatprep.subr.bf16.mxu1 %v14444_v47  ;;  %v565_v46 = vld [vmem:[#allocation2 + $0xaf8] sm:$0xff]  ;;  %v14481_v47 = vcombine.low %v552_v32, %v556_v33  ;;  %v14490_v50 = vcombine.high %v560_v40, %v564_v42 }
 0x44e   :  { %v14492_v51 = vcombine.high %v561_v43, %v565_v46  ;;  %v14491_v2 = vcombine.low %v561_v43, %v565_v46  ;;  %v608_v46 = vld [vmem:[#allocation2 + $0xc50] sm:$0xff] }
 0x450   :  { %10549 = vmatpush1.bf16.msra.mxu0 %v14441_v61  ;;  %11041 = vmatpush1.bf16.msra.mxu1 %v14443_v62  ;;  %v572_v61 = vld [vmem:[#allocation2 + $0xb30] sm:$0xff]  ;;  %v569_v62 = vld [vmem:[#allocation2 + $0xb18] sm:$0xff] }
 0x451   :  { %10550 = vmatprep.subr.bf16.mxu0 %v14450_v63  ;;  %11042 = vmatprep.subr.bf16.mxu1 %v14452_v0  ;;  %v573_v63 = vld [vmem:[#allocation2 + $0xb38] sm:$0xff]  ;;  %v14489_v0 = vcombine.low %v560_v40, %v564_v42  ;;  %v14498_v3 = vcombine.high %v568_v55, %v572_v61 }
 0x452   :  { %v14500_v4 = vcombine.high %v569_v62, %v573_v63  ;;  %v14499_v11 = vcombine.low %v569_v62, %v573_v63  ;;  %v616_v63 = vld [vmem:[#allocation2 + $0xc90] sm:$0xff] }
 0x454   :  { %10551 = vmatpush1.bf16.msra.mxu0 %v14449_v6  ;;  %11043 = vmatpush1.bf16.msra.mxu1 %v14451_v8  ;;  %v580_v6 = vld [vmem:[#allocation2 + $0xb70] sm:$0xff]  ;;  %v577_v8 = vld [vmem:[#allocation2 + $0xb58] sm:$0xff] }
 0x455   :  { %10552 = vmatprep.subr.bf16.mxu0 %v14458_v9  ;;  %11044 = vmatprep.subr.bf16.mxu1 %v14460_v10  ;;  %v581_v9 = vld [vmem:[#allocation2 + $0xb78] sm:$0xff]  ;;  %v14497_v10 = vcombine.low %v568_v55, %v572_v61  ;;  %v14506_v13 = vcombine.high %v576_v5, %v580_v6 }
 0x456   :  { %v14508_v15 = vcombine.high %v577_v8, %v581_v9  ;;  %v14507_v22 = vcombine.low %v577_v8, %v581_v9  ;;  %v624_v9 = vld [vmem:[#allocation2 + $0xcd0] sm:$0xff] }
 0x458   :  { %10553 = vmatpush1.bf16.msra.mxu0 %v14457_v18  ;;  %11045 = vmatpush1.bf16.msra.mxu1 %v14459_v19  ;;  %v588_v18 = vld [vmem:[#allocation2 + $0xbb0] sm:$0xff]  ;;  %v585_v19 = vld [vmem:[#allocation2 + $0xb98] sm:$0xff] }
 0x459   :  { %10554 = vmatprep.subr.bf16.mxu0 %v14466_v20  ;;  %11046 = vmatprep.subr.bf16.mxu1 %v14468_v21  ;;  %v589_v20 = vld [vmem:[#allocation2 + $0xbb8] sm:$0xff]  ;;  %v14505_v21 = vcombine.low %v576_v5, %v580_v6  ;;  %v14514_v24 = vcombine.high %v584_v17, %v588_v18 }
 0x45a   :  { %v14516_v25 = vcombine.high %v585_v19, %v589_v20  ;;  %v14515_v32 = vcombine.low %v585_v19, %v589_v20  ;;  %v632_v19 = vld [vmem:[#allocation2 + $0xd10] sm:$0xff] }
 0x45b   :  { %v636_v20 = vld [vmem:[#allocation2 + $0xd30] sm:$0xff] }
 0x45c   :  { %10555 = vmatpush1.bf16.msra.mxu0 %v14465_v12  ;;  %11047 = vmatpush1.bf16.msra.mxu1 %v14467_v28  ;;  %v596_v12 = vld [vmem:[#allocation2 + $0xbf0] sm:$0xff]  ;;  %v593_v28 = vld [vmem:[#allocation2 + $0xbd8] sm:$0xff] }
 0x45d   :  { %10556 = vmatprep.subr.bf16.mxu0 %v14474_v30  ;;  %11048 = vmatprep.subr.bf16.mxu1 %v14476_v31  ;;  %v597_v30 = vld [vmem:[#allocation2 + $0xbf8] sm:$0xff]  ;;  %v14513_v31 = vcombine.low %v584_v17, %v588_v18  ;;  %v14522_v33 = vcombine.high %v592_v27, %v596_v12 }
 0x45e   :  { %v14524_v57 = vcombine.high %v593_v28, %v597_v30  ;;  %v14523_v40 = vcombine.low %v593_v28, %v597_v30  ;;  %v644_v28 = vld [vmem:[#allocation2 + $0xd70] sm:$0xff]  ;;  %v641_v30 = vld [vmem:[#allocation2 + $0xd58] sm:$0xff] }
 0x460   :  { %10557 = vmatpush1.bf16.msra.mxu0 %v14473_v34  ;;  %11049 = vmatpush1.bf16.msra.mxu1 %v14475_v36  ;;  %v604_v34 = vld [vmem:[#allocation2 + $0xc30] sm:$0xff]  ;;  %v601_v36 = vld [vmem:[#allocation2 + $0xc18] sm:$0xff] }
 0x461   :  { %10558 = vmatprep.subr.bf16.mxu0 %v14482_v37  ;;  %11050 = vmatprep.subr.bf16.mxu1 %v14484_v23  ;;  %v605_v37 = vld [vmem:[#allocation2 + $0xc38] sm:$0xff]  ;;  %v14521_v23 = vcombine.low %v592_v27, %v596_v12  ;;  %v14530_v42 = vcombine.high %v600_v35, %v604_v34  ;;  %v14562_v27 = vcombine.high %v632_v19, %v636_v20  ;;  %v640_v12 = vld [vmem:[#allocation2 + $0xd50] sm:$0xff] }
 0x462   :  { %v14532_v43 = vcombine.high %v601_v36, %v605_v37  ;;  %v14531_v55 = vcombine.low %v601_v36, %v605_v37  ;;  %v652_v36 = vld [vmem:[#allocation2 + $0xdb0] sm:$0xff]  ;;  %v649_v37 = vld [vmem:[#allocation2 + $0xd98] sm:$0xff] }
 0x464   :  { %10559 = vmatpush1.bf16.msra.mxu0 %v14481_v47  ;;  %11051 = vmatpush1.bf16.msra.mxu1 %v14483_v49  ;;  %v612_v47 = vld [vmem:[#allocation2 + $0xc70] sm:$0xff]  ;;  %v609_v49 = vld [vmem:[#allocation2 + $0xc58] sm:$0xff] }
 0x465   :  { %10560 = vmatprep.subr.bf16.mxu0 %v14490_v50  ;;  %11052 = vmatprep.subr.bf16.mxu1 %v14492_v51  ;;  %v613_v50 = vld [vmem:[#allocation2 + $0xc78] sm:$0xff]  ;;  %v14529_v51 = vcombine.low %v600_v35, %v604_v34  ;;  %v14538_v61 = vcombine.high %v608_v46, %v612_v47  ;;  %v648_v34 = vld [vmem:[#allocation2 + $0xd90] sm:$0xff] }
 0x466   :  { %v14540_v62 = vcombine.high %v609_v49, %v613_v50  ;;  %v14539_v5 = vcombine.low %v609_v49, %v613_v50  ;;  %v656_v49 = vld [vmem:[#allocation2 + $0xdd0] sm:$0xff] }
 0x467   :  { %v660_v50 = vld [vmem:[#allocation2 + $0xdf0] sm:$0xff] }
 0x468   :  { %10561 = vmatpush1.bf16.msra.mxu0 %v14489_v0  ;;  %11053 = vmatpush1.bf16.msra.mxu1 %v14491_v2  ;;  %v620_v0 = vld [vmem:[#allocation2 + $0xcb0] sm:$0xff]  ;;  %v617_v2 = vld [vmem:[#allocation2 + $0xc98] sm:$0xff] }
 0x469   :  { %10562 = vmatprep.subr.bf16.mxu0 %v14498_v3  ;;  %11054 = vmatprep.subr.bf16.mxu1 %v14500_v4  ;;  %v621_v3 = vld [vmem:[#allocation2 + $0xcb8] sm:$0xff]  ;;  %v14537_v4 = vcombine.low %v608_v46, %v612_v47  ;;  %v14546_v6 = vcombine.high %v616_v63, %v620_v0 }
 0x46a   :  { %v14548_v8 = vcombine.high %v617_v2, %v621_v3 }
 0x46c   :  { %10563 = vmatpush1.bf16.msra.mxu0 %v14497_v10  ;;  %11055 = vmatpush1.bf16.msra.mxu1 %v14499_v11  ;;  %v628_v10 = vld [vmem:[#allocation2 + $0xcf0] sm:$0xff]  ;;  %v625_v11 = vld [vmem:[#allocation2 + $0xcd8] sm:$0xff] }
 0x46d   :  { %10564 = vmatprep.subr.bf16.mxu0 %v14506_v13  ;;  %11056 = vmatprep.subr.bf16.mxu1 %v14508_v15  ;;  %v629_v13 = vld [vmem:[#allocation2 + $0xcf8] sm:$0xff]  ;;  %v14545_v15 = vcombine.low %v616_v63, %v620_v0  ;;  %v14554_v17 = vcombine.high %v624_v9, %v628_v10 }
 0x46e   :  { %v14556_v18 = vcombine.high %v625_v11, %v629_v13 }
 0x470   :  { %10565 = vmatpush1.bf16.msra.mxu0 %v14505_v21  ;;  %11057 = vmatpush1.bf16.msra.mxu1 %v14507_v22  ;;  %v633_v21 = vld [vmem:[#allocation2 + $0xd18] sm:$0xff] }
 0x471   :  { %10566 = vmatprep.subr.bf16.mxu0 %v14514_v24  ;;  %11058 = vmatprep.subr.bf16.mxu1 %v14516_v25  ;;  %v637_v22 = vld [vmem:[#allocation2 + $0xd38] sm:$0xff]  ;;  %v14553_v24 = vcombine.low %v624_v9, %v628_v10  ;;  %v14555_v25 = vcombine.low %v625_v11, %v629_v13  ;;  %v664_v10 = vld [vmem:[#allocation2 + $0xe10] sm:$0xff] }
 0x472   :  { %v668_v11 = vld [vmem:[#allocation2 + $0xe30] sm:$0xff]  ;;  %v665_v13 = vld [vmem:[#allocation2 + $0xe18] sm:$0xff] }
 0x474   :  { %10567 = vmatpush1.bf16.msra.mxu0 %v14513_v31  ;;  %11059 = vmatpush1.bf16.msra.mxu1 %v14515_v32  ;;  %v645_v31 = vld [vmem:[#allocation2 + $0xd78] sm:$0xff]  ;;  %v14561_v32 = vcombine.low %v632_v19, %v636_v20  ;;  %v672_v20 = vld [vmem:[#allocation2 + $0xe50] sm:$0xff] }
 0x475   :  { %10568 = vmatprep.subr.bf16.mxu0 %v14522_v33  ;;  %11060 = vmatprep.subr.bf16.mxu1 %v14524_v57  ;;  %v14563_v33 = vcombine.low %v633_v21, %v637_v22  ;;  %v14570_v57 = vcombine.high %v640_v12, %v644_v28  ;;  %v14572_v35 = vcombine.high %v641_v30, %v645_v31 }
 0x478   :  { %10569 = vmatpush1.bf16.msra.mxu0 %v14521_v23  ;;  %11061 = vmatpush1.bf16.msra.mxu1 %v14523_v40  ;;  %v653_v23 = vld [vmem:[#allocation2 + $0xdb8] sm:$0xff]  ;;  %v14569_v40 = vcombine.low %v640_v12, %v644_v28  ;;  %v680_v28 = vld [vmem:[#allocation2 + $0xe90] sm:$0xff] }
 0x479   :  { %10579 = vmatprep.subr.bf16.mxu0 %v14530_v42  ;;  %11071 = vmatprep.subr.bf16.mxu1 %v14532_v43  ;;  %v14571_v42 = vcombine.low %v641_v30, %v645_v31  ;;  %v14578_v43 = vcombine.high %v648_v34, %v652_v36  ;;  %v14580_v47 = vcombine.high %v649_v37, %v653_v23  ;;  %v684_v30 = vld [vmem:[#allocation2 + $0xeb0] sm:$0xff]  ;;  %v681_v31 = vld [vmem:[#allocation2 + $0xe98] sm:$0xff] }
 0x47b   :  { %10571 = vmatmul.mubr.bf16.vlgmr.msra.gmra.mrb[4].mxu0 %v17316_v39  ;;  %11063 = vmatmul.mubr.bf16.vlgmr.msra.gmra.mrb[4].mxu1 %v17316_v39  ;;  %v14547_v39 = vcombine.low %v617_v2, %v621_v3  ;;  %v14577_v2 = vcombine.low %v648_v34, %v652_v36  ;;  %v688_v36 = vld [vmem:[#allocation2 + $0xed0] sm:$0xff] }
 0x47c   :  { %10580 = vmatpush1.bf16.msra.mxu0 %v14529_v51  ;;  %11072 = vmatpush1.bf16.msra.mxu1 %v14531_v55 }
 0x47d   :  { %10581 = vmatprep.subr.bf16.mxu0 %v14538_v61  ;;  %11073 = vmatprep.subr.bf16.mxu1 %v14540_v62  ;;  %v657_v61 = vld [vmem:[#allocation2 + $0xdd8] sm:$0xff] }
 0x47e   :  { %10611 = vmatprep.mubr.bf16.mxu0 %v17318_v48  ;;  %11103 = vmatprep.mubr.bf16.mxu1 %v17318_v48  ;;  %v14564_v48 = vcombine.high %v633_v21, %v637_v22  ;;  %v661_v62 = vld [vmem:[#allocation2 + $0xdf8] sm:$0xff]  ;;  %v676_v21 = vld [vmem:[#allocation2 + $0xe70] sm:$0xff] }
 0x47f   :  { %v14588_v9 = vcombine.high %v657_v61, %v661_v62  ;;  %v673_v22 = vld [vmem:[#allocation2 + $0xe58] sm:$0xff] }
 0x480   :  { %10582 = vmatpush1.bf16.msra.mxu0 %v14537_v4  ;;  %11074 = vmatpush1.bf16.msra.mxu1 %v14539_v5  ;;  %v14579_v5 = vcombine.low %v649_v37, %v653_v23  ;;  %v692_v37 = vld [vmem:[#allocation2 + $0xef0] sm:$0xff]  ;;  %v689_v23 = vld [vmem:[#allocation2 + $0xed8] sm:$0xff] }
 0x481   :  { %10583 = vmatprep.subr.bf16.mxu0 %v14546_v6  ;;  %11075 = vmatprep.subr.bf16.mxu1 %v14548_v8  ;;  %v14586_v6 = vcombine.high %v656_v49, %v660_v50 }
 0x484   :  { %10584 = vmatpush1.bf16.msra.mxu0 %v14545_v15  ;;  %11076 = vmatpush1.bf16.msra.mxu1 %v14547_v39  ;;  %v669_v15 = vld [vmem:[#allocation2 + $0xe38] sm:$0xff]  ;;  %v14585_v39 = vcombine.low %v656_v49, %v660_v50  ;;  %v696_v50 = vld [vmem:[#allocation2 + $0xf10] sm:$0xff] }
 0x485   :  { %10585 = vmatprep.subr.bf16.mxu0 %v14554_v17  ;;  %11077 = vmatprep.subr.bf16.mxu1 %v14556_v18  ;;  %v14587_v17 = vcombine.low %v657_v61, %v661_v62  ;;  %v14594_v18 = vcombine.high %v664_v10, %v668_v11  ;;  %v14596_v19 = vcombine.high %v665_v13, %v669_v15  ;;  %v700_v61 = vld [vmem:[#allocation2 + $0xf30] sm:$0xff]  ;;  %v697_v62 = vld [vmem:[#allocation2 + $0xf18] sm:$0xff] }
 0x488   :  { %10586 = vmatpush1.bf16.msra.mxu0 %v14553_v24  ;;  %11078 = vmatpush1.bf16.msra.mxu1 %v14555_v25  ;;  %v677_v24 = vld [vmem:[#allocation2 + $0xe78] sm:$0xff]  ;;  %v14593_v25 = vcombine.low %v664_v10, %v668_v11  ;;  %v14625_v11 = vcombine.low %v696_v50, %v700_v61 }
 0x489   :  { %10587 = vmatprep.subr.bf16.mxu0 %v14562_v27  ;;  %11079 = vmatprep.subr.bf16.mxu1 %v14564_v48  ;;  %v14595_v27 = vcombine.low %v665_v13, %v669_v15  ;;  %v14602_v48 = vcombine.high %v672_v20, %v676_v21  ;;  %v14604_v12 = vcombine.high %v673_v22, %v677_v24  ;;  %v709_v10 = vld [vmem:[#allocation2 + $0xf78] sm:$0xff] }
 0x48c   :  { %10588 = vmatpush1.bf16.msra.mxu0 %v14561_v32  ;;  %11080 = vmatpush1.bf16.msra.mxu1 %v14563_v33  ;;  %v685_v32 = vld [vmem:[#allocation2 + $0xeb8] sm:$0xff]  ;;  %v14601_v33 = vcombine.low %v672_v20, %v676_v21 }
 0x48d   :  { %10589 = vmatprep.subr.bf16.mxu0 %v14570_v57  ;;  %11081 = vmatprep.subr.bf16.mxu1 %v14572_v35  ;;  %v14603_v57 = vcombine.low %v673_v22, %v677_v24  ;;  %v14610_v35 = vcombine.high %v680_v28, %v684_v30  ;;  %v14612_v34 = vcombine.high %v681_v31, %v685_v32  ;;  %v717_v20 = vld [vmem:[#allocation2 + $0xfb8] sm:$0xff] }
 0x48e   :  { %v17457_v46 = vpop.f32.mrb[0].mxu0  ;;  %v17459_v51 = vpop.f32.mrb[0].mxu1 }
 0x48f   :  { %v17461_v55 = vpop.f32.mrb[1].mxu0  ;;  %v17463_v63 = vpop.f32.mrb[1].mxu1 }
 0x490   :  { %v9961_v0 = vpop.f32.mrb[2].mxu0  ;;  %10590 = vmatpush1.bf16.msra.mxu0 %v14569_v40  ;;  %v10453_v3 = vpop.f32.mrb[2].mxu1  ;;  %11082 = vmatpush1.bf16.msra.mxu1 %v14571_v42  ;;  %v693_v40 = vld [vmem:[#allocation2 + $0xef8] sm:$0xff]  ;;  %v14609_v42 = vcombine.low %v680_v28, %v684_v30 }
 0x491   :  { %v9962_v4 = vpop.f32.mrb[3].mxu0  ;;  %10591 = vmatprep.subr.bf16.mxu0 %v14578_v43  ;;  %v10454_v8 = vpop.f32.mrb[3].mxu1  ;;  %11083 = vmatprep.subr.bf16.mxu1 %v14580_v47  ;;  %v14611_v43 = vcombine.low %v681_v31, %v685_v32  ;;  %v14618_v47 = vcombine.high %v688_v36, %v692_v37  ;;  %v14620_v49 = vcombine.high %v689_v23, %v693_v40  ;;  %v701_v0 = vld [vmem:[#allocation2 + $0xf38] sm:$0xff] }
 0x492   :  { %v14619_v3 = vcombine.low %v689_v23, %v693_v40  ;;  %v14626_v4 = vcombine.high %v696_v50, %v700_v61  ;;  %v708_v8 = vld [vmem:[#allocation2 + $0xf70] sm:$0xff]  ;;  %v14627_v13 = vcombine.low %v697_v62, %v701_v0  ;;  %v725_v28 = vld [vmem:[#allocation2 + $0xff8] sm:$0xff] }
 0x493   :  { %v741_v50 = vld [vmem:[#allocation2 + $0x1078] sm:$0xff] }
 0x494   :  { %10592 = vmatpush1.bf16.msra.mxu0 %v14577_v2  ;;  %11084 = vmatpush1.bf16.msra.mxu1 %v14579_v5  ;;  %v14617_v2 = vcombine.low %v688_v36, %v692_v37  ;;  %v14628_v5 = vcombine.high %v697_v62, %v701_v0  ;;  %v733_v36 = vld [vmem:[#allocation2 + $0x1038] sm:$0xff] }
 0x495   :  { %10593 = vmatprep.subr.bf16.mxu0 %v14586_v6  ;;  %11085 = vmatprep.subr.bf16.mxu1 %v14588_v9  ;;  %v704_v6 = vld [vmem:[#allocation2 + $0xf50] sm:$0xff]  ;;  %v705_v9 = vld [vmem:[#allocation2 + $0xf58] sm:$0xff] }
 0x496   :  { %v14634_v15 = vcombine.high %v704_v6, %v708_v8  ;;  %v14633_v21 = vcombine.low %v704_v6, %v708_v8  ;;  %v14635_v22 = vcombine.low %v705_v9, %v709_v10  ;;  %v749_v6 = vld [vmem:[#allocation2 + $0x10b8] sm:$0xff] }
 0x498   :  { %10594 = vmatpush1.bf16.msra.mxu0 %v14585_v39  ;;  %11086 = vmatpush1.bf16.msra.mxu1 %v14587_v17  ;;  %v14636_v39 = vcombine.high %v705_v9, %v709_v10  ;;  %v712_v17 = vld [vmem:[#allocation2 + $0xf90] sm:$0xff] }
 0x499   :  { %10595 = vmatprep.subr.bf16.mxu0 %v14594_v18  ;;  %11087 = vmatprep.subr.bf16.mxu1 %v14596_v19  ;;  %v716_v18 = vld [vmem:[#allocation2 + $0xfb0] sm:$0xff]  ;;  %v713_v19 = vld [vmem:[#allocation2 + $0xf98] sm:$0xff] }
 0x49a   :  { %v14642_v24 = vcombine.high %v712_v17, %v716_v18  ;;  %v14641_v30 = vcombine.low %v712_v17, %v716_v18  ;;  %v14643_v31 = vcombine.low %v713_v19, %v717_v20  ;;  %v757_v17 = vld [vmem:[#allocation2 + $0x10f8] sm:$0xff] }
 0x49c   :  { %10596 = vmatpush1.bf16.msra.mxu0 %v14593_v25  ;;  %11088 = vmatpush1.bf16.msra.mxu1 %v14595_v27  ;;  %v14644_v25 = vcombine.high %v713_v19, %v717_v20  ;;  %v720_v27 = vld [vmem:[#allocation2 + $0xfd0] sm:$0xff] }
 0x49d   :  { %10597 = vmatprep.subr.bf16.mxu0 %v14602_v48  ;;  %11089 = vmatprep.subr.bf16.mxu1 %v14604_v12  ;;  %v724_v48 = vld [vmem:[#allocation2 + $0xff0] sm:$0xff]  ;;  %v721_v12 = vld [vmem:[#allocation2 + $0xfd8] sm:$0xff] }
 0x49e   :  { %v14650_v32 = vcombine.high %v720_v27, %v724_v48  ;;  %v14649_v37 = vcombine.low %v720_v27, %v724_v48  ;;  %v14651_v23 = vcombine.low %v721_v12, %v725_v28 }
 0x4a0   :  { %10598 = vmatpush1.bf16.msra.mxu0 %v14601_v33  ;;  %11090 = vmatpush1.bf16.msra.mxu1 %v14603_v57  ;;  %v14652_v33 = vcombine.high %v721_v12, %v725_v28  ;;  %v728_v57 = vld [vmem:[#allocation2 + $0x1010] sm:$0xff] }
 0x4a1   :  { %10599 = vmatprep.subr.bf16.mxu0 %v14610_v35  ;;  %11091 = vmatprep.subr.bf16.mxu1 %v14612_v34  ;;  %v732_v35 = vld [vmem:[#allocation2 + $0x1030] sm:$0xff]  ;;  %v729_v34 = vld [vmem:[#allocation2 + $0x1018] sm:$0xff] }
 0x4a2   :  { %v14658_v40 = vcombine.high %v728_v57, %v732_v35  ;;  %v14657_v61 = vcombine.low %v728_v57, %v732_v35  ;;  %v14659_v62 = vcombine.low %v729_v34, %v733_v36  ;;  %v768_v28 = vld [vmem:[#allocation2 + $0x1150] sm:$0xff] }
 0x4a4   :  { %10600 = vmatpush1.bf16.msra.mxu0 %v14609_v42  ;;  %11092 = vmatpush1.bf16.msra.mxu1 %v14611_v43  ;;  %v14660_v42 = vcombine.high %v729_v34, %v733_v36  ;;  %v736_v43 = vld [vmem:[#allocation2 + $0x1050] sm:$0xff] }
 0x4a5   :  { %10601 = vmatprep.subr.bf16.mxu0 %v14618_v47  ;;  %11093 = vmatprep.subr.bf16.mxu1 %v14620_v49  ;;  %v740_v47 = vld [vmem:[#allocation2 + $0x1070] sm:$0xff]  ;;  %v737_v49 = vld [vmem:[#allocation2 + $0x1058] sm:$0xff] }
 0x4a6   :  { %v14666_v0 = vcombine.high %v736_v43, %v740_v47  ;;  %v14665_v8 = vcombine.low %v736_v43, %v740_v47  ;;  %v14667_v9 = vcombine.low %v737_v49, %v741_v50  ;;  %v776_v36 = vld [vmem:[#allocation2 + $0x1190] sm:$0xff] }
 0x4a8   :  { %10602 = vmatpush1.bf16.msra.mxu0 %v14617_v2  ;;  %11094 = vmatpush1.bf16.msra.mxu1 %v14619_v3  ;;  %v14668_v2 = vcombine.high %v737_v49, %v741_v50  ;;  %v744_v3 = vld [vmem:[#allocation2 + $0x1090] sm:$0xff] }
 0x4a9   :  { %10603 = vmatprep.subr.bf16.mxu0 %v14626_v4  ;;  %11095 = vmatprep.subr.bf16.mxu1 %v14628_v5  ;;  %v748_v4 = vld [vmem:[#allocation2 + $0x10b0] sm:$0xff]  ;;  %v745_v5 = vld [vmem:[#allocation2 + $0x1098] sm:$0xff] }
 0x4aa   :  { %v14674_v10 = vcombine.high %v744_v3, %v748_v4  ;;  %v14673_v18 = vcombine.low %v744_v3, %v748_v4  ;;  %v784_v50 = vld [vmem:[#allocation2 + $0x11d0] sm:$0xff] }
 0x4ac   :  { %10604 = vmatpush1.bf16.msra.mxu0 %v14625_v11  ;;  %11096 = vmatpush1.bf16.msra.mxu1 %v14627_v13  ;;  %v14676_v11 = vcombine.high %v745_v5, %v749_v6  ;;  %v752_v13 = vld [vmem:[#allocation2 + $0x10d0] sm:$0xff] }
 0x4ad   :  { %10605 = vmatprep.subr.bf16.mxu0 %v14634_v15  ;;  %11097 = vmatprep.subr.bf16.mxu1 %v14636_v39  ;;  %v756_v15 = vld [vmem:[#allocation2 + $0x10f0] sm:$0xff]  ;;  %v753_v39 = vld [vmem:[#allocation2 + $0x10d8] sm:$0xff] }
 0x4ae   :  { %v14682_v19 = vcombine.high %v752_v13, %v756_v15  ;;  %v14684_v20 = vcombine.high %v753_v39, %v757_v17  ;;  %v14681_v27 = vcombine.low %v752_v13, %v756_v15  ;;  %v14683_v48 = vcombine.low %v753_v39, %v757_v17  ;;  %v800_v17 = vld [vmem:[#allocation2 + $0x1250] sm:$0xff] }
 0x4b0   :  { %10606 = vmatpush1.bf16.msra.mxu0 %v14633_v21  ;;  %11098 = vmatpush1.bf16.msra.mxu1 %v14635_v22  ;;  %v760_v21 = vld [vmem:[#allocation2 + $0x1110] sm:$0xff] }
 0x4b1   :  { %10607 = vmatprep.subr.bf16.mxu0 %v14642_v24  ;;  %11099 = vmatprep.subr.bf16.mxu1 %v14644_v25  ;;  %v764_v22 = vld [vmem:[#allocation2 + $0x1130] sm:$0xff]  ;;  %v761_v24 = vld [vmem:[#allocation2 + $0x1118] sm:$0xff] }
 0x4b2   :  { %v765_v25 = vld [vmem:[#allocation2 + $0x1138] sm:$0xff]  ;;  %v14690_v12 = vcombine.high %v760_v21, %v764_v22 }
 0x4b3   :  { %v14691_v57 = vcombine.low %v761_v24, %v765_v25 }
 0x4b4   :  { %10608 = vmatpush1.bf16.msra.mxu0 %v14641_v30  ;;  %11100 = vmatpush1.bf16.msra.mxu1 %v14643_v31  ;;  %v772_v30 = vld [vmem:[#allocation2 + $0x1170] sm:$0xff]  ;;  %v769_v31 = vld [vmem:[#allocation2 + $0x1158] sm:$0xff] }
 0x4b5   :  { %10609 = vmatprep.subr.bf16.mxu0 %v14650_v32  ;;  %11101 = vmatprep.subr.bf16.mxu1 %v14652_v33  ;;  %v773_v32 = vld [vmem:[#allocation2 + $0x1178] sm:$0xff]  ;;  %v14689_v33 = vcombine.low %v760_v21, %v764_v22  ;;  %v14698_v35 = vcombine.high %v768_v28, %v772_v30 }
 0x4b6   :  { %v14700_v34 = vcombine.high %v769_v31, %v773_v32  ;;  %v14699_v43 = vcombine.low %v769_v31, %v773_v32  ;;  %v816_v32 = vld [vmem:[#allocation2 + $0x12d0] sm:$0xff] }
 0x4b8   :  { %10610 = vmatpush1.bf16.msra.mxu0 %v14649_v37  ;;  %11102 = vmatpush1.bf16.msra.mxu1 %v14651_v23  ;;  %v780_v37 = vld [vmem:[#allocation2 + $0x11b0] sm:$0xff]  ;;  %v777_v23 = vld [vmem:[#allocation2 + $0x1198] sm:$0xff] }
 0x4b9   :  { %10620 = vmatprep.subr.bf16.mxu0 %v14658_v40  ;;  %11112 = vmatprep.subr.bf16.mxu1 %v14660_v42  ;;  %v781_v40 = vld [vmem:[#allocation2 + $0x11b8] sm:$0xff]  ;;  %v14697_v42 = vcombine.low %v768_v28, %v772_v30  ;;  %v14706_v47 = vcombine.high %v776_v36, %v780_v37 }
 0x4ba   :  { %v14708_v49 = vcombine.high %v777_v23, %v781_v40  ;;  %v14707_v3 = vcombine.low %v777_v23, %v781_v40  ;;  %v824_v40 = vld [vmem:[#allocation2 + $0x1310] sm:$0xff] }
 0x4bb   :  { %10612 = vmatmul.mubr.bf16.vlgmr.msra.gmra.mrb[4].mxu0 %v17327_v54  ;;  %11104 = vmatmul.mubr.bf16.vlgmr.msra.gmra.mrb[4].mxu1 %v17327_v54  ;;  %v14675_v54 = vcombine.low %v745_v5, %v749_v6  ;;  %v792_v6 = vld [vmem:[#allocation2 + $0x1210] sm:$0xff] }
 0x4bc   :  { %10621 = vmatpush1.bf16.msra.mxu0 %v14657_v61  ;;  %11113 = vmatpush1.bf16.msra.mxu1 %v14659_v62  ;;  %v788_v61 = vld [vmem:[#allocation2 + $0x11f0] sm:$0xff]  ;;  %v785_v62 = vld [vmem:[#allocation2 + $0x11d8] sm:$0xff] }
 0x4bd   :  { %10622 = vmatprep.subr.bf16.mxu0 %v14666_v0  ;;  %11114 = vmatprep.subr.bf16.mxu1 %v14668_v2  ;;  %v789_v0 = vld [vmem:[#allocation2 + $0x11f8] sm:$0xff]  ;;  %v14705_v2 = vcombine.low %v776_v36, %v780_v37  ;;  %v14714_v4 = vcombine.high %v784_v50, %v788_v61 }
 0x4be   :  { %10652 = vmatprep.mubr.bf16.mxu0 %v17332_v1  ;;  %11144 = vmatprep.mubr.bf16.mxu1 %v17332_v1  ;;  %v14692_v1 = vcombine.high %v761_v24, %v765_v25  ;;  %v14716_v5 = vcombine.high %v785_v62, %v789_v0  ;;  %v14715_v13 = vcombine.low %v785_v62, %v789_v0  ;;  %v808_v25 = vld [vmem:[#allocation2 + $0x1290] sm:$0xff] }
 0x4bf   :  { %v832_v0 = vld [vmem:[#allocation2 + $0x1350] sm:$0xff] }
 0x4c0   :  { %10623 = vmatpush1.bf16.msra.mxu0 %v14665_v8  ;;  %11115 = vmatpush1.bf16.msra.mxu1 %v14667_v9  ;;  %v796_v8 = vld [vmem:[#allocation2 + $0x1230] sm:$0xff]  ;;  %v793_v9 = vld [vmem:[#allocation2 + $0x1218] sm:$0xff] }
 0x4c1   :  { %10624 = vmatprep.subr.bf16.mxu0 %v14674_v10  ;;  %11116 = vmatprep.subr.bf16.mxu1 %v14676_v11  ;;  %v797_v10 = vld [vmem:[#allocation2 + $0x1238] sm:$0xff]  ;;  %v14713_v11 = vcombine.low %v784_v50, %v788_v61  ;;  %v14722_v15 = vcombine.high %v792_v6, %v796_v8 }
 0x4c2   :  { %v14724_v39 = vcombine.high %v793_v9, %v797_v10  ;;  %v14723_v21 = vcombine.low %v793_v9, %v797_v10  ;;  %v840_v10 = vld [vmem:[#allocation2 + $0x1390] sm:$0xff] }
 0x4c4   :  { %10625 = vmatpush1.bf16.msra.mxu0 %v14673_v18  ;;  %11117 = vmatpush1.bf16.msra.mxu1 %v14675_v54  ;;  %v804_v18 = vld [vmem:[#allocation2 + $0x1270] sm:$0xff]  ;;  %v801_v54 = vld [vmem:[#allocation2 + $0x1258] sm:$0xff] }
 0x4c5   :  { %10626 = vmatprep.subr.bf16.mxu0 %v14682_v19  ;;  %11118 = vmatprep.subr.bf16.mxu1 %v14684_v20  ;;  %v805_v19 = vld [vmem:[#allocation2 + $0x1278] sm:$0xff]  ;;  %v14721_v20 = vcombine.low %v792_v6, %v796_v8  ;;  %v14730_v22 = vcombine.high %v800_v17, %v804_v18 }
 0x4c6   :  { %v14732_v24 = vcombine.high %v801_v54, %v805_v19  ;;  %v14731_v28 = vcombine.low %v801_v54, %v805_v19  ;;  %v848_v19 = vld [vmem:[#allocation2 + $0x13d0] sm:$0xff] }
 0x4c8   :  { %10627 = vmatpush1.bf16.msra.mxu0 %v14681_v27  ;;  %11119 = vmatpush1.bf16.msra.mxu1 %v14683_v48  ;;  %v812_v27 = vld [vmem:[#allocation2 + $0x12b0] sm:$0xff]  ;;  %v809_v48 = vld [vmem:[#allocation2 + $0x1298] sm:$0xff] }
 0x4c9   :  { %10628 = vmatprep.subr.bf16.mxu0 %v14690_v12  ;;  %11120 = vmatprep.subr.bf16.mxu1 %v14692_v1  ;;  %v813_v12 = vld [vmem:[#allocation2 + $0x12b8] sm:$0xff]  ;;  %v14729_v1 = vcombine.low %v800_v17, %v804_v18  ;;  %v14738_v30 = vcombine.high %v808_v25, %v812_v27 }
 0x4ca   :  { %v14740_v31 = vcombine.high %v809_v48, %v813_v12  ;;  %v14739_v36 = vcombine.low %v809_v48, %v813_v12  ;;  %v856_v12 = vld [vmem:[#allocation2 + $0x1410] sm:$0xff] }
 0x4cc   :  { %10629 = vmatpush1.bf16.msra.mxu0 %v14689_v33  ;;  %11121 = vmatpush1.bf16.msra.mxu1 %v14691_v57  ;;  %v820_v33 = vld [vmem:[#allocation2 + $0x12f0] sm:$0xff]  ;;  %v817_v57 = vld [vmem:[#allocation2 + $0x12d8] sm:$0xff] }
 0x4cd   :  { %10630 = vmatprep.subr.bf16.mxu0 %v14698_v35  ;;  %11122 = vmatprep.subr.bf16.mxu1 %v14700_v34  ;;  %v821_v35 = vld [vmem:[#allocation2 + $0x12f8] sm:$0xff]  ;;  %v14737_v34 = vcombine.low %v808_v25, %v812_v27  ;;  %v14746_v37 = vcombine.high %v816_v32, %v820_v33 }
 0x4ce   :  { %v14748_v23 = vcombine.high %v817_v57, %v821_v35  ;;  %v14747_v50 = vcombine.low %v817_v57, %v821_v35  ;;  %v864_v35 = vld [vmem:[#allocation2 + $0x1450] sm:$0xff] }
 0x4d0   :  { %10631 = vmatpush1.bf16.msra.mxu0 %v14697_v42  ;;  %11123 = vmatpush1.bf16.msra.mxu1 %v14699_v43  ;;  %v828_v42 = vld [vmem:[#allocation2 + $0x1330] sm:$0xff]  ;;  %v825_v43 = vld [vmem:[#allocation2 + $0x1318] sm:$0xff] }
 0x4d1   :  { %10632 = vmatprep.subr.bf16.mxu0 %v14706_v47  ;;  %11124 = vmatprep.subr.bf16.mxu1 %v14708_v49  ;;  %v829_v47 = vld [vmem:[#allocation2 + $0x1338] sm:$0xff]  ;;  %v14745_v49 = vcombine.low %v816_v32, %v820_v33  ;;  %v14754_v61 = vcombine.high %v824_v40, %v828_v42 }
 0x4d2   :  { %v14756_v62 = vcombine.high %v825_v43, %v829_v47  ;;  %v14755_v6 = vcombine.low %v825_v43, %v829_v47  ;;  %v872_v47 = vld [vmem:[#allocation2 + $0x1490] sm:$0xff] }
 0x4d4   :  { %10633 = vmatpush1.bf16.msra.mxu0 %v14705_v2  ;;  %11125 = vmatpush1.bf16.msra.mxu1 %v14707_v3  ;;  %v836_v2 = vld [vmem:[#allocation2 + $0x1370] sm:$0xff]  ;;  %v833_v3 = vld [vmem:[#allocation2 + $0x1358] sm:$0xff] }
 0x4d5   :  { %10634 = vmatprep.subr.bf16.mxu0 %v14714_v4  ;;  %11126 = vmatprep.subr.bf16.mxu1 %v14716_v5  ;;  %v837_v4 = vld [vmem:[#allocation2 + $0x1378] sm:$0xff]  ;;  %v14753_v5 = vcombine.low %v824_v40, %v828_v42  ;;  %v14762_v8 = vcombine.high %v832_v0, %v836_v2 }
 0x4d6   :  { %v14764_v9 = vcombine.high %v833_v3, %v837_v4  ;;  %v14763_v17 = vcombine.low %v833_v3, %v837_v4  ;;  %v880_v4 = vld [vmem:[#allocation2 + $0x14d0] sm:$0xff] }
 0x4d8   :  { %10635 = vmatpush1.bf16.msra.mxu0 %v14713_v11  ;;  %11127 = vmatpush1.bf16.msra.mxu1 %v14715_v13  ;;  %v844_v11 = vld [vmem:[#allocation2 + $0x13b0] sm:$0xff]  ;;  %v841_v13 = vld [vmem:[#allocation2 + $0x1398] sm:$0xff] }
 0x4d9   :  { %10636 = vmatprep.subr.bf16.mxu0 %v14722_v15  ;;  %11128 = vmatprep.subr.bf16.mxu1 %v14724_v39  ;;  %v845_v15 = vld [vmem:[#allocation2 + $0x13b8] sm:$0xff]  ;;  %v14761_v39 = vcombine.low %v832_v0, %v836_v2  ;;  %v14770_v18 = vcombine.high %v840_v10, %v844_v11 }
 0x4da   :  { %v14772_v54 = vcombine.high %v841_v13, %v845_v15  ;;  %v14771_v25 = vcombine.low %v841_v13, %v845_v15  ;;  %v888_v13 = vld [vmem:[#allocation2 + $0x1510] sm:$0xff] }
 0x4db   :  { %v892_v15 = vld [vmem:[#allocation2 + $0x1530] sm:$0xff] }
 0x4dc   :  { %10637 = vmatpush1.bf16.msra.mxu0 %v14721_v20  ;;  %11129 = vmatpush1.bf16.msra.mxu1 %v14723_v21  ;;  %v852_v20 = vld [vmem:[#allocation2 + $0x13f0] sm:$0xff]  ;;  %v849_v21 = vld [vmem:[#allocation2 + $0x13d8] sm:$0xff] }
 0x4dd   :  { %10638 = vmatprep.subr.bf16.mxu0 %v14730_v22  ;;  %11130 = vmatprep.subr.bf16.mxu1 %v14732_v24  ;;  %v853_v22 = vld [vmem:[#allocation2 + $0x13f8] sm:$0xff]  ;;  %v14769_v24 = vcombine.low %v840_v10, %v844_v11  ;;  %v14778_v27 = vcombine.high %v848_v19, %v852_v20 }
 0x4de   :  { %v14780_v48 = vcombine.high %v849_v21, %v853_v22  ;;  %v14779_v32 = vcombine.low %v849_v21, %v853_v22  ;;  %v900_v21 = vld [vmem:[#allocation2 + $0x1570] sm:$0xff]  ;;  %v897_v22 = vld [vmem:[#allocation2 + $0x1558] sm:$0xff] }
 0x4e0   :  { %10639 = vmatpush1.bf16.msra.mxu0 %v14729_v1  ;;  %11131 = vmatpush1.bf16.msra.mxu1 %v14731_v28  ;;  %v860_v1 = vld [vmem:[#allocation2 + $0x1430] sm:$0xff]  ;;  %v857_v28 = vld [vmem:[#allocation2 + $0x1418] sm:$0xff] }
 0x4e1   :  { %10640 = vmatprep.subr.bf16.mxu0 %v14738_v30  ;;  %11132 = vmatprep.subr.bf16.mxu1 %v14740_v31  ;;  %v861_v30 = vld [vmem:[#allocation2 + $0x1438] sm:$0xff]  ;;  %v14777_v31 = vcombine.low %v848_v19, %v852_v20  ;;  %v14786_v33 = vcombine.high %v856_v12, %v860_v1  ;;  %v14818_v19 = vcombine.high %v888_v13, %v892_v15  ;;  %v896_v20 = vld [vmem:[#allocation2 + $0x1550] sm:$0xff] }
 0x4e2   :  { %v14788_v57 = vcombine.high %v857_v28, %v861_v30  ;;  %v14787_v40 = vcombine.low %v857_v28, %v861_v30  ;;  %v908_v28 = vld [vmem:[#allocation2 + $0x15b0] sm:$0xff]  ;;  %v905_v30 = vld [vmem:[#allocation2 + $0x1598] sm:$0xff] }
 0x4e4   :  { %10641 = vmatpush1.bf16.msra.mxu0 %v14737_v34  ;;  %11133 = vmatpush1.bf16.msra.mxu1 %v14739_v36  ;;  %v868_v34 = vld [vmem:[#allocation2 + $0x1470] sm:$0xff]  ;;  %v865_v36 = vld [vmem:[#allocation2 + $0x1458] sm:$0xff] }
 0x4e5   :  { %10642 = vmatprep.subr.bf16.mxu0 %v14746_v37  ;;  %11134 = vmatprep.subr.bf16.mxu1 %v14748_v23  ;;  %v869_v37 = vld [vmem:[#allocation2 + $0x1478] sm:$0xff]  ;;  %v14785_v23 = vcombine.low %v856_v12, %v860_v1  ;;  %v14794_v42 = vcombine.high %v864_v35, %v868_v34  ;;  %v904_v1 = vld [vmem:[#allocation2 + $0x1590] sm:$0xff] }
 0x4e6   :  { %v14796_v43 = vcombine.high %v865_v36, %v869_v37  ;;  %v14795_v0 = vcombine.low %v865_v36, %v869_v37  ;;  %v916_v36 = vld [vmem:[#allocation2 + $0x15f0] sm:$0xff]  ;;  %v913_v37 = vld [vmem:[#allocation2 + $0x15d8] sm:$0xff] }
 0x4e8   :  { %10643 = vmatpush1.bf16.msra.mxu0 %v14745_v49  ;;  %11135 = vmatpush1.bf16.msra.mxu1 %v14747_v50  ;;  %v876_v49 = vld [vmem:[#allocation2 + $0x14b0] sm:$0xff]  ;;  %v873_v50 = vld [vmem:[#allocation2 + $0x1498] sm:$0xff] }
 0x4e9   :  { %10644 = vmatprep.subr.bf16.mxu0 %v14754_v61  ;;  %11136 = vmatprep.subr.bf16.mxu1 %v14756_v62  ;;  %v877_v61 = vld [vmem:[#allocation2 + $0x14b8] sm:$0xff]  ;;  %v14793_v62 = vcombine.low %v864_v35, %v868_v34  ;;  %v14802_v2 = vcombine.high %v872_v47, %v876_v49  ;;  %v912_v34 = vld [vmem:[#allocation2 + $0x15d0] sm:$0xff] }
 0x4ea   :  { %v14804_v3 = vcombine.high %v873_v50, %v877_v61 }
 0x4ec   :  { %10645 = vmatpush1.bf16.msra.mxu0 %v14753_v5  ;;  %11137 = vmatpush1.bf16.msra.mxu1 %v14755_v6  ;;  %v884_v5 = vld [vmem:[#allocation2 + $0x14f0] sm:$0xff]  ;;  %v881_v6 = vld [vmem:[#allocation2 + $0x14d8] sm:$0xff] }
 0x4ed   :  { %10646 = vmatprep.subr.bf16.mxu0 %v14762_v8  ;;  %11138 = vmatprep.subr.bf16.mxu1 %v14764_v9  ;;  %v885_v8 = vld [vmem:[#allocation2 + $0x14f8] sm:$0xff]  ;;  %v14801_v9 = vcombine.low %v872_v47, %v876_v49  ;;  %v14810_v10 = vcombine.high %v880_v4, %v884_v5  ;;  %v920_v49 = vld [vmem:[#allocation2 + $0x1610] sm:$0xff] }
 0x4ee   :  { %v14812_v11 = vcombine.high %v881_v6, %v885_v8 }
 0x4f0   :  { %10647 = vmatpush1.bf16.msra.mxu0 %v14761_v39  ;;  %11139 = vmatpush1.bf16.msra.mxu1 %v14763_v17  ;;  %v889_v39 = vld [vmem:[#allocation2 + $0x1518] sm:$0xff] }
 0x4f1   :  { %10648 = vmatprep.subr.bf16.mxu0 %v14770_v18  ;;  %11140 = vmatprep.subr.bf16.mxu1 %v14772_v54  ;;  %v893_v17 = vld [vmem:[#allocation2 + $0x1538] sm:$0xff]  ;;  %v14809_v18 = vcombine.low %v880_v4, %v884_v5  ;;  %v14811_v54 = vcombine.low %v881_v6, %v885_v8  ;;  %v928_v5 = vld [vmem:[#allocation2 + $0x1650] sm:$0xff] }
 0x4f2   :  { %v932_v6 = vld [vmem:[#allocation2 + $0x1670] sm:$0xff]  ;;  %v929_v8 = vld [vmem:[#allocation2 + $0x1658] sm:$0xff] }
 0x4f4   :  { %10649 = vmatpush1.bf16.msra.mxu0 %v14769_v24  ;;  %11141 = vmatpush1.bf16.msra.mxu1 %v14771_v25  ;;  %v901_v24 = vld [vmem:[#allocation2 + $0x1578] sm:$0xff]  ;;  %v14817_v25 = vcombine.low %v888_v13, %v892_v15  ;;  %v936_v15 = vld [vmem:[#allocation2 + $0x1690] sm:$0xff] }
 0x4f5   :  { %10650 = vmatprep.subr.bf16.mxu0 %v14778_v27  ;;  %11142 = vmatprep.subr.bf16.mxu1 %v14780_v48  ;;  %v14819_v27 = vcombine.low %v889_v39, %v893_v17  ;;  %v14826_v48 = vcombine.high %v896_v20, %v900_v21  ;;  %v14828_v12 = vcombine.high %v897_v22, %v901_v24 }
 0x4f8   :  { %10651 = vmatpush1.bf16.msra.mxu0 %v14777_v31  ;;  %11143 = vmatpush1.bf16.msra.mxu1 %v14779_v32  ;;  %v909_v31 = vld [vmem:[#allocation2 + $0x15b8] sm:$0xff]  ;;  %v14825_v32 = vcombine.low %v896_v20, %v900_v21  ;;  %v944_v21 = vld [vmem:[#allocation2 + $0x16d0] sm:$0xff] }
 0x4f9   :  { %10661 = vmatprep.subr.bf16.mxu0 %v14786_v33  ;;  %11153 = vmatprep.subr.bf16.mxu1 %v14788_v57  ;;  %v14827_v33 = vcombine.low %v897_v22, %v901_v24  ;;  %v14834_v57 = vcombine.high %v904_v1, %v908_v28  ;;  %v14836_v35 = vcombine.high %v905_v30, %v909_v31  ;;  %v948_v22 = vld [vmem:[#allocation2 + $0x16f0] sm:$0xff]  ;;  %v945_v24 = vld [vmem:[#allocation2 + $0x16d8] sm:$0xff] }
 0x4fb   :  { %10653 = vmatmul.mubr.bf16.vlgmr.msra.gmra.mrb[4].mxu0 %v17341_v14  ;;  %11145 = vmatmul.mubr.bf16.vlgmr.msra.gmra.mrb[4].mxu1 %v17341_v14  ;;  %v14803_v14 = vcombine.low %v873_v50, %v877_v61  ;;  %v924_v50 = vld [vmem:[#allocation2 + $0x1630] sm:$0xff]  ;;  %v921_v61 = vld [vmem:[#allocation2 + $0x1618] sm:$0xff] }
 0x4fc   :  { %10662 = vmatpush1.bf16.msra.mxu0 %v14785_v23  ;;  %11154 = vmatpush1.bf16.msra.mxu1 %v14787_v40  ;;  %v917_v23 = vld [vmem:[#allocation2 + $0x15f8] sm:$0xff]  ;;  %v14833_v40 = vcombine.low %v904_v1, %v908_v28  ;;  %v952_v28 = vld [vmem:[#allocation2 + $0x1710] sm:$0xff] }
 0x4fd   :  { %10663 = vmatprep.subr.bf16.mxu0 %v14794_v42  ;;  %11155 = vmatprep.subr.bf16.mxu1 %v14796_v43  ;;  %v14835_v42 = vcombine.low %v905_v30, %v909_v31  ;;  %v14842_v43 = vcombine.high %v912_v34, %v916_v36  ;;  %v14844_v47 = vcombine.high %v913_v37, %v917_v23  ;;  %v956_v30 = vld [vmem:[#allocation2 + $0x1730] sm:$0xff]  ;;  %v953_v31 = vld [vmem:[#allocation2 + $0x1718] sm:$0xff] }
 0x4fe   :  { %10693 = vmatprep.mubr.bf16.mxu0 %v17346_v26  ;;  %11185 = vmatprep.mubr.bf16.mxu1 %v17346_v26  ;;  %v14820_v26 = vcombine.high %v889_v39, %v893_v17  ;;  %v940_v39 = vld [vmem:[#allocation2 + $0x16b0] sm:$0xff]  ;;  %v937_v17 = vld [vmem:[#allocation2 + $0x1698] sm:$0xff] }
 0x500   :  { %10664 = vmatpush1.bf16.msra.mxu0 %v14793_v62  ;;  %11156 = vmatpush1.bf16.msra.mxu1 %v14795_v0  ;;  %v925_v62 = vld [vmem:[#allocation2 + $0x1638] sm:$0xff]  ;;  %v14841_v0 = vcombine.low %v912_v34, %v916_v36  ;;  %v960_v36 = vld [vmem:[#allocation2 + $0x1750] sm:$0xff] }
 0x501   :  { %10665 = vmatprep.subr.bf16.mxu0 %v14802_v2  ;;  %11157 = vmatprep.subr.bf16.mxu1 %v14804_v3  ;;  %v14843_v2 = vcombine.low %v913_v37, %v917_v23  ;;  %v14850_v3 = vcombine.high %v920_v49, %v924_v50  ;;  %v14852_v4 = vcombine.high %v921_v61, %v925_v62  ;;  %v964_v37 = vld [vmem:[#allocation2 + $0x1770] sm:$0xff]  ;;  %v961_v23 = vld [vmem:[#allocation2 + $0x1758] sm:$0xff] }
 0x504   :  { %10666 = vmatpush1.bf16.msra.mxu0 %v14801_v9  ;;  %11158 = vmatpush1.bf16.msra.mxu1 %v14803_v14  ;;  %v933_v9 = vld [vmem:[#allocation2 + $0x1678] sm:$0xff]  ;;  %v14849_v14 = vcombine.low %v920_v49, %v924_v50  ;;  %v968_v50 = vld [vmem:[#allocation2 + $0x1790] sm:$0xff] }
 0x505   :  { %10667 = vmatprep.subr.bf16.mxu0 %v14810_v10  ;;  %11159 = vmatprep.subr.bf16.mxu1 %v14812_v11  ;;  %v14851_v10 = vcombine.low %v921_v61, %v925_v62  ;;  %v14858_v11 = vcombine.high %v928_v5, %v932_v6  ;;  %v14860_v13 = vcombine.high %v929_v8, %v933_v9  ;;  %v972_v61 = vld [vmem:[#allocation2 + $0x17b0] sm:$0xff]  ;;  %v969_v62 = vld [vmem:[#allocation2 + $0x1798] sm:$0xff] }
 0x508   :  { %10668 = vmatpush1.bf16.msra.mxu0 %v14809_v18  ;;  %11160 = vmatpush1.bf16.msra.mxu1 %v14811_v54  ;;  %v941_v18 = vld [vmem:[#allocation2 + $0x16b8] sm:$0xff]  ;;  %v14857_v54 = vcombine.low %v928_v5, %v932_v6  ;;  %v976_v6 = vld [vmem:[#allocation2 + $0x17d0] sm:$0xff] }
 0x509   :  { %10669 = vmatprep.subr.bf16.mxu0 %v14818_v19  ;;  %11161 = vmatprep.subr.bf16.mxu1 %v14820_v26  ;;  %v14859_v19 = vcombine.low %v929_v8, %v933_v9  ;;  %v14866_v26 = vcombine.high %v936_v15, %v940_v39  ;;  %v14868_v20 = vcombine.high %v937_v17, %v941_v18  ;;  %v980_v8 = vld [vmem:[#allocation2 + $0x17f0] sm:$0xff]  ;;  %v977_v9 = vld [vmem:[#allocation2 + $0x17d8] sm:$0xff] }
 0x50c   :  { %10670 = vmatpush1.bf16.msra.mxu0 %v14817_v25  ;;  %11162 = vmatpush1.bf16.msra.mxu1 %v14819_v27  ;;  %v949_v25 = vld [vmem:[#allocation2 + $0x16f8] sm:$0xff]  ;;  %v14865_v27 = vcombine.low %v936_v15, %v940_v39  ;;  %v984_v39 = vld [vmem:[#allocation2 + $0x1810] sm:$0xff] }
 0x50d   :  { %10671 = vmatprep.subr.bf16.mxu0 %v14826_v48  ;;  %11163 = vmatprep.subr.bf16.mxu1 %v14828_v12  ;;  %v14867_v48 = vcombine.low %v937_v17, %v941_v18  ;;  %v14874_v12 = vcombine.high %v944_v21, %v948_v22  ;;  %v14876_v1 = vcombine.high %v945_v24, %v949_v25  ;;  %v988_v17 = vld [vmem:[#allocation2 + $0x1830] sm:$0xff]  ;;  %v985_v18 = vld [vmem:[#allocation2 + $0x1818] sm:$0xff] }
 0x510   :  { %10672 = vmatpush1.bf16.msra.mxu0 %v14825_v32  ;;  %11164 = vmatpush1.bf16.msra.mxu1 %v14827_v33  ;;  %v957_v32 = vld [vmem:[#allocation2 + $0x1738] sm:$0xff]  ;;  %v14873_v33 = vcombine.low %v944_v21, %v948_v22  ;;  %v992_v22 = vld [vmem:[#allocation2 + $0x1850] sm:$0xff] }
 0x511   :  { %10673 = vmatprep.subr.bf16.mxu0 %v14834_v57  ;;  %11165 = vmatprep.subr.bf16.mxu1 %v14836_v35  ;;  %v14875_v57 = vcombine.low %v945_v24, %v949_v25  ;;  %v14882_v35 = vcombine.high %v952_v28, %v956_v30  ;;  %v14884_v34 = vcombine.high %v953_v31, %v957_v32  ;;  %v996_v24 = vld [vmem:[#allocation2 + $0x1870] sm:$0xff]  ;;  %v993_v25 = vld [vmem:[#allocation2 + $0x1858] sm:$0xff] }
 0x514   :  { %10674 = vmatpush1.bf16.msra.mxu0 %v14833_v40  ;;  %11166 = vmatpush1.bf16.msra.mxu1 %v14835_v42  ;;  %v965_v40 = vld [vmem:[#allocation2 + $0x1778] sm:$0xff]  ;;  %v14881_v42 = vcombine.low %v952_v28, %v956_v30  ;;  %v1000_v30 = vld [vmem:[#allocation2 + $0x1890] sm:$0xff] }
 0x515   :  { %10675 = vmatprep.subr.bf16.mxu0 %v14842_v43  ;;  %11167 = vmatprep.subr.bf16.mxu1 %v14844_v47  ;;  %v14883_v43 = vcombine.low %v953_v31, %v957_v32  ;;  %v14890_v47 = vcombine.high %v960_v36, %v964_v37  ;;  %v14892_v49 = vcombine.high %v961_v23, %v965_v40  ;;  %v1004_v31 = vld [vmem:[#allocation2 + $0x18b0] sm:$0xff]  ;;  %v1001_v32 = vld [vmem:[#allocation2 + $0x1898] sm:$0xff] }
 0x518   :  { %10676 = vmatpush1.bf16.msra.mxu0 %v14841_v0  ;;  %11168 = vmatpush1.bf16.msra.mxu1 %v14843_v2  ;;  %v973_v0 = vld [vmem:[#allocation2 + $0x17b8] sm:$0xff]  ;;  %v14889_v2 = vcombine.low %v960_v36, %v964_v37  ;;  %v1008_v37 = vld [vmem:[#allocation2 + $0x18d0] sm:$0xff] }
 0x519   :  { %10677 = vmatprep.subr.bf16.mxu0 %v14850_v3  ;;  %11169 = vmatprep.subr.bf16.mxu1 %v14852_v4  ;;  %v14891_v3 = vcombine.low %v961_v23, %v965_v40  ;;  %v14898_v4 = vcombine.high %v968_v50, %v972_v61  ;;  %v14900_v5 = vcombine.high %v969_v62, %v973_v0  ;;  %v1012_v23 = vld [vmem:[#allocation2 + $0x18f0] sm:$0xff]  ;;  %v1009_v40 = vld [vmem:[#allocation2 + $0x18d8] sm:$0xff] }
 0x51c   :  { %10678 = vmatpush1.bf16.msra.mxu0 %v14849_v14  ;;  %11170 = vmatpush1.bf16.msra.mxu1 %v14851_v10  ;;  %v981_v14 = vld [vmem:[#allocation2 + $0x17f8] sm:$0xff]  ;;  %v14897_v10 = vcombine.low %v968_v50, %v972_v61  ;;  %v1016_v50 = vld [vmem:[#allocation2 + $0x1910] sm:$0xff] }
 0x51d   :  { %10679 = vmatprep.subr.bf16.mxu0 %v14858_v11  ;;  %11171 = vmatprep.subr.bf16.mxu1 %v14860_v13  ;;  %v14899_v11 = vcombine.low %v969_v62, %v973_v0  ;;  %v14906_v13 = vcombine.high %v976_v6, %v980_v8  ;;  %v14908_v15 = vcombine.high %v977_v9, %v981_v14  ;;  %v1020_v61 = vld [vmem:[#allocation2 + $0x1930] sm:$0xff]  ;;  %v1017_v62 = vld [vmem:[#allocation2 + $0x1918] sm:$0xff] }
 0x51e   :  { %v1021_v0 = vld [vmem:[#allocation2 + $0x1938] sm:$0xff] }
 0x520   :  { %10680 = vmatpush1.bf16.msra.mxu0 %v14857_v54  ;;  %11172 = vmatpush1.bf16.msra.mxu1 %v14859_v19  ;;  %v989_v54 = vld [vmem:[#allocation2 + $0x1838] sm:$0xff]  ;;  %v14905_v19 = vcombine.low %v976_v6, %v980_v8  ;;  %v1028_v6 = vld [vmem:[#allocation2 + $0x1970] sm:$0xff] }
 0x521   :  { %10681 = vmatprep.subr.bf16.mxu0 %v14866_v26  ;;  %11173 = vmatprep.subr.bf16.mxu1 %v14868_v20  ;;  %v14907_v26 = vcombine.low %v977_v9, %v981_v14  ;;  %v14914_v20 = vcombine.high %v984_v39, %v988_v17  ;;  %v14916_v21 = vcombine.high %v985_v18, %v989_v54  ;;  %v1025_v8 = vld [vmem:[#allocation2 + $0x1958] sm:$0xff] }
 0x522   :  { %v1029_v9 = vld [vmem:[#allocation2 + $0x1978] sm:$0xff]  ;;  %v14945_v14 = vcombine.low %v1016_v50, %v1020_v61 }
 0x524   :  { %10682 = vmatpush1.bf16.msra.mxu0 %v14865_v27  ;;  %11174 = vmatpush1.bf16.msra.mxu1 %v14867_v48  ;;  %v997_v27 = vld [vmem:[#allocation2 + $0x1878] sm:$0xff]  ;;  %v14913_v48 = vcombine.low %v984_v39, %v988_v17  ;;  %v1036_v39 = vld [vmem:[#allocation2 + $0x19b0] sm:$0xff] }
 0x525   :  { %10683 = vmatprep.subr.bf16.mxu0 %v14874_v12  ;;  %11175 = vmatprep.subr.bf16.mxu1 %v14876_v1  ;;  %v14915_v12 = vcombine.low %v985_v18, %v989_v54  ;;  %v14922_v1 = vcombine.high %v992_v22, %v996_v24  ;;  %v14924_v28 = vcombine.high %v993_v25, %v997_v27  ;;  %v1033_v17 = vld [vmem:[#allocation2 + $0x1998] sm:$0xff] }
 0x526   :  { %v1037_v18 = vld [vmem:[#allocation2 + $0x19b8] sm:$0xff] }
 0x528   :  { %10684 = vmatpush1.bf16.msra.mxu0 %v14873_v33  ;;  %11176 = vmatpush1.bf16.msra.mxu1 %v14875_v57  ;;  %v1005_v33 = vld [vmem:[#allocation2 + $0x18b8] sm:$0xff]  ;;  %v14921_v57 = vcombine.low %v992_v22, %v996_v24  ;;  %v1044_v22 = vld [vmem:[#allocation2 + $0x19f0] sm:$0xff] }
 0x529   :  { %10685 = vmatprep.subr.bf16.mxu0 %v14882_v35  ;;  %11177 = vmatprep.subr.bf16.mxu1 %v14884_v34  ;;  %v14923_v35 = vcombine.low %v993_v25, %v997_v27  ;;  %v14930_v34 = vcombine.high %v1000_v30, %v1004_v31  ;;  %v14932_v36 = vcombine.high %v1001_v32, %v1005_v33  ;;  %v1041_v24 = vld [vmem:[#allocation2 + $0x19d8] sm:$0xff] }
 0x52a   :  { %v1045_v25 = vld [vmem:[#allocation2 + $0x19f8] sm:$0xff] }
 0x52c   :  { %10686 = vmatpush1.bf16.msra.mxu0 %v14881_v42  ;;  %11178 = vmatpush1.bf16.msra.mxu1 %v14883_v43  ;;  %v1013_v42 = vld [vmem:[#allocation2 + $0x18f8] sm:$0xff]  ;;  %v14929_v43 = vcombine.low %v1000_v30, %v1004_v31  ;;  %v1052_v30 = vld [vmem:[#allocation2 + $0x1a30] sm:$0xff] }
 0x52d   :  { %10687 = vmatprep.subr.bf16.mxu0 %v14890_v47  ;;  %11179 = vmatprep.subr.bf16.mxu1 %v14892_v49  ;;  %v14938_v47 = vcombine.high %v1008_v37, %v1012_v23  ;;  %v14940_v49 = vcombine.high %v1009_v40, %v1013_v42  ;;  %v1049_v31 = vld [vmem:[#allocation2 + $0x1a18] sm:$0xff] }
 0x530   :  { %10688 = vmatpush1.bf16.msra.mxu0 %v14889_v2  ;;  %11180 = vmatpush1.bf16.msra.mxu1 %v14891_v3  ;;  %v14937_v2 = vcombine.low %v1008_v37, %v1012_v23  ;;  %v14939_v3 = vcombine.low %v1009_v40, %v1013_v42  ;;  %v1060_v37 = vld [vmem:[#allocation2 + $0x1a70] sm:$0xff]  ;;  %v1057_v23 = vld [vmem:[#allocation2 + $0x1a58] sm:$0xff] }
 0x531   :  { %10689 = vmatprep.subr.bf16.mxu0 %v14898_v4  ;;  %11181 = vmatprep.subr.bf16.mxu1 %v14900_v5  ;;  %v14946_v4 = vcombine.high %v1016_v50, %v1020_v61  ;;  %v1024_v5 = vld [vmem:[#allocation2 + $0x1950] sm:$0xff]  ;;  %v1061_v40 = vld [vmem:[#allocation2 + $0x1a78] sm:$0xff] }
 0x532   :  { %v14953_v54 = vcombine.low %v1024_v5, %v1028_v6  ;;  %v1068_v50 = vld [vmem:[#allocation2 + $0x1ab0] sm:$0xff]  ;;  %v1065_v61 = vld [vmem:[#allocation2 + $0x1a98] sm:$0xff] }
 0x534   :  { %10690 = vmatpush1.bf16.msra.mxu0 %v14897_v10  ;;  %11182 = vmatpush1.bf16.msra.mxu1 %v14899_v11  ;;  %v14947_v10 = vcombine.low %v1017_v62, %v1021_v0  ;;  %v14954_v11 = vcombine.high %v1024_v5, %v1028_v6  ;;  %v1076_v5 = vld [vmem:[#allocation2 + $0x1af0] sm:$0xff]  ;;  %v1073_v6 = vld [vmem:[#allocation2 + $0x1ad8] sm:$0xff] }
 0x535   :  { %10691 = vmatprep.subr.bf16.mxu0 %v14906_v13  ;;  %11183 = vmatprep.subr.bf16.mxu1 %v14908_v15  ;;  %v14956_v13 = vcombine.high %v1025_v8, %v1029_v9  ;;  %v1032_v15 = vld [vmem:[#allocation2 + $0x1990] sm:$0xff] }
 0x536   :  { %v14961_v27 = vcombine.low %v1032_v15, %v1036_v39 }
 0x538   :  { %10692 = vmatpush1.bf16.msra.mxu0 %v14905_v19  ;;  %11184 = vmatpush1.bf16.msra.mxu1 %v14907_v26  ;;  %v14955_v19 = vcombine.low %v1025_v8, %v1029_v9  ;;  %v14962_v26 = vcombine.high %v1032_v15, %v1036_v39  ;;  %v1077_v8 = vld [vmem:[#allocation2 + $0x1af8] sm:$0xff]  ;;  %v1084_v15 = vld [vmem:[#allocation2 + $0x1b30] sm:$0xff] }
 0x539   :  { %10702 = vmatprep.subr.bf16.mxu0 %v14914_v20  ;;  %11194 = vmatprep.subr.bf16.mxu1 %v14916_v21  ;;  %v14964_v20 = vcombine.high %v1033_v17, %v1037_v18  ;;  %v1040_v21 = vld [vmem:[#allocation2 + $0x19d0] sm:$0xff]  ;;  %v1081_v39 = vld [vmem:[#allocation2 + $0x1b18] sm:$0xff] }
 0x53b   :  { %10694 = vmatmul.mubr.bf16.vlgmr.msra.gmra.mrb[4].mxu0 %v17355_v44  ;;  %11186 = vmatmul.mubr.bf16.vlgmr.msra.gmra.mrb[4].mxu1 %v17355_v44  ;;  %v14931_v44 = vcombine.low %v1001_v32, %v1005_v33  ;;  %v1053_v32 = vld [vmem:[#allocation2 + $0x1a38] sm:$0xff]  ;;  %v14969_v33 = vcombine.low %v1040_v21, %v1044_v22 }
 0x53c   :  { %10703 = vmatpush1.bf16.msra.mxu0 %v14913_v48  ;;  %11195 = vmatpush1.bf16.msra.mxu1 %v14915_v12  ;;  %v14963_v48 = vcombine.low %v1033_v17, %v1037_v18  ;;  %v14970_v12 = vcombine.high %v1040_v21, %v1044_v22  ;;  %v1085_v17 = vld [vmem:[#allocation2 + $0x1b38] sm:$0xff]  ;;  %v1092_v21 = vld [vmem:[#allocation2 + $0x1b70] sm:$0xff] }
 0x53d   :  { %10704 = vmatprep.subr.bf16.mxu0 %v14922_v1  ;;  %11196 = vmatprep.subr.bf16.mxu1 %v14924_v28  ;;  %v14972_v1 = vcombine.high %v1041_v24, %v1045_v25  ;;  %v1048_v28 = vld [vmem:[#allocation2 + $0x1a10] sm:$0xff]  ;;  %v1089_v22 = vld [vmem:[#allocation2 + $0x1b58] sm:$0xff] }
 0x53e   :  { %10734 = vmatprep.mubr.bf16.mxu0 %v17360_v56  ;;  %11226 = vmatprep.mubr.bf16.mxu1 %v17360_v56  ;;  %v14948_v56 = vcombine.high %v1017_v62, %v1021_v0  ;;  %v14977_v42 = vcombine.low %v1048_v28, %v1052_v30  ;;  %v1069_v62 = vld [vmem:[#allocation2 + $0x1ab8] sm:$0xff] }
 0x540   :  { %10705 = vmatpush1.bf16.msra.mxu0 %v14921_v57  ;;  %11197 = vmatpush1.bf16.msra.mxu1 %v14923_v35  ;;  %v14971_v57 = vcombine.low %v1041_v24, %v1045_v25  ;;  %v14978_v35 = vcombine.high %v1048_v28, %v1052_v30  ;;  %v1093_v24 = vld [vmem:[#allocation2 + $0x1b78] sm:$0xff]  ;;  %v1100_v28 = vld [vmem:[#allocation2 + $0x1bb0] sm:$0xff] }
 0x541   :  { %10706 = vmatprep.subr.bf16.mxu0 %v14930_v34  ;;  %11198 = vmatprep.subr.bf16.mxu1 %v14932_v36  ;;  %v14980_v34 = vcombine.high %v1049_v31, %v1053_v32  ;;  %v1056_v36 = vld [vmem:[#allocation2 + $0x1a50] sm:$0xff]  ;;  %v1097_v30 = vld [vmem:[#allocation2 + $0x1b98] sm:$0xff] }
 0x542   :  { %v14985_v0 = vcombine.low %v1056_v36, %v1060_v37 }
 0x544   :  { %10707 = vmatpush1.bf16.msra.mxu0 %v14929_v43  ;;  %11199 = vmatpush1.bf16.msra.mxu1 %v14931_v44  ;;  %v14979_v43 = vcombine.low %v1049_v31, %v1053_v32  ;;  %v14986_v44 = vcombine.high %v1056_v36, %v1060_v37  ;;  %v1101_v31 = vld [vmem:[#allocation2 + $0x1bb8] sm:$0xff]  ;;  %v1108_v36 = vld [vmem:[#allocation2 + $0x1bf0] sm:$0xff] }
 0x545   :  { %10708 = vmatprep.subr.bf16.mxu0 %v14938_v47  ;;  %11200 = vmatprep.subr.bf16.mxu1 %v14940_v49  ;;  %v14988_v47 = vcombine.high %v1057_v23, %v1061_v40  ;;  %v1064_v49 = vld [vmem:[#allocation2 + $0x1a90] sm:$0xff]  ;;  %v1105_v37 = vld [vmem:[#allocation2 + $0x1bd8] sm:$0xff] }
 0x546   :  { %v14993_v9 = vcombine.low %v1064_v49, %v1068_v50 }
 0x548   :  { %10709 = vmatpush1.bf16.msra.mxu0 %v14937_v2  ;;  %11201 = vmatpush1.bf16.msra.mxu1 %v14939_v3  ;;  %v14987_v2 = vcombine.low %v1057_v23, %v1061_v40  ;;  %v14994_v3 = vcombine.high %v1064_v49, %v1068_v50  ;;  %v1109_v23 = vld [vmem:[#allocation2 + $0x1bf8] sm:$0xff]  ;;  %v1116_v49 = vld [vmem:[#allocation2 + $0x1c30] sm:$0xff] }
 0x549   :  { %10710 = vmatprep.subr.bf16.mxu0 %v14946_v4  ;;  %11202 = vmatprep.subr.bf16.mxu1 %v14948_v56  ;;  %v14996_v4 = vcombine.high %v1065_v61, %v1069_v62  ;;  %v1072_v56 = vld [vmem:[#allocation2 + $0x1ad0] sm:$0xff]  ;;  %v1113_v50 = vld [vmem:[#allocation2 + $0x1c18] sm:$0xff] }
 0x54a   :  { %v15001_v18 = vcombine.low %v1072_v56, %v1076_v5 }
 0x54c   :  { %10711 = vmatpush1.bf16.msra.mxu0 %v14945_v14  ;;  %11203 = vmatpush1.bf16.msra.mxu1 %v14947_v10  ;;  %v14995_v14 = vcombine.low %v1065_v61, %v1069_v62  ;;  %v15002_v10 = vcombine.high %v1072_v56, %v1076_v5  ;;  %v1117_v61 = vld [vmem:[#allocation2 + $0x1c38] sm:$0xff]  ;;  %v1124_v56 = vld [vmem:[#allocation2 + $0x1c70] sm:$0xff] }
 0x54d   :  { %10712 = vmatprep.subr.bf16.mxu0 %v14954_v11  ;;  %11204 = vmatprep.subr.bf16.mxu1 %v14956_v13  ;;  %v15004_v11 = vcombine.high %v1073_v6, %v1077_v8  ;;  %v1080_v13 = vld [vmem:[#allocation2 + $0x1b10] sm:$0xff]  ;;  %v1121_v5 = vld [vmem:[#allocation2 + $0x1c58] sm:$0xff] }
 0x54e   :  { %v15009_v25 = vcombine.low %v1080_v13, %v1084_v15 }
 0x550   :  { %10713 = vmatpush1.bf16.msra.mxu0 %v14953_v54  ;;  %11205 = vmatpush1.bf16.msra.mxu1 %v14955_v19  ;;  %v15003_v54 = vcombine.low %v1073_v6, %v1077_v8  ;;  %v15010_v19 = vcombine.high %v1080_v13, %v1084_v15  ;;  %v1125_v6 = vld [vmem:[#allocation2 + $0x1c78] sm:$0xff]  ;;  %v1132_v13 = vld [vmem:[#allocation2 + $0x1cb0] sm:$0xff] }
 0x551   :  { %10714 = vmatprep.subr.bf16.mxu0 %v14962_v26  ;;  %11206 = vmatprep.subr.bf16.mxu1 %v14964_v20  ;;  %v15012_v26 = vcombine.high %v1081_v39, %v1085_v17  ;;  %v1088_v20 = vld [vmem:[#allocation2 + $0x1b50] sm:$0xff]  ;;  %v1129_v15 = vld [vmem:[#allocation2 + $0x1c98] sm:$0xff] }
 0x552   :  { %v15017_v32 = vcombine.low %v1088_v20, %v1092_v21 }
 0x554   :  { %10715 = vmatpush1.bf16.msra.mxu0 %v14961_v27  ;;  %11207 = vmatpush1.bf16.msra.mxu1 %v14963_v48  ;;  %v15011_v27 = vcombine.low %v1081_v39, %v1085_v17  ;;  %v15018_v48 = vcombine.high %v1088_v20, %v1092_v21  ;;  %v1133_v39 = vld [vmem:[#allocation2 + $0x1cb8] sm:$0xff]  ;;  %v1140_v20 = vld [vmem:[#allocation2 + $0x1cf0] sm:$0xff] }
 0x555   :  { %10716 = vmatprep.subr.bf16.mxu0 %v14970_v12  ;;  %11208 = vmatprep.subr.bf16.mxu1 %v14972_v1  ;;  %v15020_v12 = vcombine.high %v1089_v22, %v1093_v24  ;;  %v1096_v1 = vld [vmem:[#allocation2 + $0x1b90] sm:$0xff]  ;;  %v1137_v21 = vld [vmem:[#allocation2 + $0x1cd8] sm:$0xff] }
 0x556   :  { %v15025_v40 = vcombine.low %v1096_v1, %v1100_v28 }
 0x558   :  { %10717 = vmatpush1.bf16.msra.mxu0 %v14969_v33  ;;  %11209 = vmatpush1.bf16.msra.mxu1 %v14971_v57  ;;  %v15019_v33 = vcombine.low %v1089_v22, %v1093_v24  ;;  %v15026_v57 = vcombine.high %v1096_v1, %v1100_v28  ;;  %v1141_v22 = vld [vmem:[#allocation2 + $0x1cf8] sm:$0xff] }
 0x559   :  { %10718 = vmatprep.subr.bf16.mxu0 %v14978_v35  ;;  %11210 = vmatprep.subr.bf16.mxu1 %v14980_v34  ;;  %v15028_v35 = vcombine.high %v1097_v30, %v1101_v31  ;;  %v1104_v34 = vld [vmem:[#allocation2 + $0x1bd0] sm:$0xff]  ;;  %v1145_v1 = vld [vmem:[#allocation2 + $0x1d18] sm:$0xff] }
 0x55a   :  { %v15033_v62 = vcombine.low %v1104_v34, %v1108_v36  ;;  %v1149_v28 = vld [vmem:[#allocation2 + $0x1d38] sm:$0xff] }
 0x55c   :  { %10719 = vmatpush1.bf16.msra.mxu0 %v14977_v42  ;;  %11211 = vmatpush1.bf16.msra.mxu1 %v14979_v43  ;;  %v15027_v42 = vcombine.low %v1097_v30, %v1101_v31  ;;  %v15034_v43 = vcombine.high %v1104_v34, %v1108_v36  ;;  %v15067_v31 = vcombine.low %v1137_v21, %v1141_v22  ;;  %v1157_v34 = vld [vmem:[#allocation2 + $0x1d78] sm:$0xff] }
 0x55d   :  { %10720 = vmatprep.subr.bf16.mxu0 %v14986_v44  ;;  %11212 = vmatprep.subr.bf16.mxu1 %v14988_v47  ;;  %v15036_v44 = vcombine.high %v1105_v37, %v1109_v23  ;;  %v1112_v47 = vld [vmem:[#allocation2 + $0x1c10] sm:$0xff] }
 0x55e   :  { %v15041_v8 = vcombine.low %v1112_v47, %v1116_v49 }
 0x560   :  { %10721 = vmatpush1.bf16.msra.mxu0 %v14985_v0  ;;  %11213 = vmatpush1.bf16.msra.mxu1 %v14987_v2  ;;  %v15035_v0 = vcombine.low %v1105_v37, %v1109_v23  ;;  %v15042_v2 = vcombine.high %v1112_v47, %v1116_v49  ;;  %v15075_v37 = vcombine.low %v1145_v1, %v1149_v28  ;;  %v1165_v47 = vld [vmem:[#allocation2 + $0x1db8] sm:$0xff] }
 0x561   :  { %10722 = vmatprep.subr.bf16.mxu0 %v14994_v3  ;;  %11214 = vmatprep.subr.bf16.mxu1 %v14996_v4  ;;  %v15044_v3 = vcombine.high %v1113_v50, %v1117_v61  ;;  %v1120_v4 = vld [vmem:[#allocation2 + $0x1c50] sm:$0xff] }
 0x562   :  { %v15049_v17 = vcombine.low %v1120_v4, %v1124_v56 }
 0x564   :  { %10723 = vmatpush1.bf16.msra.mxu0 %v14993_v9  ;;  %11215 = vmatpush1.bf16.msra.mxu1 %v14995_v14  ;;  %v15043_v9 = vcombine.low %v1113_v50, %v1117_v61  ;;  %v15050_v14 = vcombine.high %v1120_v4, %v1124_v56  ;;  %v1173_v4 = vld [vmem:[#allocation2 + $0x1df8] sm:$0xff] }
 0x565   :  { %10724 = vmatprep.subr.bf16.mxu0 %v15002_v10  ;;  %11216 = vmatprep.subr.bf16.mxu1 %v15004_v11  ;;  %v15052_v10 = vcombine.high %v1121_v5, %v1125_v6  ;;  %v1128_v11 = vld [vmem:[#allocation2 + $0x1c90] sm:$0xff] }
 0x566   :  { %v15057_v24 = vcombine.low %v1128_v11, %v1132_v13 }
 0x568   :  { %10725 = vmatpush1.bf16.msra.mxu0 %v15001_v18  ;;  %11217 = vmatpush1.bf16.msra.mxu1 %v15003_v54  ;;  %v15051_v18 = vcombine.low %v1121_v5, %v1125_v6  ;;  %v15058_v54 = vcombine.high %v1128_v11, %v1132_v13  ;;  %v1181_v11 = vld [vmem:[#allocation2 + $0x1e38] sm:$0xff] }
 0x569   :  { %10726 = vmatprep.subr.bf16.mxu0 %v15010_v19  ;;  %11218 = vmatprep.subr.bf16.mxu1 %v15012_v26  ;;  %v15060_v19 = vcombine.high %v1129_v15, %v1133_v39  ;;  %v1136_v26 = vld [vmem:[#allocation2 + $0x1cd0] sm:$0xff] }
 0x56a   :  { %v15065_v30 = vcombine.low %v1136_v26, %v1140_v20 }
 0x56c   :  { %10727 = vmatpush1.bf16.msra.mxu0 %v15009_v25  ;;  %11219 = vmatpush1.bf16.msra.mxu1 %v15011_v27  ;;  %v15066_v25 = vcombine.high %v1136_v26, %v1140_v20  ;;  %v15068_v27 = vcombine.high %v1137_v21, %v1141_v22  ;;  %v1189_v26 = vld [vmem:[#allocation2 + $0x1e78] sm:$0xff] }
 0x56d   :  { %10728 = vmatprep.subr.bf16.mxu0 %v15018_v48  ;;  %11220 = vmatprep.subr.bf16.mxu1 %v15020_v12  ;;  %v1144_v48 = vld [vmem:[#allocation2 + $0x1d10] sm:$0xff] }
 0x56e   :  { %v1148_v12 = vld [vmem:[#allocation2 + $0x1d30] sm:$0xff] }
 0x56f   :  { %v15073_v36 = vcombine.low %v1144_v48, %v1148_v12 }
 0x570   :  { %10729 = vmatpush1.bf16.msra.mxu0 %v15017_v32  ;;  %11221 = vmatpush1.bf16.msra.mxu1 %v15019_v33  ;;  %v15074_v32 = vcombine.high %v1144_v48, %v1148_v12  ;;  %v1152_v33 = vld [vmem:[#allocation2 + $0x1d50] sm:$0xff]  ;;  %v1197_v48 = vld [vmem:[#allocation2 + $0x1eb8] sm:$0xff] }
 0x571   :  { %10730 = vmatprep.subr.bf16.mxu0 %v15026_v57  ;;  %11222 = vmatprep.subr.bf16.mxu1 %v15028_v35  ;;  %v1156_v57 = vld [vmem:[#allocation2 + $0x1d70] sm:$0xff]  ;;  %v1153_v35 = vld [vmem:[#allocation2 + $0x1d58] sm:$0xff] }
 0x572   :  { %v15082_v23 = vcombine.high %v1152_v33, %v1156_v57  ;;  %v15081_v49 = vcombine.low %v1152_v33, %v1156_v57  ;;  %v15083_v50 = vcombine.low %v1153_v35, %v1157_v34  ;;  %v1205_v33 = vld [vmem:[#allocation2 + $0x1ef8] sm:$0xff] }
 0x574   :  { %10731 = vmatpush1.bf16.msra.mxu0 %v15025_v40  ;;  %11223 = vmatpush1.bf16.msra.mxu1 %v15027_v42  ;;  %v15084_v40 = vcombine.high %v1153_v35, %v1157_v34  ;;  %v1160_v42 = vld [vmem:[#allocation2 + $0x1d90] sm:$0xff] }
 0x575   :  { %10732 = vmatprep.subr.bf16.mxu0 %v15034_v43  ;;  %11224 = vmatprep.subr.bf16.mxu1 %v15036_v44  ;;  %v1164_v43 = vld [vmem:[#allocation2 + $0x1db0] sm:$0xff]  ;;  %v1161_v44 = vld [vmem:[#allocation2 + $0x1d98] sm:$0xff] }
 0x576   :  { %v15090_v61 = vcombine.high %v1160_v42, %v1164_v43  ;;  %v15089_v56 = vcombine.low %v1160_v42, %v1164_v43  ;;  %v15091_v5 = vcombine.low %v1161_v44, %v1165_v47  ;;  %v1213_v42 = vld [vmem:[#allocation2 + $0x1f38] sm:$0xff] }
 0x578   :  { %10733 = vmatpush1.bf16.msra.mxu0 %v15033_v62  ;;  %11225 = vmatpush1.bf16.msra.mxu1 %v15035_v0  ;;  %v15092_v62 = vcombine.high %v1161_v44, %v1165_v47  ;;  %v1168_v0 = vld [vmem:[#allocation2 + $0x1dd0] sm:$0xff] }
 0x579   :  { %10743 = vmatprep.subr.bf16.mxu0 %v15042_v2  ;;  %11235 = vmatprep.subr.bf16.mxu1 %v15044_v3  ;;  %v1172_v2 = vld [vmem:[#allocation2 + $0x1df0] sm:$0xff]  ;;  %v1169_v3 = vld [vmem:[#allocation2 + $0x1dd8] sm:$0xff] }
 0x57a   :  { %v15098_v6 = vcombine.high %v1168_v0, %v1172_v2  ;;  %v15097_v13 = vcombine.low %v1168_v0, %v1172_v2  ;;  %v1221_v0 = vld [vmem:[#allocation2 + $0x1f78] sm:$0xff] }
 0x57b   :  { %10735 = vmatmul.mubr.bf16.vlgmr.msra.gmra.mrb[4].mxu0 %v17369_v16  ;;  %11227 = vmatmul.mubr.bf16.vlgmr.msra.gmra.mrb[4].mxu1 %v17369_v16  ;;  %v15059_v16 = vcombine.low %v1129_v15, %v1133_v39  ;;  %v15099_v15 = vcombine.low %v1169_v3, %v1173_v4 }
 0x57c   :  { %10744 = vmatpush1.bf16.msra.mxu0 %v15041_v8  ;;  %11236 = vmatpush1.bf16.msra.mxu1 %v15043_v9  ;;  %v15100_v8 = vcombine.high %v1169_v3, %v1173_v4  ;;  %v1176_v9 = vld [vmem:[#allocation2 + $0x1e10] sm:$0xff] }
 0x57d   :  { %10745 = vmatprep.subr.bf16.mxu0 %v15050_v14  ;;  %11237 = vmatprep.subr.bf16.mxu1 %v15052_v10  ;;  %v1180_v14 = vld [vmem:[#allocation2 + $0x1e30] sm:$0xff]  ;;  %v1177_v10 = vld [vmem:[#allocation2 + $0x1e18] sm:$0xff] }
 0x57e   :  { %10775 = vmatprep.mubr.bf16.mxu0 %v17374_v29  ;;  %11267 = vmatprep.mubr.bf16.mxu1 %v17374_v29  ;;  %v15076_v29 = vcombine.high %v1145_v1, %v1149_v28  ;;  %v15106_v39 = vcombine.high %v1176_v9, %v1180_v14  ;;  %v15105_v20 = vcombine.low %v1176_v9, %v1180_v14  ;;  %v1229_v9 = vld [vmem:[#allocation2 + $0x1fb8] sm:$0xff] }
 0x57f   :  { %v15107_v21 = vcombine.low %v1177_v10, %v1181_v11 }
 0x580   :  { %10746 = vmatpush1.bf16.msra.mxu0 %v15049_v17  ;;  %11238 = vmatpush1.bf16.msra.mxu1 %v15051_v18  ;;  %v15108_v17 = vcombine.high %v1177_v10, %v1181_v11  ;;  %v1184_v18 = vld [vmem:[#allocation2 + $0x1e50] sm:$0xff] }
 0x581   :  { %10747 = vmatprep.subr.bf16.mxu0 %v15058_v54  ;;  %11239 = vmatprep.subr.bf16.mxu1 %v15060_v19  ;;  %v1188_v54 = vld [vmem:[#allocation2 + $0x1e70] sm:$0xff]  ;;  %v1185_v19 = vld [vmem:[#allocation2 + $0x1e58] sm:$0xff] }
 0x582   :  { %v15114_v22 = vcombine.high %v1184_v18, %v1188_v54  ;;  %v15113_v12 = vcombine.low %v1184_v18, %v1188_v54  ;;  %v15115_v1 = vcombine.low %v1185_v19, %v1189_v26  ;;  %v1237_v18 = vld [vmem:[#allocation2 + $0x1ff8] sm:$0xff] }
 0x584   :  { %10748 = vmatpush1.bf16.msra.mxu0 %v15057_v24  ;;  %11240 = vmatpush1.bf16.msra.mxu1 %v15059_v16  ;;  %v15116_v24 = vcombine.high %v1185_v19, %v1189_v26  ;;  %v1192_v16 = vld [vmem:[#allocation2 + $0x1e90] sm:$0xff] }
 0x585   :  { %10749 = vmatprep.subr.bf16.mxu0 %v15066_v25  ;;  %11241 = vmatprep.subr.bf16.mxu1 %v15068_v27  ;;  %v1196_v25 = vld [vmem:[#allocation2 + $0x1eb0] sm:$0xff]  ;;  %v1193_v27 = vld [vmem:[#allocation2 + $0x1e98] sm:$0xff] }
 0x586   :  { %v15122_v28 = vcombine.high %v1192_v16, %v1196_v25  ;;  %v15121_v57 = vcombine.low %v1192_v16, %v1196_v25  ;;  %v15123_v35 = vcombine.low %v1193_v27, %v1197_v48  ;;  %v1245_v16 = vld [vmem:[#allocation2 + $0x2038] sm:$0xff] }
 0x588   :  { %10750 = vmatpush1.bf16.msra.mxu0 %v15065_v30  ;;  %11242 = vmatpush1.bf16.msra.mxu1 %v15067_v31  ;;  %v15124_v30 = vcombine.high %v1193_v27, %v1197_v48  ;;  %v1200_v31 = vld [vmem:[#allocation2 + $0x1ed0] sm:$0xff] }
 0x589   :  { %10751 = vmatprep.subr.bf16.mxu0 %v15074_v32  ;;  %11243 = vmatprep.subr.bf16.mxu1 %v15076_v29  ;;  %v1204_v32 = vld [vmem:[#allocation2 + $0x1ef0] sm:$0xff]  ;;  %v1201_v29 = vld [vmem:[#allocation2 + $0x1ed8] sm:$0xff] }
 0x58a   :  { %v15130_v34 = vcombine.high %v1200_v31, %v1204_v32  ;;  %v15129_v43 = vcombine.low %v1200_v31, %v1204_v32  ;;  %v15131_v44 = vcombine.low %v1201_v29, %v1205_v33  ;;  %v1253_v31 = vld [vmem:[#allocation2 + $0x2078] sm:$0xff] }
 0x58c   :  { %10752 = vmatpush1.bf16.msra.mxu0 %v15073_v36  ;;  %11244 = vmatpush1.bf16.msra.mxu1 %v15075_v37  ;;  %v15132_v36 = vcombine.high %v1201_v29, %v1205_v33  ;;  %v1208_v37 = vld [vmem:[#allocation2 + $0x1f10] sm:$0xff] }
 0x58d   :  { %10753 = vmatprep.subr.bf16.mxu0 %v15082_v23  ;;  %11245 = vmatprep.subr.bf16.mxu1 %v15084_v40  ;;  %v1212_v23 = vld [vmem:[#allocation2 + $0x1f30] sm:$0xff]  ;;  %v1209_v40 = vld [vmem:[#allocation2 + $0x1f18] sm:$0xff] }
 0x58e   :  { %v15138_v47 = vcombine.high %v1208_v37, %v1212_v23  ;;  %v15137_v2 = vcombine.low %v1208_v37, %v1212_v23  ;;  %v15139_v3 = vcombine.low %v1209_v40, %v1213_v42  ;;  %v1261_v37 = vld [vmem:[#allocation2 + $0x20b8] sm:$0xff] }
 0x590   :  { %10754 = vmatpush1.bf16.msra.mxu0 %v15081_v49  ;;  %11246 = vmatpush1.bf16.msra.mxu1 %v15083_v50  ;;  %v15140_v49 = vcombine.high %v1209_v40, %v1213_v42  ;;  %v1216_v50 = vld [vmem:[#allocation2 + $0x1f50] sm:$0xff] }
 0x591   :  { %10755 = vmatprep.subr.bf16.mxu0 %v15090_v61  ;;  %11247 = vmatprep.subr.bf16.mxu1 %v15092_v62  ;;  %v1220_v61 = vld [vmem:[#allocation2 + $0x1f70] sm:$0xff]  ;;  %v1217_v62 = vld [vmem:[#allocation2 + $0x1f58] sm:$0xff] }
 0x592   :  { %v15146_v4 = vcombine.high %v1216_v50, %v1220_v61  ;;  %v15145_v14 = vcombine.low %v1216_v50, %v1220_v61  ;;  %v15147_v10 = vcombine.low %v1217_v62, %v1221_v0  ;;  %v1269_v50 = vld [vmem:[#allocation2 + $0x20f8] sm:$0xff] }
 0x594   :  { %10756 = vmatpush1.bf16.msra.mxu0 %v15089_v56  ;;  %11248 = vmatpush1.bf16.msra.mxu1 %v15091_v5  ;;  %v15148_v56 = vcombine.high %v1217_v62, %v1221_v0  ;;  %v1224_v5 = vld [vmem:[#allocation2 + $0x1f90] sm:$0xff] }
 0x595   :  { %10757 = vmatprep.subr.bf16.mxu0 %v15098_v6  ;;  %11249 = vmatprep.subr.bf16.mxu1 %v15100_v8  ;;  %v1228_v6 = vld [vmem:[#allocation2 + $0x1fb0] sm:$0xff]  ;;  %v1225_v8 = vld [vmem:[#allocation2 + $0x1f98] sm:$0xff] }
 0x596   :  { %v15154_v11 = vcombine.high %v1224_v5, %v1228_v6  ;;  %v15153_v54 = vcombine.low %v1224_v5, %v1228_v6  ;;  %v15155_v19 = vcombine.low %v1225_v8, %v1229_v9 }
 0x598   :  { %10758 = vmatpush1.bf16.msra.mxu0 %v15097_v13  ;;  %11250 = vmatpush1.bf16.msra.mxu1 %v15099_v15  ;;  %v15156_v13 = vcombine.high %v1225_v8, %v1229_v9  ;;  %v1232_v15 = vld [vmem:[#allocation2 + $0x1fd0] sm:$0xff] }
 0x599   :  { %10759 = vmatprep.subr.bf16.mxu0 %v15106_v39  ;;  %11251 = vmatprep.subr.bf16.mxu1 %v15108_v17  ;;  %v1236_v39 = vld [vmem:[#allocation2 + $0x1ff0] sm:$0xff]  ;;  %v1233_v17 = vld [vmem:[#allocation2 + $0x1fd8] sm:$0xff] }
 0x59a   :  { %v15162_v26 = vcombine.high %v1232_v15, %v1236_v39  ;;  %v15161_v25 = vcombine.low %v1232_v15, %v1236_v39  ;;  %v15163_v27 = vcombine.low %v1233_v17, %v1237_v18  ;;  %v1280_v9 = vld [vmem:[#allocation2 + $0x2150] sm:$0xff] }
 0x59c   :  { %10760 = vmatpush1.bf16.msra.mxu0 %v15105_v20  ;;  %11252 = vmatpush1.bf16.msra.mxu1 %v15107_v21  ;;  %v15164_v20 = vcombine.high %v1233_v17, %v1237_v18  ;;  %v1240_v21 = vld [vmem:[#allocation2 + $0x2010] sm:$0xff] }
 0x59d   :  { %10761 = vmatprep.subr.bf16.mxu0 %v15114_v22  ;;  %11253 = vmatprep.subr.bf16.mxu1 %v15116_v24  ;;  %v1244_v22 = vld [vmem:[#allocation2 + $0x2030] sm:$0xff]  ;;  %v1241_v24 = vld [vmem:[#allocation2 + $0x2018] sm:$0xff] }
 0x59e   :  { %v15170_v48 = vcombine.high %v1240_v21, %v1244_v22  ;;  %v15169_v32 = vcombine.low %v1240_v21, %v1244_v22  ;;  %v15171_v29 = vcombine.low %v1241_v24, %v1245_v16  ;;  %v1288_v18 = vld [vmem:[#allocation2 + $0x2190] sm:$0xff] }
 0x5a0   :  { %10762 = vmatpush1.bf16.msra.mxu0 %v15113_v12  ;;  %11254 = vmatpush1.bf16.msra.mxu1 %v15115_v1  ;;  %v15172_v12 = vcombine.high %v1241_v24, %v1245_v16  ;;  %v1248_v1 = vld [vmem:[#allocation2 + $0x2050] sm:$0xff] }
 0x5a1   :  { %10763 = vmatprep.subr.bf16.mxu0 %v15122_v28  ;;  %11255 = vmatprep.subr.bf16.mxu1 %v15124_v30  ;;  %v1252_v28 = vld [vmem:[#allocation2 + $0x2070] sm:$0xff]  ;;  %v1249_v30 = vld [vmem:[#allocation2 + $0x2058] sm:$0xff] }
 0x5a2   :  { %v15178_v33 = vcombine.high %v1248_v1, %v1252_v28  ;;  %v15177_v23 = vcombine.low %v1248_v1, %v1252_v28  ;;  %v15179_v40 = vcombine.low %v1249_v30, %v1253_v31  ;;  %v1296_v16 = vld [vmem:[#allocation2 + $0x21d0] sm:$0xff] }
 0x5a4   :  { %10764 = vmatpush1.bf16.msra.mxu0 %v15121_v57  ;;  %11256 = vmatpush1.bf16.msra.mxu1 %v15123_v35  ;;  %v15180_v57 = vcombine.high %v1249_v30, %v1253_v31  ;;  %v1256_v35 = vld [vmem:[#allocation2 + $0x2090] sm:$0xff] }
 0x5a5   :  { %10765 = vmatprep.subr.bf16.mxu0 %v15130_v34  ;;  %11257 = vmatprep.subr.bf16.mxu1 %v15132_v36  ;;  %v1260_v34 = vld [vmem:[#allocation2 + $0x20b0] sm:$0xff]  ;;  %v1257_v36 = vld [vmem:[#allocation2 + $0x2098] sm:$0xff] }
 0x5a6   :  { %v15186_v42 = vcombine.high %v1256_v35, %v1260_v34  ;;  %v15185_v61 = vcombine.low %v1256_v35, %v1260_v34  ;;  %v1304_v31 = vld [vmem:[#allocation2 + $0x2210] sm:$0xff] }
 0x5a8   :  { %10766 = vmatpush1.bf16.msra.mxu0 %v15129_v43  ;;  %11258 = vmatpush1.bf16.msra.mxu1 %v15131_v44  ;;  %v15188_v43 = vcombine.high %v1257_v36, %v1261_v37  ;;  %v1264_v44 = vld [vmem:[#allocation2 + $0x20d0] sm:$0xff] }
 0x5a9   :  { %10767 = vmatprep.subr.bf16.mxu0 %v15138_v47  ;;  %11259 = vmatprep.subr.bf16.mxu1 %v15140_v49  ;;  %v1268_v47 = vld [vmem:[#allocation2 + $0x20f0] sm:$0xff]  ;;  %v1265_v49 = vld [vmem:[#allocation2 + $0x20d8] sm:$0xff] }
 0x5aa   :  { %v15194_v62 = vcombine.high %v1264_v44, %v1268_v47  ;;  %v15196_v0 = vcombine.high %v1265_v49, %v1269_v50  ;;  %v15193_v5 = vcombine.low %v1264_v44, %v1268_v47  ;;  %v15195_v6 = vcombine.low %v1265_v49, %v1269_v50  ;;  %v1320_v50 = vld [vmem:[#allocation2 + $0x2290] sm:$0xff] }
 0x5ac   :  { %10768 = vmatpush1.bf16.msra.mxu0 %v15137_v2  ;;  %11260 = vmatpush1.bf16.msra.mxu1 %v15139_v3  ;;  %v1272_v2 = vld [vmem:[#allocation2 + $0x2110] sm:$0xff] }
 0x5ad   :  { %10769 = vmatprep.subr.bf16.mxu0 %v15146_v4  ;;  %11261 = vmatprep.subr.bf16.mxu1 %v15148_v56  ;;  %v1276_v3 = vld [vmem:[#allocation2 + $0x2130] sm:$0xff]  ;;  %v1273_v4 = vld [vmem:[#allocation2 + $0x2118] sm:$0xff] }
 0x5ae   :  { %v1277_v56 = vld [vmem:[#allocation2 + $0x2138] sm:$0xff]  ;;  %v15202_v8 = vcombine.high %v1272_v2, %v1276_v3 }
 0x5af   :  { %v15203_v15 = vcombine.low %v1273_v4, %v1277_v56 }
 0x5b0   :  { %10770 = vmatpush1.bf16.msra.mxu0 %v15145_v14  ;;  %11262 = vmatpush1.bf16.msra.mxu1 %v15147_v10  ;;  %v1284_v14 = vld [vmem:[#allocation2 + $0x2170] sm:$0xff]  ;;  %v1281_v10 = vld [vmem:[#allocation2 + $0x2158] sm:$0xff] }
 0x5b1   :  { %10771 = vmatprep.subr.bf16.mxu0 %v15154_v11  ;;  %11263 = vmatprep.subr.bf16.mxu1 %v15156_v13  ;;  %v1285_v11 = vld [vmem:[#allocation2 + $0x2178] sm:$0xff]  ;;  %v15201_v13 = vcombine.low %v1272_v2, %v1276_v3  ;;  %v15210_v39 = vcombine.high %v1280_v9, %v1284_v14 }
 0x5b2   :  { %v15212_v17 = vcombine.high %v1281_v10, %v1285_v11  ;;  %v15211_v21 = vcombine.low %v1281_v10, %v1285_v11  ;;  %v1336_v11 = vld [vmem:[#allocation2 + $0x2310] sm:$0xff] }
 0x5b4   :  { %10772 = vmatpush1.bf16.msra.mxu0 %v15153_v54  ;;  %11264 = vmatpush1.bf16.msra.mxu1 %v15155_v19  ;;  %v1292_v54 = vld [vmem:[#allocation2 + $0x21b0] sm:$0xff]  ;;  %v1289_v19 = vld [vmem:[#allocation2 + $0x2198] sm:$0xff] }
 0x5b5   :  { %10773 = vmatprep.subr.bf16.mxu0 %v15162_v26  ;;  %11265 = vmatprep.subr.bf16.mxu1 %v15164_v20  ;;  %v1293_v26 = vld [vmem:[#allocation2 + $0x21b8] sm:$0xff]  ;;  %v15209_v20 = vcombine.low %v1280_v9, %v1284_v14  ;;  %v15218_v22 = vcombine.high %v1288_v18, %v1292_v54 }
 0x5b6   :  { %v15220_v24 = vcombine.high %v1289_v19, %v1293_v26  ;;  %v15219_v1 = vcombine.low %v1289_v19, %v1293_v26  ;;  %v1344_v26 = vld [vmem:[#allocation2 + $0x2350] sm:$0xff] }
 0x5b8   :  { %10774 = vmatpush1.bf16.msra.mxu0 %v15161_v25  ;;  %11266 = vmatpush1.bf16.msra.mxu1 %v15163_v27  ;;  %v1300_v25 = vld [vmem:[#allocation2 + $0x21f0] sm:$0xff]  ;;  %v1297_v27 = vld [vmem:[#allocation2 + $0x21d8] sm:$0xff] }
 0x5b9   :  { %10784 = vmatprep.subr.bf16.mxu0 %v15170_v48  ;;  %11276 = vmatprep.subr.bf16.mxu1 %v15172_v12  ;;  %v1301_v48 = vld [vmem:[#allocation2 + $0x21f8] sm:$0xff]  ;;  %v15217_v12 = vcombine.low %v1288_v18, %v1292_v54  ;;  %v15226_v28 = vcombine.high %v1296_v16, %v1300_v25 }
 0x5ba   :  { %v15228_v30 = vcombine.high %v1297_v27, %v1301_v48  ;;  %v15227_v35 = vcombine.low %v1297_v27, %v1301_v48  ;;  %v1352_v48 = vld [vmem:[#allocation2 + $0x2390] sm:$0xff] }
 0x5bb   :  { %10776 = vmatmul.mubr.bf16.vlgmr.msra.gmra.mrb[4].mxu0 %v17383_v60  ;;  %11268 = vmatmul.mubr.bf16.vlgmr.msra.gmra.mrb[4].mxu1 %v17383_v60  ;;  %v15187_v60 = vcombine.low %v1257_v36, %v1261_v37  ;;  %v1312_v37 = vld [vmem:[#allocation2 + $0x2250] sm:$0xff] }
 0x5bc   :  { %10785 = vmatpush1.bf16.msra.mxu0 %v15169_v32  ;;  %11277 = vmatpush1.bf16.msra.mxu1 %v15171_v29  ;;  %v1308_v32 = vld [vmem:[#allocation2 + $0x2230] sm:$0xff]  ;;  %v1305_v29 = vld [vmem:[#allocation2 + $0x2218] sm:$0xff] }
 0x5bd   :  { %10786 = vmatprep.subr.bf16.mxu0 %v15178_v33  ;;  %11278 = vmatprep.subr.bf16.mxu1 %v15180_v57  ;;  %v1309_v33 = vld [vmem:[#allocation2 + $0x2238] sm:$0xff]  ;;  %v15225_v57 = vcombine.low %v1296_v16, %v1300_v25  ;;  %v15234_v34 = vcombine.high %v1304_v31, %v1308_v32 }
 0x5be   :  { %10816 = vmatprep.mubr.bf16.mxu0 %v17388_v7  ;;  %11308 = vmatprep.mubr.bf16.mxu1 %v17388_v7  ;;  %v15204_v7 = vcombine.high %v1273_v4, %v1277_v56  ;;  %v15236_v36 = vcombine.high %v1305_v29, %v1309_v33  ;;  %v15235_v44 = vcombine.low %v1305_v29, %v1309_v33  ;;  %v1328_v56 = vld [vmem:[#allocation2 + $0x22d0] sm:$0xff] }
 0x5bf   :  { %v1360_v33 = vld [vmem:[#allocation2 + $0x23d0] sm:$0xff] }
 0x5c0   :  { %10787 = vmatpush1.bf16.msra.mxu0 %v15177_v23  ;;  %11279 = vmatpush1.bf16.msra.mxu1 %v15179_v40  ;;  %v1316_v23 = vld [vmem:[#allocation2 + $0x2270] sm:$0xff]  ;;  %v1313_v40 = vld [vmem:[#allocation2 + $0x2258] sm:$0xff] }
 0x5c1   :  { %10788 = vmatprep.subr.bf16.mxu0 %v15186_v42  ;;  %11280 = vmatprep.subr.bf16.mxu1 %v15188_v43  ;;  %v1317_v42 = vld [vmem:[#allocation2 + $0x2278] sm:$0xff]  ;;  %v15233_v43 = vcombine.low %v1304_v31, %v1308_v32  ;;  %v15242_v47 = vcombine.high %v1312_v37, %v1316_v23 }
 0x5c2   :  { %v15244_v49 = vcombine.high %v1313_v40, %v1317_v42  ;;  %v15243_v2 = vcombine.low %v1313_v40, %v1317_v42  ;;  %v1368_v42 = vld [vmem:[#allocation2 + $0x2410] sm:$0xff] }
 0x5c4   :  { %10789 = vmatpush1.bf16.msra.mxu0 %v15185_v61  ;;  %11281 = vmatpush1.bf16.msra.mxu1 %v15187_v60  ;;  %v1324_v61 = vld [vmem:[#allocation2 + $0x22b0] sm:$0xff]  ;;  %v1321_v60 = vld [vmem:[#allocation2 + $0x2298] sm:$0xff] }
 0x5c5   :  { %10790 = vmatprep.subr.bf16.mxu0 %v15194_v62  ;;  %11282 = vmatprep.subr.bf16.mxu1 %v15196_v0  ;;  %v1325_v62 = vld [vmem:[#allocation2 + $0x22b8] sm:$0xff]  ;;  %v15241_v0 = vcombine.low %v1312_v37, %v1316_v23  ;;  %v15250_v3 = vcombine.high %v1320_v50, %v1324_v61 }
 0x5c6   :  { %v15252_v4 = vcombine.high %v1321_v60, %v1325_v62  ;;  %v15251_v9 = vcombine.low %v1321_v60, %v1325_v62  ;;  %v1376_v62 = vld [vmem:[#allocation2 + $0x2450] sm:$0xff] }
 0x5c8   :  { %10791 = vmatpush1.bf16.msra.mxu0 %v15193_v5  ;;  %11283 = vmatpush1.bf16.msra.mxu1 %v15195_v6  ;;  %v1332_v5 = vld [vmem:[#allocation2 + $0x22f0] sm:$0xff]  ;;  %v1329_v6 = vld [vmem:[#allocation2 + $0x22d8] sm:$0xff] }
 0x5c9   :  { %10792 = vmatprep.subr.bf16.mxu0 %v15202_v8  ;;  %11284 = vmatprep.subr.bf16.mxu1 %v15204_v7  ;;  %v1333_v8 = vld [vmem:[#allocation2 + $0x22f8] sm:$0xff]  ;;  %v15249_v7 = vcombine.low %v1320_v50, %v1324_v61  ;;  %v15258_v14 = vcombine.high %v1328_v56, %v1332_v5 }
 0x5ca   :  { %v15260_v10 = vcombine.high %v1329_v6, %v1333_v8  ;;  %v15259_v18 = vcombine.low %v1329_v6, %v1333_v8  ;;  %v1384_v8 = vld [vmem:[#allocation2 + $0x2490] sm:$0xff] }
 0x5cc   :  { %10793 = vmatpush1.bf16.msra.mxu0 %v15201_v13  ;;  %11285 = vmatpush1.bf16.msra.mxu1 %v15203_v15  ;;  %v1340_v13 = vld [vmem:[#allocation2 + $0x2330] sm:$0xff]  ;;  %v1337_v15 = vld [vmem:[#allocation2 + $0x2318] sm:$0xff] }
 0x5cd   :  { %10794 = vmatprep.subr.bf16.mxu0 %v15210_v39  ;;  %11286 = vmatprep.subr.bf16.mxu1 %v15212_v17  ;;  %v1341_v39 = vld [vmem:[#allocation2 + $0x2338] sm:$0xff]  ;;  %v15257_v17 = vcombine.low %v1328_v56, %v1332_v5  ;;  %v15266_v54 = vcombine.high %v1336_v11, %v1340_v13 }
 0x5ce   :  { %v15268_v19 = vcombine.high %v1337_v15, %v1341_v39  ;;  %v15267_v16 = vcombine.low %v1337_v15, %v1341_v39  ;;  %v1392_v39 = vld [vmem:[#allocation2 + $0x24d0] sm:$0xff] }
 0x5d0   :  { %10795 = vmatpush1.bf16.msra.mxu0 %v15209_v20  ;;  %11287 = vmatpush1.bf16.msra.mxu1 %v15211_v21  ;;  %v1348_v20 = vld [vmem:[#allocation2 + $0x2370] sm:$0xff]  ;;  %v1345_v21 = vld [vmem:[#allocation2 + $0x2358] sm:$0xff] }
 0x5d1   :  { %10796 = vmatprep.subr.bf16.mxu0 %v15218_v22  ;;  %11288 = vmatprep.subr.bf16.mxu1 %v15220_v24  ;;  %v1349_v22 = vld [vmem:[#allocation2 + $0x2378] sm:$0xff]  ;;  %v15265_v24 = vcombine.low %v1336_v11, %v1340_v13  ;;  %v15274_v25 = vcombine.high %v1344_v26, %v1348_v20 }
 0x5d2   :  { %v15276_v27 = vcombine.high %v1345_v21, %v1349_v22  ;;  %v15275_v31 = vcombine.low %v1345_v21, %v1349_v22  ;;  %v1400_v21 = vld [vmem:[#allocation2 + $0x2510] sm:$0xff] }
 0x5d3   :  { %v1404_v22 = vld [vmem:[#allocation2 + $0x2530] sm:$0xff] }
 0x5d4   :  { %10797 = vmatpush1.bf16.msra.mxu0 %v15217_v12  ;;  %11289 = vmatpush1.bf16.msra.mxu1 %v15219_v1  ;;  %v1356_v12 = vld [vmem:[#allocation2 + $0x23b0] sm:$0xff]  ;;  %v1353_v1 = vld [vmem:[#allocation2 + $0x2398] sm:$0xff] }
 0x5d5   :  { %10798 = vmatprep.subr.bf16.mxu0 %v15226_v28  ;;  %11290 = vmatprep.subr.bf16.mxu1 %v15228_v30  ;;  %v1357_v28 = vld [vmem:[#allocation2 + $0x23b8] sm:$0xff]  ;;  %v15273_v30 = vcombine.low %v1344_v26, %v1348_v20  ;;  %v15282_v32 = vcombine.high %v1352_v48, %v1356_v12 }
 0x5d6   :  { %v15284_v29 = vcombine.high %v1353_v1, %v1357_v28  ;;  %v15283_v37 = vcombine.low %v1353_v1, %v1357_v28  ;;  %v1412_v1 = vld [vmem:[#allocation2 + $0x2570] sm:$0xff]  ;;  %v1409_v28 = vld [vmem:[#allocation2 + $0x2558] sm:$0xff] }
 0x5d8   :  { %10799 = vmatpush1.bf16.msra.mxu0 %v15225_v57  ;;  %11291 = vmatpush1.bf16.msra.mxu1 %v15227_v35  ;;  %v1364_v57 = vld [vmem:[#allocation2 + $0x23f0] sm:$0xff]  ;;  %v1361_v35 = vld [vmem:[#allocation2 + $0x23d8] sm:$0xff] }
 0x5d9   :  { %10800 = vmatprep.subr.bf16.mxu0 %v15234_v34  ;;  %11292 = vmatprep.subr.bf16.mxu1 %v15236_v36  ;;  %v1365_v34 = vld [vmem:[#allocation2 + $0x23f8] sm:$0xff]  ;;  %v15281_v36 = vcombine.low %v1352_v48, %v1356_v12  ;;  %v15290_v23 = vcombine.high %v1360_v33, %v1364_v57  ;;  %v15330_v48 = vcombine.high %v1400_v21, %v1404_v22  ;;  %v1408_v12 = vld [vmem:[#allocation2 + $0x2550] sm:$0xff] }
 0x5da   :  { %v15292_v40 = vcombine.high %v1361_v35, %v1365_v34  ;;  %v15291_v50 = vcombine.low %v1361_v35, %v1365_v34  ;;  %v1420_v35 = vld [vmem:[#allocation2 + $0x25b0] sm:$0xff]  ;;  %v1417_v34 = vld [vmem:[#allocation2 + $0x2598] sm:$0xff] }
 0x5dc   :  { %10801 = vmatpush1.bf16.msra.mxu0 %v15233_v43  ;;  %11293 = vmatpush1.bf16.msra.mxu1 %v15235_v44  ;;  %v1372_v43 = vld [vmem:[#allocation2 + $0x2430] sm:$0xff]  ;;  %v1369_v44 = vld [vmem:[#allocation2 + $0x2418] sm:$0xff] }
 0x5dd   :  { %10802 = vmatprep.subr.bf16.mxu0 %v15242_v47  ;;  %11294 = vmatprep.subr.bf16.mxu1 %v15244_v49  ;;  %v1373_v47 = vld [vmem:[#allocation2 + $0x2438] sm:$0xff]  ;;  %v15289_v49 = vcombine.low %v1360_v33, %v1364_v57  ;;  %v15298_v61 = vcombine.high %v1368_v42, %v1372_v43  ;;  %v1416_v57 = vld [vmem:[#allocation2 + $0x2590] sm:$0xff] }
 0x5de   :  { %v15300_v60 = vcombine.high %v1369_v44, %v1373_v47  ;;  %v15299_v56 = vcombine.low %v1369_v44, %v1373_v47  ;;  %v1428_v44 = vld [vmem:[#allocation2 + $0x25f0] sm:$0xff]  ;;  %v1425_v47 = vld [vmem:[#allocation2 + $0x25d8] sm:$0xff] }
 0x5e0   :  { %10803 = vmatpush1.bf16.msra.mxu0 %v15241_v0  ;;  %11295 = vmatpush1.bf16.msra.mxu1 %v15243_v2  ;;  %v1380_v0 = vld [vmem:[#allocation2 + $0x2470] sm:$0xff]  ;;  %v1377_v2 = vld [vmem:[#allocation2 + $0x2458] sm:$0xff] }
 0x5e1   :  { %10804 = vmatprep.subr.bf16.mxu0 %v15250_v3  ;;  %11296 = vmatprep.subr.bf16.mxu1 %v15252_v4  ;;  %v1381_v3 = vld [vmem:[#allocation2 + $0x2478] sm:$0xff]  ;;  %v15297_v4 = vcombine.low %v1368_v42, %v1372_v43  ;;  %v15306_v5 = vcombine.high %v1376_v62, %v1380_v0  ;;  %v1424_v43 = vld [vmem:[#allocation2 + $0x25d0] sm:$0xff] }
 0x5e2   :  { %v15308_v6 = vcombine.high %v1377_v2, %v1381_v3  ;;  %v15307_v11 = vcombine.low %v1377_v2, %v1381_v3  ;;  %v1436_v2 = vld [vmem:[#allocation2 + $0x2630] sm:$0xff]  ;;  %v1433_v3 = vld [vmem:[#allocation2 + $0x2618] sm:$0xff] }
 0x5e4   :  { %10805 = vmatpush1.bf16.msra.mxu0 %v15249_v7  ;;  %11297 = vmatpush1.bf16.msra.mxu1 %v15251_v9  ;;  %v1388_v7 = vld [vmem:[#allocation2 + $0x24b0] sm:$0xff]  ;;  %v1385_v9 = vld [vmem:[#allocation2 + $0x2498] sm:$0xff] }
 0x5e5   :  { %10806 = vmatprep.subr.bf16.mxu0 %v15258_v14  ;;  %11298 = vmatprep.subr.bf16.mxu1 %v15260_v10  ;;  %v1389_v14 = vld [vmem:[#allocation2 + $0x24b8] sm:$0xff]  ;;  %v15305_v10 = vcombine.low %v1376_v62, %v1380_v0  ;;  %v15314_v13 = vcombine.high %v1384_v8, %v1388_v7  ;;  %v1432_v0 = vld [vmem:[#allocation2 + $0x2610] sm:$0xff] }
 0x5e6   :  { %v15316_v15 = vcombine.high %v1385_v9, %v1389_v14 }
 0x5e8   :  { %10807 = vmatpush1.bf16.msra.mxu0 %v15257_v17  ;;  %11299 = vmatpush1.bf16.msra.mxu1 %v15259_v18  ;;  %v1396_v17 = vld [vmem:[#allocation2 + $0x24f0] sm:$0xff]  ;;  %v1393_v18 = vld [vmem:[#allocation2 + $0x24d8] sm:$0xff] }
 0x5e9   :  { %10808 = vmatprep.subr.bf16.mxu0 %v15266_v54  ;;  %11300 = vmatprep.subr.bf16.mxu1 %v15268_v19  ;;  %v1397_v54 = vld [vmem:[#allocation2 + $0x24f8] sm:$0xff]  ;;  %v15313_v19 = vcombine.low %v1384_v8, %v1388_v7  ;;  %v15322_v26 = vcombine.high %v1392_v39, %v1396_v17  ;;  %v1440_v7 = vld [vmem:[#allocation2 + $0x2650] sm:$0xff] }
 0x5ea   :  { %v15324_v20 = vcombine.high %v1393_v18, %v1397_v54 }
 0x5ec   :  { %10809 = vmatpush1.bf16.msra.mxu0 %v15265_v24  ;;  %11301 = vmatpush1.bf16.msra.mxu1 %v15267_v16  ;;  %v1401_v24 = vld [vmem:[#allocation2 + $0x2518] sm:$0xff] }
 0x5ed   :  { %10810 = vmatprep.subr.bf16.mxu0 %v15274_v25  ;;  %11302 = vmatprep.subr.bf16.mxu1 %v15276_v27  ;;  %v1405_v16 = vld [vmem:[#allocation2 + $0x2538] sm:$0xff]  ;;  %v15321_v25 = vcombine.low %v1392_v39, %v1396_v17  ;;  %v15323_v27 = vcombine.low %v1393_v18, %v1397_v54  ;;  %v1448_v17 = vld [vmem:[#allocation2 + $0x2690] sm:$0xff] }
 0x5ee   :  { %v1452_v18 = vld [vmem:[#allocation2 + $0x26b0] sm:$0xff]  ;;  %v1449_v54 = vld [vmem:[#allocation2 + $0x2698] sm:$0xff] }
 0x5f0   :  { %10811 = vmatpush1.bf16.msra.mxu0 %v15273_v30  ;;  %11303 = vmatpush1.bf16.msra.mxu1 %v15275_v31  ;;  %v1413_v30 = vld [vmem:[#allocation2 + $0x2578] sm:$0xff]  ;;  %v15329_v31 = vcombine.low %v1400_v21, %v1404_v22  ;;  %v1456_v22 = vld [vmem:[#allocation2 + $0x26d0] sm:$0xff] }
 0x5f1   :  { %10812 = vmatprep.subr.bf16.mxu0 %v15282_v32  ;;  %11304 = vmatprep.subr.bf16.mxu1 %v15284_v29  ;;  %v15331_v32 = vcombine.low %v1401_v24, %v1405_v16  ;;  %v15338_v29 = vcombine.high %v1408_v12, %v1412_v1  ;;  %v15340_v33 = vcombine.high %v1409_v28, %v1413_v30 }
 0x5f4   :  { %10813 = vmatpush1.bf16.msra.mxu0 %v15281_v36  ;;  %11305 = vmatpush1.bf16.msra.mxu1 %v15283_v37  ;;  %v1421_v36 = vld [vmem:[#allocation2 + $0x25b8] sm:$0xff]  ;;  %v15337_v37 = vcombine.low %v1408_v12, %v1412_v1  ;;  %v1464_v1 = vld [vmem:[#allocation2 + $0x2710] sm:$0xff] }
 0x5f5   :  { %10814 = vmatprep.subr.bf16.mxu0 %v15290_v23  ;;  %11306 = vmatprep.subr.bf16.mxu1 %v15292_v40  ;;  %v15339_v23 = vcombine.low %v1409_v28, %v1413_v30  ;;  %v15346_v40 = vcombine.high %v1416_v57, %v1420_v35  ;;  %v15348_v42 = vcombine.high %v1417_v34, %v1421_v36  ;;  %v1468_v28 = vld [vmem:[#allocation2 + $0x2730] sm:$0xff]  ;;  %v1465_v30 = vld [vmem:[#allocation2 + $0x2718] sm:$0xff] }
 0x5f8   :  { %10815 = vmatpush1.bf16.msra.mxu0 %v15289_v49  ;;  %11307 = vmatpush1.bf16.msra.mxu1 %v15291_v50  ;;  %v1429_v49 = vld [vmem:[#allocation2 + $0x25f8] sm:$0xff]  ;;  %v15345_v50 = vcombine.low %v1416_v57, %v1420_v35  ;;  %v1472_v35 = vld [vmem:[#allocation2 + $0x2750] sm:$0xff] }
 0x5f9   :  { %10825 = vmatprep.subr.bf16.mxu0 %v15298_v61  ;;  %11317 = vmatprep.subr.bf16.mxu1 %v15300_v60  ;;  %v15347_v61 = vcombine.low %v1417_v34, %v1421_v36  ;;  %v15354_v60 = vcombine.high %v1424_v43, %v1428_v44  ;;  %v15356_v62 = vcombine.high %v1425_v47, %v1429_v49  ;;  %v1476_v34 = vld [vmem:[#allocation2 + $0x2770] sm:$0xff]  ;;  %v1473_v36 = vld [vmem:[#allocation2 + $0x2758] sm:$0xff] }
 0x5fb   :  { %10817 = vmatmul.mubr.bf16.vlgmr.msra.gmra.mrb[4].mxu0 %v17397_v45  ;;  %11309 = vmatmul.mubr.bf16.vlgmr.msra.gmra.mrb[4].mxu1 %v17397_v45  ;;  %v15315_v45 = vcombine.low %v1385_v9, %v1389_v14  ;;  %v1444_v9 = vld [vmem:[#allocation2 + $0x2670] sm:$0xff]  ;;  %v1441_v14 = vld [vmem:[#allocation2 + $0x2658] sm:$0xff] }
 0x5fc   :  { %10826 = vmatpush1.bf16.msra.mxu0 %v15297_v4  ;;  %11318 = vmatpush1.bf16.msra.mxu1 %v15299_v56  ;;  %v1437_v4 = vld [vmem:[#allocation2 + $0x2638] sm:$0xff]  ;;  %v15353_v56 = vcombine.low %v1424_v43, %v1428_v44  ;;  %v1480_v44 = vld [vmem:[#allocation2 + $0x2790] sm:$0xff] }
 0x5fd   :  { %10827 = vmatprep.subr.bf16.mxu0 %v15306_v5  ;;  %11319 = vmatprep.subr.bf16.mxu1 %v15308_v6  ;;  %v15355_v5 = vcombine.low %v1425_v47, %v1429_v49  ;;  %v15362_v6 = vcombine.high %v1432_v0, %v1436_v2  ;;  %v15364_v8 = vcombine.high %v1433_v3, %v1437_v4  ;;  %v1484_v47 = vld [vmem:[#allocation2 + $0x27b0] sm:$0xff]  ;;  %v1481_v49 = vld [vmem:[#allocation2 + $0x2798] sm:$0xff] }
 0x5fe   :  { %10857 = vmatprep.mubr.bf16.mxu0 %v17402_v59  ;;  %11349 = vmatprep.mubr.bf16.mxu1 %v17402_v59  ;;  %v15332_v59 = vcombine.high %v1401_v24, %v1405_v16  ;;  %v1460_v24 = vld [vmem:[#allocation2 + $0x26f0] sm:$0xff]  ;;  %v1457_v16 = vld [vmem:[#allocation2 + $0x26d8] sm:$0xff] }
 0x600   :  { %10828 = vmatpush1.bf16.msra.mxu0 %v15305_v10  ;;  %11320 = vmatpush1.bf16.msra.mxu1 %v15307_v11  ;;  %v1445_v10 = vld [vmem:[#allocation2 + $0x2678] sm:$0xff]  ;;  %v15361_v11 = vcombine.low %v1432_v0, %v1436_v2  ;;  %v1488_v2 = vld [vmem:[#allocation2 + $0x27d0] sm:$0xff] }
 0x601   :  { %10829 = vmatprep.subr.bf16.mxu0 %v15314_v13  ;;  %11321 = vmatprep.subr.bf16.mxu1 %v15316_v15  ;;  %v15363_v13 = vcombine.low %v1433_v3, %v1437_v4  ;;  %v15370_v15 = vcombine.high %v1440_v7, %v1444_v9  ;;  %v15372_v39 = vcombine.high %v1441_v14, %v1445_v10  ;;  %v1492_v3 = vld [vmem:[#allocation2 + $0x27f0] sm:$0xff]  ;;  %v1489_v4 = vld [vmem:[#allocation2 + $0x27d8] sm:$0xff] }
 0x604   :  { %10830 = vmatpush1.bf16.msra.mxu0 %v15313_v19  ;;  %11322 = vmatpush1.bf16.msra.mxu1 %v15315_v45  ;;  %v1453_v19 = vld [vmem:[#allocation2 + $0x26b8] sm:$0xff]  ;;  %v15369_v45 = vcombine.low %v1440_v7, %v1444_v9  ;;  %v1496_v9 = vld [vmem:[#allocation2 + $0x2810] sm:$0xff] }
 0x605   :  { %10831 = vmatprep.subr.bf16.mxu0 %v15322_v26  ;;  %11323 = vmatprep.subr.bf16.mxu1 %v15324_v20  ;;  %v15371_v26 = vcombine.low %v1441_v14, %v1445_v10  ;;  %v15378_v20 = vcombine.high %v1448_v17, %v1452_v18  ;;  %v15380_v21 = vcombine.high %v1449_v54, %v1453_v19  ;;  %v1500_v14 = vld [vmem:[#allocation2 + $0x2830] sm:$0xff]  ;;  %v1497_v10 = vld [vmem:[#allocation2 + $0x2818] sm:$0xff] }
 0x608   :  { %10832 = vmatpush1.bf16.msra.mxu0 %v15321_v25  ;;  %11324 = vmatpush1.bf16.msra.mxu1 %v15323_v27  ;;  %v1461_v25 = vld [vmem:[#allocation2 + $0x26f8] sm:$0xff]  ;;  %v15377_v27 = vcombine.low %v1448_v17, %v1452_v18  ;;  %v1504_v18 = vld [vmem:[#allocation2 + $0x2850] sm:$0xff] }
 0x609   :  { %10833 = vmatprep.subr.bf16.mxu0 %v15330_v48  ;;  %11325 = vmatprep.subr.bf16.mxu1 %v15332_v59  ;;  %v15379_v48 = vcombine.low %v1449_v54, %v1453_v19  ;;  %v15386_v59 = vcombine.high %v1456_v22, %v1460_v24  ;;  %v15388_v12 = vcombine.high %v1457_v16, %v1461_v25  ;;  %v1508_v54 = vld [vmem:[#allocation2 + $0x2870] sm:$0xff]  ;;  %v1505_v19 = vld [vmem:[#allocation2 + $0x2858] sm:$0xff] }
 0x60c   :  { %10834 = vmatpush1.bf16.msra.mxu0 %v15329_v31  ;;  %11326 = vmatpush1.bf16.msra.mxu1 %v15331_v32  ;;  %v1469_v31 = vld [vmem:[#allocation2 + $0x2738] sm:$0xff]  ;;  %v15385_v32 = vcombine.low %v1456_v22, %v1460_v24  ;;  %v1512_v24 = vld [vmem:[#allocation2 + $0x2890] sm:$0xff] }
 0x60d   :  { %10835 = vmatprep.subr.bf16.mxu0 %v15338_v29  ;;  %11327 = vmatprep.subr.bf16.mxu1 %v15340_v33  ;;  %v15387_v29 = vcombine.low %v1457_v16, %v1461_v25  ;;  %v15394_v33 = vcombine.high %v1464_v1, %v1468_v28  ;;  %v15396_v57 = vcombine.high %v1465_v30, %v1469_v31  ;;  %v1516_v16 = vld [vmem:[#allocation2 + $0x28b0] sm:$0xff]  ;;  %v1513_v25 = vld [vmem:[#allocation2 + $0x2898] sm:$0xff] }
 0x610   :  { %10836 = vmatpush1.bf16.msra.mxu0 %v15337_v37  ;;  %11328 = vmatpush1.bf16.msra.mxu1 %v15339_v23  ;;  %v1477_v37 = vld [vmem:[#allocation2 + $0x2778] sm:$0xff]  ;;  %v15393_v23 = vcombine.low %v1464_v1, %v1468_v28  ;;  %v1520_v28 = vld [vmem:[#allocation2 + $0x28d0] sm:$0xff] }
 0x611   :  { %10837 = vmatprep.subr.bf16.mxu0 %v15346_v40  ;;  %11329 = vmatprep.subr.bf16.mxu1 %v15348_v42  ;;  %v15395_v40 = vcombine.low %v1465_v30, %v1469_v31  ;;  %v15402_v42 = vcombine.high %v1472_v35, %v1476_v34  ;;  %v15404_v43 = vcombine.high %v1473_v36, %v1477_v37  ;;  %v1524_v30 = vld [vmem:[#allocation2 + $0x28f0] sm:$0xff]  ;;  %v1521_v31 = vld [vmem:[#allocation2 + $0x28d8] sm:$0xff] }
 0x614   :  { %10838 = vmatpush1.bf16.msra.mxu0 %v15345_v50  ;;  %11330 = vmatpush1.bf16.msra.mxu1 %v15347_v61  ;;  %v1485_v50 = vld [vmem:[#allocation2 + $0x27b8] sm:$0xff]  ;;  %v15401_v61 = vcombine.low %v1472_v35, %v1476_v34  ;;  %v1528_v35 = vld [vmem:[#allocation2 + $0x2910] sm:$0xff] }
 0x615   :  { %10839 = vmatprep.subr.bf16.mxu0 %v15354_v60  ;;  %11331 = vmatprep.subr.bf16.mxu1 %v15356_v62  ;;  %v15403_v60 = vcombine.low %v1473_v36, %v1477_v37  ;;  %v15410_v62 = vcombine.high %v1480_v44, %v1484_v47  ;;  %v15412_v0 = vcombine.high %v1481_v49, %v1485_v50  ;;  %v1532_v34 = vld [vmem:[#allocation2 + $0x2930] sm:$0xff]  ;;  %v1529_v36 = vld [vmem:[#allocation2 + $0x2918] sm:$0xff] }
 0x616   :  { %v1533_v37 = vld [vmem:[#allocation2 + $0x2938] sm:$0xff] }
 0x618   :  { %10840 = vmatpush1.bf16.msra.mxu0 %v15353_v56  ;;  %11332 = vmatpush1.bf16.msra.mxu1 %v15355_v5  ;;  %v1493_v56 = vld [vmem:[#allocation2 + $0x27f8] sm:$0xff]  ;;  %v15409_v5 = vcombine.low %v1480_v44, %v1484_v47  ;;  %v1540_v44 = vld [vmem:[#allocation2 + $0x2970] sm:$0xff] }
 0x619   :  { %10841 = vmatprep.subr.bf16.mxu0 %v15362_v6  ;;  %11333 = vmatprep.subr.bf16.mxu1 %v15364_v8  ;;  %v15411_v6 = vcombine.low %v1481_v49, %v1485_v50  ;;  %v15418_v8 = vcombine.high %v1488_v2, %v1492_v3  ;;  %v15420_v7 = vcombine.high %v1489_v4, %v1493_v56  ;;  %v1537_v47 = vld [vmem:[#allocation2 + $0x2958] sm:$0xff] }
 0x61a   :  { %v1541_v49 = vld [vmem:[#allocation2 + $0x2978] sm:$0xff]  ;;  %v15457_v50 = vcombine.low %v1528_v35, %v1532_v34 }
 0x61c   :  { %10842 = vmatpush1.bf16.msra.mxu0 %v15361_v11  ;;  %11334 = vmatpush1.bf16.msra.mxu1 %v15363_v13  ;;  %v1501_v11 = vld [vmem:[#allocation2 + $0x2838] sm:$0xff]  ;;  %v15417_v13 = vcombine.low %v1488_v2, %v1492_v3  ;;  %v1548_v2 = vld [vmem:[#allocation2 + $0x29b0] sm:$0xff] }
 0x61d   :  { %10843 = vmatprep.subr.bf16.mxu0 %v15370_v15  ;;  %11335 = vmatprep.subr.bf16.mxu1 %v15372_v39  ;;  %v15419_v15 = vcombine.low %v1489_v4, %v1493_v56  ;;  %v15426_v39 = vcombine.high %v1496_v9, %v1500_v14  ;;  %v15428_v17 = vcombine.high %v1497_v10, %v1501_v11  ;;  %v1545_v3 = vld [vmem:[#allocation2 + $0x2998] sm:$0xff] }
 0x61e   :  { %v1549_v4 = vld [vmem:[#allocation2 + $0x29b8] sm:$0xff] }
 0x620   :  { %10844 = vmatpush1.bf16.msra.mxu0 %v15369_v45  ;;  %11336 = vmatpush1.bf16.msra.mxu1 %v15371_v26  ;;  %v1509_v45 = vld [vmem:[#allocation2 + $0x2878] sm:$0xff]  ;;  %v15425_v26 = vcombine.low %v1496_v9, %v1500_v14  ;;  %v1556_v9 = vld [vmem:[#allocation2 + $0x29f0] sm:$0xff] }
 0x621   :  { %10845 = vmatprep.subr.bf16.mxu0 %v15378_v20  ;;  %11337 = vmatprep.subr.bf16.mxu1 %v15380_v21  ;;  %v15427_v20 = vcombine.low %v1497_v10, %v1501_v11  ;;  %v15434_v21 = vcombine.high %v1504_v18, %v1508_v54  ;;  %v15436_v22 = vcombine.high %v1505_v19, %v1509_v45  ;;  %v1553_v14 = vld [vmem:[#allocation2 + $0x29d8] sm:$0xff] }
 0x622   :  { %v1557_v10 = vld [vmem:[#allocation2 + $0x29f8] sm:$0xff] }
 0x624   :  { %10846 = vmatpush1.bf16.msra.mxu0 %v15377_v27  ;;  %11338 = vmatpush1.bf16.msra.mxu1 %v15379_v48  ;;  %v1517_v27 = vld [vmem:[#allocation2 + $0x28b8] sm:$0xff]  ;;  %v15433_v48 = vcombine.low %v1504_v18, %v1508_v54  ;;  %v1564_v18 = vld [vmem:[#allocation2 + $0x2a30] sm:$0xff] }
 0x625   :  { %10847 = vmatprep.subr.bf16.mxu0 %v15386_v59  ;;  %11339 = vmatprep.subr.bf16.mxu1 %v15388_v12  ;;  %v15435_v59 = vcombine.low %v1505_v19, %v1509_v45  ;;  %v15442_v12 = vcombine.high %v1512_v24, %v1516_v16  ;;  %v15444_v1 = vcombine.high %v1513_v25, %v1517_v27  ;;  %v1561_v54 = vld [vmem:[#allocation2 + $0x2a18] sm:$0xff] }
 0x626   :  { %v1565_v19 = vld [vmem:[#allocation2 + $0x2a38] sm:$0xff] }
 0x628   :  { %10848 = vmatpush1.bf16.msra.mxu0 %v15385_v32  ;;  %11340 = vmatpush1.bf16.msra.mxu1 %v15387_v29  ;;  %v1525_v32 = vld [vmem:[#allocation2 + $0x28f8] sm:$0xff]  ;;  %v15441_v29 = vcombine.low %v1512_v24, %v1516_v16  ;;  %v1572_v24 = vld [vmem:[#allocation2 + $0x2a70] sm:$0xff] }
 0x629   :  { %10849 = vmatprep.subr.bf16.mxu0 %v15394_v33  ;;  %11341 = vmatprep.subr.bf16.mxu1 %v15396_v57  ;;  %v15450_v33 = vcombine.high %v1520_v28, %v1524_v30  ;;  %v15452_v57 = vcombine.high %v1521_v31, %v1525_v32  ;;  %v1569_v16 = vld [vmem:[#allocation2 + $0x2a58] sm:$0xff] }
 0x62c   :  { %10850 = vmatpush1.bf16.msra.mxu0 %v15393_v23  ;;  %11342 = vmatpush1.bf16.msra.mxu1 %v15395_v40  ;;  %v15449_v23 = vcombine.low %v1520_v28, %v1524_v30  ;;  %v15451_v40 = vcombine.low %v1521_v31, %v1525_v32  ;;  %v1580_v28 = vld [vmem:[#allocation2 + $0x2ab0] sm:$0xff]  ;;  %v1577_v30 = vld [vmem:[#allocation2 + $0x2a98] sm:$0xff] }
 0x62d   :  { %10851 = vmatprep.subr.bf16.mxu0 %v15402_v42  ;;  %11343 = vmatprep.subr.bf16.mxu1 %v15404_v43  ;;  %v15458_v42 = vcombine.high %v1528_v35, %v1532_v34  ;;  %v1536_v43 = vld [vmem:[#allocation2 + $0x2950] sm:$0xff]  ;;  %v1581_v31 = vld [vmem:[#allocation2 + $0x2ab8] sm:$0xff] }
 0x62e   :  { %v15465_v56 = vcombine.low %v1536_v43, %v1540_v44  ;;  %v1588_v35 = vld [vmem:[#allocation2 + $0x2af0] sm:$0xff]  ;;  %v1585_v34 = vld [vmem:[#allocation2 + $0x2ad8] sm:$0xff] }
 0x630   :  { %10852 = vmatpush1.bf16.msra.mxu0 %v15401_v61  ;;  %11344 = vmatpush1.bf16.msra.mxu1 %v15403_v60  ;;  %v15459_v61 = vcombine.low %v1529_v36, %v1533_v37  ;;  %v15466_v60 = vcombine.high %v1536_v43, %v1540_v44  ;;  %v1596_v43 = vld [vmem:[#allocation2 + $0x2b30] sm:$0xff]  ;;  %v1593_v44 = vld [vmem:[#allocation2 + $0x2b18] sm:$0xff] }
 0x631   :  { %10853 = vmatprep.subr.bf16.mxu0 %v15410_v62  ;;  %11345 = vmatprep.subr.bf16.mxu1 %v15412_v0  ;;  %v15468_v62 = vcombine.high %v1537_v47, %v1541_v49  ;;  %v1544_v0 = vld [vmem:[#allocation2 + $0x2990] sm:$0xff] }
 0x632   :  { %v15473_v11 = vcombine.low %v1544_v0, %v1548_v2 }
 0x634   :  { %10854 = vmatpush1.bf16.msra.mxu0 %v15409_v5  ;;  %11346 = vmatpush1.bf16.msra.mxu1 %v15411_v6  ;;  %v15467_v5 = vcombine.low %v1537_v47, %v1541_v49  ;;  %v15474_v6 = vcombine.high %v1544_v0, %v1548_v2  ;;  %v1597_v47 = vld [vmem:[#allocation2 + $0x2b38] sm:$0xff]  ;;  %v1604_v0 = vld [vmem:[#allocation2 + $0x2b70] sm:$0xff] }
 0x635   :  { %10855 = vmatprep.subr.bf16.mxu0 %v15418_v8  ;;  %11347 = vmatprep.subr.bf16.mxu1 %v15420_v7  ;;  %v15476_v8 = vcombine.high %v1545_v3, %v1549_v4  ;;  %v1552_v7 = vld [vmem:[#allocation2 + $0x29d0] sm:$0xff]  ;;  %v1601_v2 = vld [vmem:[#allocation2 + $0x2b58] sm:$0xff] }
 0x636   :  { %v15481_v45 = vcombine.low %v1552_v7, %v1556_v9 }
 0x638   :  { %10856 = vmatpush1.bf16.msra.mxu0 %v15417_v13  ;;  %11348 = vmatpush1.bf16.msra.mxu1 %v15419_v15  ;;  %v15475_v13 = vcombine.low %v1545_v3, %v1549_v4  ;;  %v15482_v15 = vcombine.high %v1552_v7, %v1556_v9  ;;  %v1605_v3 = vld [vmem:[#allocation2 + $0x2b78] sm:$0xff]  ;;  %v1612_v7 = vld [vmem:[#allocation2 + $0x2bb0] sm:$0xff] }
 0x639   :  { %10866 = vmatprep.subr.bf16.mxu0 %v15426_v39  ;;  %11358 = vmatprep.subr.bf16.mxu1 %v15428_v17  ;;  %v15484_v39 = vcombine.high %v1553_v14, %v1557_v10  ;;  %v1560_v17 = vld [vmem:[#allocation2 + $0x2a10] sm:$0xff]  ;;  %v1609_v9 = vld [vmem:[#allocation2 + $0x2b98] sm:$0xff] }
 0x63b   :  { %10858 = vmatmul.mubr.bf16.vlgmr.msra.gmra.mrb[4].mxu0 %v17411_v38  ;;  %11350 = vmatmul.mubr.bf16.vlgmr.msra.gmra.mrb[4].mxu1 %v17411_v38  ;;  %v15443_v38 = vcombine.low %v1513_v25, %v1517_v27  ;;  %v1573_v25 = vld [vmem:[#allocation2 + $0x2a78] sm:$0xff]  ;;  %v15489_v27 = vcombine.low %v1560_v17, %v1564_v18 }
 0x63c   :  { %10867 = vmatpush1.bf16.msra.mxu0 %v15425_v26  ;;  %11359 = vmatpush1.bf16.msra.mxu1 %v15427_v20  ;;  %v15483_v26 = vcombine.low %v1553_v14, %v1557_v10  ;;  %v15490_v20 = vcombine.high %v1560_v17, %v1564_v18  ;;  %v1613_v14 = vld [vmem:[#allocation2 + $0x2bb8] sm:$0xff]  ;;  %v1620_v17 = vld [vmem:[#allocation2 + $0x2bf0] sm:$0xff] }
 0x63d   :  { %10868 = vmatprep.subr.bf16.mxu0 %v15434_v21  ;;  %11360 = vmatprep.subr.bf16.mxu1 %v15436_v22  ;;  %v15492_v21 = vcombine.high %v1561_v54, %v1565_v19  ;;  %v1568_v22 = vld [vmem:[#allocation2 + $0x2a50] sm:$0xff]  ;;  %v1617_v18 = vld [vmem:[#allocation2 + $0x2bd8] sm:$0xff] }
 0x63e   :  { %10898 = vmatprep.mubr.bf16.mxu0 %v17416_v52  ;;  %11390 = vmatprep.mubr.bf16.mxu1 %v17416_v52  ;;  %v15460_v52 = vcombine.high %v1529_v36, %v1533_v37  ;;  %v15497_v32 = vcombine.low %v1568_v22, %v1572_v24  ;;  %v1589_v36 = vld [vmem:[#allocation2 + $0x2af8] sm:$0xff] }
 0x640   :  { %10869 = vmatpush1.bf16.msra.mxu0 %v15433_v48  ;;  %11361 = vmatpush1.bf16.msra.mxu1 %v15435_v59  ;;  %v15491_v48 = vcombine.low %v1561_v54, %v1565_v19  ;;  %v15498_v59 = vcombine.high %v1568_v22, %v1572_v24  ;;  %v1621_v54 = vld [vmem:[#allocation2 + $0x2bf8] sm:$0xff]  ;;  %v1628_v22 = vld [vmem:[#allocation2 + $0x2c30] sm:$0xff] }
 0x641   :  { %10870 = vmatprep.subr.bf16.mxu0 %v15442_v12  ;;  %11362 = vmatprep.subr.bf16.mxu1 %v15444_v1  ;;  %v15500_v12 = vcombine.high %v1569_v16, %v1573_v25  ;;  %v1576_v1 = vld [vmem:[#allocation2 + $0x2a90] sm:$0xff]  ;;  %v1625_v24 = vld [vmem:[#allocation2 + $0x2c18] sm:$0xff] }
 0x642   :  { %v15505_v37 = vcombine.low %v1576_v1, %v1580_v28 }
 0x644   :  { %10871 = vmatpush1.bf16.msra.mxu0 %v15441_v29  ;;  %11363 = vmatpush1.bf16.msra.mxu1 %v15443_v38  ;;  %v15499_v29 = vcombine.low %v1569_v16, %v1573_v25  ;;  %v15506_v38 = vcombine.high %v1576_v1, %v1580_v28  ;;  %v1629_v16 = vld [vmem:[#allocation2 + $0x2c38] sm:$0xff]  ;;  %v1636_v1 = vld [vmem:[#allocation2 + $0x2c70] sm:$0xff] }
 0x645   :  { %10872 = vmatprep.subr.bf16.mxu0 %v15450_v33  ;;  %11364 = vmatprep.subr.bf16.mxu1 %v15452_v57  ;;  %v15508_v33 = vcombine.high %v1577_v30, %v1581_v31  ;;  %v1584_v57 = vld [vmem:[#allocation2 + $0x2ad0] sm:$0xff]  ;;  %v1633_v28 = vld [vmem:[#allocation2 + $0x2c58] sm:$0xff] }
 0x646   :  { %v15513_v49 = vcombine.low %v1584_v57, %v1588_v35 }
 0x648   :  { %10873 = vmatpush1.bf16.msra.mxu0 %v15449_v23  ;;  %11365 = vmatpush1.bf16.msra.mxu1 %v15451_v40  ;;  %v15507_v23 = vcombine.low %v1577_v30, %v1581_v31  ;;  %v15514_v40 = vcombine.high %v1584_v57, %v1588_v35  ;;  %v1637_v30 = vld [vmem:[#allocation2 + $0x2c78] sm:$0xff]  ;;  %v1644_v57 = vld [vmem:[#allocation2 + $0x2cb0] sm:$0xff] }
 0x649   :  { %10874 = vmatprep.subr.bf16.mxu0 %v15458_v42  ;;  %11366 = vmatprep.subr.bf16.mxu1 %v15460_v52  ;;  %v15516_v42 = vcombine.high %v1585_v34, %v1589_v36  ;;  %v1592_v52 = vld [vmem:[#allocation2 + $0x2b10] sm:$0xff]  ;;  %v1641_v35 = vld [vmem:[#allocation2 + $0x2c98] sm:$0xff] }
 0x64a   :  { %v15521_v4 = vcombine.low %v1592_v52, %v1596_v43 }
 0x64c   :  { %10875 = vmatpush1.bf16.msra.mxu0 %v15457_v50  ;;  %11367 = vmatpush1.bf16.msra.mxu1 %v15459_v61  ;;  %v15515_v50 = vcombine.low %v1585_v34, %v1589_v36  ;;  %v15522_v61 = vcombine.high %v1592_v52, %v1596_v43  ;;  %v1645_v34 = vld [vmem:[#allocation2 + $0x2cb8] sm:$0xff]  ;;  %v1652_v52 = vld [vmem:[#allocation2 + $0x2cf0] sm:$0xff] }
 0x64d   :  { %10876 = vmatprep.subr.bf16.mxu0 %v15466_v60  ;;  %11368 = vmatprep.subr.bf16.mxu1 %v15468_v62  ;;  %v15524_v60 = vcombine.high %v1593_v44, %v1597_v47  ;;  %v1600_v62 = vld [vmem:[#allocation2 + $0x2b50] sm:$0xff]  ;;  %v1649_v43 = vld [vmem:[#allocation2 + $0x2cd8] sm:$0xff] }
 0x64e   :  { %v15529_v10 = vcombine.low %v1600_v62, %v1604_v0 }
 0x650   :  { %10877 = vmatpush1.bf16.msra.mxu0 %v15465_v56  ;;  %11369 = vmatpush1.bf16.msra.mxu1 %v15467_v5  ;;  %v15523_v56 = vcombine.low %v1593_v44, %v1597_v47  ;;  %v15530_v5 = vcombine.high %v1600_v62, %v1604_v0  ;;  %v1653_v44 = vld [vmem:[#allocation2 + $0x2cf8] sm:$0xff] }
 0x651   :  { %10878 = vmatprep.subr.bf16.mxu0 %v15474_v6  ;;  %11370 = vmatprep.subr.bf16.mxu1 %v15476_v8  ;;  %v15532_v6 = vcombine.high %v1601_v2, %v1605_v3  ;;  %v1608_v8 = vld [vmem:[#allocation2 + $0x2b90] sm:$0xff]  ;;  %v1657_v62 = vld [vmem:[#allocation2 + $0x2d18] sm:$0xff] }
 0x652   :  { %v15537_v19 = vcombine.low %v1608_v8, %v1612_v7  ;;  %v1661_v0 = vld [vmem:[#allocation2 + $0x2d38] sm:$0xff] }
 0x654   :  { %10879 = vmatpush1.bf16.msra.mxu0 %v15473_v11  ;;  %11371 = vmatpush1.bf16.msra.mxu1 %v15475_v13  ;;  %v15531_v11 = vcombine.low %v1601_v2, %v1605_v3  ;;  %v15538_v13 = vcombine.high %v1608_v8, %v1612_v7  ;;  %v15579_v3 = vcombine.low %v1649_v43, %v1653_v44  ;;  %v1669_v8 = vld [vmem:[#allocation2 + $0x2d78] sm:$0xff] }
 0x655   :  { %10880 = vmatprep.subr.bf16.mxu0 %v15482_v15  ;;  %11372 = vmatprep.subr.bf16.mxu1 %v15484_v39  ;;  %v15540_v15 = vcombine.high %v1609_v9, %v1613_v14  ;;  %v1616_v39 = vld [vmem:[#allocation2 + $0x2bd0] sm:$0xff] }
 0x656   :  { %v15545_v25 = vcombine.low %v1616_v39, %v1620_v17 }
 0x658   :  { %10881 = vmatpush1.bf16.msra.mxu0 %v15481_v45  ;;  %11373 = vmatpush1.bf16.msra.mxu1 %v15483_v26  ;;  %v15539_v45 = vcombine.low %v1609_v9, %v1613_v14  ;;  %v15546_v26 = vcombine.high %v1616_v39, %v1620_v17  ;;  %v15587_v9 = vcombine.low %v1657_v62, %v1661_v0  ;;  %v1677_v39 = vld [vmem:[#allocation2 + $0x2db8] sm:$0xff] }
 0x659   :  { %10882 = vmatprep.subr.bf16.mxu0 %v15490_v20  ;;  %11374 = vmatprep.subr.bf16.mxu1 %v15492_v21  ;;  %v15548_v20 = vcombine.high %v1617_v18, %v1621_v54  ;;  %v1624_v21 = vld [vmem:[#allocation2 + $0x2c10] sm:$0xff] }
 0x65a   :  { %v15553_v31 = vcombine.low %v1624_v21, %v1628_v22 }
 0x65c   :  { %10883 = vmatpush1.bf16.msra.mxu0 %v15489_v27  ;;  %11375 = vmatpush1.bf16.msra.mxu1 %v15491_v48  ;;  %v15547_v27 = vcombine.low %v1617_v18, %v1621_v54  ;;  %v15554_v48 = vcombine.high %v1624_v21, %v1628_v22  ;;  %v1685_v21 = vld [vmem:[#allocation2 + $0x2df8] sm:$0xff] }
 0x65d   :  { %10884 = vmatprep.subr.bf16.mxu0 %v15498_v59  ;;  %11376 = vmatprep.subr.bf16.mxu1 %v15500_v12  ;;  %v15556_v59 = vcombine.high %v1625_v24, %v1629_v16  ;;  %v1632_v12 = vld [vmem:[#allocation2 + $0x2c50] sm:$0xff] }
 0x65e   :  { %v15561_v36 = vcombine.low %v1632_v12, %v1636_v1 }
 0x660   :  { %10885 = vmatpush1.bf16.msra.mxu0 %v15497_v32  ;;  %11377 = vmatpush1.bf16.msra.mxu1 %v15499_v29  ;;  %v15555_v32 = vcombine.low %v1625_v24, %v1629_v16  ;;  %v15562_v29 = vcombine.high %v1632_v12, %v1636_v1  ;;  %v1693_v12 = vld [vmem:[#allocation2 + $0x2e38] sm:$0xff] }
 0x661   :  { %10886 = vmatprep.subr.bf16.mxu0 %v15506_v38  ;;  %11378 = vmatprep.subr.bf16.mxu1 %v15508_v33  ;;  %v15564_v38 = vcombine.high %v1633_v28, %v1637_v30  ;;  %v1640_v33 = vld [vmem:[#allocation2 + $0x2c90] sm:$0xff] }
 0x662   :  { %v15569_v47 = vcombine.low %v1640_v33, %v1644_v57 }
 0x664   :  { %10887 = vmatpush1.bf16.msra.mxu0 %v15505_v37  ;;  %11379 = vmatpush1.bf16.msra.mxu1 %v15507_v23  ;;  %v15563_v37 = vcombine.low %v1633_v28, %v1637_v30  ;;  %v15570_v23 = vcombine.high %v1640_v33, %v1644_v57  ;;  %v1701_v33 = vld [vmem:[#allocation2 + $0x2e78] sm:$0xff] }
 0x665   :  { %10888 = vmatprep.subr.bf16.mxu0 %v15514_v40  ;;  %11380 = vmatprep.subr.bf16.mxu1 %v15516_v42  ;;  %v15572_v40 = vcombine.high %v1641_v35, %v1645_v34  ;;  %v1648_v42 = vld [vmem:[#allocation2 + $0x2cd0] sm:$0xff] }
 0x666   :  { %v15577_v2 = vcombine.low %v1648_v42, %v1652_v52 }
 0x668   :  { %10889 = vmatpush1.bf16.msra.mxu0 %v15513_v49  ;;  %11381 = vmatpush1.bf16.msra.mxu1 %v15515_v50  ;;  %v15578_v49 = vcombine.high %v1648_v42, %v1652_v52  ;;  %v15580_v50 = vcombine.high %v1649_v43, %v1653_v44  ;;  %v1709_v42 = vld [vmem:[#allocation2 + $0x2eb8] sm:$0xff] }
 0x669   :  { %10890 = vmatprep.subr.bf16.mxu0 %v15522_v61  ;;  %11382 = vmatprep.subr.bf16.mxu1 %v15524_v60  ;;  %v1656_v61 = vld [vmem:[#allocation2 + $0x2d10] sm:$0xff] }
 0x66a   :  { %v1660_v60 = vld [vmem:[#allocation2 + $0x2d30] sm:$0xff] }
 0x66b   :  { %v15585_v7 = vcombine.low %v1656_v61, %v1660_v60 }
 0x66c   :  { %10891 = vmatpush1.bf16.msra.mxu0 %v15521_v4  ;;  %11383 = vmatpush1.bf16.msra.mxu1 %v15523_v56  ;;  %v15586_v4 = vcombine.high %v1656_v61, %v1660_v60  ;;  %v1664_v56 = vld [vmem:[#allocation2 + $0x2d50] sm:$0xff]  ;;  %v1717_v61 = vld [vmem:[#allocation2 + $0x2ef8] sm:$0xff] }
 0x66d   :  { %10892 = vmatprep.subr.bf16.mxu0 %v15530_v5  ;;  %11384 = vmatprep.subr.bf16.mxu1 %v15532_v6  ;;  %v1668_v5 = vld [vmem:[#allocation2 + $0x2d70] sm:$0xff]  ;;  %v1665_v6 = vld [vmem:[#allocation2 + $0x2d58] sm:$0xff] }
 0x66e   :  { %v15594_v14 = vcombine.high %v1664_v56, %v1668_v5  ;;  %v15593_v17 = vcombine.low %v1664_v56, %v1668_v5  ;;  %v15595_v18 = vcombine.low %v1665_v6, %v1669_v8  ;;  %v1721_v56 = vld [vmem:[#allocation2 + $0x2f18] sm:$0xff] }
 0x66f   :  { %v1725_v5 = vld [vmem:[#allocation2 + $0x2f38] sm:$0xff] }
 0x670   :  { %10893 = vmatpush1.bf16.msra.mxu0 %v15529_v10  ;;  %11385 = vmatpush1.bf16.msra.mxu1 %v15531_v11  ;;  %v15596_v10 = vcombine.high %v1665_v6, %v1669_v8  ;;  %v1672_v11 = vld [vmem:[#allocation2 + $0x2d90] sm:$0xff] }
 0x671   :  { %10894 = vmatprep.subr.bf16.mxu0 %v15538_v13  ;;  %11386 = vmatprep.subr.bf16.mxu1 %v15540_v15  ;;  %v1676_v13 = vld [vmem:[#allocation2 + $0x2db0] sm:$0xff]  ;;  %v1673_v15 = vld [vmem:[#allocation2 + $0x2d98] sm:$0xff] }
 0x672   :  { %v15602_v54 = vcombine.high %v1672_v11, %v1676_v13  ;;  %v15601_v22 = vcombine.low %v1672_v11, %v1676_v13  ;;  %v15603_v24 = vcombine.low %v1673_v15, %v1677_v39  ;;  %v1729_v13 = vld [vmem:[#allocation2 + $0x2f58] sm:$0xff] }
 0x674   :  { %10895 = vmatpush1.bf16.msra.mxu0 %v15537_v19  ;;  %11387 = vmatpush1.bf16.msra.mxu1 %v15539_v45  ;;  %v15604_v19 = vcombine.high %v1673_v15, %v1677_v39  ;;  %v1680_v45 = vld [vmem:[#allocation2 + $0x2dd0] sm:$0xff]  ;;  %v1733_v15 = vld [vmem:[#allocation2 + $0x2f78] sm:$0xff] }
 0x675   :  { %10896 = vmatprep.subr.bf16.mxu0 %v15546_v26  ;;  %11388 = vmatprep.subr.bf16.mxu1 %v15548_v20  ;;  %v1684_v26 = vld [vmem:[#allocation2 + $0x2df0] sm:$0xff]  ;;  %v1681_v20 = vld [vmem:[#allocation2 + $0x2dd8] sm:$0xff] }
 0x676   :  { %v15610_v16 = vcombine.high %v1680_v45, %v1684_v26  ;;  %v15609_v1 = vcombine.low %v1680_v45, %v1684_v26  ;;  %v15611_v28 = vcombine.low %v1681_v20, %v1685_v21  ;;  %v1740_v45 = vld [vmem:[#allocation2 + $0x2fb0] sm:$0xff] }
 0x678   :  { %10897 = vmatpush1.bf16.msra.mxu0 %v15545_v25  ;;  %11389 = vmatpush1.bf16.msra.mxu1 %v15547_v27  ;;  %v15612_v25 = vcombine.high %v1681_v20, %v1685_v21  ;;  %v1688_v27 = vld [vmem:[#allocation2 + $0x2e10] sm:$0xff]  ;;  %v1737_v20 = vld [vmem:[#allocation2 + $0x2f98] sm:$0xff] }
 0x679   :  { %10907 = vmatprep.subr.bf16.mxu0 %v15554_v48  ;;  %11399 = vmatprep.subr.bf16.mxu1 %v15556_v59  ;;  %v1692_v48 = vld [vmem:[#allocation2 + $0x2e30] sm:$0xff]  ;;  %v1689_v59 = vld [vmem:[#allocation2 + $0x2e18] sm:$0xff] }
 0x67a   :  { %v15618_v30 = vcombine.high %v1688_v27, %v1692_v48  ;;  %v15617_v57 = vcombine.low %v1688_v27, %v1692_v48  ;;  %v1741_v21 = vld [vmem:[#allocation2 + $0x2fb8] sm:$0xff]  ;;  %v1744_v48 = vld [vmem:[#allocation2 + $0x2fd0] sm:$0xff] }
 0x67b   :  { %10899 = vmatmul.mubr.bf16.vlgmr.msra.gmra.mrb[4].mxu0 %v17425_v41  ;;  %11391 = vmatmul.mubr.bf16.vlgmr.msra.gmra.mrb[4].mxu1 %v17425_v41  ;;  %v15571_v41 = vcombine.low %v1641_v35, %v1645_v34  ;;  %v15619_v35 = vcombine.low %v1689_v59, %v1693_v12  ;;  %v15668_v27 = vcombine.high %v1737_v20, %v1741_v21 }
 0x67c   :  { %10908 = vmatpush1.bf16.msra.mxu0 %v15553_v31  ;;  %11400 = vmatpush1.bf16.msra.mxu1 %v15555_v32  ;;  %v15620_v31 = vcombine.high %v1689_v59, %v1693_v12  ;;  %v1696_v32 = vld [vmem:[#allocation2 + $0x2e50] sm:$0xff] }
 0x67d   :  { %10909 = vmatprep.subr.bf16.mxu0 %v15562_v29  ;;  %11401 = vmatprep.subr.bf16.mxu1 %v15564_v38  ;;  %v1700_v29 = vld [vmem:[#allocation2 + $0x2e70] sm:$0xff]  ;;  %v1697_v38 = vld [vmem:[#allocation2 + $0x2e58] sm:$0xff] }
 0x67e   :  { %10939 = vmatprep.mubr.bf16.mxu0 %v17430_v58  ;;  %11431 = vmatprep.mubr.bf16.mxu1 %v17430_v58  ;;  %v15588_v58 = vcombine.high %v1657_v62, %v1661_v0  ;;  %v15626_v34 = vcombine.high %v1696_v32, %v1700_v29  ;;  %v15625_v52 = vcombine.low %v1696_v32, %v1700_v29  ;;  %v1748_v59 = vld [vmem:[#allocation2 + $0x2ff0] sm:$0xff] }
 0x67f   :  { %v15627_v43 = vcombine.low %v1697_v38, %v1701_v33  ;;  %v15674_v32 = vcombine.high %v1744_v48, %v1748_v59 }
 0x680   :  { %10910 = vmatpush1.bf16.msra.mxu0 %v15561_v36  ;;  %11402 = vmatpush1.bf16.msra.mxu1 %v15563_v37  ;;  %v15628_v36 = vcombine.high %v1697_v38, %v1701_v33  ;;  %v1704_v37 = vld [vmem:[#allocation2 + $0x2e90] sm:$0xff]  ;;  %v15673_v33 = vcombine.low %v1744_v48, %v1748_v59  ;;  %v16381_v48 = vld [vmem:[#allocation7 + $0x164] ss:$16 sps:$4 sm:$0xff]  }
 0x681   :  { %10911 = vmatprep.subr.bf16.mxu0 %v15570_v23  ;;  %11403 = vmatprep.subr.bf16.mxu1 %v15572_v40  ;;  %v1708_v23 = vld [vmem:[#allocation2 + $0x2eb0] sm:$0xff]  ;;  %v1705_v40 = vld [vmem:[#allocation2 + $0x2e98] sm:$0xff] }
 0x682   :  { %v15634_v44 = vcombine.high %v1704_v37, %v1708_v23  ;;  %v15633_v60 = vcombine.low %v1704_v37, %v1708_v23  ;;  %v15635_v62 = vcombine.low %v1705_v40, %v1709_v42  ;;  %v16313_v37 = vld [vmem:[#allocation7] ss:$16 sps:$4 sm:$0xff]   ;;  %v16316_v23 = vld [vmem:[#allocation7 + $0x8] ss:$16 sps:$4 sm:$0xff]   ;;  %v16384_v59 = vld [vmem:[#allocation7 + $0x16c] ss:$16 sps:$4 sm:$0xff]  }
 0x684   :  { %10912 = vmatpush1.bf16.msra.mxu0 %v15569_v47  ;;  %11404 = vmatpush1.bf16.msra.mxu1 %v15571_v41  ;;  %v15636_v47 = vcombine.high %v1705_v40, %v1709_v42  ;;  %v1712_v41 = vld [vmem:[#allocation2 + $0x2ed0] sm:$0xff]  ;;  %v16321_v40 = vld [vmem:[#allocation7 + $0x24] ss:$16 sps:$4 sm:$0xff]  }
 0x685   :  { %10913 = vmatprep.subr.bf16.mxu0 %v15578_v49  ;;  %11405 = vmatprep.subr.bf16.mxu1 %v15580_v50  ;;  %v1716_v49 = vld [vmem:[#allocation2 + $0x2ef0] sm:$0xff]  ;;  %v1713_v50 = vld [vmem:[#allocation2 + $0x2ed8] sm:$0xff] }
 0x686   :  { %v15642_v0 = vcombine.high %v1712_v41, %v1716_v49  ;;  %v15641_v6 = vcombine.low %v1712_v41, %v1716_v49  ;;  %v15643_v8 = vcombine.low %v1713_v50, %v1717_v61  ;;  %v16325_v41 = vld [vmem:[#allocation7 + $0x40] ss:$16 sps:$4 sm:$0xff]   ;;  %v16328_v49 = vld [vmem:[#allocation7 + $0x48] ss:$16 sps:$4 sm:$0xff]  }
 0x688   :  { %10914 = vmatpush1.bf16.msra.mxu0 %v15577_v2  ;;  %11406 = vmatpush1.bf16.msra.mxu1 %v15579_v3  ;;  %v15644_v2 = vcombine.high %v1713_v50, %v1717_v61  ;;  %v1720_v3 = vld [vmem:[#allocation2 + $0x2f10] sm:$0xff]  ;;  %v16333_v50 = vld [vmem:[#allocation7 + $0x64] ss:$16 sps:$4 sm:$0xff]  }
 0x689   :  { %10915 = vmatprep.subr.bf16.mxu0 %v15586_v4  ;;  %11407 = vmatprep.subr.bf16.mxu1 %v15588_v58  ;;  %v1724_v4 = vld [vmem:[#allocation2 + $0x2f30] sm:$0xff]  ;;  %v1752_v58 = vlaneseq }
 0x68a   :  { %v15649_v39 = vcombine.low %v1720_v3, %v1724_v4  ;;  %v16336_v61 = vld [vmem:[#allocation7 + $0x6c] ss:$16 sps:$4 sm:$0xff]  }
 0x68b   :  { %v17497_v11 = vshrl.u32 %v1752_v58, 7  ;;  %v16348_v58 = vld [vmem:[#allocation7 + $0xac] ss:$16 sps:$4 sm:$0xff]  }
 0x68c   :  { %10916 = vmatpush1.bf16.msra.mxu0 %v15585_v7  ;;  %11408 = vmatpush1.bf16.msra.mxu1 %v15587_v9  ;;  %v15650_v7 = vcombine.high %v1720_v3, %v1724_v4  ;;  %v15652_v9 = vcombine.high %v1721_v56, %v1725_v5  ;;  %v16340_v3 = vld [vmem:[#allocation7 + $0x88] ss:$16 sps:$4 sm:$0xff]   ;;  %v16345_v4 = vld [vmem:[#allocation7 + $0xa4] ss:$16 sps:$4 sm:$0xff]  }
 0x68d   :  { %10917 = vmatprep.subr.bf16.mxu0 %v15594_v14  ;;  %11409 = vmatprep.subr.bf16.mxu1 %v15596_v10  ;;  %v1728_v14 = vld [vmem:[#allocation2 + $0x2f50] sm:$0xff]  ;;  %v17500_v26 = vsub.s32 1, %v17497_v11 }
 0x68e   :  { %v1732_v10 = vld [vmem:[#allocation2 + $0x2f70] sm:$0xff] }
 0x690   :  { %10918 = vmatpush1.bf16.msra.mxu0 %v15593_v17  ;;  %11410 = vmatpush1.bf16.msra.mxu1 %v15595_v18  ;;  %v15651_v17 = vcombine.low %v1721_v56, %v1725_v5  ;;  %v15658_v18 = vcombine.high %v1728_v14, %v1732_v10  ;;  %v16343_v56 = vld [vmem:[#allocation7 + $0xa0] ss:$16 sps:$4 sm:$0xff]   ;;  %v16346_v5 = vld [vmem:[#allocation7 + $0xa8] ss:$16 sps:$4 sm:$0xff]  }
 0x691   :  { %10919 = vmatprep.subr.bf16.mxu0 %v15602_v54  ;;  %11411 = vmatprep.subr.bf16.mxu1 %v15604_v19  ;;  %v15660_v54 = vcombine.high %v1729_v13, %v1733_v15  ;;  %v1736_v19 = vld [vmem:[#allocation2 + $0x2f90] sm:$0xff] }
 0x694   :  { %10920 = vmatpush1.bf16.msra.mxu0 %v15601_v22  ;;  %11412 = vmatpush1.bf16.msra.mxu1 %v15603_v24  ;;  %v17502_v22 = vld [vmem:[#allocation5] sm:$0xff]  ;;  %v15657_v24 = vcombine.low %v1728_v14, %v1732_v10  ;;  %v16357_v14 = vld [vmem:[#allocation7 + $0xe4] ss:$16 sps:$4 sm:$0xff]  }
 0x695   :  { %10921 = vmatprep.subr.bf16.mxu0 %v15610_v16  ;;  %11413 = vmatprep.subr.bf16.mxu1 %v15612_v25  ;;  %v15659_v16 = vcombine.low %v1729_v13, %v1733_v15  ;;  %v15666_v25 = vcombine.high %v1736_v19, %v1740_v45  ;;  %v1759_v12 = vrot.slane %v17502_v22, %v17500_v26  ;;  %v16360_v10 = vld [vmem:[#allocation7 + $0xec] ss:$16 sps:$4 sm:$0xff]   ;;  %v16355_v13 = vld [vmem:[#allocation7 + $0xe0] ss:$16 sps:$4 sm:$0xff]   ;;  %v16358_v15 = vld [vmem:[#allocation7 + $0xe8] ss:$16 sps:$4 sm:$0xff]  }
 0x697   :  { %v16075_v38 = vadd.f32 %v17461_v55, %v1759_v12  ;;  %v16324_v55 = vld [vmem:[#allocation7 + $0x2c] ss:$16 sps:$4 sm:$0xff]   ;;  %v16379_v12 = vld [vmem:[#allocation7 + $0x160] ss:$16 sps:$4 sm:$0xff]  }
 0x698   :  { %10922 = vmatpush1.bf16.msra.mxu0 %v15609_v1  ;;  %11414 = vmatpush1.bf16.msra.mxu1 %v15611_v28  ;;  %v1745_v1 = vld [vmem:[#allocation2 + $0x2fd8] sm:$0xff] }
 0x699   :  { %10923 = vmatprep.subr.bf16.mxu0 %v15618_v30  ;;  %11415 = vmatprep.subr.bf16.mxu1 %v15620_v31  ;;  %v1749_v28 = vld [vmem:[#allocation2 + $0x2ff8] sm:$0xff]  ;;  %v15665_v30 = vcombine.low %v1736_v19, %v1740_v45  ;;  %v15667_v31 = vcombine.low %v1737_v20, %v1741_v21  ;;  %v16372_v45 = vld [vmem:[#allocation7 + $0x12c] ss:$16 sps:$4 sm:$0xff]   ;;  %v16370_v21 = vld [vmem:[#allocation7 + $0x128] ss:$16 sps:$4 sm:$0xff]  }
 0x69a   :  { %v15676_v29 = vcombine.high %v1745_v1, %v1749_v28  ;;  %v16369_v19 = vld [vmem:[#allocation7 + $0x124] ss:$16 sps:$4 sm:$0xff]   ;;  %v16367_v20 = vld [vmem:[#allocation7 + $0x120] ss:$16 sps:$4 sm:$0xff]  }
 0x69c   :  { %10924 = vmatpush1.bf16.msra.mxu0 %v15617_v57  ;;  %11416 = vmatpush1.bf16.msra.mxu1 %v15619_v35  ;;  %v15675_v57 = vcombine.low %v1745_v1, %v1749_v28  ;;  %v16315_v35 = vld [vmem:[#allocation7 + $0x4] ss:$16 sps:$4 sm:$0xff]   ;;  %v16382_v1 = vld [vmem:[#allocation7 + $0x168] ss:$16 sps:$4 sm:$0xff]  }
 0x69d   :  { %10925 = vmatprep.subr.bf16.mxu0 %v15626_v34  ;;  %11417 = vmatprep.subr.bf16.mxu1 %v15628_v36  ;;  %v16318_v34 = vld [vmem:[#allocation7 + $0xc] ss:$16 sps:$4 sm:$0xff]   ;;  %v11441_v36 = vmax.f32 %v16075_v38, 0.0  ;;  %v16387_v28 = vld [vmem:[#allocation7 + $0x184] ss:$16 sps:$4 sm:$0xff]  }
 0x69e   :  { %v16393_v38 = vld [vmem:[#allocation7 + $0x1a4] ss:$16 sps:$4 sm:$0xff]  }
 0x69f   :  { %v11449_v42 = vpack.c.bf16 %v11441_v36, %v11441_v36  ;;  %v16394_v36 = vld [vmem:[#allocation7 + $0x1a8] ss:$16 sps:$4 sm:$0xff]  }
 0x6a0   :  { %10926 = vmatpush1.bf16.msra.mxu0 %v15625_v52  ;;  %11418 = vmatpush1.bf16.msra.mxu1 %v15627_v43  ;;  %v16319_v52 = vld [vmem:[#allocation7 + $0x20] ss:$16 sps:$4 sm:$0xff]   ;;  %v16322_v43 = vld [vmem:[#allocation7 + $0x28] ss:$16 sps:$4 sm:$0xff]  }
 0x6a1   :  { %10927 = vmatprep.subr.bf16.mxu0 %v15634_v44  ;;  %11419 = vmatprep.subr.bf16.mxu1 %v15636_v47  ;;  %v16327_v44 = vld [vmem:[#allocation7 + $0x44] ss:$16 sps:$4 sm:$0xff]   ;;  %v16330_v47 = vld [vmem:[#allocation7 + $0x4c] ss:$16 sps:$4 sm:$0xff]  }
 0x6a4   :  { %10928 = vmatpush1.bf16.msra.mxu0 %v15633_v60  ;;  %11420 = vmatpush1.bf16.msra.mxu1 %v15635_v62  ;;  %v16334_v60 = vld [vmem:[#allocation7 + $0x68] ss:$16 sps:$4 sm:$0xff]   ;;  %v16339_v62 = vld [vmem:[#allocation7 + $0x84] ss:$16 sps:$4 sm:$0xff]  }
 0x6a5   :  { %10929 = vmatprep.subr.bf16.mxu0 %v15642_v0  ;;  %11421 = vmatprep.subr.bf16.mxu1 %v15644_v2  ;;  %v16342_v0 = vld [vmem:[#allocation7 + $0x8c] ss:$16 sps:$4 sm:$0xff]   ;;  %v16337_v2 = vld [vmem:[#allocation7 + $0x80] ss:$16 sps:$4 sm:$0xff]  }
 0x6a8   :  { %10930 = vmatpush1.bf16.msra.mxu0 %v15641_v6  ;;  %11422 = vmatpush1.bf16.msra.mxu1 %v15643_v8  ;;  %v16351_v6 = vld [vmem:[#allocation7 + $0xc4] ss:$16 sps:$4 sm:$0xff]   ;;  %v16354_v8 = vld [vmem:[#allocation7 + $0xcc] ss:$16 sps:$4 sm:$0xff]  }
 0x6a9   :  { %10931 = vmatprep.subr.bf16.mxu0 %v15650_v7  ;;  %11423 = vmatprep.subr.bf16.mxu1 %v15652_v9  ;;  %v16349_v7 = vld [vmem:[#allocation7 + $0xc0] ss:$16 sps:$4 sm:$0xff]   ;;  %v16352_v9 = vld [vmem:[#allocation7 + $0xc8] ss:$16 sps:$4 sm:$0xff]  }
 0x6ac   :  { %10932 = vmatpush1.bf16.msra.mxu0 %v15649_v39  ;;  %11424 = vmatpush1.bf16.msra.mxu1 %v15651_v17  ;;  %v16363_v39 = vld [vmem:[#allocation7 + $0x104] ss:$16 sps:$4 sm:$0xff]   ;;  %v16366_v17 = vld [vmem:[#allocation7 + $0x10c] ss:$16 sps:$4 sm:$0xff]  }
 0x6ad   :  { %10933 = vmatprep.subr.bf16.mxu0 %v15658_v18  ;;  %11425 = vmatprep.subr.bf16.mxu1 %v15660_v54  ;;  %v16361_v18 = vld [vmem:[#allocation7 + $0x100] ss:$16 sps:$4 sm:$0xff]   ;;  %v16364_v54 = vld [vmem:[#allocation7 + $0x108] ss:$16 sps:$4 sm:$0xff]  }
 0x6b0   :  { %10934 = vmatpush1.bf16.msra.mxu0 %v15657_v24  ;;  %11426 = vmatpush1.bf16.msra.mxu1 %v15659_v16  ;;  %v16375_v24 = vld [vmem:[#allocation7 + $0x144] ss:$16 sps:$4 sm:$0xff]   ;;  %v16378_v16 = vld [vmem:[#allocation7 + $0x14c] ss:$16 sps:$4 sm:$0xff]  }
 0x6b1   :  { %10935 = vmatprep.subr.bf16.mxu0 %v15666_v25  ;;  %11427 = vmatprep.subr.bf16.mxu1 %v15668_v27  ;;  %v16373_v25 = vld [vmem:[#allocation7 + $0x140] ss:$16 sps:$4 sm:$0xff]   ;;  %v16376_v27 = vld [vmem:[#allocation7 + $0x148] ss:$16 sps:$4 sm:$0xff]  }
 0x6b4   :  { %10936 = vmatpush1.bf16.msra.mxu0 %v15665_v30  ;;  %11428 = vmatpush1.bf16.msra.mxu1 %v15667_v31  ;;  %v16390_v30 = vld [vmem:[#allocation7 + $0x18c] ss:$16 sps:$4 sm:$0xff]   ;;  %v16385_v31 = vld [vmem:[#allocation7 + $0x180] ss:$16 sps:$4 sm:$0xff]  }
 0x6b5   :  { %10937 = vmatprep.subr.bf16.mxu0 %v15674_v32  ;;  %11429 = vmatprep.subr.bf16.mxu1 %v15676_v29  ;;  %v17510_v32 = vsub.s32 0, %v17497_v11  ;;  %v16388_v29 = vld [vmem:[#allocation7 + $0x188] ss:$16 sps:$4 sm:$0xff]  }
 0x6b8   :  { %10938 = vmatpush1.bf16.msra.mxu0 %v15673_v33  ;;  %11430 = vmatpush1.bf16.msra.mxu1 %v15675_v57  ;;  %v16396_v33 = vld [vmem:[#allocation7 + $0x1ac] ss:$16 sps:$4 sm:$0xff]   ;;  %v1766_v57 = vsub.s32 3, %v17497_v11 }
 0x6b9   :  { %13014 = vmatprep.subr.bf16.mxu0 %v16315_v35  ;;  %13178 = vmatprep.subr.bf16.mxu1 %v16318_v34  ;;  %v16391_v35 = vld [vmem:[#allocation7 + $0x1a0] ss:$16 sps:$4 sm:$0xff]   ;;  %v1755_v34 = vrot.slane %v17502_v22, %v17510_v32 }
 0x6bb   :  { %10940 = vmatmul.mubr.bf16.vlgmr.msra.gmra.mrb[4].mxu0 %v17439_v53  ;;  %11432 = vmatmul.mubr.bf16.vlgmr.msra.gmra.mrb[4].mxu1 %v17439_v53  ;;  %v16331_v53 = vld [vmem:[#allocation7 + $0x60] ss:$16 sps:$4 sm:$0xff]  }
 0x6bc   :  { %13015 = vmatpush1.bf16.msra.mxu0 %v16313_v37  ;;  %13046 = vmatprep.mubr.bf16.mxu0 %v11449_v42  ;;  %v16399_v37 = vld [vmem:[#allocation7 + $0x1c4] ss:$16 sps:$4 sm:$0xff]  }
 0x6bd   :  { %13179 = vmatpush1.bf16.msra.mxu1 %v16316_v23  ;;  %13210 = vmatprep.mubr.bf16.mxu1 %v11449_v42  ;;  %v16402_v23 = vld [vmem:[#allocation7 + $0x1cc] ss:$16 sps:$4 sm:$0xff]   ;;  %v16397_v42 = vld [vmem:[#allocation7 + $0x1c0] ss:$16 sps:$4 sm:$0xff]  }
 0x6be   :  { %13016 = vmatprep.subr.bf16.mxu0 %v16321_v40  ;;  %13180 = vmatprep.subr.bf16.mxu1 %v16324_v55  ;;  %v1767_v40 = vrot.slane %v17502_v22, %v1766_v57  ;;  %v16074_v55 = vadd.f32 %v17457_v46, %v1755_v34  ;;  %v16409_v46 = vld [vmem:[#allocation7 + $0x200] ss:$16 sps:$4 sm:$0xff]   ;;  %v16474_v34 = vld [vmem:[#allocation7 + $0x34c] ss:$16 sps:$4 sm:$0xff]  }
 0x6c0   :  { %13017 = vmatpush1.bf16.msra.mxu0 %v16319_v52  ;;  %v16400_v52 = vld [vmem:[#allocation7 + $0x1c8] ss:$16 sps:$4 sm:$0xff]  }
 0x6c1   :  { %13181 = vmatpush1.bf16.msra.mxu1 %v16322_v43  ;;  %13018 = vmatprep.subr.bf16.mxu0 %v16327_v44  ;;  %v16405_v43 = vld [vmem:[#allocation7 + $0x1e4] ss:$16 sps:$4 sm:$0xff]   ;;  %v16408_v44 = vld [vmem:[#allocation7 + $0x1ec] ss:$16 sps:$4 sm:$0xff]  }
 0x6c2   :  { %13182 = vmatprep.subr.bf16.mxu1 %v16330_v47  ;;  %v16077_v47 = vadd.f32 %v17463_v63, %v1767_v40  ;;  %v16420_v63 = vld [vmem:[#allocation7 + $0x22c] ss:$16 sps:$4 sm:$0xff]  }
 0x6c3   :  { %v16480_v40 = vld [vmem:[#allocation7 + $0x36c] ss:$16 sps:$4 sm:$0xff]  }
 0x6c4   :  { %13019 = vmatpush1.bf16.msra.mxu0 %v16325_v41  ;;  %v16403_v41 = vld [vmem:[#allocation7 + $0x1e0] ss:$16 sps:$4 sm:$0xff]  }
 0x6c5   :  { %13183 = vmatpush1.bf16.msra.mxu1 %v16328_v49  ;;  %13020 = vmatprep.subr.bf16.mxu0 %v16333_v50  ;;  %v11440_v49 = vmax.f32 %v16074_v55, 0.0  ;;  %v16406_v50 = vld [vmem:[#allocation7 + $0x1e8] ss:$16 sps:$4 sm:$0xff]  }
 0x6c6   :  { %13184 = vmatprep.subr.bf16.mxu1 %v16336_v61  ;;  %v16411_v61 = vld [vmem:[#allocation7 + $0x204] ss:$16 sps:$4 sm:$0xff]   ;;  %v16478_v55 = vld [vmem:[#allocation7 + $0x368] ss:$16 sps:$4 sm:$0xff]  }
 0x6c8   :  { %13021 = vmatpush1.bf16.msra.mxu0 %v16331_v53  ;;  %v16414_v53 = vld [vmem:[#allocation7 + $0x20c] ss:$16 sps:$4 sm:$0xff]  }
 0x6c9   :  { %13185 = vmatpush1.bf16.msra.mxu1 %v16334_v60  ;;  %13022 = vmatprep.subr.bf16.mxu0 %v16339_v62  ;;  %v11443_v60 = vmax.f32 %v16077_v47, 0.0  ;;  %v11448_v62 = vpack.c.bf16 %v11440_v49, %v11440_v49  ;;  %v1762_v47 = vsub.s32 2, %v17497_v11  ;;  %v16489_v49 = vld [vmem:[#allocation7 + $0x3a4] ss:$16 sps:$4 sm:$0xff]  }
 0x6ca   :  { %13186 = vmatprep.subr.bf16.mxu1 %v16342_v0  ;;  %v16412_v0 = vld [vmem:[#allocation7 + $0x208] ss:$16 sps:$4 sm:$0xff]  }
 0x6cc   :  { %13023 = vmatpush1.bf16.msra.mxu0 %v16337_v2  ;;  %v16417_v2 = vld [vmem:[#allocation7 + $0x224] ss:$16 sps:$4 sm:$0xff]  }
 0x6cd   :  { %13187 = vmatpush1.bf16.msra.mxu1 %v16340_v3  ;;  %13024 = vmatprep.subr.bf16.mxu0 %v16345_v4  ;;  %v11451_v3 = vpack.c.bf16 %v11443_v60, %v11443_v60  ;;  %v16415_v4 = vld [vmem:[#allocation7 + $0x220] ss:$16 sps:$4 sm:$0xff]   ;;  %v16490_v60 = vld [vmem:[#allocation7 + $0x3a8] ss:$16 sps:$4 sm:$0xff]  }
 0x6ce   :  { %13188 = vmatprep.subr.bf16.mxu1 %v16348_v58  ;;  %v16418_v58 = vld [vmem:[#allocation7 + $0x228] ss:$16 sps:$4 sm:$0xff]  }
 0x6d0   :  { %13025 = vmatpush1.bf16.msra.mxu0 %v16343_v56  ;;  %v16423_v56 = vld [vmem:[#allocation7 + $0x244] ss:$16 sps:$4 sm:$0xff]  }
 0x6d1   :  { %13189 = vmatpush1.bf16.msra.mxu1 %v16346_v5  ;;  %13026 = vmatprep.subr.bf16.mxu0 %v16351_v6  ;;  %v16426_v5 = vld [vmem:[#allocation7 + $0x24c] ss:$16 sps:$4 sm:$0xff]   ;;  %v16421_v6 = vld [vmem:[#allocation7 + $0x240] ss:$16 sps:$4 sm:$0xff]  }
 0x6d2   :  { %13190 = vmatprep.subr.bf16.mxu1 %v16354_v8  ;;  %v16424_v8 = vld [vmem:[#allocation7 + $0x248] ss:$16 sps:$4 sm:$0xff]  }
 0x6d4   :  { %13027 = vmatpush1.bf16.msra.mxu0 %v16349_v7  ;;  %v16429_v7 = vld [vmem:[#allocation7 + $0x264] ss:$16 sps:$4 sm:$0xff]  }
 0x6d5   :  { %13191 = vmatpush1.bf16.msra.mxu1 %v16352_v9  ;;  %13028 = vmatprep.subr.bf16.mxu0 %v16357_v14  ;;  %v16432_v9 = vld [vmem:[#allocation7 + $0x26c] ss:$16 sps:$4 sm:$0xff]   ;;  %v16427_v14 = vld [vmem:[#allocation7 + $0x260] ss:$16 sps:$4 sm:$0xff]  }
 0x6d6   :  { %13192 = vmatprep.subr.bf16.mxu1 %v16360_v10  ;;  %v16430_v10 = vld [vmem:[#allocation7 + $0x268] ss:$16 sps:$4 sm:$0xff]  }
 0x6d8   :  { %13029 = vmatpush1.bf16.msra.mxu0 %v16355_v13  ;;  %v16435_v13 = vld [vmem:[#allocation7 + $0x284] ss:$16 sps:$4 sm:$0xff]  }
 0x6d9   :  { %13193 = vmatpush1.bf16.msra.mxu1 %v16358_v15  ;;  %13030 = vmatprep.subr.bf16.mxu0 %v16363_v39  ;;  %v16438_v15 = vld [vmem:[#allocation7 + $0x28c] ss:$16 sps:$4 sm:$0xff]   ;;  %v16433_v39 = vld [vmem:[#allocation7 + $0x280] ss:$16 sps:$4 sm:$0xff]  }
 0x6da   :  { %13194 = vmatprep.subr.bf16.mxu1 %v16366_v17  ;;  %v16436_v17 = vld [vmem:[#allocation7 + $0x288] ss:$16 sps:$4 sm:$0xff]  }
 0x6dc   :  { %13031 = vmatpush1.bf16.msra.mxu0 %v16361_v18  ;;  %v16441_v18 = vld [vmem:[#allocation7 + $0x2a4] ss:$16 sps:$4 sm:$0xff]  }
 0x6dd   :  { %13195 = vmatpush1.bf16.msra.mxu1 %v16364_v54  ;;  %13032 = vmatprep.subr.bf16.mxu0 %v16369_v19  ;;  %v16444_v54 = vld [vmem:[#allocation7 + $0x2ac] ss:$16 sps:$4 sm:$0xff]   ;;  %v16439_v19 = vld [vmem:[#allocation7 + $0x2a0] ss:$16 sps:$4 sm:$0xff]  }
 0x6de   :  { %13196 = vmatprep.subr.bf16.mxu1 %v16372_v45  ;;  %v16442_v45 = vld [vmem:[#allocation7 + $0x2a8] ss:$16 sps:$4 sm:$0xff]  }
 0x6e0   :  { %13033 = vmatpush1.bf16.msra.mxu0 %v16367_v20  ;;  %v16447_v20 = vld [vmem:[#allocation7 + $0x2c4] ss:$16 sps:$4 sm:$0xff]  }
 0x6e1   :  { %13197 = vmatpush1.bf16.msra.mxu1 %v16370_v21  ;;  %13034 = vmatprep.subr.bf16.mxu0 %v16375_v24  ;;  %v16450_v21 = vld [vmem:[#allocation7 + $0x2cc] ss:$16 sps:$4 sm:$0xff]   ;;  %v16445_v24 = vld [vmem:[#allocation7 + $0x2c0] ss:$16 sps:$4 sm:$0xff]  }
 0x6e2   :  { %13198 = vmatprep.subr.bf16.mxu1 %v16378_v16  ;;  %v16448_v16 = vld [vmem:[#allocation7 + $0x2c8] ss:$16 sps:$4 sm:$0xff]  }
 0x6e4   :  { %13035 = vmatpush1.bf16.msra.mxu0 %v16373_v25  ;;  %v16453_v25 = vld [vmem:[#allocation7 + $0x2e4] ss:$16 sps:$4 sm:$0xff]  }
 0x6e5   :  { %13199 = vmatpush1.bf16.msra.mxu1 %v16376_v27  ;;  %13036 = vmatprep.subr.bf16.mxu0 %v16381_v48  ;;  %v16456_v27 = vld [vmem:[#allocation7 + $0x2ec] ss:$16 sps:$4 sm:$0xff]   ;;  %v16451_v48 = vld [vmem:[#allocation7 + $0x2e0] ss:$16 sps:$4 sm:$0xff]  }
 0x6e6   :  { %13200 = vmatprep.subr.bf16.mxu1 %v16384_v59  ;;  %v16454_v59 = vld [vmem:[#allocation7 + $0x2e8] ss:$16 sps:$4 sm:$0xff]  }
 0x6e8   :  { %13037 = vmatpush1.bf16.msra.mxu0 %v16379_v12  ;;  %v16459_v12 = vld [vmem:[#allocation7 + $0x304] ss:$16 sps:$4 sm:$0xff]  }
 0x6e9   :  { %13201 = vmatpush1.bf16.msra.mxu1 %v16382_v1  ;;  %13038 = vmatprep.subr.bf16.mxu0 %v16387_v28  ;;  %v16462_v1 = vld [vmem:[#allocation7 + $0x30c] ss:$16 sps:$4 sm:$0xff]   ;;  %v16457_v28 = vld [vmem:[#allocation7 + $0x300] ss:$16 sps:$4 sm:$0xff]  }
 0x6ea   :  { %13202 = vmatprep.subr.bf16.mxu1 %v16390_v30  ;;  %v16460_v30 = vld [vmem:[#allocation7 + $0x308] ss:$16 sps:$4 sm:$0xff]  }
 0x6ec   :  { %13039 = vmatpush1.bf16.msra.mxu0 %v16385_v31  ;;  %v16465_v31 = vld [vmem:[#allocation7 + $0x324] ss:$16 sps:$4 sm:$0xff]  }
 0x6ed   :  { %13203 = vmatpush1.bf16.msra.mxu1 %v16388_v29  ;;  %13040 = vmatprep.subr.bf16.mxu0 %v16393_v38  ;;  %v16468_v29 = vld [vmem:[#allocation7 + $0x32c] ss:$16 sps:$4 sm:$0xff]   ;;  %v16463_v38 = vld [vmem:[#allocation7 + $0x320] ss:$16 sps:$4 sm:$0xff]  }
 0x6ee   :  { %13204 = vmatprep.subr.bf16.mxu1 %v16396_v33  ;;  %v16466_v33 = vld [vmem:[#allocation7 + $0x328] ss:$16 sps:$4 sm:$0xff]  }
 0x6f0   :  { %13041 = vmatpush1.bf16.msra.mxu0 %v16391_v35  ;;  %v16471_v35 = vld [vmem:[#allocation7 + $0x344] ss:$16 sps:$4 sm:$0xff]  }
 0x6f1   :  { %13205 = vmatpush1.bf16.msra.mxu1 %v16394_v36  ;;  %13042 = vmatprep.subr.bf16.mxu0 %v16399_v37  ;;  %v16469_v36 = vld [vmem:[#allocation7 + $0x340] ss:$16 sps:$4 sm:$0xff]   ;;  %v16472_v37 = vld [vmem:[#allocation7 + $0x348] ss:$16 sps:$4 sm:$0xff]  }
 0x6f2   :  { %13206 = vmatprep.subr.bf16.mxu1 %v16402_v23  ;;  %v16477_v23 = vld [vmem:[#allocation7 + $0x364] ss:$16 sps:$4 sm:$0xff]  }
 0x6f4   :  { %13043 = vmatpush1.bf16.msra.mxu0 %v16397_v42  ;;  %v16475_v42 = vld [vmem:[#allocation7 + $0x360] ss:$16 sps:$4 sm:$0xff]  }
 0x6f5   :  { %13207 = vmatpush1.bf16.msra.mxu1 %v16400_v52  ;;  %13044 = vmatprep.subr.bf16.mxu0 %v16405_v43  ;;  %v16483_v52 = vld [vmem:[#allocation7 + $0x384] ss:$16 sps:$4 sm:$0xff]   ;;  %v16486_v43 = vld [vmem:[#allocation7 + $0x38c] ss:$16 sps:$4 sm:$0xff]  }
 0x6f6   :  { %13208 = vmatprep.subr.bf16.mxu1 %v16408_v44  ;;  %v16481_v44 = vld [vmem:[#allocation7 + $0x380] ss:$16 sps:$4 sm:$0xff]  }
 0x6f8   :  { %13045 = vmatpush1.bf16.msra.mxu0 %v16403_v41  ;;  %v16484_v41 = vld [vmem:[#allocation7 + $0x388] ss:$16 sps:$4 sm:$0xff]  }
 0x6f9   :  { %13209 = vmatpush1.bf16.msra.mxu1 %v16406_v50  ;;  %13055 = vmatprep.subr.bf16.mxu0 %v16411_v61  ;;  %v16492_v50 = vld [vmem:[#allocation7 + $0x3ac] ss:$16 sps:$4 sm:$0xff]   ;;  %v16487_v61 = vld [vmem:[#allocation7 + $0x3a0] ss:$16 sps:$4 sm:$0xff]  }
 0x6fa   :  { %13219 = vmatprep.subr.bf16.mxu1 %v16414_v53  ;;  %v1763_v53 = vrot.slane %v17502_v22, %v1762_v47 }
 0x6fb   :  { %13047 = vmatmul.mubr.bf16.vlgmr.msra.gmra.mrb[8].mxu0 %v11448_v62 }
 0x6fc   :  { %13211 = vmatmul.mubr.bf16.vlgmr.msra.gmra.mrb[8].mxu1 %v11448_v62  ;;  %13056 = vmatpush1.bf16.msra.mxu0 %v16409_v46  ;;  %v16495_v46 = vld [vmem:[#allocation7 + $0x3c4] ss:$16 sps:$4 sm:$0xff]   ;;  %v16498_v62 = vld [vmem:[#allocation7 + $0x3cc] ss:$16 sps:$4 sm:$0xff]  }
 0x6fd   :  { %13087 = vmatprep.mubr.bf16.mxu0 %v11451_v3  ;;  %13220 = vmatpush1.bf16.msra.mxu1 %v16412_v0  ;;  %v16493_v0 = vld [vmem:[#allocation7 + $0x3c0] ss:$16 sps:$4 sm:$0xff]  }
 0x6fe   :  { %13251 = vmatprep.mubr.bf16.mxu1 %v11451_v3  ;;  %13057 = vmatprep.subr.bf16.mxu0 %v16417_v2  ;;  %v16076_v2 = vadd.f32 %v17459_v51, %v1763_v53  ;;  %v16496_v3 = vld [vmem:[#allocation7 + $0x3c8] ss:$16 sps:$4 sm:$0xff]   ;;  %v16576_v53 = vld [vmem:[#allocation7 + $0x56c] ss:$16 sps:$4 sm:$0xff]  }
 0x6ff   :  { %13221 = vmatprep.subr.bf16.mxu1 %v16420_v63  ;;  %v16501_v63 = vld [vmem:[#allocation7 + $0x3e4] ss:$16 sps:$4 sm:$0xff]   ;;  %v16508_v51 = vld [vmem:[#allocation7 + $0x408] ss:$16 sps:$4 sm:$0xff]  }
 0x700   :  { %13058 = vmatpush1.bf16.msra.mxu0 %v16415_v4  ;;  %v16504_v4 = vld [vmem:[#allocation7 + $0x3ec] ss:$16 sps:$4 sm:$0xff]  }
 0x701   :  { %13222 = vmatpush1.bf16.msra.mxu1 %v16418_v58  ;;  %13059 = vmatprep.subr.bf16.mxu0 %v16423_v56  ;;  %v16499_v58 = vld [vmem:[#allocation7 + $0x3e0] ss:$16 sps:$4 sm:$0xff]   ;;  %v11442_v56 = vmax.f32 %v16076_v2, 0.0 }
 0x702   :  { %13223 = vmatprep.subr.bf16.mxu1 %v16426_v5  ;;  %v16502_v5 = vld [vmem:[#allocation7 + $0x3e8] ss:$16 sps:$4 sm:$0xff]   ;;  %v16577_v2 = vld [vmem:[#allocation7 + $0x580] ss:$16 sps:$4 sm:$0xff]  }
 0x704   :  { %13060 = vmatpush1.bf16.msra.mxu0 %v16421_v6  ;;  %v16507_v6 = vld [vmem:[#allocation7 + $0x404] ss:$16 sps:$4 sm:$0xff]  }
 0x705   :  { %13224 = vmatpush1.bf16.msra.mxu1 %v16424_v8  ;;  %13061 = vmatprep.subr.bf16.mxu0 %v16429_v7  ;;  %v16510_v8 = vld [vmem:[#allocation7 + $0x40c] ss:$16 sps:$4 sm:$0xff]   ;;  %v16505_v7 = vld [vmem:[#allocation7 + $0x400] ss:$16 sps:$4 sm:$0xff]  }
 0x706   :  { %13225 = vmatprep.subr.bf16.mxu1 %v16432_v9  ;;  %v11450_v9 = vpack.c.bf16 %v11442_v56, %v11442_v56  ;;  %v16586_v56 = vld [vmem:[#allocation7 + $0x5a8] ss:$16 sps:$4 sm:$0xff]  }
 0x708   :  { %13062 = vmatpush1.bf16.msra.mxu0 %v16427_v14  ;;  %v16513_v14 = vld [vmem:[#allocation7 + $0x424] ss:$16 sps:$4 sm:$0xff]  }
 0x709   :  { %13226 = vmatpush1.bf16.msra.mxu1 %v16430_v10  ;;  %13063 = vmatprep.subr.bf16.mxu0 %v16435_v13  ;;  %v16516_v10 = vld [vmem:[#allocation7 + $0x42c] ss:$16 sps:$4 sm:$0xff]   ;;  %v16511_v13 = vld [vmem:[#allocation7 + $0x420] ss:$16 sps:$4 sm:$0xff]  }
 0x70a   :  { %13227 = vmatprep.subr.bf16.mxu1 %v16438_v15  ;;  %v16514_v15 = vld [vmem:[#allocation7 + $0x428] ss:$16 sps:$4 sm:$0xff]  }
 0x70c   :  { %13064 = vmatpush1.bf16.msra.mxu0 %v16433_v39  ;;  %v16519_v39 = vld [vmem:[#allocation7 + $0x444] ss:$16 sps:$4 sm:$0xff]  }
 0x70d   :  { %13228 = vmatpush1.bf16.msra.mxu1 %v16436_v17  ;;  %13065 = vmatprep.subr.bf16.mxu0 %v16441_v18  ;;  %v16522_v17 = vld [vmem:[#allocation7 + $0x44c] ss:$16 sps:$4 sm:$0xff]   ;;  %v16517_v18 = vld [vmem:[#allocation7 + $0x440] ss:$16 sps:$4 sm:$0xff]  }
 0x70e   :  { %13229 = vmatprep.subr.bf16.mxu1 %v16444_v54  ;;  %v16520_v54 = vld [vmem:[#allocation7 + $0x448] ss:$16 sps:$4 sm:$0xff]  }
 0x710   :  { %13066 = vmatpush1.bf16.msra.mxu0 %v16439_v19  ;;  %v16525_v19 = vld [vmem:[#allocation7 + $0x464] ss:$16 sps:$4 sm:$0xff]  }
 0x711   :  { %13230 = vmatpush1.bf16.msra.mxu1 %v16442_v45  ;;  %13067 = vmatprep.subr.bf16.mxu0 %v16447_v20  ;;  %v16528_v45 = vld [vmem:[#allocation7 + $0x46c] ss:$16 sps:$4 sm:$0xff]   ;;  %v16523_v20 = vld [vmem:[#allocation7 + $0x460] ss:$16 sps:$4 sm:$0xff]  }
 0x712   :  { %13231 = vmatprep.subr.bf16.mxu1 %v16450_v21  ;;  %v16526_v21 = vld [vmem:[#allocation7 + $0x468] ss:$16 sps:$4 sm:$0xff]  }
 0x714   :  { %13068 = vmatpush1.bf16.msra.mxu0 %v16445_v24  ;;  %v16531_v24 = vld [vmem:[#allocation7 + $0x484] ss:$16 sps:$4 sm:$0xff]  }
 0x715   :  { %13232 = vmatpush1.bf16.msra.mxu1 %v16448_v16  ;;  %13069 = vmatprep.subr.bf16.mxu0 %v16453_v25  ;;  %v16534_v16 = vld [vmem:[#allocation7 + $0x48c] ss:$16 sps:$4 sm:$0xff]   ;;  %v16529_v25 = vld [vmem:[#allocation7 + $0x480] ss:$16 sps:$4 sm:$0xff]  }
 0x716   :  { %13233 = vmatprep.subr.bf16.mxu1 %v16456_v27  ;;  %v16532_v27 = vld [vmem:[#allocation7 + $0x488] ss:$16 sps:$4 sm:$0xff]  }
 0x718   :  { %13070 = vmatpush1.bf16.msra.mxu0 %v16451_v48  ;;  %v16537_v48 = vld [vmem:[#allocation7 + $0x4a4] ss:$16 sps:$4 sm:$0xff]  }
 0x719   :  { %13234 = vmatpush1.bf16.msra.mxu1 %v16454_v59  ;;  %13071 = vmatprep.subr.bf16.mxu0 %v16459_v12  ;;  %v16540_v59 = vld [vmem:[#allocation7 + $0x4ac] ss:$16 sps:$4 sm:$0xff]   ;;  %v16535_v12 = vld [vmem:[#allocation7 + $0x4a0] ss:$16 sps:$4 sm:$0xff]  }
 0x71a   :  { %13235 = vmatprep.subr.bf16.mxu1 %v16462_v1  ;;  %v16538_v1 = vld [vmem:[#allocation7 + $0x4a8] ss:$16 sps:$4 sm:$0xff]  }
 0x71c   :  { %13072 = vmatpush1.bf16.msra.mxu0 %v16457_v28  ;;  %v16543_v28 = vld [vmem:[#allocation7 + $0x4c4] ss:$16 sps:$4 sm:$0xff]  }
 0x71d   :  { %13236 = vmatpush1.bf16.msra.mxu1 %v16460_v30  ;;  %13073 = vmatprep.subr.bf16.mxu0 %v16465_v31  ;;  %v16546_v30 = vld [vmem:[#allocation7 + $0x4cc] ss:$16 sps:$4 sm:$0xff]   ;;  %v16541_v31 = vld [vmem:[#allocation7 + $0x4c0] ss:$16 sps:$4 sm:$0xff]  }
 0x71e   :  { %13237 = vmatprep.subr.bf16.mxu1 %v16468_v29  ;;  %v16544_v29 = vld [vmem:[#allocation7 + $0x4c8] ss:$16 sps:$4 sm:$0xff]  }
 0x720   :  { %13074 = vmatpush1.bf16.msra.mxu0 %v16463_v38  ;;  %v16549_v38 = vld [vmem:[#allocation7 + $0x4e4] ss:$16 sps:$4 sm:$0xff]  }
 0x721   :  { %13238 = vmatpush1.bf16.msra.mxu1 %v16466_v33  ;;  %13075 = vmatprep.subr.bf16.mxu0 %v16471_v35  ;;  %v16552_v33 = vld [vmem:[#allocation7 + $0x4ec] ss:$16 sps:$4 sm:$0xff]   ;;  %v16547_v35 = vld [vmem:[#allocation7 + $0x4e0] ss:$16 sps:$4 sm:$0xff]  }
 0x722   :  { %13239 = vmatprep.subr.bf16.mxu1 %v16474_v34  ;;  %v16550_v34 = vld [vmem:[#allocation7 + $0x4e8] ss:$16 sps:$4 sm:$0xff]  }
 0x724   :  { %13076 = vmatpush1.bf16.msra.mxu0 %v16469_v36  ;;  %v16555_v36 = vld [vmem:[#allocation7 + $0x504] ss:$16 sps:$4 sm:$0xff]  }
 0x725   :  { %13240 = vmatpush1.bf16.msra.mxu1 %v16472_v37  ;;  %13077 = vmatprep.subr.bf16.mxu0 %v16477_v23  ;;  %v16558_v37 = vld [vmem:[#allocation7 + $0x50c] ss:$16 sps:$4 sm:$0xff]   ;;  %v16553_v23 = vld [vmem:[#allocation7 + $0x500] ss:$16 sps:$4 sm:$0xff]  }
 0x726   :  { %13241 = vmatprep.subr.bf16.mxu1 %v16480_v40  ;;  %v16556_v40 = vld [vmem:[#allocation7 + $0x508] ss:$16 sps:$4 sm:$0xff]  }
 0x728   :  { %13078 = vmatpush1.bf16.msra.mxu0 %v16475_v42  ;;  %v16561_v42 = vld [vmem:[#allocation7 + $0x524] ss:$16 sps:$4 sm:$0xff]  }
 0x729   :  { %13242 = vmatpush1.bf16.msra.mxu1 %v16478_v55  ;;  %13079 = vmatprep.subr.bf16.mxu0 %v16483_v52  ;;  %v16564_v55 = vld [vmem:[#allocation7 + $0x52c] ss:$16 sps:$4 sm:$0xff]   ;;  %v16559_v52 = vld [vmem:[#allocation7 + $0x520] ss:$16 sps:$4 sm:$0xff]  }
 0x72a   :  { %13243 = vmatprep.subr.bf16.mxu1 %v16486_v43  ;;  %v16562_v43 = vld [vmem:[#allocation7 + $0x528] ss:$16 sps:$4 sm:$0xff]  }
 0x72c   :  { %13080 = vmatpush1.bf16.msra.mxu0 %v16481_v44  ;;  %v16567_v44 = vld [vmem:[#allocation7 + $0x544] ss:$16 sps:$4 sm:$0xff]  }
 0x72d   :  { %13244 = vmatpush1.bf16.msra.mxu1 %v16484_v41  ;;  %13081 = vmatprep.subr.bf16.mxu0 %v16489_v49  ;;  %v16570_v41 = vld [vmem:[#allocation7 + $0x54c] ss:$16 sps:$4 sm:$0xff]   ;;  %v16565_v49 = vld [vmem:[#allocation7 + $0x540] ss:$16 sps:$4 sm:$0xff]  }
 0x72e   :  { %13245 = vmatprep.subr.bf16.mxu1 %v16492_v50  ;;  %v16568_v50 = vld [vmem:[#allocation7 + $0x548] ss:$16 sps:$4 sm:$0xff]  }
 0x730   :  { %13082 = vmatpush1.bf16.msra.mxu0 %v16487_v61  ;;  %v16573_v61 = vld [vmem:[#allocation7 + $0x564] ss:$16 sps:$4 sm:$0xff]  }
 0x731   :  { %13246 = vmatpush1.bf16.msra.mxu1 %v16490_v60  ;;  %13083 = vmatprep.subr.bf16.mxu0 %v16495_v46  ;;  %v16571_v60 = vld [vmem:[#allocation7 + $0x560] ss:$16 sps:$4 sm:$0xff]   ;;  %v16574_v46 = vld [vmem:[#allocation7 + $0x568] ss:$16 sps:$4 sm:$0xff]  }
 0x732   :  { %13247 = vmatprep.subr.bf16.mxu1 %v16498_v62  ;;  %v16579_v62 = vld [vmem:[#allocation7 + $0x584] ss:$16 sps:$4 sm:$0xff]  }
 0x734   :  { %13084 = vmatpush1.bf16.msra.mxu0 %v16493_v0  ;;  %v16582_v0 = vld [vmem:[#allocation7 + $0x58c] ss:$16 sps:$4 sm:$0xff]  }
 0x735   :  { %13248 = vmatpush1.bf16.msra.mxu1 %v16496_v3  ;;  %13085 = vmatprep.subr.bf16.mxu0 %v16501_v63  ;;  %v16580_v3 = vld [vmem:[#allocation7 + $0x588] ss:$16 sps:$4 sm:$0xff]   ;;  %v16585_v63 = vld [vmem:[#allocation7 + $0x5a4] ss:$16 sps:$4 sm:$0xff]  }
 0x736   :  { %13249 = vmatprep.subr.bf16.mxu1 %v16504_v4  ;;  %v16588_v4 = vld [vmem:[#allocation7 + $0x5ac] ss:$16 sps:$4 sm:$0xff]  }
 0x738   :  { %13086 = vmatpush1.bf16.msra.mxu0 %v16499_v58  ;;  %v16583_v58 = vld [vmem:[#allocation7 + $0x5a0] ss:$16 sps:$4 sm:$0xff]  }
 0x739   :  { %13250 = vmatpush1.bf16.msra.mxu1 %v16502_v5  ;;  %13096 = vmatprep.subr.bf16.mxu0 %v16507_v6  ;;  %v16591_v5 = vld [vmem:[#allocation7 + $0x5c4] ss:$16 sps:$4 sm:$0xff]   ;;  %v16594_v6 = vld [vmem:[#allocation7 + $0x5cc] ss:$16 sps:$4 sm:$0xff]  }
 0x73a   :  { %13260 = vmatprep.subr.bf16.mxu1 %v16510_v8  ;;  %v16589_v8 = vld [vmem:[#allocation7 + $0x5c0] ss:$16 sps:$4 sm:$0xff]  }
 0x73b   :  { %13088 = vmatmul.mubr.bf16.vlgmr.msra.gmra.mrb[8].mxu0 %v11450_v9 }
 0x73c   :  { %13252 = vmatmul.mubr.bf16.vlgmr.msra.gmra.mrb[8].mxu1 %v11450_v9  ;;  %13097 = vmatpush1.bf16.msra.mxu0 %v16505_v7  ;;  %v16592_v7 = vld [vmem:[#allocation7 + $0x5c8] ss:$16 sps:$4 sm:$0xff]   ;;  %v16597_v9 = vld [vmem:[#allocation7 + $0x5e4] ss:$16 sps:$4 sm:$0xff]  }
 0x73d   :  { %13261 = vmatpush1.bf16.msra.mxu1 %v16508_v51  ;;  %13098 = vmatprep.subr.bf16.mxu0 %v16513_v14  ;;  %v16600_v51 = vld [vmem:[#allocation7 + $0x5ec] ss:$16 sps:$4 sm:$0xff]   ;;  %v16595_v14 = vld [vmem:[#allocation7 + $0x5e0] ss:$16 sps:$4 sm:$0xff]  }
 0x73e   :  { %13262 = vmatprep.subr.bf16.mxu1 %v16516_v10  ;;  %v16598_v10 = vld [vmem:[#allocation7 + $0x5e8] ss:$16 sps:$4 sm:$0xff]  }
 0x740   :  { %13099 = vmatpush1.bf16.msra.mxu0 %v16511_v13  ;;  %v16603_v13 = vld [vmem:[#allocation7 + $0x604] ss:$16 sps:$4 sm:$0xff]  }
 0x741   :  { %13263 = vmatpush1.bf16.msra.mxu1 %v16514_v15  ;;  %13100 = vmatprep.subr.bf16.mxu0 %v16519_v39  ;;  %v16606_v15 = vld [vmem:[#allocation7 + $0x60c] ss:$16 sps:$4 sm:$0xff]   ;;  %v1770_v39 = vsub.s32 4, %v17497_v11 }
 0x742   :  { %13264 = vmatprep.subr.bf16.mxu1 %v16522_v17  ;;  %v1774_v17 = vsub.s32 5, %v17497_v11 }
 0x744   :  { %13101 = vmatpush1.bf16.msra.mxu0 %v16517_v18  ;;  %v1782_v18 = vsub.s32 7, %v17497_v11 }
 0x745   :  { %13265 = vmatpush1.bf16.msra.mxu1 %v16520_v54  ;;  %13102 = vmatprep.subr.bf16.mxu0 %v16525_v19  ;;  %v1771_v54 = vrot.slane %v17502_v22, %v1770_v39  ;;  %v1775_v19 = vrot.slane %v17502_v22, %v1774_v17  ;;  %v16655_v39 = vld [vmem:[#allocation7 + $0x720] ss:$16 sps:$4 sm:$0xff]   ;;  %v16658_v17 = vld [vmem:[#allocation7 + $0x728] ss:$16 sps:$4 sm:$0xff]  }
 0x746   :  { %13266 = vmatprep.subr.bf16.mxu1 %v16528_v45  ;;  %v1783_v45 = vrot.slane %v17502_v22, %v1782_v18  ;;  %v16609_v22 = vld [vmem:[#allocation7 + $0x624] ss:$16 sps:$4 sm:$0xff]  }
 0x747   :  { %v16663_v18 = vld [vmem:[#allocation7 + $0x744] ss:$16 sps:$4 sm:$0xff]  }
 0x748   :  { %13103 = vmatpush1.bf16.msra.mxu0 %v16523_v20 }
 0x749   :  { %13267 = vmatpush1.bf16.msra.mxu1 %v16526_v21  ;;  %13104 = vmatprep.subr.bf16.mxu0 %v16531_v24 }
 0x74a   :  { %13268 = vmatprep.subr.bf16.mxu1 %v16534_v16 }
 0x74c   :  { %13105 = vmatpush1.bf16.msra.mxu0 %v16529_v25 }
 0x74d   :  { %13269 = vmatpush1.bf16.msra.mxu1 %v16532_v27  ;;  %13106 = vmatprep.subr.bf16.mxu0 %v16537_v48 }
 0x74e   :  { %13270 = vmatprep.subr.bf16.mxu1 %v16540_v59 }
 0x750   :  { %13107 = vmatpush1.bf16.msra.mxu0 %v16535_v12 }
 0x751   :  { %13271 = vmatpush1.bf16.msra.mxu1 %v16538_v1  ;;  %13108 = vmatprep.subr.bf16.mxu0 %v16543_v28 }
 0x752   :  { %13272 = vmatprep.subr.bf16.mxu1 %v16546_v30 }
 0x754   :  { %13109 = vmatpush1.bf16.msra.mxu0 %v16541_v31 }
 0x755   :  { %13273 = vmatpush1.bf16.msra.mxu1 %v16544_v29  ;;  %13110 = vmatprep.subr.bf16.mxu0 %v16549_v38 }
 0x756   :  { %13274 = vmatprep.subr.bf16.mxu1 %v16552_v33  ;;  %v16601_v33 = vld [vmem:[#allocation7 + $0x600] ss:$16 sps:$4 sm:$0xff]  }
 0x758   :  { %13111 = vmatpush1.bf16.msra.mxu0 %v16547_v35  ;;  %v16604_v35 = vld [vmem:[#allocation7 + $0x608] ss:$16 sps:$4 sm:$0xff]  }
 0x759   :  { %13275 = vmatpush1.bf16.msra.mxu1 %v16550_v34  ;;  %13112 = vmatprep.subr.bf16.mxu0 %v16555_v36  ;;  %v16612_v36 = vld [vmem:[#allocation7 + $0x62c] ss:$16 sps:$4 sm:$0xff]  }
 0x75a   :  { %13276 = vmatprep.subr.bf16.mxu1 %v16558_v37 }
 0x75c   :  { %13113 = vmatpush1.bf16.msra.mxu0 %v16553_v23  ;;  %v16607_v23 = vld [vmem:[#allocation7 + $0x620] ss:$16 sps:$4 sm:$0xff]  }
 0x75d   :  { %13277 = vmatpush1.bf16.msra.mxu1 %v16556_v40  ;;  %13114 = vmatprep.subr.bf16.mxu0 %v16561_v42  ;;  %v16610_v40 = vld [vmem:[#allocation7 + $0x628] ss:$16 sps:$4 sm:$0xff]   ;;  %v16615_v42 = vld [vmem:[#allocation7 + $0x644] ss:$16 sps:$4 sm:$0xff]  }
 0x75e   :  { %13278 = vmatprep.subr.bf16.mxu1 %v16564_v55  ;;  %v16618_v55 = vld [vmem:[#allocation7 + $0x64c] ss:$16 sps:$4 sm:$0xff]  }
 0x760   :  { %13115 = vmatpush1.bf16.msra.mxu0 %v16559_v52  ;;  %v16613_v52 = vld [vmem:[#allocation7 + $0x640] ss:$16 sps:$4 sm:$0xff]  }
 0x761   :  { %13279 = vmatpush1.bf16.msra.mxu1 %v16562_v43  ;;  %13116 = vmatprep.subr.bf16.mxu0 %v16567_v44  ;;  %v16616_v43 = vld [vmem:[#allocation7 + $0x648] ss:$16 sps:$4 sm:$0xff]   ;;  %v16621_v44 = vld [vmem:[#allocation7 + $0x664] ss:$16 sps:$4 sm:$0xff]  }
 0x762   :  { %13280 = vmatprep.subr.bf16.mxu1 %v16570_v41  ;;  %v16624_v41 = vld [vmem:[#allocation7 + $0x66c] ss:$16 sps:$4 sm:$0xff]  }
 0x764   :  { %13117 = vmatpush1.bf16.msra.mxu0 %v16565_v49  ;;  %v16619_v49 = vld [vmem:[#allocation7 + $0x660] ss:$16 sps:$4 sm:$0xff]  }
 0x765   :  { %13281 = vmatpush1.bf16.msra.mxu1 %v16568_v50  ;;  %13118 = vmatprep.subr.bf16.mxu0 %v16573_v61  ;;  %v16622_v50 = vld [vmem:[#allocation7 + $0x668] ss:$16 sps:$4 sm:$0xff]   ;;  %v16627_v61 = vld [vmem:[#allocation7 + $0x684] ss:$16 sps:$4 sm:$0xff]  }
 0x766   :  { %13282 = vmatprep.subr.bf16.mxu1 %v16576_v53  ;;  %v16630_v53 = vld [vmem:[#allocation7 + $0x68c] ss:$16 sps:$4 sm:$0xff]  }
 0x768   :  { %13119 = vmatpush1.bf16.msra.mxu0 %v16571_v60  ;;  %v16625_v60 = vld [vmem:[#allocation7 + $0x680] ss:$16 sps:$4 sm:$0xff]  }
 0x769   :  { %13283 = vmatpush1.bf16.msra.mxu1 %v16574_v46  ;;  %13120 = vmatprep.subr.bf16.mxu0 %v16579_v62  ;;  %v16628_v46 = vld [vmem:[#allocation7 + $0x688] ss:$16 sps:$4 sm:$0xff]   ;;  %v16633_v62 = vld [vmem:[#allocation7 + $0x6a4] ss:$16 sps:$4 sm:$0xff]  }
 0x76a   :  { %13284 = vmatprep.subr.bf16.mxu1 %v16582_v0  ;;  %v16636_v0 = vld [vmem:[#allocation7 + $0x6ac] ss:$16 sps:$4 sm:$0xff]  }
 0x76c   :  { %13121 = vmatpush1.bf16.msra.mxu0 %v16577_v2  ;;  %v16631_v2 = vld [vmem:[#allocation7 + $0x6a0] ss:$16 sps:$4 sm:$0xff]  }
 0x76d   :  { %13285 = vmatpush1.bf16.msra.mxu1 %v16580_v3  ;;  %13122 = vmatprep.subr.bf16.mxu0 %v16585_v63  ;;  %v16634_v3 = vld [vmem:[#allocation7 + $0x6a8] ss:$16 sps:$4 sm:$0xff]   ;;  %v16639_v63 = vld [vmem:[#allocation7 + $0x6c4] ss:$16 sps:$4 sm:$0xff]  }
 0x76e   :  { %13286 = vmatprep.subr.bf16.mxu1 %v16588_v4  ;;  %v16642_v4 = vld [vmem:[#allocation7 + $0x6cc] ss:$16 sps:$4 sm:$0xff]  }
 0x770   :  { %13123 = vmatpush1.bf16.msra.mxu0 %v16583_v58  ;;  %v16637_v58 = vld [vmem:[#allocation7 + $0x6c0] ss:$16 sps:$4 sm:$0xff]  }
 0x771   :  { %13287 = vmatpush1.bf16.msra.mxu1 %v16586_v56  ;;  %13124 = vmatprep.subr.bf16.mxu0 %v16591_v5  ;;  %v16640_v56 = vld [vmem:[#allocation7 + $0x6c8] ss:$16 sps:$4 sm:$0xff]   ;;  %v16645_v5 = vld [vmem:[#allocation7 + $0x6e4] ss:$16 sps:$4 sm:$0xff]  }
 0x772   :  { %13288 = vmatprep.subr.bf16.mxu1 %v16594_v6  ;;  %v16648_v6 = vld [vmem:[#allocation7 + $0x6ec] ss:$16 sps:$4 sm:$0xff]  }
 0x774   :  { %13125 = vmatpush1.bf16.msra.mxu0 %v16589_v8  ;;  %v16643_v8 = vld [vmem:[#allocation7 + $0x6e0] ss:$16 sps:$4 sm:$0xff]  }
 0x775   :  { %13289 = vmatpush1.bf16.msra.mxu1 %v16592_v7  ;;  %13126 = vmatprep.subr.bf16.mxu0 %v16597_v9  ;;  %v16646_v7 = vld [vmem:[#allocation7 + $0x6e8] ss:$16 sps:$4 sm:$0xff]   ;;  %v16651_v9 = vld [vmem:[#allocation7 + $0x704] ss:$16 sps:$4 sm:$0xff]  }
 0x776   :  { %13290 = vmatprep.subr.bf16.mxu1 %v16600_v51  ;;  %v16654_v51 = vld [vmem:[#allocation7 + $0x70c] ss:$16 sps:$4 sm:$0xff]  }
 0x778   :  { %13127 = vmatpush1.bf16.msra.mxu0 %v16595_v14  ;;  %v16649_v14 = vld [vmem:[#allocation7 + $0x700] ss:$16 sps:$4 sm:$0xff]  }
 0x779   :  { %13291 = vmatpush1.bf16.msra.mxu1 %v16598_v10  ;;  %13137 = vmatprep.subr.bf16.mxu0 %v16603_v13  ;;  %v16652_v10 = vld [vmem:[#allocation7 + $0x708] ss:$16 sps:$4 sm:$0xff]   ;;  %v16657_v13 = vld [vmem:[#allocation7 + $0x724] ss:$16 sps:$4 sm:$0xff]  }
 0x77a   :  { %13301 = vmatprep.subr.bf16.mxu1 %v16606_v15  ;;  %v16660_v15 = vld [vmem:[#allocation7 + $0x72c] ss:$16 sps:$4 sm:$0xff]  }
 0x78e   :  { %v10941_v20 = vpop.f32.mrb[4].mxu0  ;;  %v17531_v24 = vpop.f32.mrb[4].mxu1 }
 0x78f   :  { %v16078_v21 = vadd.f32 %v10941_v20, %v1771_v54  ;;  %v10943_v16 = vpop.f32.mrb[5].mxu0  ;;  %v11435_v27 = vpop.f32.mrb[5].mxu1  ;;  %v16666_v54 = vld [vmem:[#allocation7 + $0x74c] ss:$16 sps:$4 sm:$0xff]   ;;  %v16669_v20 = vld [vmem:[#allocation7 + $0x764] ss:$16 sps:$4 sm:$0xff]  }
 0x790   :  { %v16079_v25 = vadd.f32 %v10943_v16, %v1775_v19  ;;  %v10945_v48 = vpop.f32.mrb[6].mxu0  ;;  %v16081_v12 = vadd.f32 %v11435_v27, %v1783_v45  ;;  %v11437_v1 = vpop.f32.mrb[6].mxu1  ;;  %v16661_v19 = vld [vmem:[#allocation7 + $0x740] ss:$16 sps:$4 sm:$0xff]   ;;  %v16664_v45 = vld [vmem:[#allocation7 + $0x748] ss:$16 sps:$4 sm:$0xff]  }
 0x791   :  { %v11444_v59 = vmax.f32 %v16078_v21, 0.0  ;;  %v10946_v28 = vpop.f32.mrb[7].mxu0  ;;  %v11438_v31 = vpop.f32.mrb[7].mxu1  ;;  %v16672_v21 = vld [vmem:[#allocation7 + $0x76c] ss:$16 sps:$4 sm:$0xff]   ;;  %v1778_v1 = vsub.s32 6, %v17497_v11 }
 0x792   :  { %v11445_v30 = vmax.f32 %v16079_v25, 0.0  ;;  %v11447_v29 = vmax.f32 %v16081_v12, 0.0  ;;  %v16667_v16 = vld [vmem:[#allocation7 + $0x760] ss:$16 sps:$4 sm:$0xff]   ;;  %v16670_v25 = vld [vmem:[#allocation7 + $0x768] ss:$16 sps:$4 sm:$0xff]  }
 0x793   :  { %v11452_v34 = vpack.c.bf16 %v11444_v59, %v11444_v59  ;;  %v16675_v27 = vld [vmem:[#allocation7 + $0x784] ss:$16 sps:$4 sm:$0xff]   ;;  %v16678_v48 = vld [vmem:[#allocation7 + $0x78c] ss:$16 sps:$4 sm:$0xff]   ;;  %v16673_v59 = vld [vmem:[#allocation7 + $0x780] ss:$16 sps:$4 sm:$0xff]  }
 0x794   :  { %v11453_v38 = vpack.c.bf16 %v11445_v30, %v11445_v30  ;;  %v11455_v37 = vpack.c.bf16 %v11447_v29, %v11447_v29  ;;  %v16676_v12 = vld [vmem:[#allocation7 + $0x788] ss:$16 sps:$4 sm:$0xff]   ;;  %v16681_v28 = vld [vmem:[#allocation7 + $0x7a4] ss:$16 sps:$4 sm:$0xff]   ;;  %v16684_v30 = vld [vmem:[#allocation7 + $0x7ac] ss:$16 sps:$4 sm:$0xff]  }
 0x795   :  { %v16679_v31 = vld [vmem:[#allocation7 + $0x7a0] ss:$16 sps:$4 sm:$0xff]   ;;  %v16682_v29 = vld [vmem:[#allocation7 + $0x7a8] ss:$16 sps:$4 sm:$0xff]  }
 0x796   :  { %13128 = vmatprep.mubr.bf16.mxu0 %v11453_v38  ;;  %13292 = vmatprep.mubr.bf16.mxu1 %v11453_v38  ;;  %v16817_v38 = vld [vmem:[#allocation5] sm:$0xff] }
 0x797   :  { %13129 = vmatmul.mubr.bf16.vlgmr.msra.gmra.mrb[8].mxu0 %v11452_v34  ;;  %13293 = vmatmul.mubr.bf16.vlgmr.msra.gmra.mrb[8].mxu1 %v11452_v34  ;;  %v16690_v34 = vld [vmem:[#allocation7 + $0x7cc] ss:$16 sps:$4 sm:$0xff]  }
 0x798   :  { %13138 = vmatpush1.bf16.msra.mxu0 %v16601_v33  ;;  %13302 = vmatpush1.bf16.msra.mxu1 %v16604_v35  ;;  %v1779_v33 = vrot.slane %v16817_v38, %v1778_v1  ;;  %v16687_v35 = vld [vmem:[#allocation7 + $0x7c4] ss:$16 sps:$4 sm:$0xff]  }
 0x799   :  { %13169 = vmatprep.mubr.bf16.mxu0 %v11455_v37  ;;  %13333 = vmatprep.mubr.bf16.mxu1 %v11455_v37  ;;  %v16801_v1 = vld [vmem:[#allocation13 + $0x60] sm:$0xff]   ;;  %v16807_v11 = vld [vmem:[#allocation13 + $0x78] sm:$0xff]  }
 0x79a   :  { %13139 = vmatprep.subr.bf16.mxu0 %v16609_v22  ;;  %13303 = vmatprep.subr.bf16.mxu1 %v16612_v36  ;;  %v16685_v22 = vld [vmem:[#allocation7 + $0x7c0] ss:$16 sps:$4 sm:$0xff]   ;;  %v16688_v36 = vld [vmem:[#allocation7 + $0x7c8] ss:$16 sps:$4 sm:$0xff]   ;;  %v16080_v37 = vadd.f32 %v17531_v24, %v1779_v33  ;;  %v16700_v24 = vld [vmem:[#allocation10 + $0x10] ss:$8 sps:$4 sm:$0xff]  }
 0x79c   :  { %13140 = vmatpush1.bf16.msra.mxu0 %v16607_v23  ;;  %13304 = vmatpush1.bf16.msra.mxu1 %v16610_v40  ;;  %v16693_v23 = vld [vmem:[#allocation7 + $0x7e4] ss:$16 sps:$4 sm:$0xff]   ;;  %v16696_v40 = vld [vmem:[#allocation7 + $0x7ec] ss:$16 sps:$4 sm:$0xff]  }
 0x79d   :  { %13141 = vmatprep.subr.bf16.mxu0 %v16615_v42  ;;  %13305 = vmatprep.subr.bf16.mxu1 %v16618_v55  ;;  %v16691_v42 = vld [vmem:[#allocation7 + $0x7e0] ss:$16 sps:$4 sm:$0xff]   ;;  %v16694_v55 = vld [vmem:[#allocation7 + $0x7e8] ss:$16 sps:$4 sm:$0xff]  }
 0x7a0   :  { %13142 = vmatpush1.bf16.msra.mxu0 %v16613_v52  ;;  %13306 = vmatpush1.bf16.msra.mxu1 %v16616_v43  ;;  %v11446_v52 = vmax.f32 %v16080_v37, 0.0  ;;  %v16699_v43 = vld [vmem:[#allocation10 + $0x4] ss:$8 sps:$4 sm:$0xff]  }
 0x7a1   :  { %13143 = vmatprep.subr.bf16.mxu0 %v16621_v44  ;;  %13307 = vmatprep.subr.bf16.mxu1 %v16624_v41  ;;  %v16697_v44 = vld [vmem:[#allocation10] ss:$8 sps:$4 sm:$0xff]  }
 0x7a2   :  { %v11454_v41 = vpack.c.bf16 %v11446_v52, %v11446_v52 }
 0x7a4   :  { %13144 = vmatpush1.bf16.msra.mxu0 %v16619_v49  ;;  %13308 = vmatpush1.bf16.msra.mxu1 %v16622_v50  ;;  %v16702_v49 = vld [vmem:[#allocation10 + $0x14] ss:$8 sps:$4 sm:$0xff]   ;;  %v16705_v50 = vld [vmem:[#allocation10 + $0x24] ss:$8 sps:$4 sm:$0xff]  }
 0x7a5   :  { %13145 = vmatprep.subr.bf16.mxu0 %v16627_v61  ;;  %13309 = vmatprep.subr.bf16.mxu1 %v16630_v53  ;;  %v16703_v61 = vld [vmem:[#allocation10 + $0x20] ss:$8 sps:$4 sm:$0xff]   ;;  %v16708_v53 = vld [vmem:[#allocation10 + $0x34] ss:$8 sps:$4 sm:$0xff]  }
 0x7a8   :  { %13146 = vmatpush1.bf16.msra.mxu0 %v16625_v60  ;;  %13310 = vmatpush1.bf16.msra.mxu1 %v16628_v46  ;;  %v16706_v60 = vld [vmem:[#allocation10 + $0x30] ss:$8 sps:$4 sm:$0xff]   ;;  %v16711_v46 = vld [vmem:[#allocation10 + $0x44] ss:$8 sps:$4 sm:$0xff]  }
 0x7a9   :  { %13147 = vmatprep.subr.bf16.mxu0 %v16633_v62  ;;  %13311 = vmatprep.subr.bf16.mxu1 %v16636_v0  ;;  %v16709_v62 = vld [vmem:[#allocation10 + $0x40] ss:$8 sps:$4 sm:$0xff]   ;;  %v16714_v0 = vld [vmem:[#allocation10 + $0x54] ss:$8 sps:$4 sm:$0xff]  }
 0x7ac   :  { %13148 = vmatpush1.bf16.msra.mxu0 %v16631_v2  ;;  %13312 = vmatpush1.bf16.msra.mxu1 %v16634_v3  ;;  %v16712_v2 = vld [vmem:[#allocation10 + $0x50] ss:$8 sps:$4 sm:$0xff]   ;;  %v16717_v3 = vld [vmem:[#allocation10 + $0x64] ss:$8 sps:$4 sm:$0xff]  }
 0x7ad   :  { %13149 = vmatprep.subr.bf16.mxu0 %v16639_v63  ;;  %13313 = vmatprep.subr.bf16.mxu1 %v16642_v4  ;;  %v16715_v63 = vld [vmem:[#allocation10 + $0x60] ss:$8 sps:$4 sm:$0xff]   ;;  %v16720_v4 = vld [vmem:[#allocation10 + $0x74] ss:$8 sps:$4 sm:$0xff]  }
 0x7b0   :  { %13150 = vmatpush1.bf16.msra.mxu0 %v16637_v58  ;;  %13314 = vmatpush1.bf16.msra.mxu1 %v16640_v56  ;;  %v16718_v58 = vld [vmem:[#allocation10 + $0x70] ss:$8 sps:$4 sm:$0xff]   ;;  %v16723_v56 = vld [vmem:[#allocation10 + $0x84] ss:$8 sps:$4 sm:$0xff]  }
 0x7b1   :  { %13151 = vmatprep.subr.bf16.mxu0 %v16645_v5  ;;  %13315 = vmatprep.subr.bf16.mxu1 %v16648_v6  ;;  %v16721_v5 = vld [vmem:[#allocation10 + $0x80] ss:$8 sps:$4 sm:$0xff]   ;;  %v16726_v6 = vld [vmem:[#allocation10 + $0x94] ss:$8 sps:$4 sm:$0xff]  }
 0x7b4   :  { %13152 = vmatpush1.bf16.msra.mxu0 %v16643_v8  ;;  %13316 = vmatpush1.bf16.msra.mxu1 %v16646_v7  ;;  %v16724_v8 = vld [vmem:[#allocation10 + $0x90] ss:$8 sps:$4 sm:$0xff]   ;;  %v16729_v7 = vld [vmem:[#allocation10 + $0xa4] ss:$8 sps:$4 sm:$0xff]  }
 0x7b5   :  { %13153 = vmatprep.subr.bf16.mxu0 %v16651_v9  ;;  %13317 = vmatprep.subr.bf16.mxu1 %v16654_v51  ;;  %v16727_v9 = vld [vmem:[#allocation10 + $0xa0] ss:$8 sps:$4 sm:$0xff]   ;;  %v16732_v51 = vld [vmem:[#allocation10 + $0xb4] ss:$8 sps:$4 sm:$0xff]  }
 0x7b8   :  { %13154 = vmatpush1.bf16.msra.mxu0 %v16649_v14  ;;  %13318 = vmatpush1.bf16.msra.mxu1 %v16652_v10  ;;  %v16730_v14 = vld [vmem:[#allocation10 + $0xb0] ss:$8 sps:$4 sm:$0xff]   ;;  %v16735_v10 = vld [vmem:[#allocation10 + $0xc4] ss:$8 sps:$4 sm:$0xff]  }
 0x7b9   :  { %13155 = vmatprep.subr.bf16.mxu0 %v16657_v13  ;;  %13319 = vmatprep.subr.bf16.mxu1 %v16660_v15  ;;  %v16733_v13 = vld [vmem:[#allocation10 + $0xc0] ss:$8 sps:$4 sm:$0xff]   ;;  %v16738_v15 = vld [vmem:[#allocation10 + $0xd4] ss:$8 sps:$4 sm:$0xff]  }
 0x7bc   :  { %13156 = vmatpush1.bf16.msra.mxu0 %v16655_v39  ;;  %13320 = vmatpush1.bf16.msra.mxu1 %v16658_v17  ;;  %v16736_v39 = vld [vmem:[#allocation10 + $0xd0] ss:$8 sps:$4 sm:$0xff]   ;;  %v16741_v17 = vld [vmem:[#allocation10 + $0xe4] ss:$8 sps:$4 sm:$0xff]  }
 0x7bd   :  { %13157 = vmatprep.subr.bf16.mxu0 %v16663_v18  ;;  %13321 = vmatprep.subr.bf16.mxu1 %v16666_v54  ;;  %v16739_v18 = vld [vmem:[#allocation10 + $0xe0] ss:$8 sps:$4 sm:$0xff]   ;;  %v16744_v54 = vld [vmem:[#allocation10 + $0xf4] ss:$8 sps:$4 sm:$0xff]  }
 0x7c0   :  { %13158 = vmatpush1.bf16.msra.mxu0 %v16661_v19  ;;  %13322 = vmatpush1.bf16.msra.mxu1 %v16664_v45  ;;  %v16742_v19 = vld [vmem:[#allocation10 + $0xf0] ss:$8 sps:$4 sm:$0xff]   ;;  %v16747_v45 = vld [vmem:[#allocation10 + $0x104] ss:$8 sps:$4 sm:$0xff]  }
 0x7c1   :  { %13159 = vmatprep.subr.bf16.mxu0 %v16669_v20  ;;  %13323 = vmatprep.subr.bf16.mxu1 %v16672_v21  ;;  %v16793_v20 = vld [vmem:[#allocation13 + $0x40] sm:$0xff]  }
 0x7c2   :  { %v16794_v21 = vld [vmem:[#allocation13] sm:$0xff]  }
 0x7c4   :  { %13160 = vmatpush1.bf16.msra.mxu0 %v16667_v16  ;;  %13324 = vmatpush1.bf16.msra.mxu1 %v16670_v25  ;;  %v16795_v16 = vld [vmem:[#allocation13 + $0x48] sm:$0xff]  }
 0x7c5   :  { %13161 = vmatprep.subr.bf16.mxu0 %v16675_v27  ;;  %13325 = vmatprep.subr.bf16.mxu1 %v16678_v48  ;;  %v16796_v25 = vld [vmem:[#allocation13 + $0x8] sm:$0xff]   ;;  %v16797_v27 = vld [vmem:[#allocation13 + $0x50] sm:$0xff]  }
 0x7c6   :  { %v16798_v48 = vld [vmem:[#allocation13 + $0x10] sm:$0xff]  }
 0x7c8   :  { %13162 = vmatpush1.bf16.msra.mxu0 %v16673_v59  ;;  %13326 = vmatpush1.bf16.msra.mxu1 %v16676_v12  ;;  %v16799_v59 = vld [vmem:[#allocation13 + $0x58] sm:$0xff]  }
 0x7c9   :  { %13163 = vmatprep.subr.bf16.mxu0 %v16681_v28  ;;  %13327 = vmatprep.subr.bf16.mxu1 %v16684_v30  ;;  %v16800_v12 = vld [vmem:[#allocation13 + $0x18] sm:$0xff]   ;;  %v16802_v28 = vld [vmem:[#allocation13 + $0x20] sm:$0xff]   ;;  %v16803_v30 = vld [vmem:[#allocation13 + $0x68] sm:$0xff]  }
 0x7cc   :  { %13164 = vmatpush1.bf16.msra.mxu0 %v16679_v31  ;;  %13328 = vmatpush1.bf16.msra.mxu1 %v16682_v29  ;;  %v16804_v31 = vld [vmem:[#allocation13 + $0x28] sm:$0xff]   ;;  %v17535_v29 = vld [vmem:[#allocation8] sm:$0xf] }
 0x7cd   :  { %13165 = vmatprep.subr.bf16.mxu0 %v16687_v35  ;;  %13329 = vmatprep.subr.bf16.mxu1 %v16690_v34  ;;  %v11717_v38 = vrot.slane %v17535_v29, %v17510_v32  ;;  %v11721_v33 = vrot.slane %v17535_v29, %v17500_v26  ;;  %v11729_v35 = vrot.slane %v17535_v29, %v1766_v57 }
 0x7d0   :  { %13166 = vmatpush1.bf16.msra.mxu0 %v16685_v22  ;;  %13330 = vmatpush1.bf16.msra.mxu1 %v16688_v36 }
 0x7d1   :  { %13167 = vmatprep.subr.bf16.mxu0 %v16693_v23  ;;  %13331 = vmatprep.subr.bf16.mxu1 %v16696_v40 }
 0x7d4   :  { %13168 = vmatpush1.bf16.msra.mxu0 %v16691_v42  ;;  %13332 = vmatpush1.bf16.msra.mxu1 %v16694_v55 }
 0x7d5   :  { %13746 = vmatprep.subr.bf16.mxu0 %v16699_v43  ;;  %16023 = vmatprep.subr.bf16.mxu1 %v16793_v20  ;;  %v11725_v20 = vrot.slane %v17535_v29, %v1762_v47  ;;  %v16808_v47 = vld [vmem:[#allocation13 + $0x38] sm:$0xff]  }
 0x7d7   :  { %13170 = vmatmul.mubr.bf16.vlgmr.msra.gmra.mrb[8].mxu0 %v11454_v41  ;;  %13334 = vmatmul.mubr.bf16.vlgmr.msra.gmra.mrb[8].mxu1 %v11454_v41 }
 0x7d8   :  { %13747 = vmatpush1.bf16.msra.mxu0 %v16697_v44  ;;  %16024 = vmatpush3.bf16.msra.mxu1 %v16794_v21  ;;  %v16789_v21 = vld [vmem:[#allocation10 + $0x1e4] ss:$8 sps:$4 sm:$0xff]  }
 0x7d9   :  { %13748 = vmatprep.subr.bf16.mxu0 %v16702_v49  ;;  %16025 = vmatprep.subr.bf16.mxu1 %v16795_v16  ;;  %v16787_v16 = vld [vmem:[#allocation10 + $0x1e0] ss:$8 sps:$4 sm:$0xff]  }
 0x7dc   :  { %13749 = vmatpush1.bf16.msra.mxu0 %v16700_v24  ;;  %16026 = vmatpush3.bf16.msra.mxu1 %v16796_v25 }
 0x7dd   :  { %13750 = vmatprep.subr.bf16.mxu0 %v16705_v50  ;;  %16027 = vmatprep.subr.bf16.mxu1 %v16797_v27  ;;  %v16792_v27 = vld [vmem:[#allocation10 + $0x1f4] ss:$8 sps:$4 sm:$0xff]  }
 0x7e0   :  { %13751 = vmatpush1.bf16.msra.mxu0 %v16703_v61  ;;  %16028 = vmatpush3.bf16.msra.mxu1 %v16798_v48  ;;  %v16745_v61 = vld [vmem:[#allocation10 + $0x100] ss:$8 sps:$4 sm:$0xff]   ;;  %v16790_v48 = vld [vmem:[#allocation10 + $0x1f0] ss:$8 sps:$4 sm:$0xff]  }
 0x7e1   :  { %13752 = vmatprep.subr.bf16.mxu0 %v16708_v53  ;;  %16029 = vmatprep.subr.bf16.mxu1 %v16799_v59 }
 0x7e4   :  { %13753 = vmatpush1.bf16.msra.mxu0 %v16706_v60  ;;  %16030 = vmatpush3.bf16.msra.mxu1 %v16800_v12  ;;  %v16750_v60 = vld [vmem:[#allocation10 + $0x114] ss:$8 sps:$4 sm:$0xff]  }
 0x7e5   :  { %13754 = vmatprep.subr.bf16.mxu0 %v16711_v46  ;;  %16031 = vmatprep.subr.bf16.mxu1 %v16801_v1  ;;  %v16748_v46 = vld [vmem:[#allocation10 + $0x110] ss:$8 sps:$4 sm:$0xff]  }
 0x7e6   :  { %v16805_v1 = vld [vmem:[#allocation13 + $0x70] sm:$0xff]  }
 0x7e8   :  { %13755 = vmatpush1.bf16.msra.mxu0 %v16709_v62  ;;  %16032 = vmatpush3.bf16.msra.mxu1 %v16802_v28  ;;  %v16753_v62 = vld [vmem:[#allocation10 + $0x124] ss:$8 sps:$4 sm:$0xff]   ;;  %v16806_v28 = vld [vmem:[#allocation13 + $0x30] sm:$0xff]  }
 0x7e9   :  { %13756 = vmatprep.subr.bf16.mxu0 %v16714_v0  ;;  %16033 = vmatprep.subr.bf16.mxu1 %v16803_v30  ;;  %v16751_v0 = vld [vmem:[#allocation10 + $0x120] ss:$8 sps:$4 sm:$0xff]   ;;  %v17092_v30 = vmov 0.0  }
 0x7ec   :  { %13757 = vmatpush1.bf16.msra.mxu0 %v16712_v2  ;;  %16034 = vmatpush3.bf16.msra.mxu1 %v16804_v31  ;;  %v16756_v2 = vld [vmem:[#allocation10 + $0x134] ss:$8 sps:$4 sm:$0xff]   ;;  %v13414_v31 = vld [vmem:[#allocation11] sm:$0x3] }
 0x7ed   :  { %13758 = vmatprep.subr.bf16.mxu0 %v16717_v3  ;;  %v16754_v3 = vld [vmem:[#allocation10 + $0x130] ss:$8 sps:$4 sm:$0xff]   ;;  %16035 = vmatprep.subr.bf16.mxu1 %v16805_v1  ;;  %v13419_v29 = vrot.slane %v13414_v31, %v17510_v32 }
 0x7ee   :  { %v16811_v32 = vld [vmem:[#allocation16 + $0x10] sm:$0xff]  }
 0x7f0   :  { %13759 = vmatpush1.bf16.msra.mxu0 %v16715_v63  ;;  %v16759_v63 = vld [vmem:[#allocation10 + $0x144] ss:$8 sps:$4 sm:$0xff]   ;;  %16036 = vmatpush3.bf16.msra.mxu1 %v16806_v28 }
 0x7f1   :  { %13760 = vmatprep.subr.bf16.mxu0 %v16720_v4  ;;  %v16757_v4 = vld [vmem:[#allocation10 + $0x140] ss:$8 sps:$4 sm:$0xff]   ;;  %16037 = vmatprep.subr.bf16.mxu1 %v16807_v11 }
 0x7f4   :  { %13761 = vmatpush1.bf16.msra.mxu0 %v16718_v58  ;;  %v16762_v58 = vld [vmem:[#allocation10 + $0x154] ss:$8 sps:$4 sm:$0xff]   ;;  %16038 = vmatpush3.bf16.msra.mxu1 %v16808_v47 }
 0x7f5   :  { %13762 = vmatprep.subr.bf16.mxu0 %v16723_v56  ;;  %v16760_v56 = vld [vmem:[#allocation10 + $0x150] ss:$8 sps:$4 sm:$0xff]   ;;  %16054 = vmatprep.subr.bf16.mxu1 %v17092_v30 }
 0x7f8   :  { %13763 = vmatpush1.bf16.msra.mxu0 %v16721_v5  ;;  %v16765_v5 = vld [vmem:[#allocation10 + $0x164] ss:$8 sps:$4 sm:$0xff]  }
 0x7f9   :  { %13764 = vmatprep.subr.bf16.mxu0 %v16726_v6  ;;  %v16763_v6 = vld [vmem:[#allocation10 + $0x160] ss:$8 sps:$4 sm:$0xff]  }
 0x7fc   :  { %13765 = vmatpush1.bf16.msra.mxu0 %v16724_v8  ;;  %v16768_v8 = vld [vmem:[#allocation10 + $0x174] ss:$8 sps:$4 sm:$0xff]  }
 0x7fd   :  { %13766 = vmatprep.subr.bf16.mxu0 %v16729_v7  ;;  %v16766_v7 = vld [vmem:[#allocation10 + $0x170] ss:$8 sps:$4 sm:$0xff]  }
 0x800   :  { %13767 = vmatpush1.bf16.msra.mxu0 %v16727_v9  ;;  %v16771_v9 = vld [vmem:[#allocation10 + $0x184] ss:$8 sps:$4 sm:$0xff]  }
 0x801   :  { %13768 = vmatprep.subr.bf16.mxu0 %v16732_v51  ;;  %v16769_v51 = vld [vmem:[#allocation10 + $0x180] ss:$8 sps:$4 sm:$0xff]  }
 0x804   :  { %13769 = vmatpush1.bf16.msra.mxu0 %v16730_v14  ;;  %v16774_v14 = vld [vmem:[#allocation10 + $0x194] ss:$8 sps:$4 sm:$0xff]  }
 0x805   :  { %13770 = vmatprep.subr.bf16.mxu0 %v16735_v10  ;;  %v16772_v10 = vld [vmem:[#allocation10 + $0x190] ss:$8 sps:$4 sm:$0xff]  }
 0x808   :  { %13771 = vmatpush1.bf16.msra.mxu0 %v16733_v13  ;;  %v16777_v13 = vld [vmem:[#allocation10 + $0x1a4] ss:$8 sps:$4 sm:$0xff]  }
 0x809   :  { %13772 = vmatprep.subr.bf16.mxu0 %v16738_v15  ;;  %v16775_v15 = vld [vmem:[#allocation10 + $0x1a0] ss:$8 sps:$4 sm:$0xff]  }
 0x80c   :  { %13773 = vmatpush1.bf16.msra.mxu0 %v16736_v39  ;;  %v16780_v39 = vld [vmem:[#allocation10 + $0x1b4] ss:$8 sps:$4 sm:$0xff]  }
 0x80d   :  { %13774 = vmatprep.subr.bf16.mxu0 %v16741_v17  ;;  %v16778_v17 = vld [vmem:[#allocation10 + $0x1b0] ss:$8 sps:$4 sm:$0xff]  }
 0x810   :  { %13775 = vmatpush1.bf16.msra.mxu0 %v16739_v18  ;;  %v16783_v18 = vld [vmem:[#allocation10 + $0x1c4] ss:$8 sps:$4 sm:$0xff]  }
 0x811   :  { %13776 = vmatprep.subr.bf16.mxu0 %v16744_v54  ;;  %v16781_v54 = vld [vmem:[#allocation10 + $0x1c0] ss:$8 sps:$4 sm:$0xff]  }
 0x814   :  { %13777 = vmatpush1.bf16.msra.mxu0 %v16742_v19  ;;  %v16786_v19 = vld [vmem:[#allocation10 + $0x1d4] ss:$8 sps:$4 sm:$0xff]  }
 0x815   :  { %13787 = vmatprep.subr.bf16.mxu0 %v16747_v45  ;;  %v16784_v45 = vld [vmem:[#allocation10 + $0x1d0] ss:$8 sps:$4 sm:$0xff]  }
 0x8aa   :  { %v13171_v34 = vpop.f32.mrb[8].mxu0  ;;  %v17544_v22 = vpop.f32.mrb[8].mxu1 }
 0x8ab   :  { %v16082_v36 = vadd.f32 %v13171_v34, %v11717_v38  ;;  %v13173_v37 = vpop.f32.mrb[9].mxu0  ;;  %v13337_v23 = vpop.f32.mrb[9].mxu1  ;;  %v16084_v25 = vadd.f32 %v17544_v22, %v11725_v20  ;;  %v13423_v38 = vrot.slane %v13414_v31, %v17500_v26  ;;  %v16812_v26 = vld [vmem:[#allocation16 + $0x18] sm:$0xff]  }
 0x8ac   :  { %v16083_v40 = vadd.f32 %v13173_v37, %v11721_v33  ;;  %v16085_v42 = vadd.f32 %v13337_v23, %v11729_v35  ;;  %v13175_v55 = vpop.f32.mrb[10].mxu0  ;;  %v13339_v52 = vpop.f32.mrb[10].mxu1 }
 0x8ad   :  { %v13342_v43 = vmax.f32 %v16082_v36, 0.0  ;;  %v13176_v44 = vpop.f32.mrb[11].mxu0  ;;  %v13340_v41 = vpop.f32.mrb[11].mxu1  ;;  %v13344_v59 = vmax.f32 %v16084_v25, 0.0  ;;  %v16809_v55 = vld [vmem:[#allocation16] sm:$0xff]  }
 0x8ae   :  { %v13343_v49 = vmax.f32 %v16083_v40, 0.0  ;;  %v13345_v24 = vmax.f32 %v16085_v42, 0.0  ;;  %v16813_v44 = vld [vmem:[#allocation16 + $0x20] sm:$0xff]   ;;  %v16814_v41 = vld [vmem:[#allocation16 + $0x28] sm:$0xff]  }
 0x8af   :  { %v13346_v53 = vpack.c.bf16 %v13342_v43, %v13342_v43  ;;  %v13348_v12 = vpack.c.bf16 %v13344_v59, %v13344_v59  ;;  %v16810_v43 = vld [vmem:[#allocation16 + $0x8] sm:$0xff]  }
 0x8b0   :  { %v13347_v50 = vpack.c.bf16 %v13343_v49, %v13343_v49  ;;  %v13349_v57 = vpack.c.bf16 %v13345_v24, %v13345_v24  ;;  %v16815_v49 = vld [vmem:[#allocation16 + $0x30] sm:$0xff]   ;;  %v16816_v24 = vld [vmem:[#allocation16 + $0x38] sm:$0xff]  }
 0x8b2   :  { %13778 = vmatprep.mubr.bf16.mxu0 %v13347_v50 }
 0x8b3   :  { %13779 = vmatmul.mubr.bf16.vlgmr.msra.gmra.mrb[12].mxu0 %v13346_v53 }
 0x8b4   :  { %13788 = vmatpush1.bf16.msra.mxu0 %v16745_v61  ;;  %13819 = vmatprep.mubr.bf16.mxu0 %v13349_v57  ;;  %v15997_v61 = vld [vmem:[#allocation14] ss:$0 sm:$0xff] }
 0x8b5   :  { %13789 = vmatprep.subr.bf16.mxu0 %v16750_v60 }
 0x8b8   :  { %13790 = vmatpush1.bf16.msra.mxu0 %v16748_v46 }
 0x8b9   :  { %13791 = vmatprep.subr.bf16.mxu0 %v16753_v62 }
 0x8bc   :  { %13792 = vmatpush1.bf16.msra.mxu0 %v16751_v0 }
 0x8bd   :  { %13793 = vmatprep.subr.bf16.mxu0 %v16756_v2 }
 0x8c0   :  { %13794 = vmatpush1.bf16.msra.mxu0 %v16754_v3  ;;  %v16014_v3 = vld [vmem:[#allocation17] ss:$0 sm:$0xff] }
 0x8c1   :  { %13795 = vmatprep.subr.bf16.mxu0 %v16759_v63 }
 0x8c4   :  { %13796 = vmatpush1.bf16.msra.mxu0 %v16757_v4 }
 0x8c5   :  { %13797 = vmatprep.subr.bf16.mxu0 %v16762_v58 }
 0x8c8   :  { %13798 = vmatpush1.bf16.msra.mxu0 %v16760_v56 }
 0x8c9   :  { %13799 = vmatprep.subr.bf16.mxu0 %v16765_v5 }
 0x8cc   :  { %13800 = vmatpush1.bf16.msra.mxu0 %v16763_v6 }
 0x8cd   :  { %13801 = vmatprep.subr.bf16.mxu0 %v16768_v8 }
 0x8d0   :  { %13802 = vmatpush1.bf16.msra.mxu0 %v16766_v7 }
 0x8d1   :  { %13803 = vmatprep.subr.bf16.mxu0 %v16771_v9 }
 0x8d4   :  { %13804 = vmatpush1.bf16.msra.mxu0 %v16769_v51 }
 0x8d5   :  { %13805 = vmatprep.subr.bf16.mxu0 %v16774_v14 }
 0x8d8   :  { %13806 = vmatpush1.bf16.msra.mxu0 %v16772_v10 }
 0x8d9   :  { %13807 = vmatprep.subr.bf16.mxu0 %v16777_v13 }
 0x8dc   :  { %13808 = vmatpush1.bf16.msra.mxu0 %v16775_v15 }
 0x8dd   :  { %13809 = vmatprep.subr.bf16.mxu0 %v16780_v39 }
 0x8e0   :  { %13810 = vmatpush1.bf16.msra.mxu0 %v16778_v17 }
 0x8e1   :  { %13811 = vmatprep.subr.bf16.mxu0 %v16783_v18 }
 0x8e4   :  { %13812 = vmatpush1.bf16.msra.mxu0 %v16781_v54 }
 0x8e5   :  { %13813 = vmatprep.subr.bf16.mxu0 %v16786_v19 }
 0x8e8   :  { %13814 = vmatpush1.bf16.msra.mxu0 %v16784_v45 }
 0x8e9   :  { %13815 = vmatprep.subr.bf16.mxu0 %v16789_v21 }
 0x8ec   :  { %13816 = vmatpush1.bf16.msra.mxu0 %v16787_v16 }
 0x8ed   :  { %13817 = vmatprep.subr.bf16.mxu0 %v16792_v27 }
 0x8f0   :  { %13818 = vmatpush1.bf16.msra.mxu0 %v16790_v48 }
 0x8f3   :  { %13820 = vmatmul.mubr.bf16.vlgmr.msra.gmra.mrb[12].mxu0 %v13348_v12 }
 0x9c6   :  { %v13821_v33 = vpop.f32.mrb[12].mxu0 }
 0x9c7   :  { %v16086_v35 = vadd.f32 %v13821_v33, %v13419_v29  ;;  %v13823_v34 = vpop.f32.mrb[13].mxu0 }
 0x9c8   :  { %v16087_v22 = vadd.f32 %v13823_v34, %v13423_v38  ;;  %v13825_v36 = vpop.f32.mrb[14].mxu0 }
 0x9c9   :  { %v13828_v37 = vmax.f32 %v16086_v35, 0.0  ;;  %v13826_v23 = vpop.f32.mrb[15].mxu0 }
 0x9ca   :  { %v13829_v40 = vmax.f32 %v16087_v22, 0.0 }
 0x9cb   :  { %v13830_v52 = vpack.c.bf16 %v13828_v37, %v13828_v37 }
 0x9cc   :  { %v13831_v42 = vpack.c.bf16 %v13829_v40, %v13829_v40 }
 0x9ce   :  { %13999 = vmatprep.mubr.bf16.mxu1 %v13831_v42 }
 0x9cf   :  { %14000 = vmatmul.mubr.bf16.vlgmr.msra.gmra.mrb[12].mxu1 %v13830_v52 }
 0x9d0   :  { %16055 = vmatpush3.bf16.msra.mxu1 %v16809_v55  ;;  %16070 = vmatprep.mubr.msk.bf16.mxu1 %vm17093_vm0, %v17092_v30 }
 0x9d1   :  { %16056 = vmatprep.subr.bf16.mxu1 %v17092_v30 }
 0x9d4   :  { %16057 = vmatpush3.bf16.msra.mxu1 %v16810_v43 }
 0x9d5   :  { %16058 = vmatprep.subr.bf16.mxu1 %v17092_v30 }
 0x9d8   :  { %16059 = vmatpush3.bf16.msra.mxu1 %v16811_v32 }
 0x9d9   :  { %16060 = vmatprep.subr.bf16.mxu1 %v17092_v30 }
 0x9dc   :  { %16061 = vmatpush3.bf16.msra.mxu1 %v16812_v26 }
 0x9dd   :  { %16062 = vmatprep.subr.bf16.mxu1 %v17092_v30 }
 0x9e0   :  { %16063 = vmatpush3.bf16.msra.mxu1 %v16813_v44 }
 0x9e1   :  { %16064 = vmatprep.subr.bf16.mxu1 %v17092_v30 }
 0x9e4   :  { %16065 = vmatpush3.bf16.msra.mxu1 %v16814_v41 }
 0x9e5   :  { %16066 = vmatprep.subr.bf16.mxu1 %v17092_v30 }
 0x9e8   :  { %16067 = vmatpush3.bf16.msra.mxu1 %v16815_v49 }
 0x9e9   :  { %16068 = vmatprep.subr.bf16.mxu1 %v17092_v30 }
 0x9ec   :  { %16069 = vmatpush3.bf16.msra.mxu1 %v16816_v24 }
 0xaa2   :  { %v16039_v50 = vpop.f32.mrb[12].mxu1 }
 0xaa3   :  { %v16040_v53 = vpop.f32.mrb[13].mxu1 }
 0xaa4   :  { %v16041_v60 = vadd.f32 %v16040_v53, %v16039_v50  ;;  %v16042_v57 = vpop.f32.mrb[14].mxu1 }
 0xaa5   :  { %v16043_v46 = vpop.f32.mrb[15].mxu1 }
 0xaa6   :  { %v14002_v62 = vadd.f32 %v16041_v60, %v15997_v61 }
 0xaa8   :  { %v14007_v0 = vmax.f32 %v14002_v62, 0.0 }
 0xaaa   :  { %v14008_v2 = vpack.c.bf16 %v14007_v0, %v14007_v0 }
 0xaac   :  { %16071 = vmatmul.mubr.bf16.vlgmr.msra.gmra.mrb[16].mxu1 %v14008_v2 }
 0xb7f   :  { %v14114_v63 = vpop.f32.mrb[16].mxu1 }
 0xb80   :  { %v14115_v4 = vadd.f32 %v16014_v3, %v14114_v63  ;;  %v16072_v58 = vpop.f32.mrb[17].mxu1 }
 0xb81   :  { %v14117_v56 = vpop.f32.mrb[18].mxu1 }
 0xb82   :  { %14120 = vst [vmem:[#allocation19] sm:$0xff] %v14115_v4  ;;  %v16073_v5 = vpop.f32.mrb[19].mxu1 }
 0xb83   :  { %17049 = shalt.err (!%p17046_p0)
}
 0xb84   :  { %s17050_s26 = scalar_lea.hbm %s17575_s11, 128 }
 0xb85   :  { %p17051_p1 = scmp.ne.s32.totalorder %s17575_s11, %s17050_s26  ;;  %p17054_p2 = scmp.lt.u32.totalorder %s17050_s26, %s17575_s11 }
 0xb87   :  { %p17056_p3 = pnand %p17054_p2, %p17051_p1 }
 0xb89   :  { %17059 = shalt.err (!%p17056_p3)
}
 0xb8a   :  { %14130 = dma.vmem_to_hbm [thread:$0]  %s14128_s22, 128, %s17575_s11, [#allocation4]  }
 0xb8b   :  { %17072 = dma.done.wait [#allocation4], 128  }
 0xb8c   :  { %17073 = vsyncadd [#allocation4], 4294967168 }
 0xb8d   :  { %14134 = vsyncpa [#allocation3], 1 }
 0xb8e   :  { %14135 = vsyncpa [#allocation6], 1 }
 0xb8f   :  { %14136 = vsyncpa [#allocation9], 1 }
 0xb90   :  { %14137 = vsyncpa [#allocation12], 1 }
 0xb91   :  { %14138 = vsyncpa [#allocation15], 1 }
 0xb92   :  { %14139 = vsyncpa [#allocation18], 1 }
 0xb93   :  { %14140 = vsyncpa [#allocation4], 1 }

</bundles_post_ra>
